<compile_context>
chip_gen: v7x
topology: tpu7x:2x2x1
jax: 0.10.0
libtpu: 0.0.40
codegen_flags: <defaults>
</compile_context>

<pallas_src>
import functools

import jax
import jax.numpy as jnp
from jax.experimental import pallas as pl
from jax.experimental.pallas import tpu as pltpu

H_IMG = 28
W_IMG = 28

# index of the precomputed border-mask row for a given (nonzero) conv shift
_SHIFT_IDX = {-2: 0, -1: 1, 1: 2, 2: 3}


# ----------------------------------------------------------------------------
# Fused kernel (per grid step: pb "para" elements at once):
#   conv1(3x3)+relu -> conv2(5x5)+relu   on all pb*bs flattened images
#   x^T = grad^T + blockdiag(weight) @ conv                  (pb*M, Npad)
#   per p: 2-layer matrix LSTM (dir & lr), gates fused into wide MXU dots
#   outputs packed into one (pb*6, M, Npad) lane-dense slab
# ----------------------------------------------------------------------------
def _fused_kernel(img_ref, grad_ref, state_ref, wblk_ref,
                  w1x_ref, w1h_ref, w2a_ref, w2b_ref, w2c_ref,
                  b1_ref, b2_ref, mask_ref,
                  c1w_ref, c1b_ref, c2w_ref, c2b_ref,
                  out_ref, *, pb, bf16_act):
    M = w1x_ref.shape[1]           # output_size (8)
    Npad = img_ref.shape[2]        # 896 = 7*128 (flattened 28*28 pixels, padded)

    msk = mask_ref[...]            # (9, Npad) float32 border / valid masks

    def cmask(sx):
        i = _SHIFT_IDX[sx]
        return msk[i:i + 1, :]

    def rmask(sy):
        i = 4 + _SHIFT_IDX[sy]
        return msk[i:i + 1, :]

    vmask = msk[8:9, :]            # 1.0 on lanes < 784, 0.0 on pad lanes

    def act_tanh(v):
        if bf16_act:
            v = v.astype(jnp.bfloat16)
        return jnp.tanh(v).astype(jnp.float32)

    def act_sig(v):
        # single-EUP sigmoid: 0.5*tanh(0.5 z)+0.5 (no exp + divide lowering)
        return 0.5 * act_tanh(0.5 * v) + 0.5

    # ---- conv + relu on all pb*bs flattened 28x28 images at once (full
    # 8-sublane vreg fill).  Column/row shifts are XLU lane rotations; image
    # borders are handled with the precomputed 0/1 mask rows (one multiply per
    # tap).  Pad lanes (>=784) carry garbage that never reaches a valid output
    # lane and is zeroed by vmask before the reductions / stores.
    def conv_relu(x, kw_ref, kb_ref, K):
        pad = K // 2
        hx = []
        for dj in range(K):
            sx = dj - pad
            if sx == 0:
                hx.append(x)
            else:
                hx.append(pltpu.roll(x, shift=(-sx) % Npad, axis=1) * cmask(sx))
        acc = None
        for di in range(K):
            sy = di - pad
            part = kw_ref[di * K] * hx[0]
            for dj in range(1, K):
                part = part + kw_ref[di * K + dj] * hx[dj]
            if sy != 0:
                part = pltpu.roll(part, shift=(-(sy * W_IMG)) % Npad,
                                  axis=1) * rmask(sy)
            acc = part if acc is None else acc + part
        return jnp.maximum(acc + kb_ref[0], 0.0)

    y1 = conv_relu(img_ref[0], c1w_ref, c1b_ref, 3)      # (pb*bs, Npad)
    y2 = conv_relu(y1, c2w_ref, c2b_ref, 5)              # (pb*bs, Npad)

    def dotf(a, b):
        return jnp.dot(a, b, preferred_element_type=jnp.float32)

    # gradient assembly for all local p at once via a block-diagonal weight
    x_all = grad_ref[0] + dotf(wblk_ref[...], y2)        # (pb*M, Npad)

    h1_all = state_ref[0, 0]
    c1_all = state_ref[0, 1]
    h2_all = state_ref[0, 2]
    c2_all = state_ref[0, 3]

    w1x = w1x_ref[...]
    w1h = w1h_ref[...]
    w2a = w2a_ref[...]
    w2b = w2b_ref[...]
    w2c = w2c_ref[...]
    b1 = b1_ref[...]
    b2 = b2_ref[...]

    # packed gate row order: [i_d, f_d, o_d, i_l, f_l, o_l, g_d, g_l]
    def split_gates(z):
        sg = act_sig(z[:6 * M])                   # one bulk pass (6 gates)
        th = act_tanh(z[6 * M:])                  # one bulk pass (2 gates)
        return (sg[0 * M:1 * M], sg[1 * M:2 * M], sg[2 * M:3 * M],
                sg[3 * M:4 * M], sg[4 * M:5 * M], sg[5 * M:6 * M],
                th[0 * M:1 * M], th[1 * M:2 * M])

    # F.normalize(p=2) over the flattened (valid) matrix of one p, via rsqrt
    def l2norm(a):
        ss = jnp.sum(a * a)
        return a * jax.lax.rsqrt(jnp.maximum(ss, 1e-24))

    for p in range(pb):
        lo, hi = p * M, (p + 1) * M
        x, h1, c1 = x_all[lo:hi], h1_all[lo:hi], c1_all[lo:hi]
        h2, c2 = h2_all[lo:hi], c2_all[lo:hi]

        # layer 1: dir and lr share (x, h1, c1); no concat, per-block dots
        z1 = dotf(w1x, x) + dotf(w1h, h1) + b1
        i_d, f_d, o_d, i_l, f_l, o_l, g_d, g_l = split_gates(z1)
        c1d = f_d * c1 + i_d * g_d
        h1d = o_d * act_tanh(c1d)
        c1l = f_l * c1 + i_l * g_l
        h1l = o_l * act_tanh(c1l)

        # layer 2: dir uses (h1d, h2, c2), lr uses (h1l, h2, c2); w2a has zero
        # lr rows and w2b zero dir rows (block-sparse packing, no concat).
        z2 = dotf(w2a, h1d) + dotf(w2b, h1l) + dotf(w2c, h2) + b2
        i_d, f_d, o_d, i_l, f_l, o_l, g_d, g_l = split_gates(z2)
        c2d = f_d * c2 + i_d * g_d
        h2d = o_d * act_tanh(c2d)
        c2l = f_l * c2 + i_l * g_l
        h2l = o_l * act_tanh(c2l)

        base = 6 * p
        out_ref[0, base + 0] = act_sig(h2l) * vmask        # update_lr
        out_ref[0, base + 1] = h2d * vmask                 # update_dir
        out_ref[0, base + 2] = l2norm(h1d * h1l * vmask)   # next_state[0]
        out_ref[0, base + 3] = l2norm(c1d * c1l * vmask)   # next_state[1]
        out_ref[0, base + 4] = l2norm(h2d * h2l * vmask)   # next_state[2]
        out_ref[0, base + 5] = l2norm(c2d * c2l * vmask)   # next_state[3]


# ----------------------------------------------------------------------------
# Parameter init (deterministic, synthetic) and weight packing.
# ----------------------------------------------------------------------------
def init_params(key, input_size, output_size, batchsize_data, batchsize_para):
    bs = batchsize_data // batchsize_para
    M = output_size
    ks = jax.random.split(key, 9)
    return {
        "weight": jax.random.normal(ks[0], (M, bs), jnp.float32),
        # pro1 / pro2 exist in the module but are unused in forward().
        "pro1": jax.random.normal(ks[1], (input_size, input_size), jnp.float32),
        "pro2": jax.random.normal(ks[2], (input_size, input_size), jnp.float32),
        "conv1_w": 0.1 * jax.random.normal(ks[3], (3, 3), jnp.float32),
        "conv1_b": 0.1 * jax.random.normal(ks[4], (1,), jnp.float32),
        "conv2_w": 0.1 * jax.random.normal(ks[5], (5, 5), jnp.float32),
        "conv2_b": 0.1 * jax.random.normal(ks[6], (1,), jnp.float32),
        "W_dir": 0.1 * jax.random.normal(ks[7], (2, 2, 4, M, M), jnp.float32),
        "b_dir": jnp.zeros((2, 4, M), jnp.float32),
        "W_lr": 0.1 * jax.random.normal(ks[8], (2, 2, 4, M, M), jnp.float32),
        "b_lr": jnp.zeros((2, 4, M), jnp.float32),
    }


def _pack_lstm_weights(params, M):
    """Pack both 2-layer matrix-LSTM cells into fused, transposed gate blocks.

    Packed row order (blocks of M rows): [i_dir, f_dir, o_dir, i_lr, f_lr,
    o_lr, g_dir, g_lr]  (sigmoid gates first, tanh gates last).
      layer 1: z1 = W1x @ x^T   + W1h @ h1^T  + b1
      layer 2: z2 = W2a @ h1d^T + W2b @ h1l^T + W2c @ h2^T + b2
               (W2a has zero lr rows, W2b has zero dir rows: block-sparse.)
    """
    Wd, bd = params["W_dir"], params["b_dir"]
    Wl, bl = params["W_lr"], params["b_lr"]
    z = jnp.zeros((M, M), jnp.float32)
    # original gate indices: i=0, f=1, g=2, o=3
    order = [("d", 0), ("d", 1), ("d", 3),
             ("l", 0), ("l", 1), ("l", 3),
             ("d", 2), ("l", 2)]
    w1x, w1h, w2a, w2b, w2c, b1, b2 = [], [], [], [], [], [], []
    for which, g in order:
        if which == "d":
            w1x.append(Wd[0, 0, g].T)
            w1h.append(Wd[0, 1, g].T)
            w2a.append(Wd[1, 0, g].T)
            w2b.append(z)
            w2c.append(Wd[1, 1, g].T)
            b1.append(bd[0, g])
            b2.append(bd[1, g])
        else:
            w1x.append(Wl[0, 0, g].T)
            w1h.append(Wl[0, 1, g].T)
            w2a.append(z)
            w2b.append(Wl[1, 0, g].T)
            w2c.append(Wl[1, 1, g].T)
            b1.append(bl[0, g])
            b2.append(bl[1, g])
    cat = lambda xs: jnp.concatenate(xs, axis=0)
    return (cat(w1x), cat(w1h), cat(w2a), cat(w2b), cat(w2c),
            jnp.concatenate(b1)[:, None], jnp.concatenate(b2)[:, None])


def _detect_bf16_transcendentals():
    # bf16 EUP only pays off on v6e / v7x; v5e and older keep f32.
    try:
        kind = jax.devices()[0].device_kind.lower()
    except Exception:
        return False
    return any(tag in kind for tag in ("v6", "v7", "tpu7"))


# ----------------------------------------------------------------------------
# Forward wrapper.
# ----------------------------------------------------------------------------
def lstm_optimizee_forward(params, input_gradients, prev_state, inputs_data, *,
                           batchsize_data, batchsize_para, input_size,
                           output_size, p_block=None,
                           bf16_transcendentals=None):
    assert input_size == H_IMG * W_IMG, \
        "forward reshapes to 28x28, so input_size must be 784"
    P = batchsize_para
    bs = batchsize_data // batchsize_para
    N, M = input_size, output_size
    Npad = pl.cdiv(N, 128) * 128              # 896: lane-aligned pixel count

    PB = P if p_block is None else p_block    # p's processed per grid step
    assert P % PB == 0
    G = P // PB                               # default: G=1 (grid collapsed)

    if bf16_transcendentals is None:
        bf16_transcendentals = _detect_bf16_transcendentals()

    # images: (B,784,1).permute(0,2,1).view(B,784) is a pure reshape (trailing
    # dim is 1); pad lanes to Npad and group PB para-batches per grid step.
    imgs = inputs_data.reshape(batchsize_data, N)
    imgs = jnp.pad(imgs, ((0, 0), (0, Npad - N)))
    imgs = imgs.reshape(G, PB * bs, Npad)

    # lane-dense transposed gradients: (P, N, M) -> (G, PB*M, Npad)
    gradT = jnp.transpose(input_gradients, (0, 2, 1))
    gradT = jnp.pad(gradT, ((0, 0), (0, 0), (0, Npad - N)))
    gradT = gradT.reshape(G, PB * M, Npad)

    # TODO(synk): the recurrent state could be carried in this packed
    # lane-dense layout across optimizer steps to avoid the transposes below.
    if prev_state is None:
        stT = jnp.zeros((G, 4, PB * M, Npad), jnp.float32)
    else:
        stT = jnp.stack(prev_state, axis=0)               # (4, P, N, M)
        stT = jnp.transpose(stT, (0, 1, 3, 2))            # (4, P, M, N)
        stT = jnp.pad(stT, ((0, 0), (0, 0), (0, 0), (0, Npad - N)))
        stT = stT.reshape(4, G, PB * M, Npad)
        stT = jnp.transpose(stT, (1, 0, 2, 3))            # (G, 4, PB*M, Npad)

    w1x, w1h, w2a, w2b, w2c, b1, b2 = _pack_lstm_weights(params, M)
    # block-diagonal conv-mix weight so all PB p's share one MXU dot
    wblk = jnp.kron(jnp.eye(PB, dtype=jnp.float32), params["weight"])

    # precomputed conv border masks (4 column + 4 row) and valid-lane mask
    lane = jnp.arange(Npad, dtype=jnp.int32)
    row = lane // W_IMG
    col = lane % W_IMG

    def _cm(sx):
        return col >= -sx if sx < 0 else col < W_IMG - sx

    def _rm(sy):
        return row >= -sy if sy < 0 else row < H_IMG - sy

    masks = jnp.stack([_cm(-2), _cm(-1), _cm(1), _cm(2),
                       _rm(-2), _rm(-1), _rm(1), _rm(2),
                       lane < N]).astype(jnp.float32)      # (9, Npad)

    smem = pl.BlockSpec(memory_space=pltpu.MemorySpace.SMEM)
    kernel = functools.partial(_fused_kernel, pb=PB,
                               bf16_act=bf16_transcendentals)

    out = pl.pallas_call(
        kernel,
        grid=(G,),
        in_specs=[
            pl.BlockSpec((1, PB * bs, Npad), lambda g: (g, 0, 0)),
            pl.BlockSpec((1, PB * M, Npad), lambda g: (g, 0, 0)),
            pl.BlockSpec((1, 4, PB * M, Npad), lambda g: (g, 0, 0, 0)),
            # grid-constant blocks below are fetched once and re-used
            pl.BlockSpec((PB * M, PB * bs), lambda g: (0, 0)),
            pl.BlockSpec((8 * M, M), lambda g: (0, 0)),
            pl.BlockSpec((8 * M, M), lambda g: (0, 0)),
            pl.BlockSpec((8 * M, M), lambda g: (0, 0)),
            pl.BlockSpec((8 * M, M), lambda g: (0, 0)),
            pl.BlockSpec((8 * M, M), lambda g: (0, 0)),
            pl.BlockSpec((8 * M, 1), lambda g: (0, 0)),
            pl.BlockSpec((8 * M, 1), lambda g: (0, 0)),
            pl.BlockSpec((9, Npad), lambda g: (0, 0)),
            smem, smem, smem, smem,
        ],
        out_specs=pl.BlockSpec((1, PB * 6, M, Npad), lambda g: (g, 0, 0, 0)),
        out_shape=jax.ShapeDtypeStruct((G, PB * 6, M, Npad), jnp.float32),
        compiler_params=pltpu.CompilerParams(
            dimension_semantics=("parallel",)),
    )(imgs, gradT, stT, wblk, w1x, w1h, w2a, w2b, w2c, b1, b2, masks,
      params["conv1_w"].reshape(-1), params["conv1_b"],
      params["conv2_w"].reshape(-1), params["conv2_b"])

    # back to the PyTorch (P, N, M) layout
    out = out.reshape(P, 6, M, Npad)[..., :N]              # drop pad lanes
    outT = jnp.transpose(out, (0, 1, 3, 2))                # (P, 6, N, M)
    update_lr, update_dir = outT[:, 0], outT[:, 1]
    next_state = (outT[:, 2], outT[:, 3], outT[:, 4], outT[:, 5])
    return update_lr, update_dir, next_state


if __name__ == "__main__":
    input_size = 784      # forced by the 28x28 reshape in forward()
    output_size = 8
    batchsize_data = 8
    batchsize_para = 2    # batch_size = 4

    key = jax.random.PRNGKey(0)
    kp, kg, kd = jax.random.split(key, 3)

    params = init_params(kp, input_size, output_size,
                         batchsize_data, batchsize_para)
    input_gradients = jax.random.normal(
        kg, (batchsize_para, input_size, output_size), jnp.float32)
    inputs_data = jax.random.normal(
        kd, (batchsize_data, 784, 1), jnp.float32)

    forward = jax.jit(functools.partial(
        lstm_optimizee_forward,
        batchsize_data=batchsize_data, batchsize_para=batchsize_para,
        input_size=input_size, output_size=output_size))

    update_lr, update_dir, next_state = forward(
        params, input_gradients, None, inputs_data)
    # feed the state back once to exercise the prev_state path
    update_lr, update_dir, next_state = forward(
        params, update_dir, next_state, inputs_data)

    jax.block_until_ready((update_lr, update_dir, next_state))
    assert update_lr.shape == (batchsize_para, input_size, output_size)
    assert update_dir.shape == (batchsize_para, input_size, output_size)
    assert all(s.shape == (batchsize_para, input_size, output_size)
               for s in next_state)
    print("KERNEL_OK")
</pallas_src>

<mosaic_0001>
module attributes {stable_mosaic.version = 11 : i64} {
  func.func @_fused_kernel(%arg0: i32, %arg1: memref<1x8x896xf32, #tpu.memory_space<vmem>>, %arg2: memref<1x16x896xf32, #tpu.memory_space<vmem>>, %arg3: memref<1x4x16x896xf32, #tpu.memory_space<vmem>>, %arg4: memref<16x8xf32, #tpu.memory_space<vmem>>, %arg5: memref<64x8xf32, #tpu.memory_space<vmem>>, %arg6: memref<64x8xf32, #tpu.memory_space<vmem>>, %arg7: memref<64x8xf32, #tpu.memory_space<vmem>>, %arg8: memref<64x8xf32, #tpu.memory_space<vmem>>, %arg9: memref<64x8xf32, #tpu.memory_space<vmem>>, %arg10: memref<64x1xf32, #tpu.memory_space<vmem>>, %arg11: memref<64x1xf32, #tpu.memory_space<vmem>>, %arg12: memref<9x896xf32, #tpu.memory_space<vmem>>, %arg13: memref<9xf32, #tpu.memory_space<smem>>, %arg14: memref<1xf32, #tpu.memory_space<smem>>, %arg15: memref<25xf32, #tpu.memory_space<smem>>, %arg16: memref<1xf32, #tpu.memory_space<smem>>, %arg17: memref<1x12x8x896xf32, #tpu.memory_space<vmem>>) attributes {dimension_semantics = [#tpu.dimension_semantics<parallel>], iteration_bounds = array<i64: 1>, scalar_prefetch = 0 : i64, scratch_operands = 0 : i64, tpu.core_type = #tpu.core_type<tc>, window_params = [{transform_indices = @transform_0, window_bounds = array<i64: 1, 8, 896>}, {transform_indices = @transform_1, window_bounds = array<i64: 1, 16, 896>}, {transform_indices = @transform_2, window_bounds = array<i64: 1, 4, 16, 896>}, {pipeline_mode = #tpu.pipeline_mode<synchronous>, transform_indices = @transform_3, window_bounds = array<i64: 16, 8>}, {pipeline_mode = #tpu.pipeline_mode<synchronous>, transform_indices = @transform_4, window_bounds = array<i64: 64, 8>}, {pipeline_mode = #tpu.pipeline_mode<synchronous>, transform_indices = @transform_5, window_bounds = array<i64: 64, 8>}, {pipeline_mode = #tpu.pipeline_mode<synchronous>, transform_indices = @transform_6, window_bounds = array<i64: 64, 8>}, {pipeline_mode = #tpu.pipeline_mode<synchronous>, transform_indices = @transform_7, window_bounds = array<i64: 64, 8>}, {pipeline_mode = #tpu.pipeline_mode<synchronous>, transform_indices = @transform_8, window_bounds = array<i64: 64, 8>}, {pipeline_mode = #tpu.pipeline_mode<synchronous>, transform_indices = @transform_9, window_bounds = array<i64: 64, 1>}, {pipeline_mode = #tpu.pipeline_mode<synchronous>, transform_indices = @transform_10, window_bounds = array<i64: 64, 1>}, {pipeline_mode = #tpu.pipeline_mode<synchronous>, transform_indices = @transform_11, window_bounds = array<i64: 9, 896>}, {transform_indices = @transform_12, window_bounds = array<i64: 9>}, {transform_indices = @transform_13, window_bounds = array<i64: 1>}, {transform_indices = @transform_14, window_bounds = array<i64: 25>}, {transform_indices = @transform_15, window_bounds = array<i64: 1>}, {transform_indices = @transform_16, window_bounds = array<i64: 1, 12, 8, 896>}]} {
    %c0 = arith.constant 0 : index
    %c0_0 = arith.constant 0 : index
    %0 = vector.load %arg12[%c0, %c0_0] : memref<9x896xf32, #tpu.memory_space<vmem>>, vector<9x896xf32>
    %1 = vector.extract_strided_slice %0 {offsets = [8, 0], sizes = [1, 896], strides = [1, 1]} : vector<9x896xf32> to vector<1x896xf32>
    %c0_1 = arith.constant 0 : index
    %c0_2 = arith.constant 0 : index
    %c0_3 = arith.constant 0 : index
    %2 = vector.load %arg1[%c0_1, %c0_2, %c0_3] : memref<1x8x896xf32, #tpu.memory_space<vmem>>, vector<1x8x896xf32>
    %3 = vector.shape_cast %2 : vector<1x8x896xf32> to vector<8x896xf32>
    %c1_i32 = arith.constant 1 : i32
    %4 = tpu.dynamic_rotate %3 by %c1_i32 dim 1 : vector<8x896xf32>, i32 -> vector<8x896xf32>
    %5 = vector.extract_strided_slice %0 {offsets = [1, 0], sizes = [1, 896], strides = [1, 1]} : vector<9x896xf32> to vector<1x896xf32>
    %6 = vector.broadcast %5 : vector<1x896xf32> to vector<8x896xf32>
    %7 = arith.mulf %4, %6 : vector<8x896xf32>
    %c895_i32 = arith.constant 895 : i32
    %8 = tpu.dynamic_rotate %3 by %c895_i32 dim 1 : vector<8x896xf32>, i32 -> vector<8x896xf32>
    %9 = vector.extract_strided_slice %0 {offsets = [2, 0], sizes = [1, 896], strides = [1, 1]} : vector<9x896xf32> to vector<1x896xf32>
    %10 = vector.broadcast %9 : vector<1x896xf32> to vector<8x896xf32>
    %11 = arith.mulf %8, %10 : vector<8x896xf32>
    %c0_4 = arith.constant 0 : index
    %12 = memref.load %arg13[%c0_4] : memref<9xf32, #tpu.memory_space<smem>>
    %13 = vector.broadcast %12 : f32 to vector<8x896xf32>
    %14 = arith.mulf %13, %7 : vector<8x896xf32>
    %c1 = arith.constant 1 : index
    %15 = memref.load %arg13[%c1] : memref<9xf32, #tpu.memory_space<smem>>
    %16 = vector.broadcast %15 : f32 to vector<8x896xf32>
    %17 = arith.mulf %16, %3 : vector<8x896xf32>
    %18 = arith.addf %14, %17 : vector<8x896xf32>
    %c2 = arith.constant 2 : index
    %19 = memref.load %arg13[%c2] : memref<9xf32, #tpu.memory_space<smem>>
    %20 = vector.broadcast %19 : f32 to vector<8x896xf32>
    %21 = arith.mulf %20, %11 : vector<8x896xf32>
    %22 = arith.addf %18, %21 : vector<8x896xf32>
    %c28_i32 = arith.constant 28 : i32
    %23 = tpu.dynamic_rotate %22 by %c28_i32 dim 1 : vector<8x896xf32>, i32 -> vector<8x896xf32>
    %24 = vector.extract_strided_slice %0 {offsets = [5, 0], sizes = [1, 896], strides = [1, 1]} : vector<9x896xf32> to vector<1x896xf32>
    %25 = vector.broadcast %24 : vector<1x896xf32> to vector<8x896xf32>
    %26 = arith.mulf %23, %25 : vector<8x896xf32>
    %c3 = arith.constant 3 : index
    %27 = memref.load %arg13[%c3] : memref<9xf32, #tpu.memory_space<smem>>
    %28 = vector.broadcast %27 : f32 to vector<8x896xf32>
    %29 = arith.mulf %28, %7 : vector<8x896xf32>
    %c4 = arith.constant 4 : index
    %30 = memref.load %arg13[%c4] : memref<9xf32, #tpu.memory_space<smem>>
    %31 = vector.broadcast %30 : f32 to vector<8x896xf32>
    %32 = arith.mulf %31, %3 : vector<8x896xf32>
    %33 = arith.addf %29, %32 : vector<8x896xf32>
    %c5 = arith.constant 5 : index
    %34 = memref.load %arg13[%c5] : memref<9xf32, #tpu.memory_space<smem>>
    %35 = vector.broadcast %34 : f32 to vector<8x896xf32>
    %36 = arith.mulf %35, %11 : vector<8x896xf32>
    %37 = arith.addf %33, %36 : vector<8x896xf32>
    %38 = arith.addf %26, %37 : vector<8x896xf32>
    %c6 = arith.constant 6 : index
    %39 = memref.load %arg13[%c6] : memref<9xf32, #tpu.memory_space<smem>>
    %40 = vector.broadcast %39 : f32 to vector<8x896xf32>
    %41 = arith.mulf %40, %7 : vector<8x896xf32>
    %c7 = arith.constant 7 : index
    %42 = memref.load %arg13[%c7] : memref<9xf32, #tpu.memory_space<smem>>
    %43 = vector.broadcast %42 : f32 to vector<8x896xf32>
    %44 = arith.mulf %43, %3 : vector<8x896xf32>
    %45 = arith.addf %41, %44 : vector<8x896xf32>
    %c8 = arith.constant 8 : index
    %46 = memref.load %arg13[%c8] : memref<9xf32, #tpu.memory_space<smem>>
    %47 = vector.broadcast %46 : f32 to vector<8x896xf32>
    %48 = arith.mulf %47, %11 : vector<8x896xf32>
    %49 = arith.addf %45, %48 : vector<8x896xf32>
    %c868_i32 = arith.constant 868 : i32
    %50 = tpu.dynamic_rotate %49 by %c868_i32 dim 1 : vector<8x896xf32>, i32 -> vector<8x896xf32>
    %51 = vector.extract_strided_slice %0 {offsets = [6, 0], sizes = [1, 896], strides = [1, 1]} : vector<9x896xf32> to vector<1x896xf32>
    %52 = vector.broadcast %51 : vector<1x896xf32> to vector<8x896xf32>
    %53 = arith.mulf %50, %52 : vector<8x896xf32>
    %54 = arith.addf %38, %53 : vector<8x896xf32>
    %c0_5 = arith.constant 0 : index
    %55 = memref.load %arg14[%c0_5] : memref<1xf32, #tpu.memory_space<smem>>
    %56 = vector.broadcast %55 : f32 to vector<8x896xf32>
    %57 = arith.addf %54, %56 : vector<8x896xf32>
    %cst = arith.constant 0.000000e+00 : f32
    %58 = vector.broadcast %cst : f32 to vector<8x896xf32>
    %59 = arith.maximumf %57, %58 : vector<8x896xf32>
    %c2_i32 = arith.constant 2 : i32
    %60 = tpu.dynamic_rotate %59 by %c2_i32 dim 1 : vector<8x896xf32>, i32 -> vector<8x896xf32>
    %61 = vector.extract_strided_slice %0 {offsets = [0, 0], sizes = [1, 896], strides = [1, 1]} : vector<9x896xf32> to vector<1x896xf32>
    %62 = vector.broadcast %61 : vector<1x896xf32> to vector<8x896xf32>
    %63 = arith.mulf %60, %62 : vector<8x896xf32>
    %c1_i32_6 = arith.constant 1 : i32
    %64 = tpu.dynamic_rotate %59 by %c1_i32_6 dim 1 : vector<8x896xf32>, i32 -> vector<8x896xf32>
    %65 = vector.extract_strided_slice %0 {offsets = [1, 0], sizes = [1, 896], strides = [1, 1]} : vector<9x896xf32> to vector<1x896xf32>
    %66 = vector.broadcast %65 : vector<1x896xf32> to vector<8x896xf32>
    %67 = arith.mulf %64, %66 : vector<8x896xf32>
    %c895_i32_7 = arith.constant 895 : i32
    %68 = tpu.dynamic_rotate %59 by %c895_i32_7 dim 1 : vector<8x896xf32>, i32 -> vector<8x896xf32>
    %69 = vector.extract_strided_slice %0 {offsets = [2, 0], sizes = [1, 896], strides = [1, 1]} : vector<9x896xf32> to vector<1x896xf32>
    %70 = vector.broadcast %69 : vector<1x896xf32> to vector<8x896xf32>
    %71 = arith.mulf %68, %70 : vector<8x896xf32>
    %c894_i32 = arith.constant 894 : i32
    %72 = tpu.dynamic_rotate %59 by %c894_i32 dim 1 : vector<8x896xf32>, i32 -> vector<8x896xf32>
    %73 = vector.extract_strided_slice %0 {offsets = [3, 0], sizes = [1, 896], strides = [1, 1]} : vector<9x896xf32> to vector<1x896xf32>
    %74 = vector.broadcast %73 : vector<1x896xf32> to vector<8x896xf32>
    %75 = arith.mulf %72, %74 : vector<8x896xf32>
    %c0_8 = arith.constant 0 : index
    %76 = memref.load %arg15[%c0_8] : memref<25xf32, #tpu.memory_space<smem>>
    %77 = vector.broadcast %76 : f32 to vector<8x896xf32>
    %78 = arith.mulf %77, %63 : vector<8x896xf32>
    %c1_9 = arith.constant 1 : index
    %79 = memref.load %arg15[%c1_9] : memref<25xf32, #tpu.memory_space<smem>>
    %80 = vector.broadcast %79 : f32 to vector<8x896xf32>
    %81 = arith.mulf %80, %67 : vector<8x896xf32>
    %82 = arith.addf %78, %81 : vector<8x896xf32>
    %c2_10 = arith.constant 2 : index
    %83 = memref.load %arg15[%c2_10] : memref<25xf32, #tpu.memory_space<smem>>
    %84 = vector.broadcast %83 : f32 to vector<8x896xf32>
    %85 = arith.mulf %84, %59 : vector<8x896xf32>
    %86 = arith.addf %82, %85 : vector<8x896xf32>
    %c3_11 = arith.constant 3 : index
    %87 = memref.load %arg15[%c3_11] : memref<25xf32, #tpu.memory_space<smem>>
    %88 = vector.broadcast %87 : f32 to vector<8x896xf32>
    %89 = arith.mulf %88, %71 : vector<8x896xf32>
    %90 = arith.addf %86, %89 : vector<8x896xf32>
    %c4_12 = arith.constant 4 : index
    %91 = memref.load %arg15[%c4_12] : memref<25xf32, #tpu.memory_space<smem>>
    %92 = vector.broadcast %91 : f32 to vector<8x896xf32>
    %93 = arith.mulf %92, %75 : vector<8x896xf32>
    %94 = arith.addf %90, %93 : vector<8x896xf32>
    %c56_i32 = arith.constant 56 : i32
    %95 = tpu.dynamic_rotate %94 by %c56_i32 dim 1 : vector<8x896xf32>, i32 -> vector<8x896xf32>
    %96 = vector.extract_strided_slice %0 {offsets = [4, 0], sizes = [1, 896], strides = [1, 1]} : vector<9x896xf32> to vector<1x896xf32>
    %97 = vector.broadcast %96 : vector<1x896xf32> to vector<8x896xf32>
    %98 = arith.mulf %95, %97 : vector<8x896xf32>
    %c5_13 = arith.constant 5 : index
    %99 = memref.load %arg15[%c5_13] : memref<25xf32, #tpu.memory_space<smem>>
    %100 = vector.broadcast %99 : f32 to vector<8x896xf32>
    %101 = arith.mulf %100, %63 : vector<8x896xf32>
    %c6_14 = arith.constant 6 : index
    %102 = memref.load %arg15[%c6_14] : memref<25xf32, #tpu.memory_space<smem>>
    %103 = vector.broadcast %102 : f32 to vector<8x896xf32>
    %104 = arith.mulf %103, %67 : vector<8x896xf32>
    %105 = arith.addf %101, %104 : vector<8x896xf32>
    %c7_15 = arith.constant 7 : index
    %106 = memref.load %arg15[%c7_15] : memref<25xf32, #tpu.memory_space<smem>>
    %107 = vector.broadcast %106 : f32 to vector<8x896xf32>
    %108 = arith.mulf %107, %59 : vector<8x896xf32>
    %109 = arith.addf %105, %108 : vector<8x896xf32>
    %c8_16 = arith.constant 8 : index
    %110 = memref.load %arg15[%c8_16] : memref<25xf32, #tpu.memory_space<smem>>
    %111 = vector.broadcast %110 : f32 to vector<8x896xf32>
    %112 = arith.mulf %111, %71 : vector<8x896xf32>
    %113 = arith.addf %109, %112 : vector<8x896xf32>
    %c9 = arith.constant 9 : index
    %114 = memref.load %arg15[%c9] : memref<25xf32, #tpu.memory_space<smem>>
    %115 = vector.broadcast %114 : f32 to vector<8x896xf32>
    %116 = arith.mulf %115, %75 : vector<8x896xf32>
    %117 = arith.addf %113, %116 : vector<8x896xf32>
    %c28_i32_17 = arith.constant 28 : i32
    %118 = tpu.dynamic_rotate %117 by %c28_i32_17 dim 1 : vector<8x896xf32>, i32 -> vector<8x896xf32>
    %119 = vector.extract_strided_slice %0 {offsets = [5, 0], sizes = [1, 896], strides = [1, 1]} : vector<9x896xf32> to vector<1x896xf32>
    %120 = vector.broadcast %119 : vector<1x896xf32> to vector<8x896xf32>
    %121 = arith.mulf %118, %120 : vector<8x896xf32>
    %122 = arith.addf %98, %121 : vector<8x896xf32>
    %c10 = arith.constant 10 : index
    %123 = memref.load %arg15[%c10] : memref<25xf32, #tpu.memory_space<smem>>
    %124 = vector.broadcast %123 : f32 to vector<8x896xf32>
    %125 = arith.mulf %124, %63 : vector<8x896xf32>
    %c11 = arith.constant 11 : index
    %126 = memref.load %arg15[%c11] : memref<25xf32, #tpu.memory_space<smem>>
    %127 = vector.broadcast %126 : f32 to vector<8x896xf32>
    %128 = arith.mulf %127, %67 : vector<8x896xf32>
    %129 = arith.addf %125, %128 : vector<8x896xf32>
    %c12 = arith.constant 12 : index
    %130 = memref.load %arg15[%c12] : memref<25xf32, #tpu.memory_space<smem>>
    %131 = vector.broadcast %130 : f32 to vector<8x896xf32>
    %132 = arith.mulf %131, %59 : vector<8x896xf32>
    %133 = arith.addf %129, %132 : vector<8x896xf32>
    %c13 = arith.constant 13 : index
    %134 = memref.load %arg15[%c13] : memref<25xf32, #tpu.memory_space<smem>>
    %135 = vector.broadcast %134 : f32 to vector<8x896xf32>
    %136 = arith.mulf %135, %71 : vector<8x896xf32>
    %137 = arith.addf %133, %136 : vector<8x896xf32>
    %c14 = arith.constant 14 : index
    %138 = memref.load %arg15[%c14] : memref<25xf32, #tpu.memory_space<smem>>
    %139 = vector.broadcast %138 : f32 to vector<8x896xf32>
    %140 = arith.mulf %139, %75 : vector<8x896xf32>
    %141 = arith.addf %137, %140 : vector<8x896xf32>
    %142 = arith.addf %122, %141 : vector<8x896xf32>
    %c15 = arith.constant 15 : index
    %143 = memref.load %arg15[%c15] : memref<25xf32, #tpu.memory_space<smem>>
    %144 = vector.broadcast %143 : f32 to vector<8x896xf32>
    %145 = arith.mulf %144, %63 : vector<8x896xf32>
    %c16 = arith.constant 16 : index
    %146 = memref.load %arg15[%c16] : memref<25xf32, #tpu.memory_space<smem>>
    %147 = vector.broadcast %146 : f32 to vector<8x896xf32>
    %148 = arith.mulf %147, %67 : vector<8x896xf32>
    %149 = arith.addf %145, %148 : vector<8x896xf32>
    %c17 = arith.constant 17 : index
    %150 = memref.load %arg15[%c17] : memref<25xf32, #tpu.memory_space<smem>>
    %151 = vector.broadcast %150 : f32 to vector<8x896xf32>
    %152 = arith.mulf %151, %59 : vector<8x896xf32>
    %153 = arith.addf %149, %152 : vector<8x896xf32>
    %c18 = arith.constant 18 : index
    %154 = memref.load %arg15[%c18] : memref<25xf32, #tpu.memory_space<smem>>
    %155 = vector.broadcast %154 : f32 to vector<8x896xf32>
    %156 = arith.mulf %155, %71 : vector<8x896xf32>
    %157 = arith.addf %153, %156 : vector<8x896xf32>
    %c19 = arith.constant 19 : index
    %158 = memref.load %arg15[%c19] : memref<25xf32, #tpu.memory_space<smem>>
    %159 = vector.broadcast %158 : f32 to vector<8x896xf32>
    %160 = arith.mulf %159, %75 : vector<8x896xf32>
    %161 = arith.addf %157, %160 : vector<8x896xf32>
    %c868_i32_18 = arith.constant 868 : i32
    %162 = tpu.dynamic_rotate %161 by %c868_i32_18 dim 1 : vector<8x896xf32>, i32 -> vector<8x896xf32>
    %163 = vector.extract_strided_slice %0 {offsets = [6, 0], sizes = [1, 896], strides = [1, 1]} : vector<9x896xf32> to vector<1x896xf32>
    %164 = vector.broadcast %163 : vector<1x896xf32> to vector<8x896xf32>
    %165 = arith.mulf %162, %164 : vector<8x896xf32>
    %166 = arith.addf %142, %165 : vector<8x896xf32>
    %c20 = arith.constant 20 : index
    %167 = memref.load %arg15[%c20] : memref<25xf32, #tpu.memory_space<smem>>
    %168 = vector.broadcast %167 : f32 to vector<8x896xf32>
    %169 = arith.mulf %168, %63 : vector<8x896xf32>
    %c21 = arith.constant 21 : index
    %170 = memref.load %arg15[%c21] : memref<25xf32, #tpu.memory_space<smem>>
    %171 = vector.broadcast %170 : f32 to vector<8x896xf32>
    %172 = arith.mulf %171, %67 : vector<8x896xf32>
    %173 = arith.addf %169, %172 : vector<8x896xf32>
    %c22 = arith.constant 22 : index
    %174 = memref.load %arg15[%c22] : memref<25xf32, #tpu.memory_space<smem>>
    %175 = vector.broadcast %174 : f32 to vector<8x896xf32>
    %176 = arith.mulf %175, %59 : vector<8x896xf32>
    %177 = arith.addf %173, %176 : vector<8x896xf32>
    %c23 = arith.constant 23 : index
    %178 = memref.load %arg15[%c23] : memref<25xf32, #tpu.memory_space<smem>>
    %179 = vector.broadcast %178 : f32 to vector<8x896xf32>
    %180 = arith.mulf %179, %71 : vector<8x896xf32>
    %181 = arith.addf %177, %180 : vector<8x896xf32>
    %c24 = arith.constant 24 : index
    %182 = memref.load %arg15[%c24] : memref<25xf32, #tpu.memory_space<smem>>
    %183 = vector.broadcast %182 : f32 to vector<8x896xf32>
    %184 = arith.mulf %183, %75 : vector<8x896xf32>
    %185 = arith.addf %181, %184 : vector<8x896xf32>
    %c840_i32 = arith.constant 840 : i32
    %186 = tpu.dynamic_rotate %185 by %c840_i32 dim 1 : vector<8x896xf32>, i32 -> vector<8x896xf32>
    %187 = vector.extract_strided_slice %0 {offsets = [7, 0], sizes = [1, 896], strides = [1, 1]} : vector<9x896xf32> to vector<1x896xf32>
    %188 = vector.broadcast %187 : vector<1x896xf32> to vector<8x896xf32>
    %189 = arith.mulf %186, %188 : vector<8x896xf32>
    %190 = arith.addf %166, %189 : vector<8x896xf32>
    %c0_19 = arith.constant 0 : index
    %191 = memref.load %arg16[%c0_19] : memref<1xf32, #tpu.memory_space<smem>>
    %192 = vector.broadcast %191 : f32 to vector<8x896xf32>
    %193 = arith.addf %190, %192 : vector<8x896xf32>
    %cst_20 = arith.constant 0.000000e+00 : f32
    %194 = vector.broadcast %cst_20 : f32 to vector<8x896xf32>
    %195 = arith.maximumf %193, %194 : vector<8x896xf32>
    %c0_21 = arith.constant 0 : index
    %c0_22 = arith.constant 0 : index
    %c0_23 = arith.constant 0 : index
    %196 = vector.load %arg2[%c0_21, %c0_22, %c0_23] : memref<1x16x896xf32, #tpu.memory_space<vmem>>, vector<1x16x896xf32>
    %197 = vector.shape_cast %196 : vector<1x16x896xf32> to vector<16x896xf32>
    %c0_24 = arith.constant 0 : index
    %c0_25 = arith.constant 0 : index
    %198 = vector.load %arg4[%c0_24, %c0_25] : memref<16x8xf32, #tpu.memory_space<vmem>>, vector<16x8xf32>
    %cst_26 = arith.constant dense<0.000000e+00> : vector<16x896xf32>
    %199 = tpu.matmul %198, %195, %cst_26 {dimension_numbers = #tpu.dot_dimension_numbers<[1], [0], [0], [1], [0, 0, 1, 1], [], []>} : vector<16x8xf32>, vector<8x896xf32>, vector<16x896xf32> -> vector<16x896xf32>
    %200 = arith.addf %197, %199 : vector<16x896xf32>
    %c0_27 = arith.constant 0 : index
    %c0_28 = arith.constant 0 : index
    %c0_29 = arith.constant 0 : index
    %c0_30 = arith.constant 0 : index
    %201 = vector.load %arg3[%c0_27, %c0_28, %c0_29, %c0_30] : memref<1x4x16x896xf32, #tpu.memory_space<vmem>>, vector<1x1x16x896xf32>
    %202 = vector.shape_cast %201 : vector<1x1x16x896xf32> to vector<16x896xf32>
    %c0_31 = arith.constant 0 : index
    %c1_32 = arith.constant 1 : index
    %c0_33 = arith.constant 0 : index
    %c0_34 = arith.constant 0 : index
    %203 = vector.load %arg3[%c0_31, %c1_32, %c0_33, %c0_34] : memref<1x4x16x896xf32, #tpu.memory_space<vmem>>, vector<1x1x16x896xf32>
    %204 = vector.shape_cast %203 : vector<1x1x16x896xf32> to vector<16x896xf32>
    %c0_35 = arith.constant 0 : index
    %c2_36 = arith.constant 2 : index
    %c0_37 = arith.constant 0 : index
    %c0_38 = arith.constant 0 : index
    %205 = vector.load %arg3[%c0_35, %c2_36, %c0_37, %c0_38] : memref<1x4x16x896xf32, #tpu.memory_space<vmem>>, vector<1x1x16x896xf32>
    %206 = vector.shape_cast %205 : vector<1x1x16x896xf32> to vector<16x896xf32>
    %c0_39 = arith.constant 0 : index
    %c3_40 = arith.constant 3 : index
    %c0_41 = arith.constant 0 : index
    %c0_42 = arith.constant 0 : index
    %207 = vector.load %arg3[%c0_39, %c3_40, %c0_41, %c0_42] : memref<1x4x16x896xf32, #tpu.memory_space<vmem>>, vector<1x1x16x896xf32>
    %208 = vector.shape_cast %207 : vector<1x1x16x896xf32> to vector<16x896xf32>
    %c0_43 = arith.constant 0 : index
    %c0_44 = arith.constant 0 : index
    %209 = vector.load %arg5[%c0_43, %c0_44] : memref<64x8xf32, #tpu.memory_space<vmem>>, vector<64x8xf32>
    %c0_45 = arith.constant 0 : index
    %c0_46 = arith.constant 0 : index
    %210 = vector.load %arg6[%c0_45, %c0_46] : memref<64x8xf32, #tpu.memory_space<vmem>>, vector<64x8xf32>
    %c0_47 = arith.constant 0 : index
    %c0_48 = arith.constant 0 : index
    %211 = vector.load %arg7[%c0_47, %c0_48] : memref<64x8xf32, #tpu.memory_space<vmem>>, vector<64x8xf32>
    %c0_49 = arith.constant 0 : index
    %c0_50 = arith.constant 0 : index
    %212 = vector.load %arg8[%c0_49, %c0_50] : memref<64x8xf32, #tpu.memory_space<vmem>>, vector<64x8xf32>
    %c0_51 = arith.constant 0 : index
    %c0_52 = arith.constant 0 : index
    %213 = vector.load %arg9[%c0_51, %c0_52] : memref<64x8xf32, #tpu.memory_space<vmem>>, vector<64x8xf32>
    %c0_53 = arith.constant 0 : index
    %c0_54 = arith.constant 0 : index
    %214 = vector.load %arg10[%c0_53, %c0_54] : memref<64x1xf32, #tpu.memory_space<vmem>>, vector<64x1xf32>
    %c0_55 = arith.constant 0 : index
    %c0_56 = arith.constant 0 : index
    %215 = vector.load %arg11[%c0_55, %c0_56] : memref<64x1xf32, #tpu.memory_space<vmem>>, vector<64x1xf32>
    %216 = vector.extract_strided_slice %200 {offsets = [0, 0], sizes = [8, 896], strides = [1, 1]} : vector<16x896xf32> to vector<8x896xf32>
    %217 = vector.extract_strided_slice %202 {offsets = [0, 0], sizes = [8, 896], strides = [1, 1]} : vector<16x896xf32> to vector<8x896xf32>
    %218 = vector.extract_strided_slice %204 {offsets = [0, 0], sizes = [8, 896], strides = [1, 1]} : vector<16x896xf32> to vector<8x896xf32>
    %219 = vector.extract_strided_slice %206 {offsets = [0, 0], sizes = [8, 896], strides = [1, 1]} : vector<16x896xf32> to vector<8x896xf32>
    %220 = vector.extract_strided_slice %208 {offsets = [0, 0], sizes = [8, 896], strides = [1, 1]} : vector<16x896xf32> to vector<8x896xf32>
    %cst_57 = arith.constant dense<0.000000e+00> : vector<64x896xf32>
    %221 = tpu.matmul %209, %216, %cst_57 {dimension_numbers = #tpu.dot_dimension_numbers<[1], [0], [0], [1], [0, 0, 1, 1], [], []>} : vector<64x8xf32>, vector<8x896xf32>, vector<64x896xf32> -> vector<64x896xf32>
    %cst_58 = arith.constant dense<0.000000e+00> : vector<64x896xf32>
    %222 = tpu.matmul %210, %217, %cst_58 {dimension_numbers = #tpu.dot_dimension_numbers<[1], [0], [0], [1], [0, 0, 1, 1], [], []>} : vector<64x8xf32>, vector<8x896xf32>, vector<64x896xf32> -> vector<64x896xf32>
    %223 = arith.addf %221, %222 : vector<64x896xf32>
    %224 = vector.broadcast %214 : vector<64x1xf32> to vector<64x896xf32>
    %225 = arith.addf %223, %224 : vector<64x896xf32>
    %226 = vector.extract_strided_slice %225 {offsets = [0, 0], sizes = [48, 896], strides = [1, 1]} : vector<64x896xf32> to vector<48x896xf32>
    %cst_59 = arith.constant 5.000000e-01 : f32
    %227 = vector.broadcast %cst_59 : f32 to vector<48x896xf32>
    %228 = arith.mulf %227, %226 : vector<48x896xf32>
    %229 = math.tanh %228 : vector<48x896xf32>
    %cst_60 = arith.constant 5.000000e-01 : f32
    %230 = vector.broadcast %cst_60 : f32 to vector<48x896xf32>
    %231 = arith.mulf %230, %229 : vector<48x896xf32>
    %cst_61 = arith.constant 5.000000e-01 : f32
    %232 = vector.broadcast %cst_61 : f32 to vector<48x896xf32>
    %233 = arith.addf %231, %232 : vector<48x896xf32>
    %234 = vector.extract_strided_slice %225 {offsets = [48, 0], sizes = [16, 896], strides = [1, 1]} : vector<64x896xf32> to vector<16x896xf32>
    %235 = math.tanh %234 : vector<16x896xf32>
    %236 = vector.extract_strided_slice %233 {offsets = [0, 0], sizes = [8, 896], strides = [1, 1]} : vector<48x896xf32> to vector<8x896xf32>
    %237 = vector.extract_strided_slice %233 {offsets = [8, 0], sizes = [8, 896], strides = [1, 1]} : vector<48x896xf32> to vector<8x896xf32>
    %238 = vector.extract_strided_slice %233 {offsets = [16, 0], sizes = [8, 896], strides = [1, 1]} : vector<48x896xf32> to vector<8x896xf32>
    %239 = vector.extract_strided_slice %233 {offsets = [24, 0], sizes = [8, 896], strides = [1, 1]} : vector<48x896xf32> to vector<8x896xf32>
    %240 = vector.extract_strided_slice %233 {offsets = [32, 0], sizes = [8, 896], strides = [1, 1]} : vector<48x896xf32> to vector<8x896xf32>
    %241 = vector.extract_strided_slice %233 {offsets = [40, 0], sizes = [8, 896], strides = [1, 1]} : vector<48x896xf32> to vector<8x896xf32>
    %242 = vector.extract_strided_slice %235 {offsets = [0, 0], sizes = [8, 896], strides = [1, 1]} : vector<16x896xf32> to vector<8x896xf32>
    %243 = vector.extract_strided_slice %235 {offsets = [8, 0], sizes = [8, 896], strides = [1, 1]} : vector<16x896xf32> to vector<8x896xf32>
    %244 = arith.mulf %237, %218 : vector<8x896xf32>
    %245 = arith.mulf %236, %242 : vector<8x896xf32>
    %246 = arith.addf %244, %245 : vector<8x896xf32>
    %247 = math.tanh %246 : vector<8x896xf32>
    %248 = arith.mulf %238, %247 : vector<8x896xf32>
    %249 = arith.mulf %240, %218 : vector<8x896xf32>
    %250 = arith.mulf %239, %243 : vector<8x896xf32>
    %251 = arith.addf %249, %250 : vector<8x896xf32>
    %252 = math.tanh %251 : vector<8x896xf32>
    %253 = arith.mulf %241, %252 : vector<8x896xf32>
    %cst_62 = arith.constant dense<0.000000e+00> : vector<64x896xf32>
    %254 = tpu.matmul %211, %248, %cst_62 {dimension_numbers = #tpu.dot_dimension_numbers<[1], [0], [0], [1], [0, 0, 1, 1], [], []>} : vector<64x8xf32>, vector<8x896xf32>, vector<64x896xf32> -> vector<64x896xf32>
    %cst_63 = arith.constant dense<0.000000e+00> : vector<64x896xf32>
    %255 = tpu.matmul %212, %253, %cst_63 {dimension_numbers = #tpu.dot_dimension_numbers<[1], [0], [0], [1], [0, 0, 1, 1], [], []>} : vector<64x8xf32>, vector<8x896xf32>, vector<64x896xf32> -> vector<64x896xf32>
    %256 = arith.addf %254, %255 : vector<64x896xf32>
    %cst_64 = arith.constant dense<0.000000e+00> : vector<64x896xf32>
    %257 = tpu.matmul %213, %219, %cst_64 {dimension_numbers = #tpu.dot_dimension_numbers<[1], [0], [0], [1], [0, 0, 1, 1], [], []>} : vector<64x8xf32>, vector<8x896xf32>, vector<64x896xf32> -> vector<64x896xf32>
    %258 = arith.addf %256, %257 : vector<64x896xf32>
    %259 = vector.broadcast %215 : vector<64x1xf32> to vector<64x896xf32>
    %260 = arith.addf %258, %259 : vector<64x896xf32>
    %261 = vector.extract_strided_slice %260 {offsets = [0, 0], sizes = [48, 896], strides = [1, 1]} : vector<64x896xf32> to vector<48x896xf32>
    %cst_65 = arith.constant 5.000000e-01 : f32
    %262 = vector.broadcast %cst_65 : f32 to vector<48x896xf32>
    %263 = arith.mulf %262, %261 : vector<48x896xf32>
    %264 = math.tanh %263 : vector<48x896xf32>
    %cst_66 = arith.constant 5.000000e-01 : f32
    %265 = vector.broadcast %cst_66 : f32 to vector<48x896xf32>
    %266 = arith.mulf %265, %264 : vector<48x896xf32>
    %cst_67 = arith.constant 5.000000e-01 : f32
    %267 = vector.broadcast %cst_67 : f32 to vector<48x896xf32>
    %268 = arith.addf %266, %267 : vector<48x896xf32>
    %269 = vector.extract_strided_slice %260 {offsets = [48, 0], sizes = [16, 896], strides = [1, 1]} : vector<64x896xf32> to vector<16x896xf32>
    %270 = math.tanh %269 : vector<16x896xf32>
    %271 = vector.extract_strided_slice %268 {offsets = [0, 0], sizes = [8, 896], strides = [1, 1]} : vector<48x896xf32> to vector<8x896xf32>
    %272 = vector.extract_strided_slice %268 {offsets = [8, 0], sizes = [8, 896], strides = [1, 1]} : vector<48x896xf32> to vector<8x896xf32>
    %273 = vector.extract_strided_slice %268 {offsets = [16, 0], sizes = [8, 896], strides = [1, 1]} : vector<48x896xf32> to vector<8x896xf32>
    %274 = vector.extract_strided_slice %268 {offsets = [24, 0], sizes = [8, 896], strides = [1, 1]} : vector<48x896xf32> to vector<8x896xf32>
    %275 = vector.extract_strided_slice %268 {offsets = [32, 0], sizes = [8, 896], strides = [1, 1]} : vector<48x896xf32> to vector<8x896xf32>
    %276 = vector.extract_strided_slice %268 {offsets = [40, 0], sizes = [8, 896], strides = [1, 1]} : vector<48x896xf32> to vector<8x896xf32>
    %277 = vector.extract_strided_slice %270 {offsets = [0, 0], sizes = [8, 896], strides = [1, 1]} : vector<16x896xf32> to vector<8x896xf32>
    %278 = vector.extract_strided_slice %270 {offsets = [8, 0], sizes = [8, 896], strides = [1, 1]} : vector<16x896xf32> to vector<8x896xf32>
    %279 = arith.mulf %272, %220 : vector<8x896xf32>
    %280 = arith.mulf %271, %277 : vector<8x896xf32>
    %281 = arith.addf %279, %280 : vector<8x896xf32>
    %282 = math.tanh %281 : vector<8x896xf32>
    %283 = arith.mulf %273, %282 : vector<8x896xf32>
    %284 = arith.mulf %275, %220 : vector<8x896xf32>
    %285 = arith.mulf %274, %278 : vector<8x896xf32>
    %286 = arith.addf %284, %285 : vector<8x896xf32>
    %287 = math.tanh %286 : vector<8x896xf32>
    %288 = arith.mulf %276, %287 : vector<8x896xf32>
    %cst_68 = arith.constant 5.000000e-01 : f32
    %289 = vector.broadcast %cst_68 : f32 to vector<8x896xf32>
    %290 = arith.mulf %289, %288 : vector<8x896xf32>
    %291 = math.tanh %290 : vector<8x896xf32>
    %cst_69 = arith.constant 5.000000e-01 : f32
    %292 = vector.broadcast %cst_69 : f32 to vector<8x896xf32>
    %293 = arith.mulf %292, %291 : vector<8x896xf32>
    %cst_70 = arith.constant 5.000000e-01 : f32
    %294 = vector.broadcast %cst_70 : f32 to vector<8x896xf32>
    %295 = arith.addf %293, %294 : vector<8x896xf32>
    %296 = vector.broadcast %1 : vector<1x896xf32> to vector<8x896xf32>
    %297 = arith.mulf %295, %296 : vector<8x896xf32>
    %c0_71 = arith.constant 0 : index
    %c0_72 = arith.constant 0 : index
    %c0_73 = arith.constant 0 : index
    %c0_74 = arith.constant 0 : index
    %298 = vector.load %arg17[%c0_71, %c0_72, %c0_73, %c0_74] : memref<1x12x8x896xf32, #tpu.memory_space<vmem>>, vector<1x1x8x896xf32>
    %299 = vector.shape_cast %298 : vector<1x1x8x896xf32> to vector<8x896xf32>
    %300 = vector.shape_cast %297 : vector<8x896xf32> to vector<1x1x8x896xf32>
    tpu.vector_store %arg17[%c0_71, %c0_72, %c0_73, %c0_74], %300 {strides = array<i32>} : memref<1x12x8x896xf32, #tpu.memory_space<vmem>>, vector<1x1x8x896xf32>,
    %301 = vector.broadcast %1 : vector<1x896xf32> to vector<8x896xf32>
    %302 = arith.mulf %283, %301 : vector<8x896xf32>
    %c0_75 = arith.constant 0 : index
    %c1_76 = arith.constant 1 : index
    %c0_77 = arith.constant 0 : index
    %c0_78 = arith.constant 0 : index
    %303 = vector.load %arg17[%c0_75, %c1_76, %c0_77, %c0_78] : memref<1x12x8x896xf32, #tpu.memory_space<vmem>>, vector<1x1x8x896xf32>
    %304 = vector.shape_cast %303 : vector<1x1x8x896xf32> to vector<8x896xf32>
    %305 = vector.shape_cast %302 : vector<8x896xf32> to vector<1x1x8x896xf32>
    tpu.vector_store %arg17[%c0_75, %c1_76, %c0_77, %c0_78], %305 {strides = array<i32>} : memref<1x12x8x896xf32, #tpu.memory_space<vmem>>, vector<1x1x8x896xf32>,
    %306 = arith.mulf %248, %253 : vector<8x896xf32>
    %307 = vector.broadcast %1 : vector<1x896xf32> to vector<8x896xf32>
    %308 = arith.mulf %306, %307 : vector<8x896xf32>
    %309 = arith.mulf %308, %308 : vector<8x896xf32>
    %310 = vector.shape_cast %309 : vector<8x896xf32> to vector<1x8x896xf32>
    %cst_79 = arith.constant dense<0.000000e+00> : vector<1xf32>
    %311 = vector.multi_reduction <add>, %310, %cst_79 [1, 2] : vector<1x8x896xf32> to vector<1xf32>
    %312 = vector.shape_cast %311 : vector<1xf32> to vector<1x1x1xf32>
    %313 = vector.extract %312[0, 0, 0] : f32 from vector<1x1x1xf32>
    %cst_80 = arith.constant 1.000000e-24 : f32
    %314 = arith.maximumf %313, %cst_80 : f32
    %315 = math.rsqrt %314 : f32
    %316 = vector.broadcast %315 : f32 to vector<8x896xf32>
    %317 = arith.mulf %308, %316 : vector<8x896xf32>
    %c0_81 = arith.constant 0 : index
    %c2_82 = arith.constant 2 : index
    %c0_83 = arith.constant 0 : index
    %c0_84 = arith.constant 0 : index
    %318 = vector.load %arg17[%c0_81, %c2_82, %c0_83, %c0_84] : memref<1x12x8x896xf32, #tpu.memory_space<vmem>>, vector<1x1x8x896xf32>
    %319 = vector.shape_cast %318 : vector<1x1x8x896xf32> to vector<8x896xf32>
    %320 = vector.shape_cast %317 : vector<8x896xf32> to vector<1x1x8x896xf32>
    tpu.vector_store %arg17[%c0_81, %c2_82, %c0_83, %c0_84], %320 {strides = array<i32>} : memref<1x12x8x896xf32, #tpu.memory_space<vmem>>, vector<1x1x8x896xf32>,
    %321 = arith.mulf %246, %251 : vector<8x896xf32>
    %322 = vector.broadcast %1 : vector<1x896xf32> to vector<8x896xf32>
    %323 = arith.mulf %321, %322 : vector<8x896xf32>
    %324 = arith.mulf %323, %323 : vector<8x896xf32>
    %325 = vector.shape_cast %324 : vector<8x896xf32> to vector<1x8x896xf32>
    %cst_85 = arith.constant dense<0.000000e+00> : vector<1xf32>
    %326 = vector.multi_reduction <add>, %325, %cst_85 [1, 2] : vector<1x8x896xf32> to vector<1xf32>
    %327 = vector.shape_cast %326 : vector<1xf32> to vector<1x1x1xf32>
    %328 = vector.extract %327[0, 0, 0] : f32 from vector<1x1x1xf32>
    %cst_86 = arith.constant 1.000000e-24 : f32
    %329 = arith.maximumf %328, %cst_86 : f32
    %330 = math.rsqrt %329 : f32
    %331 = vector.broadcast %330 : f32 to vector<8x896xf32>
    %332 = arith.mulf %323, %331 : vector<8x896xf32>
    %c0_87 = arith.constant 0 : index
    %c3_88 = arith.constant 3 : index
    %c0_89 = arith.constant 0 : index
    %c0_90 = arith.constant 0 : index
    %333 = vector.load %arg17[%c0_87, %c3_88, %c0_89, %c0_90] : memref<1x12x8x896xf32, #tpu.memory_space<vmem>>, vector<1x1x8x896xf32>
    %334 = vector.shape_cast %333 : vector<1x1x8x896xf32> to vector<8x896xf32>
    %335 = vector.shape_cast %332 : vector<8x896xf32> to vector<1x1x8x896xf32>
    tpu.vector_store %arg17[%c0_87, %c3_88, %c0_89, %c0_90], %335 {strides = array<i32>} : memref<1x12x8x896xf32, #tpu.memory_space<vmem>>, vector<1x1x8x896xf32>,
    %336 = arith.mulf %283, %288 : vector<8x896xf32>
    %337 = vector.broadcast %1 : vector<1x896xf32> to vector<8x896xf32>
    %338 = arith.mulf %336, %337 : vector<8x896xf32>
    %339 = arith.mulf %338, %338 : vector<8x896xf32>
    %340 = vector.shape_cast %339 : vector<8x896xf32> to vector<1x8x896xf32>
    %cst_91 = arith.constant dense<0.000000e+00> : vector<1xf32>
    %341 = vector.multi_reduction <add>, %340, %cst_91 [1, 2] : vector<1x8x896xf32> to vector<1xf32>
    %342 = vector.shape_cast %341 : vector<1xf32> to vector<1x1x1xf32>
    %343 = vector.extract %342[0, 0, 0] : f32 from vector<1x1x1xf32>
    %cst_92 = arith.constant 1.000000e-24 : f32
    %344 = arith.maximumf %343, %cst_92 : f32
    %345 = math.rsqrt %344 : f32
    %346 = vector.broadcast %345 : f32 to vector<8x896xf32>
    %347 = arith.mulf %338, %346 : vector<8x896xf32>
    %c0_93 = arith.constant 0 : index
    %c4_94 = arith.constant 4 : index
    %c0_95 = arith.constant 0 : index
    %c0_96 = arith.constant 0 : index
    %348 = vector.load %arg17[%c0_93, %c4_94, %c0_95, %c0_96] : memref<1x12x8x896xf32, #tpu.memory_space<vmem>>, vector<1x1x8x896xf32>
    %349 = vector.shape_cast %348 : vector<1x1x8x896xf32> to vector<8x896xf32>
    %350 = vector.shape_cast %347 : vector<8x896xf32> to vector<1x1x8x896xf32>
    tpu.vector_store %arg17[%c0_93, %c4_94, %c0_95, %c0_96], %350 {strides = array<i32>} : memref<1x12x8x896xf32, #tpu.memory_space<vmem>>, vector<1x1x8x896xf32>,
    %351 = arith.mulf %281, %286 : vector<8x896xf32>
    %352 = vector.broadcast %1 : vector<1x896xf32> to vector<8x896xf32>
    %353 = arith.mulf %351, %352 : vector<8x896xf32>
    %354 = arith.mulf %353, %353 : vector<8x896xf32>
    %355 = vector.shape_cast %354 : vector<8x896xf32> to vector<1x8x896xf32>
    %cst_97 = arith.constant dense<0.000000e+00> : vector<1xf32>
    %356 = vector.multi_reduction <add>, %355, %cst_97 [1, 2] : vector<1x8x896xf32> to vector<1xf32>
    %357 = vector.shape_cast %356 : vector<1xf32> to vector<1x1x1xf32>
    %358 = vector.extract %357[0, 0, 0] : f32 from vector<1x1x1xf32>
    %cst_98 = arith.constant 1.000000e-24 : f32
    %359 = arith.maximumf %358, %cst_98 : f32
    %360 = math.rsqrt %359 : f32
    %361 = vector.broadcast %360 : f32 to vector<8x896xf32>
    %362 = arith.mulf %353, %361 : vector<8x896xf32>
    %c0_99 = arith.constant 0 : index
    %c5_100 = arith.constant 5 : index
    %c0_101 = arith.constant 0 : index
    %c0_102 = arith.constant 0 : index
    %363 = vector.load %arg17[%c0_99, %c5_100, %c0_101, %c0_102] : memref<1x12x8x896xf32, #tpu.memory_space<vmem>>, vector<1x1x8x896xf32>
    %364 = vector.shape_cast %363 : vector<1x1x8x896xf32> to vector<8x896xf32>
    %365 = vector.shape_cast %362 : vector<8x896xf32> to vector<1x1x8x896xf32>
    tpu.vector_store %arg17[%c0_99, %c5_100, %c0_101, %c0_102], %365 {strides = array<i32>} : memref<1x12x8x896xf32, #tpu.memory_space<vmem>>, vector<1x1x8x896xf32>,
    %366 = vector.extract_strided_slice %200 {offsets = [8, 0], sizes = [8, 896], strides = [1, 1]} : vector<16x896xf32> to vector<8x896xf32>
    %367 = vector.extract_strided_slice %202 {offsets = [8, 0], sizes = [8, 896], strides = [1, 1]} : vector<16x896xf32> to vector<8x896xf32>
    %368 = vector.extract_strided_slice %204 {offsets = [8, 0], sizes = [8, 896], strides = [1, 1]} : vector<16x896xf32> to vector<8x896xf32>
    %369 = vector.extract_strided_slice %206 {offsets = [8, 0], sizes = [8, 896], strides = [1, 1]} : vector<16x896xf32> to vector<8x896xf32>
    %370 = vector.extract_strided_slice %208 {offsets = [8, 0], sizes = [8, 896], strides = [1, 1]} : vector<16x896xf32> to vector<8x896xf32>
    %cst_103 = arith.constant dense<0.000000e+00> : vector<64x896xf32>
    %371 = tpu.matmul %209, %366, %cst_103 {dimension_numbers = #tpu.dot_dimension_numbers<[1], [0], [0], [1], [0, 0, 1, 1], [], []>} : vector<64x8xf32>, vector<8x896xf32>, vector<64x896xf32> -> vector<64x896xf32>
    %cst_104 = arith.constant dense<0.000000e+00> : vector<64x896xf32>
    %372 = tpu.matmul %210, %367, %cst_104 {dimension_numbers = #tpu.dot_dimension_numbers<[1], [0], [0], [1], [0, 0, 1, 1], [], []>} : vector<64x8xf32>, vector<8x896xf32>, vector<64x896xf32> -> vector<64x896xf32>
    %373 = arith.addf %371, %372 : vector<64x896xf32>
    %374 = vector.broadcast %214 : vector<64x1xf32> to vector<64x896xf32>
    %375 = arith.addf %373, %374 : vector<64x896xf32>
    %376 = vector.extract_strided_slice %375 {offsets = [0, 0], sizes = [48, 896], strides = [1, 1]} : vector<64x896xf32> to vector<48x896xf32>
    %cst_105 = arith.constant 5.000000e-01 : f32
    %377 = vector.broadcast %cst_105 : f32 to vector<48x896xf32>
    %378 = arith.mulf %377, %376 : vector<48x896xf32>
    %379 = math.tanh %378 : vector<48x896xf32>
    %cst_106 = arith.constant 5.000000e-01 : f32
    %380 = vector.broadcast %cst_106 : f32 to vector<48x896xf32>
    %381 = arith.mulf %380, %379 : vector<48x896xf32>
    %cst_107 = arith.constant 5.000000e-01 : f32
    %382 = vector.broadcast %cst_107 : f32 to vector<48x896xf32>
    %383 = arith.addf %381, %382 : vector<48x896xf32>
    %384 = vector.extract_strided_slice %375 {offsets = [48, 0], sizes = [16, 896], strides = [1, 1]} : vector<64x896xf32> to vector<16x896xf32>
    %385 = math.tanh %384 : vector<16x896xf32>
    %386 = vector.extract_strided_slice %383 {offsets = [0, 0], sizes = [8, 896], strides = [1, 1]} : vector<48x896xf32> to vector<8x896xf32>
    %387 = vector.extract_strided_slice %383 {offsets = [8, 0], sizes = [8, 896], strides = [1, 1]} : vector<48x896xf32> to vector<8x896xf32>
    %388 = vector.extract_strided_slice %383 {offsets = [16, 0], sizes = [8, 896], strides = [1, 1]} : vector<48x896xf32> to vector<8x896xf32>
    %389 = vector.extract_strided_slice %383 {offsets = [24, 0], sizes = [8, 896], strides = [1, 1]} : vector<48x896xf32> to vector<8x896xf32>
    %390 = vector.extract_strided_slice %383 {offsets = [32, 0], sizes = [8, 896], strides = [1, 1]} : vector<48x896xf32> to vector<8x896xf32>
    %391 = vector.extract_strided_slice %383 {offsets = [40, 0], sizes = [8, 896], strides = [1, 1]} : vector<48x896xf32> to vector<8x896xf32>
    %392 = vector.extract_strided_slice %385 {offsets = [0, 0], sizes = [8, 896], strides = [1, 1]} : vector<16x896xf32> to vector<8x896xf32>
    %393 = vector.extract_strided_slice %385 {offsets = [8, 0], sizes = [8, 896], strides = [1, 1]} : vector<16x896xf32> to vector<8x896xf32>
    %394 = arith.mulf %387, %368 : vector<8x896xf32>
    %395 = arith.mulf %386, %392 : vector<8x896xf32>
    %396 = arith.addf %394, %395 : vector<8x896xf32>
    %397 = math.tanh %396 : vector<8x896xf32>
    %398 = arith.mulf %388, %397 : vector<8x896xf32>
    %399 = arith.mulf %390, %368 : vector<8x896xf32>
    %400 = arith.mulf %389, %393 : vector<8x896xf32>
    %401 = arith.addf %399, %400 : vector<8x896xf32>
    %402 = math.tanh %401 : vector<8x896xf32>
    %403 = arith.mulf %391, %402 : vector<8x896xf32>
    %cst_108 = arith.constant dense<0.000000e+00> : vector<64x896xf32>
    %404 = tpu.matmul %211, %398, %cst_108 {dimension_numbers = #tpu.dot_dimension_numbers<[1], [0], [0], [1], [0, 0, 1, 1], [], []>} : vector<64x8xf32>, vector<8x896xf32>, vector<64x896xf32> -> vector<64x896xf32>
    %cst_109 = arith.constant dense<0.000000e+00> : vector<64x896xf32>
    %405 = tpu.matmul %212, %403, %cst_109 {dimension_numbers = #tpu.dot_dimension_numbers<[1], [0], [0], [1], [0, 0, 1, 1], [], []>} : vector<64x8xf32>, vector<8x896xf32>, vector<64x896xf32> -> vector<64x896xf32>
    %406 = arith.addf %404, %405 : vector<64x896xf32>
    %cst_110 = arith.constant dense<0.000000e+00> : vector<64x896xf32>
    %407 = tpu.matmul %213, %369, %cst_110 {dimension_numbers = #tpu.dot_dimension_numbers<[1], [0], [0], [1], [0, 0, 1, 1], [], []>} : vector<64x8xf32>, vector<8x896xf32>, vector<64x896xf32> -> vector<64x896xf32>
    %408 = arith.addf %406, %407 : vector<64x896xf32>
    %409 = vector.broadcast %215 : vector<64x1xf32> to vector<64x896xf32>
    %410 = arith.addf %408, %409 : vector<64x896xf32>
    %411 = vector.extract_strided_slice %410 {offsets = [0, 0], sizes = [48, 896], strides = [1, 1]} : vector<64x896xf32> to vector<48x896xf32>
    %cst_111 = arith.constant 5.000000e-01 : f32
    %412 = vector.broadcast %cst_111 : f32 to vector<48x896xf32>
    %413 = arith.mulf %412, %411 : vector<48x896xf32>
    %414 = math.tanh %413 : vector<48x896xf32>
    %cst_112 = arith.constant 5.000000e-01 : f32
    %415 = vector.broadcast %cst_112 : f32 to vector<48x896xf32>
    %416 = arith.mulf %415, %414 : vector<48x896xf32>
    %cst_113 = arith.constant 5.000000e-01 : f32
    %417 = vector.broadcast %cst_113 : f32 to vector<48x896xf32>
    %418 = arith.addf %416, %417 : vector<48x896xf32>
    %419 = vector.extract_strided_slice %410 {offsets = [48, 0], sizes = [16, 896], strides = [1, 1]} : vector<64x896xf32> to vector<16x896xf32>
    %420 = math.tanh %419 : vector<16x896xf32>
    %421 = vector.extract_strided_slice %418 {offsets = [0, 0], sizes = [8, 896], strides = [1, 1]} : vector<48x896xf32> to vector<8x896xf32>
    %422 = vector.extract_strided_slice %418 {offsets = [8, 0], sizes = [8, 896], strides = [1, 1]} : vector<48x896xf32> to vector<8x896xf32>
    %423 = vector.extract_strided_slice %418 {offsets = [16, 0], sizes = [8, 896], strides = [1, 1]} : vector<48x896xf32> to vector<8x896xf32>
    %424 = vector.extract_strided_slice %418 {offsets = [24, 0], sizes = [8, 896], strides = [1, 1]} : vector<48x896xf32> to vector<8x896xf32>
    %425 = vector.extract_strided_slice %418 {offsets = [32, 0], sizes = [8, 896], strides = [1, 1]} : vector<48x896xf32> to vector<8x896xf32>
    %426 = vector.extract_strided_slice %418 {offsets = [40, 0], sizes = [8, 896], strides = [1, 1]} : vector<48x896xf32> to vector<8x896xf32>
    %427 = vector.extract_strided_slice %420 {offsets = [0, 0], sizes = [8, 896], strides = [1, 1]} : vector<16x896xf32> to vector<8x896xf32>
    %428 = vector.extract_strided_slice %420 {offsets = [8, 0], sizes = [8, 896], strides = [1, 1]} : vector<16x896xf32> to vector<8x896xf32>
    %429 = arith.mulf %422, %370 : vector<8x896xf32>
    %430 = arith.mulf %421, %427 : vector<8x896xf32>
    %431 = arith.addf %429, %430 : vector<8x896xf32>
    %432 = math.tanh %431 : vector<8x896xf32>
    %433 = arith.mulf %423, %432 : vector<8x896xf32>
    %434 = arith.mulf %425, %370 : vector<8x896xf32>
    %435 = arith.mulf %424, %428 : vector<8x896xf32>
    %436 = arith.addf %434, %435 : vector<8x896xf32>
    %437 = math.tanh %436 : vector<8x896xf32>
    %438 = arith.mulf %426, %437 : vector<8x896xf32>
    %cst_114 = arith.constant 5.000000e-01 : f32
    %439 = vector.broadcast %cst_114 : f32 to vector<8x896xf32>
    %440 = arith.mulf %439, %438 : vector<8x896xf32>
    %441 = math.tanh %440 : vector<8x896xf32>
    %cst_115 = arith.constant 5.000000e-01 : f32
    %442 = vector.broadcast %cst_115 : f32 to vector<8x896xf32>
    %443 = arith.mulf %442, %441 : vector<8x896xf32>
    %cst_116 = arith.constant 5.000000e-01 : f32
    %444 = vector.broadcast %cst_116 : f32 to vector<8x896xf32>
    %445 = arith.addf %443, %444 : vector<8x896xf32>
    %446 = vector.broadcast %1 : vector<1x896xf32> to vector<8x896xf32>
    %447 = arith.mulf %445, %446 : vector<8x896xf32>
    %c0_117 = arith.constant 0 : index
    %c6_118 = arith.constant 6 : index
    %c0_119 = arith.constant 0 : index
    %c0_120 = arith.constant 0 : index
    %448 = vector.load %arg17[%c0_117, %c6_118, %c0_119, %c0_120] : memref<1x12x8x896xf32, #tpu.memory_space<vmem>>, vector<1x1x8x896xf32>
    %449 = vector.shape_cast %448 : vector<1x1x8x896xf32> to vector<8x896xf32>
    %450 = vector.shape_cast %447 : vector<8x896xf32> to vector<1x1x8x896xf32>
    tpu.vector_store %arg17[%c0_117, %c6_118, %c0_119, %c0_120], %450 {strides = array<i32>} : memref<1x12x8x896xf32, #tpu.memory_space<vmem>>, vector<1x1x8x896xf32>,
    %451 = vector.broadcast %1 : vector<1x896xf32> to vector<8x896xf32>
    %452 = arith.mulf %433, %451 : vector<8x896xf32>
    %c0_121 = arith.constant 0 : index
    %c7_122 = arith.constant 7 : index
    %c0_123 = arith.constant 0 : index
    %c0_124 = arith.constant 0 : index
    %453 = vector.load %arg17[%c0_121, %c7_122, %c0_123, %c0_124] : memref<1x12x8x896xf32, #tpu.memory_space<vmem>>, vector<1x1x8x896xf32>
    %454 = vector.shape_cast %453 : vector<1x1x8x896xf32> to vector<8x896xf32>
    %455 = vector.shape_cast %452 : vector<8x896xf32> to vector<1x1x8x896xf32>
    tpu.vector_store %arg17[%c0_121, %c7_122, %c0_123, %c0_124], %455 {strides = array<i32>} : memref<1x12x8x896xf32, #tpu.memory_space<vmem>>, vector<1x1x8x896xf32>,
    %456 = arith.mulf %398, %403 : vector<8x896xf32>
    %457 = vector.broadcast %1 : vector<1x896xf32> to vector<8x896xf32>
    %458 = arith.mulf %456, %457 : vector<8x896xf32>
    %459 = arith.mulf %458, %458 : vector<8x896xf32>
    %460 = vector.shape_cast %459 : vector<8x896xf32> to vector<1x8x896xf32>
    %cst_125 = arith.constant dense<0.000000e+00> : vector<1xf32>
    %461 = vector.multi_reduction <add>, %460, %cst_125 [1, 2] : vector<1x8x896xf32> to vector<1xf32>
    %462 = vector.shape_cast %461 : vector<1xf32> to vector<1x1x1xf32>
    %463 = vector.extract %462[0, 0, 0] : f32 from vector<1x1x1xf32>
    %cst_126 = arith.constant 1.000000e-24 : f32
    %464 = arith.maximumf %463, %cst_126 : f32
    %465 = math.rsqrt %464 : f32
    %466 = vector.broadcast %465 : f32 to vector<8x896xf32>
    %467 = arith.mulf %458, %466 : vector<8x896xf32>
    %c0_127 = arith.constant 0 : index
    %c8_128 = arith.constant 8 : index
    %c0_129 = arith.constant 0 : index
    %c0_130 = arith.constant 0 : index
    %468 = vector.load %arg17[%c0_127, %c8_128, %c0_129, %c0_130] : memref<1x12x8x896xf32, #tpu.memory_space<vmem>>, vector<1x1x8x896xf32>
    %469 = vector.shape_cast %468 : vector<1x1x8x896xf32> to vector<8x896xf32>
    %470 = vector.shape_cast %467 : vector<8x896xf32> to vector<1x1x8x896xf32>
    tpu.vector_store %arg17[%c0_127, %c8_128, %c0_129, %c0_130], %470 {strides = array<i32>} : memref<1x12x8x896xf32, #tpu.memory_space<vmem>>, vector<1x1x8x896xf32>,
    %471 = arith.mulf %396, %401 : vector<8x896xf32>
    %472 = vector.broadcast %1 : vector<1x896xf32> to vector<8x896xf32>
    %473 = arith.mulf %471, %472 : vector<8x896xf32>
    %474 = arith.mulf %473, %473 : vector<8x896xf32>
    %475 = vector.shape_cast %474 : vector<8x896xf32> to vector<1x8x896xf32>
    %cst_131 = arith.constant dense<0.000000e+00> : vector<1xf32>
    %476 = vector.multi_reduction <add>, %475, %cst_131 [1, 2] : vector<1x8x896xf32> to vector<1xf32>
    %477 = vector.shape_cast %476 : vector<1xf32> to vector<1x1x1xf32>
    %478 = vector.extract %477[0, 0, 0] : f32 from vector<1x1x1xf32>
    %cst_132 = arith.constant 1.000000e-24 : f32
    %479 = arith.maximumf %478, %cst_132 : f32
    %480 = math.rsqrt %479 : f32
    %481 = vector.broadcast %480 : f32 to vector<8x896xf32>
    %482 = arith.mulf %473, %481 : vector<8x896xf32>
    %c0_133 = arith.constant 0 : index
    %c9_134 = arith.constant 9 : index
    %c0_135 = arith.constant 0 : index
    %c0_136 = arith.constant 0 : index
    %483 = vector.load %arg17[%c0_133, %c9_134, %c0_135, %c0_136] : memref<1x12x8x896xf32, #tpu.memory_space<vmem>>, vector<1x1x8x896xf32>
    %484 = vector.shape_cast %483 : vector<1x1x8x896xf32> to vector<8x896xf32>
    %485 = vector.shape_cast %482 : vector<8x896xf32> to vector<1x1x8x896xf32>
    tpu.vector_store %arg17[%c0_133, %c9_134, %c0_135, %c0_136], %485 {strides = array<i32>} : memref<1x12x8x896xf32, #tpu.memory_space<vmem>>, vector<1x1x8x896xf32>,
    %486 = arith.mulf %433, %438 : vector<8x896xf32>
    %487 = vector.broadcast %1 : vector<1x896xf32> to vector<8x896xf32>
    %488 = arith.mulf %486, %487 : vector<8x896xf32>
    %489 = arith.mulf %488, %488 : vector<8x896xf32>
    %490 = vector.shape_cast %489 : vector<8x896xf32> to vector<1x8x896xf32>
    %cst_137 = arith.constant dense<0.000000e+00> : vector<1xf32>
    %491 = vector.multi_reduction <add>, %490, %cst_137 [1, 2] : vector<1x8x896xf32> to vector<1xf32>
    %492 = vector.shape_cast %491 : vector<1xf32> to vector<1x1x1xf32>
    %493 = vector.extract %492[0, 0, 0] : f32 from vector<1x1x1xf32>
    %cst_138 = arith.constant 1.000000e-24 : f32
    %494 = arith.maximumf %493, %cst_138 : f32
    %495 = math.rsqrt %494 : f32
    %496 = vector.broadcast %495 : f32 to vector<8x896xf32>
    %497 = arith.mulf %488, %496 : vector<8x896xf32>
    %c0_139 = arith.constant 0 : index
    %c10_140 = arith.constant 10 : index
    %c0_141 = arith.constant 0 : index
    %c0_142 = arith.constant 0 : index
    %498 = vector.load %arg17[%c0_139, %c10_140, %c0_141, %c0_142] : memref<1x12x8x896xf32, #tpu.memory_space<vmem>>, vector<1x1x8x896xf32>
    %499 = vector.shape_cast %498 : vector<1x1x8x896xf32> to vector<8x896xf32>
    %500 = vector.shape_cast %497 : vector<8x896xf32> to vector<1x1x8x896xf32>
    tpu.vector_store %arg17[%c0_139, %c10_140, %c0_141, %c0_142], %500 {strides = array<i32>} : memref<1x12x8x896xf32, #tpu.memory_space<vmem>>, vector<1x1x8x896xf32>,
    %501 = arith.mulf %431, %436 : vector<8x896xf32>
    %502 = vector.broadcast %1 : vector<1x896xf32> to vector<8x896xf32>
    %503 = arith.mulf %501, %502 : vector<8x896xf32>
    %504 = arith.mulf %503, %503 : vector<8x896xf32>
    %505 = vector.shape_cast %504 : vector<8x896xf32> to vector<1x8x896xf32>
    %cst_143 = arith.constant dense<0.000000e+00> : vector<1xf32>
    %506 = vector.multi_reduction <add>, %505, %cst_143 [1, 2] : vector<1x8x896xf32> to vector<1xf32>
    %507 = vector.shape_cast %506 : vector<1xf32> to vector<1x1x1xf32>
    %508 = vector.extract %507[0, 0, 0] : f32 from vector<1x1x1xf32>
    %cst_144 = arith.constant 1.000000e-24 : f32
    %509 = arith.maximumf %508, %cst_144 : f32
    %510 = math.rsqrt %509 : f32
    %511 = vector.broadcast %510 : f32 to vector<8x896xf32>
    %512 = arith.mulf %503, %511 : vector<8x896xf32>
    %c0_145 = arith.constant 0 : index
    %c11_146 = arith.constant 11 : index
    %c0_147 = arith.constant 0 : index
    %c0_148 = arith.constant 0 : index
    %513 = vector.load %arg17[%c0_145, %c11_146, %c0_147, %c0_148] : memref<1x12x8x896xf32, #tpu.memory_space<vmem>>, vector<1x1x8x896xf32>
    %514 = vector.shape_cast %513 : vector<1x1x8x896xf32> to vector<8x896xf32>
    %515 = vector.shape_cast %512 : vector<8x896xf32> to vector<1x1x8x896xf32>
    tpu.vector_store %arg17[%c0_145, %c11_146, %c0_147, %c0_148], %515 {strides = array<i32>} : memref<1x12x8x896xf32, #tpu.memory_space<vmem>>, vector<1x1x8x896xf32>,
    return
  }
  func.func @transform_0(%arg0: i32) -> (i32, i32, i32) {
    %c0_i32 = arith.constant 0 : i32
    %c0_i32_0 = arith.constant 0 : i32
    %c0_i32_1 = arith.constant 0 : i32
    return %arg0, %c0_i32, %c0_i32_0 : i32, i32, i32
  }
  func.func @transform_1(%arg0: i32) -> (i32, i32, i32) {
    %c0_i32 = arith.constant 0 : i32
    %c0_i32_0 = arith.constant 0 : i32
    %c0_i32_1 = arith.constant 0 : i32
    return %arg0, %c0_i32, %c0_i32_0 : i32, i32, i32
  }
  func.func @transform_2(%arg0: i32) -> (i32, i32, i32, i32) {
    %c0_i32 = arith.constant 0 : i32
    %c0_i32_0 = arith.constant 0 : i32
    %c0_i32_1 = arith.constant 0 : i32
    %c0_i32_2 = arith.constant 0 : i32
    return %arg0, %c0_i32, %c0_i32_0, %c0_i32_1 : i32, i32, i32, i32
  }
  func.func @transform_3(%arg0: i32) -> (i32, i32) {
    %c0_i32 = arith.constant 0 : i32
    %c0_i32_0 = arith.constant 0 : i32
    %c0_i32_1 = arith.constant 0 : i32
    return %c0_i32, %c0_i32_0 : i32, i32
  }
  func.func @transform_4(%arg0: i32) -> (i32, i32) {
    %c0_i32 = arith.constant 0 : i32
    %c0_i32_0 = arith.constant 0 : i32
    %c0_i32_1 = arith.constant 0 : i32
    return %c0_i32, %c0_i32_0 : i32, i32
  }
  func.func @transform_5(%arg0: i32) -> (i32, i32) {
    %c0_i32 = arith.constant 0 : i32
    %c0_i32_0 = arith.constant 0 : i32
    %c0_i32_1 = arith.constant 0 : i32
    return %c0_i32, %c0_i32_0 : i32, i32
  }
  func.func @transform_6(%arg0: i32) -> (i32, i32) {
    %c0_i32 = arith.constant 0 : i32
    %c0_i32_0 = arith.constant 0 : i32
    %c0_i32_1 = arith.constant 0 : i32
    return %c0_i32, %c0_i32_0 : i32, i32
  }
  func.func @transform_7(%arg0: i32) -> (i32, i32) {
    %c0_i32 = arith.constant 0 : i32
    %c0_i32_0 = arith.constant 0 : i32
    %c0_i32_1 = arith.constant 0 : i32
    return %c0_i32, %c0_i32_0 : i32, i32
  }
  func.func @transform_8(%arg0: i32) -> (i32, i32) {
    %c0_i32 = arith.constant 0 : i32
    %c0_i32_0 = arith.constant 0 : i32
    %c0_i32_1 = arith.constant 0 : i32
    return %c0_i32, %c0_i32_0 : i32, i32
  }
  func.func @transform_9(%arg0: i32) -> (i32, i32) {
    %c0_i32 = arith.constant 0 : i32
    %c0_i32_0 = arith.constant 0 : i32
    %c0_i32_1 = arith.constant 0 : i32
    return %c0_i32, %c0_i32_0 : i32, i32
  }
  func.func @transform_10(%arg0: i32) -> (i32, i32) {
    %c0_i32 = arith.constant 0 : i32
    %c0_i32_0 = arith.constant 0 : i32
    %c0_i32_1 = arith.constant 0 : i32
    return %c0_i32, %c0_i32_0 : i32, i32
  }
  func.func @transform_11(%arg0: i32) -> (i32, i32) {
    %c0_i32 = arith.constant 0 : i32
    %c0_i32_0 = arith.constant 0 : i32
    %c0_i32_1 = arith.constant 0 : i32
    return %c0_i32, %c0_i32_0 : i32, i32
  }
  func.func @transform_12(%arg0: i32) -> i32 {
    %c0_i32 = arith.constant 0 : i32
    %c0_i32_0 = arith.constant 0 : i32
    return %c0_i32 : i32
  }
  func.func @transform_13(%arg0: i32) -> i32 {
    %c0_i32 = arith.constant 0 : i32
    %c0_i32_0 = arith.constant 0 : i32
    return %c0_i32 : i32
  }
  func.func @transform_14(%arg0: i32) -> i32 {
    %c0_i32 = arith.constant 0 : i32
    %c0_i32_0 = arith.constant 0 : i32
    return %c0_i32 : i32
  }
  func.func @transform_15(%arg0: i32) -> i32 {
    %c0_i32 = arith.constant 0 : i32
    %c0_i32_0 = arith.constant 0 : i32
    return %c0_i32 : i32
  }
  func.func @transform_16(%arg0: i32) -> (i32, i32, i32, i32) {
    %c0_i32 = arith.constant 0 : i32
    %c0_i32_0 = arith.constant 0 : i32
    %c0_i32_1 = arith.constant 0 : i32
    %c0_i32_2 = arith.constant 0 : i32
    return %arg0, %c0_i32, %c0_i32_0, %c0_i32_1 : i32, i32, i32, i32
  }
}

</mosaic_0001>

<bundles_post_ra>
// kernel: lstm_optimizee_forward.1
= control target key start
LH: loop header
LB: loop body
LE: loop exit
PB: predicated region body
PF: predicated region fallthrough
CT: control target
= control target key end

     0   :  { %s14743_s0 = inlined_call_operand.vmem [shape: f32[1,8,896], index: 0, kind: input, shape index: {}]   ;;  %s14744_s1 = inlined_call_operand.vmem [shape: f32[1,16,896], index: 1, kind: input, shape index: {}]   ;;  %s14745_s2 = inlined_call_operand.vmem [shape: f32[1,4,16,896], index: 2, kind: input, shape index: {}]   ;;  %s14746_s3 = inlined_call_operand.vmem [shape: f32[16,8], index: 3, kind: input, shape index: {}]   ;;  %s14747_s4 = inlined_call_operand.vmem [shape: f32[64,8], index: 4, kind: input, shape index: {}]   ;;  %s14748_s5 = inlined_call_operand.vmem [shape: f32[64,8], index: 5, kind: input, shape index: {}]   ;;  %s14749_s6 = inlined_call_operand.vmem [shape: f32[64,8], index: 6, kind: input, shape index: {}]   ;;  %s14750_s7 = inlined_call_operand.vmem [shape: f32[64,8], index: 7, kind: input, shape index: {}]   ;;  %s14751_s8 = inlined_call_operand.vmem [shape: f32[64,8], index: 8, kind: input, shape index: {}]   ;;  %s14752_s9 = inlined_call_operand.vmem [shape: f32[64,1], index: 9, kind: input, shape index: {}]   ;;  %s14753_s10 = inlined_call_operand.vmem [shape: f32[64,1], index: 10, kind: input, shape index: {}]   ;;  %s14754_s11 = inlined_call_operand.vmem [shape: f32[9,896], index: 11, kind: input, shape index: {}]   ;;  %s14755_s12 = inlined_call_operand.vmem [shape: f32[9], index: 12, kind: input, shape index: {}]   ;;  %s14756_s13 = inlined_call_operand.<no memory space> [shape: f32[1], index: 13, kind: input, shape index: {}]   ;;  %s14757_s14 = inlined_call_operand.vmem [shape: f32[25], index: 14, kind: input, shape index: {}]   ;;  %s14758_s15 = inlined_call_operand.<no memory space> [shape: f32[1], index: 15, kind: input, shape index: {}]   ;;  %s14759_s16 = inlined_call_operand.vmem [shape: f32[1,12,8,896], index: 16, kind: output, shape index: {}]  }
   0x1   :  { %14866 = sst [smem:[#allocation87_spill]] %s14743_s0 }
   0x2   :  { %23 = vsyncpa [#allocation5], 0  ;;  %s55_s23 = sshll.u32 %s14755_s12, 4  ;;  %s56_s23 = int_to_ptr.vmem [resolvable:$true] %s55_s23 }
   0x3   :  { %24 = vsyncpa [#allocation7], 0  ;;  %s67_s26 = sshll.u32 %s14757_s14, 4  ;;  %s10053_s27 = scalar_lea.vmem %s56_s23, 16  ;;  %s68_s26 = int_to_ptr.vmem [resolvable:$true] %s67_s26 }
   0x4   :  { %p10054_p0 = scmp.ne.s32.totalorder %s56_s23, %s10053_s27  ;;  %p10058_p1 = scmp.lt.s32.totalorder %s56_s23, %s56_s23 }
   0x5   :  { %p10059_p2 = scmp.lt.s32.totalorder %s10053_s27, %s10053_s27 }
   0x7   :  { %p10060_p3 = por %p10059_p2, %p10058_p1 }
   0x9   :  { %p10061_p4 = pnand %p10060_p3, %p10054_p0 }
   0xb   :  { %10064 = shalt.err (!%p10061_p4)
}
   0xc   :  { %s10081_s28 = smov [#allocation4]   ;;  %s10065_s29 = scalar_lea.vmem %s68_s26, 16 }
   0xd   :  { %58 = dma.vmem_to_smem %s56_s23, 16, %s10081_s28, [#allocation5]  }
   0xe   :  { %p10066_p5 = scmp.ne.s32.totalorder %s68_s26, %s10065_s29  ;;  %p10070_p6 = scmp.lt.s32.totalorder %s68_s26, %s68_s26 }
   0xf   :  { %p10071_p7 = scmp.lt.s32.totalorder %s10065_s29, %s10065_s29 }
  0x11   :  { %p10072_p8 = por %p10071_p7, %p10070_p6 }
  0x13   :  { %p10073_p9 = pnand %p10072_p8, %p10066_p5 }
  0x15   :  { %10076 = shalt.err (!%p10073_p9)
}
  0x16   :  { %s10082_s12 = smov [#allocation6]  }
  0x17   :  { %70 = dma.vmem_to_smem %s68_s26, 16, %s10082_s12, [#allocation7]  }
  0x18   :  { %10077 = dma.done.wait [#allocation5], 16  }
  0x19   :  { %10078 = vsyncadd [#allocation5], 4294967280 }
  0x1a   :  { %10079 = dma.done.wait [#allocation7], 16  }
  0x1b   :  { %10080 = vsyncadd [#allocation7], 4294967280 }
  0x1c   :  { %79 = sfence }
  0x1d   :  { %s14867_s0 = sld [smem:[#allocation87_spill]]  ;;  %s10083_s19 = smov 1   ;;  %v115_v7 = vlaneseq  ;;  %v10260_v11 = vld [vmem:[%s14754_s11 + $0x18] sm:$0xff]  ;;  %v10267_v14 = vld [vmem:[%s14754_s11 + $0x8] sm:$0xff]  ;;  %v10272_v15 = vld [vmem:[%s14754_s11 + $0x10] sm:$0xff]  ;;  %vm1249_vm8 = vcmask 64512  }
  0x1e   :  { %s10084_s12 = smov 127   ;;  %s8274_s14 = sld [smem:[#allocation4 + $0x3]]  ;;  %14871 = vst [vmem:[#allocation13_spill] sm:$0xff] %v10260_v11  ;;  %14872 = vst [vmem:[#allocation14_spill] sm:$0xff] %v10267_v14  ;;  %v10277_v16 = vld [vmem:[%s14754_s11] sm:$0xff]  ;;  %v10282_v17 = vld [vmem:[%s14754_s11 + $0x30] sm:$0xff] }
  0x1f   :  { %v10248_v8 = vshrl.u32 %v115_v7, 7  ;;  %s10250_s30 = sld [smem:[#allocation4 + $0x1]]  ;;  %v10254_v9 = vand.u32 127, %v115_v7  ;;  %s10262_s20 = sld [smem:[#allocation4]]  ;;  %14873 = vst [vmem:[#allocation15_spill] sm:$0xff] %v10272_v15  ;;  %14874 = vst [vmem:[#allocation16_spill] sm:$0xff] %v10277_v16 }
  0x20   :  { %14875 = vst [vmem:[#allocation17_spill] sm:$0xff] %v10282_v17  ;;  %s10285_s29 = sld [smem:[#allocation4 + $0x2]]  ;;  %s10287_s17 = sld [smem:[#allocation4 + $0x7]]  ;;  %v10292_v19 = vld [vmem:[%s14754_s11 + $0x20] sm:$0xff]  ;;  %v10297_v20 = vld [vmem:[%s14754_s11 + $0x28] sm:$0xff] }
  0x21   :  { %14870 = vst [vmem:[#allocation12_spill] sm:$0xff] %v10248_v8  ;;  %v127_v10 = vsub.s32 1, %v10248_v8  ;;  %v184_v18 = vsub.s32 2, %v10248_v8  ;;  %14876 = vst [vmem:[#allocation18_spill] sm:$0xff] %v10292_v19  ;;  %s10299_s24 = sld [smem:[#allocation4 + $0x6]]  ;;  %vm117_vm0 = vcmp.lt.s32.totalorder %v10254_v9, 1 }
  0x22   :  { %14877 = vst [vmem:[#allocation19_spill] sm:$0xff] %v10297_v20  ;;  %s10308_s25 = sld [smem:[#allocation4 + $0x4]]  ;;  %s10323_s26 = sld [smem:[#allocation4 + $0x8]]  ;;  %vm174_vm1 = vcmp.lt.s32.totalorder %v10254_v9, 127  ;;  %vm272_vm2 = vcmp.lt.s32.totalorder %v10254_v9, 28  ;;  %vm418_vm3 = vcmp.lt.s32.totalorder %v10254_v9, 100 }
  0x23   :  { %v10188_v0 = vld [vmem:[%s14867_s0 + $0x10] sm:$0xff]  ;;  %v10193_v1 = vld [vmem:[%s14867_s0] sm:$0xff]  ;;  %v10202_v2 = vld [vmem:[%s14867_s0 + $0x18] sm:$0xff]  ;;  %v10303_v21 = vrot.slane %v10260_v11, %v127_v10  ;;  %v10306_v22 = vrot.slane %v10267_v14, %v127_v10  ;;  %v10315_v26 = vrot.slane %v10272_v15, %v127_v10  ;;  %v10318_v27 = vrot.slane %v10277_v16, %v127_v10  ;;  %s10088_s27 = smov 126   ;;  %s8281_s28 = sld [smem:[#allocation6 + $0x2]] }
  0x24   :  { %105 = vrot.lane.b32.xlu1 %v10188_v0, %s10083_s19  ;;  %101 = vrot.lane.b32.xlu0 %v10193_v1, %s10083_s19  ;;  %v10207_v3 = vld [vmem:[%s14867_s0 + $0x8] sm:$0xff]  ;;  %v10221_v5 = vld [vmem:[%s14867_s0 + $0x30] sm:$0xff]  ;;  %v10321_v28 = vrot.slane %v10282_v17, %v127_v10  ;;  %v10326_v29 = vrot.slane %v10292_v19, %v127_v10  ;;  %v10329_v30 = vrot.slane %v10297_v20, %v127_v10  ;;  %s8301_s18 = sld [smem:[#allocation6 + $0x16]]  ;;  %s8289_s21 = sld [smem:[#allocation6 + $0xa]]  ;;  %vm498_vm4 = vcmp.lt.s32.totalorder %v10254_v9, 2 }
  0x25   :  { %v10216_v4 = vld [vmem:[%s14867_s0 + $0x28] sm:$0xff]  ;;  %14869 = vst [vmem:[#allocation11_spill] sm:$0xff] %v10221_v5  ;;  %v10230_v6 = vld [vmem:[%s14867_s0 + $0x20] sm:$0xff]  ;;  %s10252_s0 = sld [smem:[#allocation4 + $0x5]]  ;;  %14878 = vst [vmem:[#allocation20_spill] sm:$0xff] %v10303_v21  ;;  %v10310_v23 = vstv %s8274_s14  ;;  %v10332_v31 = vrot.slane %v10277_v16, %v184_v18  ;;  %v10335_v32 = vstv %s10250_s30  ;;  %v10339_v33 = vrot.slane %v10267_v14, %v184_v18  ;;  %s10085_s14 = smov 28  }
  0x26   :  { %14868 = vst [vmem:[#allocation10_spill] sm:$0xff] %v10216_v4  ;;  %14879 = vst [vmem:[#allocation21_spill] sm:$0xff] %v10306_v22  ;;  %v10342_v34 = vrot.slane %v10272_v15, %v184_v18  ;;  %v10345_v35 = vrot.slane %v10260_v11, %v184_v18  ;;  %v10351_v37 = vrot.slane %v10292_v19, %v184_v18  ;;  %v10360_v40 = vstv %s10262_s20  ;;  %s10086_s30 = smov 100   ;;  %s8291_s22 = sld [smem:[#allocation6 + $0xc]] }
  0x27   :  { %14880 = vst [vmem:[#allocation22_spill] sm:$0xff] %v10315_v26  ;;  %14881 = vst [vmem:[#allocation23_spill] sm:$0xff] %v10318_v27  ;;  %v10354_v38 = vrot.slane %v10297_v20, %v184_v18  ;;  %v10357_v39 = vrot.slane %v10282_v17, %v184_v18  ;;  %v229_v46 = vmul.f32 %v10335_v32, %v10207_v3  ;;  %v10376_v48 = vstv %s10285_s29  ;;  %s8286_s29 = sld [smem:[#allocation6 + $0x7]]  ;;  %s10796_s23 = sld [smem:[#allocation6]] }
  0x28   :  { %107 = vrot.lane.b32.xlu1 %v10202_v2, %s10083_s19  ;;  %103 = vrot.lane.b32.xlu0 %v10207_v3, %s10083_s19  ;;  %14882 = vst [vmem:[#allocation24_spill] sm:$0xff] %v10321_v28  ;;  %14883 = vst [vmem:[#allocation25_spill] sm:$0xff] %v10329_v30  ;;  %v228_v49 = vmul.f32 %v10335_v32, %v10193_v1  ;;  %v10381_v50 = vstv %s10287_s17  ;;  %v231_v51 = vmul.f32 %v10335_v32, %v10202_v2  ;;  %s8296_s17 = sld [smem:[#allocation6 + $0x11]]  ;;  %s10857_s20 = sld [smem:[#allocation6 + $0x10]] }
  0x29   :  { %14884 = vst [vmem:[#allocation26_spill] sm:$0xff] %v10332_v31  ;;  %14885 = vst [vmem:[#allocation27_spill] sm:$0xff] %v10335_v32  ;;  %v230_v52 = vmul.f32 %v10335_v32, %v10188_v0  ;;  %v10388_v53 = vstv %s10299_s24  ;;  %v10392_v54 = vmul.f32 %v10335_v32, %v10221_v5  ;;  %v325_v58 = vstv %s10308_s25  ;;  %s10798_s24 = sld [smem:[#allocation6 + $0x5]]  ;;  %s10804_s25 = sld [smem:[#allocation6 + $0x14]] }
  0x2a   :  { %14886 = vst [vmem:[#allocation28_spill] sm:$0xff] %v10351_v37  ;;  %14887 = vst [vmem:[#allocation29_spill] sm:$0xff] %v10354_v38  ;;  %v10405_v62 = vmul.f32 %v10381_v50, %v10207_v3  ;;  %v10408_v63 = vstv %s10323_s26  ;;  %v10412_v7 = vmul.f32 %v10381_v50, %v10202_v2  ;;  %v10416_v10 = vmul.f32 %v10381_v50, %v10188_v0  ;;  %s10841_s26 = sld [smem:[#allocation6 + $0x1]] }
  0x2b   :  { %v10348_v36 = vstv %s10252_s0  ;;  %14888 = vst [vmem:[#allocation30_spill] sm:$0xff] %v10357_v39  ;;  %14889 = vst [vmem:[#allocation31_spill] sm:$0xff] %v10381_v50  ;;  %v10428_v18 = vmul.f32 %v10381_v50, %v10216_v4  ;;  %v10455_v17 = vmul.f32 %v325_v58, %v10221_v5  ;;  %s10855_s0 = sld [smem:[#allocation6 + $0x6]]  ;;  %vm611_vm5 = vcmp.lt.s32.totalorder %v10254_v9, 126 }
  0x2c   :  { %111 = vrot.lane.b32.xlu1 %v10216_v4, %s10083_s19  ;;  %113 = vrot.lane.b32.xlu0 %v10221_v5, %s10083_s19  ;;  %vm741_vm6 = vcmp.lt.s32.totalorder %v10254_v9, 56  ;;  %vm1167_vm7 = vcmp.lt.s32.totalorder %v10254_v9, 72  ;;  %v1576_v9 = vld [vmem:[%s14745_s2] sm:$0xff] }
  0x2d   :  { %14891 = vst [vmem:[#allocation33_spill] sm:$0xff] %v10428_v18  ;;  %14892 = vst [vmem:[#allocation34_spill] sm:$0xff] %v10455_v17 }
  0x30   :  { %160 = vrot.lane.b32.xlu1 %v10193_v1, %s10084_s12  ;;  %109 = vrot.lane.b32.xlu0 %v10230_v6, %s10083_s19 }
  0x34   :  { %164 = vrot.lane.b32.xlu1 %v10188_v0, %s10084_s12  ;;  %162 = vrot.lane.b32.xlu0 %v10207_v3, %s10084_s12 }
  0x38   :  { %168 = vrot.lane.b32.xlu1 %v10230_v6, %s10084_s12  ;;  %166 = vrot.lane.b32.xlu0 %v10202_v2, %s10084_s12 }
  0x3c   :  { %170 = vrot.lane.b32.xlu1 %v10216_v4, %s10084_s12  ;;  %172 = vrot.lane.b32.xlu0 %v10221_v5, %s10084_s12 }
  0x96   :  { %v106_v12 = vpop.permute.xlu1 %105  ;;  %v102_v13 = vpop.permute.xlu0 %101 }
  0x9a   :  { %v10312_v24 = vpop.permute.xlu1 %107  ;;  %v104_v25 = vpop.permute.xlu0 %103 }
  0x9b   :  { %v121_v41 = vsel %vm117_vm0, %v106_v12, %v10312_v24  ;;  %v122_v42 = vsel %vm117_vm0, %v104_v25, %v106_v12  ;;  %v123_v43 = vsel %vm117_vm0, %v102_v13, %v104_v25  ;;  %v10420_v12 = vmul.f32 %v10381_v50, %v10193_v1 }
  0x9c   :  { %v156_v55 = vmul.f32 %v10303_v21, %v121_v41  ;;  %v154_v56 = vmul.f32 %v10306_v22, %v123_v43  ;;  %v155_v57 = vmul.f32 %v10315_v26, %v122_v42  ;;  %v327_v25 = vmul.f32 %v325_v58, %v10207_v3 }
  0x9d   :  { %v10432_v41 = vmul.f32 %v325_v58, %v10188_v0  ;;  %v10435_v42 = vmul.f32 %v325_v58, %v10202_v2  ;;  %v10438_v43 = vmul.f32 %v325_v58, %v10193_v1  ;;  %v10449_v2 = vmul.f32 %v325_v58, %v10230_v6 }
  0x9e   :  { %v10369_v44 = vpop.permute.xlu1 %111  ;;  %v114_v45 = vpop.permute.xlu0 %113  ;;  %v222_v22 = vmul.f32 %v10360_v40, %v156_v55  ;;  %v221_v21 = vmul.f32 %v10360_v40, %v155_v57  ;;  %v10452_v1 = vmul.f32 %v325_v58, %v10216_v4  ;;  %v318_v20 = vmul.f32 %v10310_v23, %v154_v56 }
  0x9f   :  { %v124_v47 = vsel %vm117_vm0, %v114_v45, %v102_v13  ;;  %v10424_v13 = vmul.f32 %v10381_v50, %v10230_v6  ;;  %v10467_v11 = vmul.f32 %v10310_v23, %v155_v57  ;;  %v366_v5 = vmul.f32 %v10388_v53, %v154_v56 }
  0xa0   :  { %v10399_v59 = vmul.f32 %v10318_v27, %v124_v47  ;;  %v118_v47 = vsel %vm117_vm0, %v10369_v44, %v114_v45  ;;  %v220_v27 = vmul.f32 %v10360_v40, %v154_v56  ;;  %v10458_v45 = vmul.f32 %v10310_v23, %v156_v55 }
  0xa1   :  { %14890 = vst [vmem:[#allocation32_spill] sm:$0xff] %v10424_v13  ;;  %v10470_v15 = vmul.f32 %v10321_v28, %v118_v47  ;;  %v238_v4 = vadd.f32 %v231_v51, %v222_v22  ;;  %v237_v50 = vadd.f32 %v230_v52, %v221_v21  ;;  %v368_v47 = vmul.f32 %v10388_v53, %v156_v55 }
  0xa2   :  { %v10401_v60 = vpop.permute.xlu1 %160  ;;  %v110_v61 = vpop.permute.xlu0 %109  ;;  %v219_v0 = vmul.f32 %v10360_v40, %v10399_v59  ;;  %v236_v8 = vadd.f32 %v229_v46, %v220_v27  ;;  %v367_v22 = vmul.f32 %v10388_v53, %v155_v57  ;;  %v317_v52 = vmul.f32 %v10310_v23, %v10399_v59 }
  0xa3   :  { %v334_v55 = vadd.f32 %v327_v25, %v318_v20  ;;  %v225_v57 = vmul.f32 %v10360_v40, %v10470_v15 }
  0xa4   :  { %v235_v13 = vadd.f32 %v228_v49, %v219_v0 }
  0xa6   :  { %v165_v3 = vpop.permute.xlu1 %164  ;;  %v163_v26 = vpop.permute.xlu0 %162 }
  0xa7   :  { %v179_v19 = vsel %vm174_vm1, %v163_v26, %v165_v3  ;;  %v180_v16 = vsel %vm174_vm1, %v10401_v60, %v163_v26 }
  0xa8   :  { %v10473_v58 = vmul.f32 %v10332_v31, %v180_v16  ;;  %v211_v14 = vmul.f32 %v10339_v33, %v179_v19  ;;  %v120_v16 = vsel %vm117_vm0, %v10312_v24, %v110_v61  ;;  %v119_v24 = vsel %vm117_vm0, %v110_v61, %v10369_v44 }
  0xa9   :  { %v323_v44 = vmul.f32 %v10310_v23, %v10470_v15  ;;  %v157_v20 = vmul.f32 %v10326_v29, %v120_v16 }
  0xaa   :  { %v169_v18 = vpop.permute.xlu1 %168  ;;  %v167_v17 = vpop.permute.xlu0 %166  ;;  %v245_v26 = vmul.f32 %v10376_v48, %v211_v14  ;;  %v244_v32 = vmul.f32 %v10376_v48, %v10473_v58  ;;  %v343_v56 = vmul.f32 %v10348_v36, %v211_v14 }
  0xab   :  { %v177_v19 = vsel %vm174_vm1, %v167_v17, %v169_v18  ;;  %v178_v21 = vsel %vm174_vm1, %v165_v3, %v167_v17 }
  0xac   :  { %v212_v27 = vmul.f32 %v10342_v34, %v178_v21  ;;  %v213_v46 = vmul.f32 %v10345_v35, %v177_v19  ;;  %v252_v49 = vadd.f32 %v245_v26, %v236_v8  ;;  %v251_v51 = vadd.f32 %v244_v32, %v235_v13 }
  0xad   :  { %v391_v19 = vmul.f32 %v10408_v63, %v211_v14  ;;  %v158_v21 = vmul.f32 %v10329_v30, %v119_v24  ;;  %v383_v24 = vadd.f32 %v10416_v10, %v367_v22  ;;  %v336_v10 = vadd.f32 %v10435_v42, %v10458_v45 }
  0xae   :  { %v171_v0 = vpop.permute.xlu1 %170  ;;  %v173_v17 = vpop.permute.xlu0 %172  ;;  %260 = vrot.lane.b32.xlu1 %v252_v49, %s10085_s14  ;;  %258 = vrot.lane.b32.xlu0 %v251_v51, %s10085_s14  ;;  %v247_v8 = vmul.f32 %v10376_v48, %v213_v46  ;;  %v246_v32 = vmul.f32 %v10376_v48, %v212_v27  ;;  %v393_v16 = vmul.f32 %v10408_v63, %v213_v46 }
  0xaf   :  { %v176_v61 = vsel %vm174_vm1, %v169_v18, %v171_v0  ;;  %v181_v13 = vsel %vm174_vm1, %v173_v17, %v10401_v60  ;;  %v175_v25 = vsel %vm174_vm1, %v171_v0, %v173_v17  ;;  %v10519_v51 = vadd.f32 %v343_v56, %v334_v55 }
  0xb0   :  { %v10514_v3 = vmul.f32 %v10357_v39, %v181_v13  ;;  %v254_v26 = vadd.f32 %v247_v8, %v238_v4  ;;  %v253_v49 = vadd.f32 %v246_v32, %v237_v50  ;;  %v214_v18 = vmul.f32 %v10351_v37, %v176_v61 }
  0xb1   :  { %v382_v60 = vadd.f32 %v10405_v62, %v366_v5  ;;  %v241_v0 = vadd.f32 %v10392_v54, %v225_v57  ;;  %v215_v14 = vmul.f32 %v10354_v38, %v175_v25  ;;  %v384_v50 = vadd.f32 %v10412_v7, %v368_v47 }
  0xb2   :  { %264 = vrot.lane.b32.xlu1 %v254_v26, %s10085_s14  ;;  %v250_v4 = vmul.f32 %v10376_v48, %v10514_v3  ;;  %262 = vrot.lane.b32.xlu0 %v253_v49, %s10085_s14  ;;  %v365_v55 = vmul.f32 %v10388_v53, %v10399_v59  ;;  %v321_v56 = vmul.f32 %v10310_v23, %v157_v20 }
  0xb3   :  { %v398_v17 = vadd.f32 %v391_v19, %v382_v60  ;;  %v392_v54 = vmul.f32 %v10408_v63, %v212_v27  ;;  %v322_v62 = vmul.f32 %v10310_v23, %v158_v21  ;;  %v400_v8 = vadd.f32 %v393_v16, %v384_v50  ;;  %v14895_v60 = vld [vmem:[#allocation34_spill] sm:$0xff] }
  0xb4   :  { %v257_v5 = vadd.f32 %v250_v4, %v241_v0  ;;  %v390_v32 = vmul.f32 %v10408_v63, %v10473_v58  ;;  %v369_v57 = vmul.f32 %v10388_v53, %v157_v20  ;;  %v346_v7 = vmul.f32 %v10348_v36, %v214_v18 }
  0xb5   :  { %v335_v59 = vadd.f32 %v10432_v41, %v10467_v11  ;;  %v344_v47 = vmul.f32 %v10348_v36, %v212_v27  ;;  %v347_v23 = vmul.f32 %v10348_v36, %v215_v14  ;;  %v345_v22 = vmul.f32 %v10348_v36, %v213_v46 }
  0xb6   :  { %406 = vrot.lane.b32.xlu1 %v398_v17, %s10086_s30  ;;  %270 = vrot.lane.b32.xlu0 %v257_v5, %s10085_s14  ;;  %v333_v61 = vadd.f32 %v10438_v43, %v317_v52  ;;  %v342_v13 = vmul.f32 %v10348_v36, %v10473_v58  ;;  %v348_v25 = vmul.f32 %v10348_v36, %v10514_v3  ;;  %v14893_v52 = vld [vmem:[#allocation27_spill] sm:$0xff] }
  0xb7   :  { %v399_v11 = vadd.f32 %v392_v54, %v383_v24  ;;  %v10554_v41 = vadd.f32 %v344_v47, %v335_v59  ;;  %v337_v42 = vadd.f32 %v10449_v2, %v321_v56  ;;  %v394_v45 = vmul.f32 %v10408_v63, %v214_v18  ;;  %v14894_v2 = vld [vmem:[#allocation32_spill] sm:$0xff]  ;;  %v14897_v17 = vld [vmem:[#allocation11_spill] sm:$0xff] }
  0xb8   :  { %v10558_v27 = vadd.f32 %v345_v22, %v336_v10  ;;  %v10560_v26 = vadd.f32 %v342_v13, %v333_v61  ;;  %v338_v46 = vadd.f32 %v10452_v1, %v322_v62  ;;  %v381_v43 = vadd.f32 %v10420_v12, %v365_v55  ;;  %v14898_v5 = vld [vmem:[#allocation31_spill] sm:$0xff] }
  0xb9   :  { %v370_v58 = vmul.f32 %v10388_v53, %v158_v21  ;;  %v223_v36 = vmul.f32 %v10360_v40, %v157_v20  ;;  %v232_v19 = vmul.f32 %v14893_v52, %v10230_v6  ;;  %v385_v49 = vadd.f32 %v14894_v2, %v369_v57  ;;  %v14896_v6 = vld [vmem:[#allocation33_spill] sm:$0xff]  ;;  %v14903_v13 = vld [vmem:[#allocation15_spill] sm:$0xff] }
  0xba   :  { %410 = vrot.lane.b32.xlu1 %v400_v8, %s10086_s30  ;;  %408 = vrot.lane.b32.xlu0 %v399_v11, %s10086_s30  ;;  %v10571_v16 = vadd.f32 %v346_v7, %v337_v42  ;;  %v339_v0 = vadd.f32 %v14895_v60, %v323_v44  ;;  %v10574_v1 = vadd.f32 %v347_v23, %v338_v46  ;;  %v14899_v8 = vld [vmem:[#allocation10_spill] sm:$0xff]  ;;  %v14900_v23 = vld [vmem:[#allocation12_spill] sm:$0xff] }
  0xbb   :  { %v397_v4 = vadd.f32 %v390_v32, %v381_v43  ;;  %v395_v12 = vmul.f32 %v10408_v63, %v215_v14  ;;  %v401_v50 = vadd.f32 %v394_v45, %v385_v49  ;;  %v248_v24 = vmul.f32 %v10376_v48, %v214_v18  ;;  %v14905_v43 = vld [vmem:[#allocation13_spill] sm:$0xff] }
  0xbc   :  { %v10578_v20 = vadd.f32 %v348_v25, %v339_v0  ;;  %v386_v55 = vadd.f32 %v14896_v6, %v370_v58  ;;  %v371_v56 = vmul.f32 %v10388_v53, %v10470_v15  ;;  %v380_v44 = vmul.f32 %v14898_v5, %v14897_v17  ;;  %v14909_v0 = vld [vmem:[#allocation16_spill] sm:$0xff] }
  0xbd   :  { %v239_v54 = vadd.f32 %v232_v19, %v223_v36  ;;  %v224_v62 = vmul.f32 %v10360_v40, %v158_v21  ;;  %v233_v18 = vmul.f32 %v14893_v52, %v14899_v8  ;;  %v396_v57 = vmul.f32 %v10408_v63, %v10514_v3 }
  0xbe   :  { %404 = vrot.lane.b32.xlu1 %v397_v4, %s10086_s30  ;;  %412 = vrot.lane.b32.xlu0 %v401_v50, %s10086_s30  ;;  %v402_v32 = vadd.f32 %v395_v12, %v386_v55  ;;  %v249_v59 = vmul.f32 %v10376_v48, %v215_v14  ;;  %v387_v15 = vadd.f32 %v380_v44, %v371_v56  ;;  %v10598_v22 = vsub.s32 5, %v14900_v23  ;;  %v14901_v14 = vld [vmem:[#allocation14_spill] sm:$0xff] }
  0xbf   :  { %v255_v7 = vadd.f32 %v248_v24, %v239_v54  ;;  %v240_v53 = vadd.f32 %v233_v18, %v224_v62  ;;  %v10602_v3 = vsub.s32 6, %v14900_v23  ;;  %v10658_v62 = vstv %s14756_s13  ;;  %s10087_s13 = smov 2  }
  0xc0   :  { %v403_v10 = vadd.f32 %v396_v57, %v387_v15  ;;  %v10606_v61 = vrot.slane %v14901_v14, %v10598_v22  ;;  %v10610_v25 = vrot.slane %v14903_v13, %v10598_v22  ;;  %v10620_v58 = vrot.slane %v14905_v43, %v10598_v22  ;;  %v14913_v15 = vld [vmem:[#allocation18_spill] sm:$0xff] }
  0xc1   :  { %v256_v47 = vadd.f32 %v249_v59, %v240_v53  ;;  %v10625_v36 = vrot.slane %v14901_v14, %v10602_v3  ;;  %v10633_v49 = vrot.slane %v14903_v13, %v10602_v3  ;;  %v10637_v4 = vrot.slane %v14909_v0, %v10598_v22 }
  0xc2   :  { %414 = vrot.lane.b32.xlu1 %v402_v32, %s10086_s30  ;;  %266 = vrot.lane.b32.xlu0 %v255_v7, %s10085_s14  ;;  %14902 = vst [vmem:[#allocation27_spill] sm:$0xff] %v10606_v61  ;;  %14904 = vst [vmem:[#allocation32_spill] sm:$0xff] %v10610_v25  ;;  %v10646_v55 = vrot.slane %v14905_v43, %v10602_v3  ;;  %v10674_v53 = vrot.slane %v14913_v15, %v10598_v22 }
  0xc3   :  { %14906 = vst [vmem:[#allocation34_spill] sm:$0xff] %v10620_v58  ;;  %14907 = vst [vmem:[#allocation33_spill] sm:$0xff] %v10625_v36 }
  0xc4   :  { %14908 = vst [vmem:[#allocation11_spill] sm:$0xff] %v10633_v49  ;;  %14910 = vst [vmem:[#allocation31_spill] sm:$0xff] %v10637_v4 }
  0xc5   :  { %14911 = vst [vmem:[#allocation10_spill] sm:$0xff] %v10646_v55  ;;  %14914 = vst [vmem:[#allocation15_spill] sm:$0xff] %v10674_v53 }
  0xc6   :  { %416 = vrot.lane.b32.xlu1 %v403_v10, %s10086_s30  ;;  %268 = vrot.lane.b32.xlu0 %v256_v47, %s10085_s14 }
 0x120   :  { %v261_v40 = vpop.permute.xlu1 %260  ;;  %v259_v21 = vpop.permute.xlu0 %258 }
 0x121   :  { %v278_v11 = vsel %vm272_vm2, %v259_v21, %v261_v40 }
 0x122   :  { %v309_v52 = vmul.f32 %v10606_v61, %v278_v11 }
 0x124   :  { %v265_v63 = vpop.permute.xlu1 %264  ;;  %v263_v48 = vpop.permute.xlu0 %262  ;;  %v357_v56 = vadd.f32 %v10519_v51, %v309_v52  ;;  %v10664_v51 = vrot.slane %v14909_v0, %v10602_v3 }
 0x125   :  { %v277_v42 = vsel %vm272_vm2, %v261_v40, %v263_v48  ;;  %v276_v19 = vsel %vm272_vm2, %v263_v48, %v265_v63 }
 0x126   :  { %v310_v2 = vmul.f32 %v10610_v25, %v277_v42  ;;  %v311_v50 = vmul.f32 %v10620_v58, %v276_v19  ;;  %14912 = vst [vmem:[#allocation14_spill] sm:$0xff] %v10664_v51  ;;  %v10687_v19 = vrot.slane %v14913_v15, %v10602_v3 }
 0x128   :  { %v407_v45 = vpop.permute.xlu1 %406  ;;  %v10616_v46 = vpop.permute.xlu0 %270  ;;  %v358_v17 = vadd.f32 %v10554_v41, %v310_v2  ;;  %v359_v57 = vadd.f32 %v10558_v27, %v311_v50  ;;  %14915 = vst [vmem:[#allocation13_spill] sm:$0xff] %v10687_v19 }
 0x129   :  { %v279_v54 = vsel %vm272_vm2, %v10616_v46, %v259_v21 }
 0x12a   :  { %v308_v10 = vmul.f32 %v10637_v4, %v279_v54 }
 0x12c   :  { %v411_v60 = vpop.permute.xlu1 %410  ;;  %v409_v12 = vpop.permute.xlu0 %408 }
 0x12d   :  { %v422_v24 = vsel %vm418_vm3, %v409_v12, %v411_v60  ;;  %v423_v6 = vsel %vm418_vm3, %v407_v45, %v409_v12 }
 0x12e   :  { %v455_v5 = vmul.f32 %v10625_v36, %v423_v6  ;;  %v456_v44 = vmul.f32 %v10633_v49, %v422_v24  ;;  %v10918_v36 = vstv %s10804_s25  ;;  %s10090_s25 = smov 72  }
 0x130   :  { %v10660_v8 = vpop.permute.xlu1 %404  ;;  %v462_v18 = vadd.f32 %v455_v5, %v357_v56  ;;  %v463_v32 = vadd.f32 %v456_v44, %v358_v17  ;;  %v413_v41 = vpop.permute.xlu0 %412 }
 0x131   :  { %v424_v7 = vsel %vm418_vm3, %v10660_v8, %v407_v45  ;;  %v421_v59 = vsel %vm418_vm3, %v411_v60, %v413_v41  ;;  %v356_v60 = vadd.f32 %v10560_v26, %v308_v10 }
 0x132   :  { %v471_v47 = vadd.f32 %v10658_v62, %v462_v18  ;;  %v472_v40 = vadd.f32 %v10658_v62, %v463_v32  ;;  %v457_v21 = vmul.f32 %v10646_v55, %v421_v59  ;;  %v454_v11 = vmul.f32 %v10664_v51, %v424_v7  ;;  %v14916_v32 = vld [vmem:[#allocation19_spill] sm:$0xff]  ;;  %v14918_v59 = vld [vmem:[#allocation17_spill] sm:$0xff] }
 0x133   :  { %v10734_v10 = vrot.slane %v14918_v59, %v10598_v22 }
 0x134   :  { %v10680_v27 = vmax.f32 %v471_v47, 0.0  ;;  %v10682_v48 = vmax.f32 %v472_v40, 0.0  ;;  %v464_v42 = vadd.f32 %v457_v21, %v359_v57  ;;  %v415_v45 = vpop.permute.xlu1 %414  ;;  %v267_v52 = vpop.permute.xlu0 %266  ;;  %v461_v6 = vadd.f32 %v454_v11, %v356_v60 }
 0x135   :  { %v275_v2 = vsel %vm272_vm2, %v265_v63, %v267_v52  ;;  %v420_v24 = vsel %vm418_vm3, %v413_v41, %v415_v45  ;;  %v10724_v41 = vrot.slane %v14916_v32, %v10598_v22  ;;  %14919 = vst [vmem:[#allocation35_spill] sm:$0xff] %v10734_v10  ;;  %v10742_v21 = vrot.slane %v14916_v32, %v10602_v3 }
 0x136   :  { %v473_v12 = vadd.f32 %v10658_v62, %v464_v42  ;;  %v312_v50 = vmul.f32 %v10674_v53, %v275_v2  ;;  %486 = vrot.lane.b32.xlu0 %v10680_v27, %s10087_s13  ;;  %488 = vrot.lane.b32.xlu1 %v10682_v48, %s10087_s13  ;;  %v458_v26 = vmul.f32 %v10687_v19, %v420_v24  ;;  %v680_v24 = vstv %s8281_s28  ;;  %s10901_s28 = sld [smem:[#allocation6 + $0x4]] }
 0x137   :  { %v470_v17 = vadd.f32 %v10658_v62, %v461_v6  ;;  %14917 = vst [vmem:[#allocation18_spill] sm:$0xff] %v10724_v41  ;;  %14920 = vst [vmem:[#allocation36_spill] sm:$0xff] %v10742_v21  ;;  %v810_v6 = vstv %s8286_s29  ;;  %v10896_v53 = vsub.s32 3, %v14900_v23  ;;  %s10906_s29 = sld [smem:[#allocation6 + $0x8]] }
 0x138   :  { %v10700_v56 = vmax.f32 %v473_v12, 0.0  ;;  %v360_v63 = vadd.f32 %v10571_v16, %v312_v50  ;;  %v269_v54 = vpop.permute.xlu0 %268  ;;  %v417_v7 = vpop.permute.xlu1 %416 }
 0x139   :  { %v10713_v44 = vmax.f32 %v470_v17, 0.0  ;;  %v274_v57 = vsel %vm272_vm2, %v267_v52, %v269_v54  ;;  %v273_v40 = vsel %vm272_vm2, %v269_v54, %v10616_v46  ;;  %v419_v22 = vsel %vm418_vm3, %v415_v45, %v417_v7 }
 0x13a   :  { %543 = vrot.lane.b32.xlu1 %v10680_v27, %s10083_s19  ;;  %490 = vrot.lane.b32.xlu0 %v10700_v56, %s10087_s13  ;;  %v465_v5 = vadd.f32 %v458_v26, %v360_v63  ;;  %v313_v47 = vmul.f32 %v10724_v41, %v274_v57  ;;  %v314_v11 = vmul.f32 %v10734_v10, %v273_v40  ;;  %v10802_v63 = vstv %s8296_s17  ;;  %s10915_s17 = sld [smem:[#allocation6 + $0x12]] }
 0x13b   :  { %v10754_v46 = vrot.slane %v14918_v59, %v10602_v3  ;;  %v459_v52 = vmul.f32 %v10742_v21, %v419_v22  ;;  %v425_v45 = vsel %vm418_vm3, %v417_v7, %v10660_v8  ;;  %v10806_v26 = vstv %s8301_s18  ;;  %s10926_s18 = sld [smem:[#allocation6 + $0x17]]  ;;  %v14964_v59 = vld [vmem:[#allocation21_spill] sm:$0xff] }
 0x13c   :  { %v474_v16 = vadd.f32 %v10658_v62, %v465_v5  ;;  %v361_v42 = vadd.f32 %v10574_v1, %v313_v47  ;;  %v362_v2 = vadd.f32 %v10578_v20, %v314_v11  ;;  %v10810_v5 = vstv %s8289_s21  ;;  %s10944_s21 = sld [smem:[#allocation6 + $0x9]] }
 0x13d   :  { %14921 = vst [vmem:[#allocation37_spill] sm:$0xff] %v10754_v46  ;;  %v460_v1 = vmul.f32 %v10754_v46, %v425_v45  ;;  %14923 = vst [vmem:[#allocation39_spill] sm:$0xff] %v10810_v5  ;;  %v10814_v54 = vstv %s8291_s22  ;;  %v10820_v7 = vmul.f32 %v680_v24, %v10682_v48  ;;  %v10823_v47 = vmul.f32 %v810_v6, %v10682_v48  ;;  %s10964_s22 = sld [smem:[#allocation6 + $0x13]] }
 0x13e   :  { %547 = vrot.lane.b32.xlu1 %v10700_v56, %s10083_s19  ;;  %545 = vrot.lane.b32.xlu0 %v10682_v48, %s10083_s19  ;;  %v10720_v18 = vmax.f32 %v474_v16, 0.0  ;;  %v466_v60 = vadd.f32 %v459_v52, %v361_v42  ;;  %14924 = vst [vmem:[#allocation40_spill] sm:$0xff] %v10814_v54  ;;  %v10826_v40 = vmul.f32 %v680_v24, %v10680_v27  ;;  %v10899_v46 = vstv %s10796_s23  ;;  %s11238_s23 = sld [smem:[#allocation6 + $0xd]] }
 0x13f   :  { %v467_v3 = vadd.f32 %v460_v1, %v362_v2  ;;  %v10831_v11 = vmul.f32 %v680_v24, %v10700_v56  ;;  %v10834_v42 = vmul.f32 %v810_v6, %v10700_v56  ;;  %v10837_v52 = vmul.f32 %v810_v6, %v10680_v27 }
 0x140   :  { %v475_v12 = vadd.f32 %v10658_v62, %v466_v60  ;;  %v10845_v2 = vmul.f32 %v10802_v63, %v10700_v56  ;;  %v10849_v60 = vmul.f32 %v10802_v63, %v10682_v48  ;;  %v10853_v1 = vmul.f32 %v10806_v26, %v10700_v56 }
 0x141   :  { %v476_v50 = vadd.f32 %v10658_v62, %v467_v3  ;;  %v10794_v62 = vsub.s32 0, %v14900_v23  ;;  %v10861_v3 = vmul.f32 %v10806_v26, %v10682_v48  ;;  %v10871_v45 = vmul.f32 %v10802_v63, %v10680_v27 }
 0x142   :  { %541 = vrot.lane.b32.xlu1 %v10713_v44, %s10083_s19  ;;  %484 = vrot.lane.b32.xlu0 %v10713_v44, %s10087_s13  ;;  %v10772_v8 = vmax.f32 %v475_v12, 0.0  ;;  %14925 = vst [vmem:[#allocation41_spill] sm:$0xff] %v10853_v1  ;;  %v10864_v12 = vmul.f32 %v680_v24, %v10713_v44  ;;  %v10877_v22 = vmul.f32 %v10802_v63, %v10720_v18  ;;  %v10904_v10 = vstv %s10798_s24  ;;  %s10089_s24 = smov 56  }
 0x143   :  { %v10777_v20 = vmax.f32 %v476_v50, 0.0  ;;  %14926 = vst [vmem:[#allocation42_spill] sm:$0xff] %v10861_v3  ;;  %v10867_v50 = vmul.f32 %v810_v6, %v10713_v44  ;;  %14929 = vst [vmem:[#allocation45_spill] sm:$0xff] %v10871_v45  ;;  %v10883_v16 = vmul.f32 %v10802_v63, %v10713_v44  ;;  %v10887_v17 = vmul.f32 %v10806_v26, %v10680_v27 }
 0x144   :  { %14922 = vst [vmem:[#allocation38_spill] sm:$0xff] %v10772_v8  ;;  %14927 = vst [vmem:[#allocation43_spill] sm:$0xff] %v10864_v12  ;;  %v10891_v19 = vmul.f32 %v10806_v26, %v10713_v44  ;;  %v10910_v51 = vmul.f32 %v10806_v26, %v10720_v18  ;;  %v10921_v61 = vmul.f32 %v680_v24, %v10720_v18  ;;  %v11044_v38 = vstv %s10926_s18 }
 0x145   :  { %14928 = vst [vmem:[#allocation44_spill] sm:$0xff] %v10867_v50  ;;  %14930 = vst [vmem:[#allocation46_spill] sm:$0xff] %v10883_v16  ;;  %v10924_v49 = vmul.f32 %v810_v6, %v10720_v18  ;;  %v10930_v55 = vmul.f32 %v10814_v54, %v10682_v48  ;;  %v10934_v25 = vmul.f32 %v10814_v54, %v10700_v56  ;;  %v11033_v16 = vstv %s10915_s17 }
 0x146   :  { %549 = vrot.lane.b32.xlu1 %v10720_v18, %s10083_s19  ;;  %492 = vrot.lane.b32.xlu0 %v10720_v18, %s10087_s13  ;;  %14931 = vst [vmem:[#allocation47_spill] sm:$0xff] %v10887_v17  ;;  %14932 = vst [vmem:[#allocation48_spill] sm:$0xff] %v10891_v19  ;;  %v10938_v58 = vmul.f32 %v10814_v54, %v10713_v44  ;;  %v10942_v23 = vmul.f32 %v10814_v54, %v10680_v27  ;;  %v14954_v17 = vld [vmem:[#allocation22_spill] sm:$0xff]  ;;  %v11050_v30 = vstv %s10944_s21 }
 0x147   :  { %14933 = vst [vmem:[#allocation49_spill] sm:$0xff] %v10904_v10  ;;  %14934 = vst [vmem:[#allocation50_spill] sm:$0xff] %v10910_v51  ;;  %v14965_v0 = vrot.slane %v14901_v14, %v10794_v62 }
 0x148   :  { %14935 = vst [vmem:[#allocation51_spill] sm:$0xff] %v10921_v61  ;;  %14936 = vst [vmem:[#allocation52_spill] sm:$0xff] %v10924_v49  ;;  %v10947_v49 = vmul.f32 %v680_v24, %v10777_v20  ;;  %v11021_v61 = vstv %s10906_s29 }
 0x149   :  { %14937 = vst [vmem:[#allocation53_spill] sm:$0xff] %v10930_v55  ;;  %14938 = vst [vmem:[#allocation54_spill] sm:$0xff] %v10934_v25  ;;  %v10953_v55 = vmul.f32 %v680_v24, %v10772_v8  ;;  %v10970_v24 = vmul.f32 %v10802_v63, %v10777_v20  ;;  %v10986_v25 = vmul.f32 %v10814_v54, %v10777_v20 }
 0x14a   :  { %575 = vrot.lane.b32.xlu1 %v10700_v56, %s10084_s12  ;;  %573 = vrot.lane.b32.xlu0 %v10682_v48, %s10084_s12  ;;  %14939 = vst [vmem:[#allocation55_spill] sm:$0xff] %v10938_v58  ;;  %14940 = vst [vmem:[#allocation56_spill] sm:$0xff] %v10942_v23  ;;  %v10982_v23 = vmul.f32 %v10806_v26, %v10772_v8 }
 0x14b   :  { %14941 = vst [vmem:[#allocation57_spill] sm:$0xff] %v10947_v49  ;;  %14943 = vst [vmem:[#allocation59_spill] sm:$0xff] %v10953_v55 }
 0x14c   :  { %14945 = vst [vmem:[#allocation61_spill] sm:$0xff] %v10970_v24  ;;  %14948 = vst [vmem:[#allocation64_spill] sm:$0xff] %v10982_v23  ;;  %v10990_v24 = vmul.f32 %v10814_v54, %v10720_v18  ;;  %v11018_v23 = vstv %s10901_s28 }
 0x14d   :  { %14949 = vst [vmem:[#allocation65_spill] sm:$0xff] %v10986_v25  ;;  %14952 = vst [vmem:[#allocation68_spill] sm:$0xff] %v11021_v61 }
 0x14e   :  { %571 = vrot.lane.b32.xlu1 %v10680_v27, %s10084_s12  ;;  %577 = vrot.lane.b32.xlu0 %v10720_v18, %s10084_s12  ;;  %14950 = vst [vmem:[#allocation66_spill] sm:$0xff] %v10990_v24 }
 0x152   :  { %603 = vrot.lane.b32.xlu1 %v10700_v56, %s10088_s27  ;;  %601 = vrot.lane.b32.xlu0 %v10682_v48, %s10088_s27  ;;  %v10950_v48 = vmul.f32 %v810_v6, %v10777_v20  ;;  %v10956_v56 = vmul.f32 %v810_v6, %v10772_v8  ;;  %v10974_v6 = vmul.f32 %v10806_v26, %v10777_v20  ;;  %v11001_v26 = vstv %s10855_s0 }
 0x153   :  { %14951 = vst [vmem:[#allocation67_spill] sm:$0xff] %v11001_v26 }
 0x154   :  { %14942 = vst [vmem:[#allocation58_spill] sm:$0xff] %v10950_v48  ;;  %14944 = vst [vmem:[#allocation60_spill] sm:$0xff] %v10956_v56  ;;  %v14953_v56 = vrot.slane %v14903_v13, %v10794_v62  ;;  %v14955_v48 = vld [vmem:[#allocation20_spill] sm:$0xff] }
 0x155   :  { %14946 = vst [vmem:[#allocation62_spill] sm:$0xff] %v10974_v6 }
 0x156   :  { %599 = vrot.lane.b32.xlu1 %v10680_v27, %s10088_s27  ;;  %605 = vrot.lane.b32.xlu0 %v10720_v18, %s10088_s27  ;;  %v10978_v27 = vmul.f32 %v10802_v63, %v10772_v8  ;;  %v11009_v18 = vstv %s10857_s20 }
 0x158   :  { %14947 = vst [vmem:[#allocation63_spill] sm:$0xff] %v10978_v27  ;;  %v10998_v27 = vstv %s10841_s26 }
 0x15a   :  { %607 = vrot.lane.b32.xlu1 %v10772_v8, %s10088_s27  ;;  %579 = vrot.lane.b32.xlu0 %v10772_v8, %s10084_s12 }
 0x15e   :  { %553 = vrot.lane.b32.xlu1 %v10777_v20, %s10083_s19  ;;  %496 = vrot.lane.b32.xlu0 %v10777_v20, %s10087_s13 }
 0x162   :  { %551 = vrot.lane.b32.xlu1 %v10772_v8, %s10083_s19  ;;  %494 = vrot.lane.b32.xlu0 %v10772_v8, %s10087_s13  ;;  %s8290_s19 = sld [smem:[#allocation6 + $0xb]] }
 0x163   :  { %s10873_s13 = sld [smem:[#allocation6 + $0x3]] }
 0x166   :  { %581 = vrot.lane.b32.xlu1 %v10777_v20, %s10084_s12  ;;  %569 = vrot.lane.b32.xlu0 %v10713_v44, %s10084_s12  ;;  %s10800_s12 = sld [smem:[#allocation6 + $0xf]] }
 0x168   :  { %v10817_v57 = vstv %s8290_s19  ;;  %s10966_s19 = sld [smem:[#allocation6 + $0x18]] }
 0x169   :  { %v11006_v25 = vstv %s10873_s13 }
 0x16a   :  { %609 = vrot.lane.b32.xlu1 %v10777_v20, %s10088_s27  ;;  %597 = vrot.lane.b32.xlu0 %v10713_v44, %s10088_s27  ;;  %s10879_s27 = sld [smem:[#allocation6 + $0x15]] }
 0x16c   :  { %v10913_v4 = vstv %s10800_s12  ;;  %s11274_s12 = sld [smem:[#allocation6 + $0xe]] }
 0x170   :  { %v11012_v24 = vstv %s10879_s27 }
 0x1a8   :  { %v489_v21 = vpop.permute.xlu1 %488  ;;  %v10893_v41 = vpop.permute.xlu0 %486 }
 0x1a9   :  { %v503_v6 = vsel %vm498_vm4, %v10893_v41, %v489_v21 }
 0x1aa   :  { %v536_v19 = vmul.f32 %v14953_v56, %v503_v6  ;;  %v14956_v56 = vrot.slane %v14905_v43, %v10794_v62 }
 0x1ac   :  { %v544_v44 = vpop.permute.xlu1 %543  ;;  %v10958_v58 = vpop.permute.xlu0 %490  ;;  %v11071_v49 = vmul.f32 %v10810_v5, %v536_v19  ;;  %v658_v32 = vmul.f32 %v10899_v46, %v536_v19  ;;  %v788_v39 = vmul.f32 %v10904_v10, %v536_v19  ;;  %v11095_v31 = vmul.f32 %v10918_v36, %v536_v19 }
 0x1ad   :  { %v502_v63 = vsel %vm498_vm4, %v489_v21, %v10958_v58 }
 0x1ae   :  { %v537_v6 = vmul.f32 %v14956_v56, %v502_v63  ;;  %v11068_v56 = vstv %s10966_s19  ;;  %14961 = vst [vmem:[#allocation71_spill] sm:$0xff] %v11071_v49  ;;  %14963 = vst [vmem:[#allocation73_spill] sm:$0xff] %v11095_v31 }
 0x1af   :  { %14960 = vst [vmem:[#allocation70_spill] sm:$0xff] %v11068_v56 }
 0x1b0   :  { %v548_v54 = vpop.permute.xlu1 %547  ;;  %v546_v8 = vpop.permute.xlu0 %545  ;;  %v789_v3 = vmul.f32 %v10904_v10, %v537_v6 }
 0x1b1   :  { %v558_v55 = vsel %vm117_vm0, %v546_v8, %v548_v54  ;;  %v559_v21 = vsel %vm117_vm0, %v544_v44, %v546_v8 }
 0x1b2   :  { %v11036_v45 = vmul.f32 %v559_v21, %v14954_v17  ;;  %v11039_v50 = vmul.f32 %v558_v55, %v14955_v48  ;;  %v11061_v48 = vstv %s10964_s22 }
 0x1b3   :  { %14959 = vst [vmem:[#allocation69_spill] sm:$0xff] %v11061_v48 }
 0x1b4   :  { %v11056_v21 = vpop.permute.xlu1 %541  ;;  %v11058_v55 = vpop.permute.xlu0 %484  ;;  %v667_v20 = vmul.f32 %v10998_v27, %v11036_v45  ;;  %v797_v63 = vmul.f32 %v11001_v26, %v11036_v45  ;;  %v668_v49 = vmul.f32 %v10998_v27, %v11039_v50  ;;  %v798_v12 = vmul.f32 %v11001_v26, %v11039_v50 }
 0x1b5   :  { %14957 = vst [vmem:[#allocation22_spill] sm:$0xff] %v11056_v21  ;;  %14958 = vst [vmem:[#allocation20_spill] sm:$0xff] %v11058_v55  ;;  %v560_v17 = vsel %vm117_vm0, %v11056_v21, %v544_v44  ;;  %v504_v8 = vsel %vm498_vm4, %v11058_v55, %v10893_v41  ;;  %v11090_v44 = vmul.f32 %v10810_v5, %v537_v6 }
 0x1b6   :  { %v976_v41 = vmul.f32 %v10913_v4, %v536_v19  ;;  %v11098_v28 = vmul.f32 %v560_v17, %v14964_v59  ;;  %v11103_v55 = vmul.f32 %v14965_v0, %v504_v8  ;;  %v977_v0 = vmul.f32 %v10913_v4, %v537_v6 }
 0x1b7   :  { %14962 = vst [vmem:[#allocation72_spill] sm:$0xff] %v11090_v44  ;;  %v659_v44 = vmul.f32 %v10899_v46, %v537_v6  ;;  %v1085_v8 = vmul.f32 %v10918_v36, %v537_v6  ;;  %v674_v17 = vadd.f32 %v667_v20, %v658_v32  ;;  %v804_v37 = vadd.f32 %v797_v63, %v788_v39 }
 0x1b8   :  { %v11105_v21 = vpop.permute.xlu1 %549  ;;  %v11107_v56 = vpop.permute.xlu0 %492  ;;  %v805_v31 = vadd.f32 %v798_v12, %v789_v3  ;;  %v985_v6 = vmul.f32 %v11009_v18, %v11036_v45  ;;  %v657_v39 = vmul.f32 %v10899_v46, %v11103_v55  ;;  %v796_v32 = vmul.f32 %v11001_v26, %v11098_v28 }
 0x1b9   :  { %14966 = vst [vmem:[#allocation21_spill] sm:$0xff] %v11105_v21  ;;  %14967 = vst [vmem:[#allocation74_spill] sm:$0xff] %v11107_v56  ;;  %v557_v19 = vsel %vm117_vm0, %v548_v54, %v11105_v21  ;;  %v501_v59 = vsel %vm498_vm4, %v10958_v58, %v11107_v56  ;;  %v675_v48 = vadd.f32 %v668_v49, %v659_v44 }
 0x1ba   :  { %v11122_v1 = vmul.f32 %v557_v19, %v10326_v29  ;;  %v14969_v54 = vrot.slane %v14913_v15, %v10794_v62  ;;  %v986_v58 = vmul.f32 %v11009_v18, %v11039_v50  ;;  %v666_v29 = vmul.f32 %v10998_v27, %v11098_v28 }
 0x1bb   :  { %v787_v49 = vmul.f32 %v10904_v10, %v11103_v55  ;;  %v11143_v3 = vmul.f32 %v10817_v57, %v11036_v45  ;;  %v11147_v12 = vmul.f32 %v10817_v57, %v11039_v50  ;;  %v11151_v20 = vmul.f32 %v10817_v57, %v11098_v28 }
 0x1bc   :  { %14968 = vst [vmem:[#allocation75_spill] sm:$0xff] %v11122_v1  ;;  %v11127_v21 = vmul.f32 %v14969_v54, %v501_v59  ;;  %v576_v56 = vpop.permute.xlu1 %575  ;;  %v574_v51 = vpop.permute.xlu0 %573  ;;  %v11157_v44 = vmul.f32 %v10810_v5, %v11103_v55  ;;  %v690_v59 = vadd.f32 %v10820_v7, %v674_v17  ;;  %v820_v54 = vadd.f32 %v10823_v47, %v804_v37 }
 0x1bd   :  { %14971 = vst [vmem:[#allocation77_spill] sm:$0xff] %v11143_v3  ;;  %14972 = vst [vmem:[#allocation78_spill] sm:$0xff] %v11147_v12  ;;  %v586_v63 = vsel %vm174_vm1, %v574_v51, %v576_v56  ;;  %v691_v12 = vadd.f32 %v10831_v11, %v675_v48  ;;  %v11166_v3 = vadd.f32 %v10834_v42, %v805_v31 }
 0x1be   :  { %14970 = vst [vmem:[#allocation76_spill] sm:$0xff] %v11127_v21  ;;  %14973 = vst [vmem:[#allocation79_spill] sm:$0xff] %v11151_v20  ;;  %v11160_v19 = vmul.f32 %v586_v63, %v10342_v34  ;;  %v978_v20 = vmul.f32 %v10913_v4, %v11127_v21  ;;  %v987_v26 = vmul.f32 %v11009_v18, %v11122_v1 }
 0x1bf   :  { %14974 = vst [vmem:[#allocation80_spill] sm:$0xff] %v11157_v44  ;;  %v673_v34 = vadd.f32 %v666_v29, %v657_v39  ;;  %v993_v63 = vadd.f32 %v986_v58, %v977_v0  ;;  %v803_v7 = vadd.f32 %v796_v32, %v787_v49  ;;  %v992_v17 = vadd.f32 %v985_v6, %v976_v41 }
 0x1c0   :  { %14975 = vst [vmem:[#allocation81_spill] sm:$0xff] %v11160_v19  ;;  %v11172_v10 = vpop.permute.xlu1 %571  ;;  %v11174_v44 = vpop.permute.xlu0 %577  ;;  %v1086_v47 = vmul.f32 %v10918_v36, %v11127_v21  ;;  %v1095_v11 = vmul.f32 %v11012_v24, %v11122_v1  ;;  %v11188_v42 = vmul.f32 %v10817_v57, %v11122_v1  ;;  %v699_v48 = vmul.f32 %v11006_v25, %v11160_v19 }
 0x1c1   :  { %v587_v37 = vsel %vm174_vm1, %v11172_v10, %v574_v51  ;;  %v585_v31 = vsel %vm174_vm1, %v576_v56, %v11174_v44  ;;  %v829_v51 = vmul.f32 %v11021_v61, %v11160_v19  ;;  %v1094_v41 = vmul.f32 %v11012_v24, %v11039_v50 }
 0x1c2   :  { %14976 = vst [vmem:[#allocation82_spill] sm:$0xff] %v11188_v42  ;;  %v11197_v56 = vmul.f32 %v587_v37, %v10339_v33  ;;  %v11200_v0 = vmul.f32 %v585_v31, %v10345_v35  ;;  %v1017_v58 = vmul.f32 %v11033_v16, %v11160_v19  ;;  %v994_v6 = vadd.f32 %v987_v26, %v978_v20 }
 0x1c3   :  { %v11206_v39 = vmul.f32 %v10810_v5, %v11127_v21  ;;  %v689_v32 = vadd.f32 %v10826_v40, %v673_v34  ;;  %v1009_v50 = vadd.f32 %v10845_v2, %v993_v63  ;;  %v1008_v33 = vadd.f32 %v10849_v60, %v992_v17  ;;  %v14986_v21 = vld [vmem:[#allocation73_spill] sm:$0xff] }
 0x1c4   :  { %14977 = vst [vmem:[#allocation83_spill] sm:$0xff] %v11200_v0  ;;  %v604_v29 = vpop.permute.xlu1 %603  ;;  %v602_v49 = vpop.permute.xlu0 %601  ;;  %v819_v37 = vadd.f32 %v10837_v52, %v803_v7  ;;  %v1102_v31 = vadd.f32 %v1095_v11, %v1086_v47  ;;  %v1093_v26 = vmul.f32 %v11012_v24, %v11036_v45  ;;  %v14979_v20 = vrot.slane %v14903_v13, %v10896_v53 }
 0x1c5   :  { %14978 = vst [vmem:[#allocation84_spill] sm:$0xff] %v11206_v39  ;;  %v615_v35 = vsel %vm611_vm5, %v602_v49, %v604_v29  ;;  %v706_v39 = vadd.f32 %v699_v48, %v690_v59  ;;  %v836_v40 = vadd.f32 %v829_v51, %v820_v54  ;;  %v1101_v34 = vadd.f32 %v1094_v41, %v1085_v8 }
 0x1c6   :  { %v11219_v42 = vmul.f32 %v14979_v20, %v615_v35  ;;  %v700_v2 = vmul.f32 %v11006_v25, %v11200_v0  ;;  %v698_v60 = vmul.f32 %v11006_v25, %v11197_v56  ;;  %v1024_v63 = vadd.f32 %v1017_v58, %v1008_v33  ;;  %v14985_v20 = vld [vmem:[#allocation41_spill] sm:$0xff] }
 0x1c7   :  { %v11226_v52 = vadd.f32 %v10877_v22, %v994_v6  ;;  %v830_v59 = vmul.f32 %v11021_v61, %v11200_v0  ;;  %v1018_v8 = vmul.f32 %v11033_v16, %v11200_v0  ;;  %v828_v54 = vmul.f32 %v11021_v61, %v11197_v56 }
 0x1c8   :  { %14980 = vst [vmem:[#allocation85_spill] sm:$0xff] %v11219_v42  ;;  %v11228_v7 = vpop.permute.xlu1 %599  ;;  %v606_v45 = vpop.permute.xlu0 %605  ;;  %v715_v13 = vmul.f32 %v11018_v23, %v11219_v42  ;;  %v845_v47 = vmul.f32 %v11050_v30, %v11219_v42  ;;  %v1126_v11 = vmul.f32 %v11044_v38, %v11200_v0  ;;  %v14981_v48 = vrot.slane %v14901_v14, %v10896_v53 }
 0x1c9   :  { %v616_v22 = vsel %vm611_vm5, %v11228_v7, %v602_v49  ;;  %v614_v17 = vsel %vm611_vm5, %v604_v29, %v606_v45  ;;  %v14982_v41 = vrot.slane %v14905_v43, %v10896_v53  ;;  %v14984_v49 = vld [vmem:[#allocation50_spill] sm:$0xff]  ;;  %v707_v29 = vadd.f32 %v700_v2, %v691_v12  ;;  %v14987_v12 = vld [vmem:[#allocation69_spill] sm:$0xff] }
 0x1ca   :  { %v11252_v51 = vmul.f32 %v14981_v48, %v616_v22  ;;  %v722_v6 = vadd.f32 %v715_v13, %v706_v39  ;;  %v11260_v33 = vadd.f32 %v14984_v49, %v1102_v31  ;;  %v705_v35 = vadd.f32 %v698_v60, %v689_v32  ;;  %v14988_v60 = vld [vmem:[#allocation28_spill] sm:$0xff]  ;;  %v14992_v48 = vld [vmem:[#allocation22_spill] sm:$0xff] }
 0x1cb   :  { %v11257_v58 = vmul.f32 %v14982_v41, %v614_v17  ;;  %v1117_v1 = vadd.f32 %v14985_v20, %v1101_v34  ;;  %v1100_v0 = vadd.f32 %v1093_v26, %v14986_v21  ;;  %v837_v39 = vadd.f32 %v830_v59, %v11166_v3 }
 0x1cc   :  { %v11264_v61 = vpop.permute.xlu1 %607  ;;  %731 = vrot.lane.b32.xlu0 %v722_v6, %s10089_s24  ;;  %v11267_v14 = vpop.permute.xlu0 %579  ;;  %v1025_v31 = vadd.f32 %v1018_v8, %v1009_v50  ;;  %v1033_v32 = vmul.f32 %v14987_v12, %v11219_v42  ;;  %v852_v26 = vadd.f32 %v845_v47, %v836_v40  ;;  %v835_v34 = vadd.f32 %v828_v54, %v819_v37  ;;  %v14989_v8 = vld [vmem:[#allocation42_spill] sm:$0xff]  ;;  %v14993_v6 = vld [vmem:[#allocation20_spill] sm:$0xff] }
 0x1cd   :  { %14983 = vst [vmem:[#allocation86_spill] sm:$0xff] %v11257_v58  ;;  %v716_v43 = vmul.f32 %v11018_v23, %v11257_v58  ;;  %v584_v21 = vsel %vm174_vm1, %v11174_v44, %v11267_v14  ;;  %v1133_v2 = vadd.f32 %v1126_v11, %v1117_v1  ;;  %v714_v3 = vmul.f32 %v11018_v23, %v11252_v51  ;;  %v14990_v37 = vld [vmem:[#allocation70_spill] sm:$0xff] }
 0x1ce   :  { %v11281_v13 = vmul.f32 %v584_v21, %v14988_v60  ;;  %v846_v50 = vmul.f32 %v11050_v30, %v11257_v58  ;;  %v613_v59 = vsel %vm611_vm5, %v606_v45, %v11264_v61  ;;  %v1116_v44 = vadd.f32 %v14989_v8, %v1100_v0  ;;  %v14995_v60 = vld [vmem:[#allocation23_spill] sm:$0xff]  ;;  %v14996_v8 = vld [vmem:[#allocation16_spill] sm:$0xff] }
 0x1cf   :  { %v723_v22 = vadd.f32 %v716_v43, %v707_v29  ;;  %v1125_v1 = vmul.f32 %v11044_v38, %v11160_v19  ;;  %v1141_v40 = vmul.f32 %v14990_v37, %v11219_v42  ;;  %v1034_v47 = vmul.f32 %v14987_v12, %v11257_v58 }
 0x1d0   :  { %v554_v54 = vpop.permute.xlu1 %553  ;;  %861 = vrot.lane.b32.xlu0 %v852_v26, %s10085_s14  ;;  %v497_v17 = vpop.permute.xlu0 %496  ;;  %v1040_v11 = vadd.f32 %v1033_v32, %v1024_v63  ;;  %v975_v45 = vmul.f32 %v10913_v4, %v11103_v55  ;;  %v11302_v0 = vstv %s11238_s23  ;;  %v844_v29 = vmul.f32 %v11050_v30, %v11252_v51 }
 0x1d1   :  { %733 = vrot.lane.b32.xlu1 %v723_v22, %s10089_s24  ;;  %14991 = vst [vmem:[#allocation50_spill] sm:$0xff] %v11302_v0  ;;  %v561_v41 = vsel %vm117_vm0, %v554_v54, %v14992_v48  ;;  %v505_v49 = vsel %vm498_vm4, %v497_v17, %v14993_v6  ;;  %v1142_v20 = vmul.f32 %v14990_v37, %v11257_v58 }
 0x1d2   :  { %v14994_v63 = vrot.slane %v14913_v15, %v10896_v53  ;;  %v721_v32 = vadd.f32 %v714_v3, %v705_v35  ;;  %v853_v21 = vadd.f32 %v846_v50, %v837_v39  ;;  %v1019_v26 = vmul.f32 %v11033_v16, %v11281_v13 }
 0x1d3   :  { %v11322_v22 = vmul.f32 %v561_v41, %v14995_v60  ;;  %v14997_v48 = vrot.slane %v14996_v8, %v10794_v62  ;;  %v1132_v58 = vadd.f32 %v1125_v1, %v1116_v44  ;;  %v984_v15 = vmul.f32 %v11009_v18, %v11098_v28 }
 0x1d4   :  { %v11317_v43 = vmul.f32 %v14994_v63, %v613_v59  ;;  %v552_v42 = vpop.permute.xlu1 %551  ;;  %729 = vrot.lane.b32.xlu0 %v721_v32, %s10089_s24  ;;  %v495_v35 = vpop.permute.xlu0 %494  ;;  %v1041_v39 = vadd.f32 %v1034_v47, %v1025_v31  ;;  %v1127_v3 = vmul.f32 %v11044_v38, %v11281_v13  ;;  %v11337_v50 = vmul.f32 %v11033_v16, %v11197_v56 }
 0x1d5   :  { %v11327_v6 = vmul.f32 %v14997_v48, %v505_v49  ;;  %863 = vrot.lane.b32.xlu1 %v853_v21, %s10085_s14  ;;  %v11340_v59 = vstv %s11274_s12  ;;  %v555_v44 = vsel %vm117_vm0, %v552_v42, %v554_v54  ;;  %v499_v1 = vsel %vm498_vm4, %v495_v35, %v497_v17  ;;  %v14999_v21 = vld [vmem:[#allocation24_spill] sm:$0xff]  ;;  %v15000_v48 = vld [vmem:[#allocation17_spill] sm:$0xff] }
 0x1d6   :  { %14998 = vst [vmem:[#allocation41_spill] sm:$0xff] %v11340_v59  ;;  %v851_v41 = vadd.f32 %v844_v29, %v835_v34  ;;  %v1149_v49 = vadd.f32 %v1142_v20, %v1133_v2  ;;  %v1026_v63 = vadd.f32 %v1019_v26, %v11226_v52  ;;  %v1035_v31 = vmul.f32 %v14987_v12, %v11317_v43 }
 0x1d7   :  { %v1143_v47 = vmul.f32 %v14990_v37, %v11317_v43  ;;  %v11351_v32 = vadd.f32 %v1141_v40, %v1132_v58  ;;  %v11354_v60 = vmul.f32 %v555_v44, %v14999_v21  ;;  %v15001_v54 = vrot.slane %v15000_v48, %v10794_v62 }
 0x1d8   :  { %v656_v34 = vmul.f32 %v10899_v46, %v11327_v6  ;;  %v665_v52 = vmul.f32 %v10998_v27, %v11322_v22  ;;  %v582_v2 = vpop.permute.xlu1 %581  ;;  %1051 = vrot.lane.b32.xlu0 %v1041_v39, %s10086_s30  ;;  %v570_v17 = vpop.permute.xlu0 %569  ;;  %v1134_v58 = vadd.f32 %v1127_v3, %v11260_v33  ;;  %v11367_v40 = vadd.f32 %v984_v15, %v975_v45  ;;  %v15003_v15 = vld [vmem:[#allocation26_spill] sm:$0xff] }
 0x1d9   :  { %v11359_v59 = vmul.f32 %v15001_v54, %v499_v1  ;;  %v11371_v29 = vmul.f32 %v14987_v12, %v11252_v51  ;;  %v1083_v20 = vmul.f32 %v10918_v36, %v11103_v55  ;;  %v11377_v26 = vmul.f32 %v10817_v57, %v11322_v22  ;;  %859 = vrot.lane.b32.xlu1 %v851_v41, %s10085_s14  ;;  %v15004_v1 = vld [vmem:[#allocation49_spill] sm:$0xff]  ;;  %v15005_v54 = vld [vmem:[#allocation30_spill] sm:$0xff] }
 0x1da   :  { %v588_v39 = vsel %vm174_vm1, %v570_v17, %v11172_v10  ;;  %v589_v33 = vsel %vm174_vm1, %v582_v2, %v570_v17  ;;  %v1092_v45 = vmul.f32 %v11012_v24, %v11098_v28  ;;  %v1042_v55 = vadd.f32 %v1035_v31, %v1026_v63  ;;  %v15008_v63 = vld [vmem:[#allocation21_spill] sm:$0xff] }
 0x1db   :  { %15002 = vst [vmem:[#allocation73_spill] sm:$0xff] %v11377_v26  ;;  %v11388_v3 = vmul.f32 %v588_v39, %v15003_v15  ;;  %v672_v44 = vadd.f32 %v665_v52, %v656_v34  ;;  %v786_v21 = vmul.f32 %v15004_v1, %v11327_v6  ;;  %v11393_v41 = vmul.f32 %v589_v33, %v15005_v54  ;;  %v15006_v26 = vld [vmem:[#allocation67_spill] sm:$0xff]  ;;  %v15009_v34 = vld [vmem:[#allocation74_spill] sm:$0xff] }
 0x1dc   :  { %v795_v10 = vmul.f32 %v15006_v26, %v11322_v22  ;;  %v662_v17 = vmul.f32 %v10899_v46, %v11359_v59  ;;  %v671_v28 = vmul.f32 %v10998_v27, %v11354_v60  ;;  %v11403_v39 = vmul.f32 %v10810_v5, %v11327_v6  ;;  %v610_v33 = vpop.permute.xlu1 %609  ;;  %1049 = vrot.lane.b32.xlu0 %v1040_v11, %s10086_s30  ;;  %v598_v15 = vpop.permute.xlu0 %597  ;;  %v15012_v5 = vld [vmem:[#allocation43_spill] sm:$0xff] }
 0x1dd   :  { %v556_v31 = vsel %vm117_vm0, %v15008_v63, %v552_v42  ;;  %v500_v52 = vsel %vm498_vm4, %v15009_v34, %v495_v35  ;;  %v697_v54 = vmul.f32 %v11006_v25, %v11388_v3  ;;  %1053 = vrot.lane.b32.xlu1 %v1042_v55, %s10086_s30  ;;  %v618_v42 = vsel %vm611_vm5, %v610_v33, %v598_v15 }
 0x1de   :  { %15007 = vst [vmem:[#allocation69_spill] sm:$0xff] %v11403_v39  ;;  %v617_v39 = vsel %vm611_vm5, %v598_v15, %v11228_v7  ;;  %v678_v63 = vadd.f32 %v671_v28, %v662_v17  ;;  %v792_v35 = vmul.f32 %v15004_v1, %v11359_v59  ;;  %v15010_v11 = vrot.slane %v14996_v8, %v10896_v53 }
 0x1df   :  { %v15011_v0 = vrot.slane %v15000_v48, %v10896_v53  ;;  %v1150_v19 = vadd.f32 %v1143_v47, %v1134_v58  ;;  %v688_v7 = vadd.f32 %v15012_v5, %v672_v44  ;;  %v583_v17 = vsel %vm174_vm1, %v11267_v14, %v582_v2  ;;  %v15013_v47 = vld [vmem:[#allocation57_spill] sm:$0xff]  ;;  %v15015_v44 = vld [vmem:[#allocation19_spill] sm:$0xff] }
 0x1e0   :  { %v11425_v34 = vmul.f32 %v15010_v11, %v617_v39  ;;  %v802_v28 = vadd.f32 %v795_v10, %v786_v21  ;;  %v703_v15 = vmul.f32 %v11006_v25, %v11393_v41  ;;  %v801_v8 = vmul.f32 %v15006_v26, %v11354_v60  ;;  %v15014_v2 = vld [vmem:[#allocation25_spill] sm:$0xff]  ;;  %v15020_v11 = vld [vmem:[#allocation44_spill] sm:$0xff] }
 0x1e1   :  { %v11430_v55 = vmul.f32 %v15011_v0, %v618_v42  ;;  %v612_v48 = vsel %vm611_vm5, %v11264_v61, %v610_v33  ;;  %1161 = vrot.lane.b32.xlu0 %v1150_v19, %s10090_s25  ;;  %v704_v0 = vadd.f32 %v697_v54, %v688_v7  ;;  %v694_v14 = vadd.f32 %v15013_v47, %v678_v63  ;;  %v15017_v61 = vld [vmem:[#allocation68_spill] sm:$0xff]  ;;  %v15018_v63 = vld [vmem:[#allocation29_spill] sm:$0xff] }
 0x1e2   :  { %v713_v5 = vmul.f32 %v11018_v23, %v11425_v34  ;;  %v11448_v58 = vmul.f32 %v556_v31, %v15014_v2  ;;  %v15016_v21 = vrot.slane %v15015_v44, %v10794_v62  ;;  %1159 = vrot.lane.b32.xlu1 %v1149_v49, %s10090_s25  ;;  %v827_v39 = vmul.f32 %v15017_v61, %v11388_v3 }
 0x1e3   :  { %v808_v19 = vadd.f32 %v801_v8, %v792_v35  ;;  %v719_v54 = vmul.f32 %v11018_v23, %v11430_v55  ;;  %v974_v42 = vmul.f32 %v10913_v4, %v11327_v6  ;;  %v983_v31 = vmul.f32 %v11009_v18, %v11322_v22 }
 0x1e4   :  { %v11453_v10 = vmul.f32 %v15016_v21, %v500_v52  ;;  %v720_v33 = vadd.f32 %v713_v5, %v704_v0  ;;  %v11465_v62 = vmul.f32 %v583_v17, %v15018_v63  ;;  %v15019_v49 = vrot.slane %v15015_v44, %v10896_v53  ;;  %v15021_v0 = vld [vmem:[#allocation58_spill] sm:$0xff] }
 0x1e5   :  { %v818_v35 = vadd.f32 %v15020_v11, %v802_v28  ;;  %v843_v7 = vmul.f32 %v11050_v30, %v11425_v34  ;;  %v710_v8 = vadd.f32 %v703_v15, %v694_v14  ;;  %v824_v5 = vadd.f32 %v15021_v0, %v808_v19  ;;  %v15022_v28 = vld [vmem:[#allocation45_spill] sm:$0xff] }
 0x1e6   :  { %v11470_v52 = vmul.f32 %v15019_v49, %v612_v48  ;;  %727 = vrot.lane.b32.xlu0 %v720_v33, %s10089_s24  ;;  %v833_v47 = vmul.f32 %v15017_v61, %v11393_v41  ;;  %v1099_v17 = vadd.f32 %v1092_v45, %v1083_v20  ;;  %1157 = vrot.lane.b32.xlu1 %v11351_v32, %s10090_s25 }
 0x1e7   :  { %v834_v53 = vadd.f32 %v827_v39, %v818_v35  ;;  %v849_v48 = vmul.f32 %v11050_v30, %v11430_v55  ;;  %v1007_v2 = vadd.f32 %v15022_v28, %v11367_v40  ;;  %v1082_v44 = vmul.f32 %v10918_v36, %v11327_v6  ;;  %v15024_v35 = vld [vmem:[#allocation46_spill] sm:$0xff]  ;;  %v15026_v28 = vld [vmem:[#allocation59_spill] sm:$0xff] }
 0x1e8   :  { %v726_v15 = vadd.f32 %v719_v54, %v710_v8  ;;  %v990_v14 = vadd.f32 %v983_v31, %v974_v42  ;;  %v1015_v21 = vmul.f32 %v11033_v16, %v11388_v3  ;;  %v1091_v20 = vmul.f32 %v11012_v24, %v11322_v22  ;;  %v15023_v54 = vld [vmem:[#allocation47_spill] sm:$0xff] }
 0x1e9   :  { %v850_v45 = vadd.f32 %v843_v7, %v834_v53  ;;  %v1124_v32 = vmul.f32 %v11044_v38, %v11197_v56  ;;  %v661_v39 = vmul.f32 %v10899_v46, %v11453_v10  ;;  %v670_v40 = vmul.f32 %v10998_v27, %v11448_v58 }
 0x1ea   :  { %739 = vrot.lane.b32.xlu0 %v726_v15, %s10089_s24  ;;  %v840_v6 = vadd.f32 %v833_v47, %v824_v5  ;;  %v1023_v19 = vadd.f32 %v11337_v50, %v1007_v2  ;;  %v1031_v33 = vmul.f32 %v14987_v12, %v11425_v34  ;;  %v1115_v22 = vadd.f32 %v15023_v54, %v1099_v17  ;;  %v15025_v17 = vld [vmem:[#allocation76_spill] sm:$0xff]  ;;  %v15027_v15 = vld [vmem:[#allocation75_spill] sm:$0xff] }
 0x1eb   :  { %857 = vrot.lane.b32.xlu1 %v850_v45, %s10085_s14  ;;  %v1098_v42 = vadd.f32 %v1091_v20, %v1082_v44  ;;  %v677_v31 = vadd.f32 %v670_v40, %v661_v39  ;;  %v791_v63 = vmul.f32 %v15004_v1, %v11453_v10  ;;  %v800_v49 = vmul.f32 %v15006_v26, %v11448_v58  ;;  %v15028_v20 = vld [vmem:[#allocation48_spill] sm:$0xff] }
 0x1ec   :  { %v1039_v11 = vadd.f32 %v11371_v29, %v1023_v19  ;;  %v1006_v7 = vadd.f32 %v15024_v35, %v990_v14  ;;  %v1140_v50 = vmul.f32 %v14990_v37, %v11252_v51  ;;  %v1123_v8 = vmul.f32 %v11044_v38, %v11388_v3 }
 0x1ed   :  { %v856_v0 = vadd.f32 %v849_v48, %v840_v6  ;;  %v1131_v5 = vadd.f32 %v1124_v32, %v1115_v22  ;;  %v1139_v47 = vmul.f32 %v14990_v37, %v11425_v34  ;;  %v660_v53 = vmul.f32 %v10899_v46, %v15025_v17 }
 0x1ee   :  { %1047 = vrot.lane.b32.xlu0 %v1039_v11, %s10086_s30  ;;  %v693_v29 = vadd.f32 %v15026_v28, %v677_v31  ;;  %v702_v2 = vmul.f32 %v11006_v25, %v11465_v62  ;;  %v807_v44 = vadd.f32 %v800_v49, %v791_v63  ;;  %v669_v14 = vmul.f32 %v10998_v27, %v15027_v15  ;;  %v15030_v31 = vld [vmem:[#allocation51_spill] sm:$0xff] }
 0x1ef   :  { %869 = vrot.lane.b32.xlu1 %v856_v0, %s10085_s14  ;;  %v1022_v48 = vadd.f32 %v1015_v21, %v1006_v7  ;;  %v1114_v45 = vadd.f32 %v15028_v20, %v1098_v42  ;;  %v790_v32 = vmul.f32 %v15004_v1, %v15025_v17  ;;  %v799_v46 = vmul.f32 %v15006_v26, %v15027_v15  ;;  %v15029_v26 = vld [vmem:[#allocation60_spill] sm:$0xff] }
 0x1f0   :  { %v1147_v39 = vadd.f32 %v1140_v50, %v1131_v5  ;;  %v718_v40 = vmul.f32 %v11018_v23, %v11470_v52  ;;  %v676_v6 = vadd.f32 %v669_v14, %v660_v53  ;;  %v701_v19 = vmul.f32 %v11006_v25, %v11281_v13  ;;  %v15032_v15 = vld [vmem:[#allocation52_spill] sm:$0xff] }
 0x1f1   :  { %v1038_v27 = vadd.f32 %v1031_v33, %v1022_v48  ;;  %v1130_v54 = vadd.f32 %v1123_v8, %v1114_v45  ;;  %v832_v21 = vmul.f32 %v15017_v61, %v11465_v62  ;;  %v980_v22 = vmul.f32 %v10913_v4, %v11359_v59 }
 0x1f2   :  { %1155 = vrot.lane.b32.xlu0 %v1147_v39, %s10090_s25  ;;  %v709_v1 = vadd.f32 %v702_v2, %v693_v29  ;;  %v823_v42 = vadd.f32 %v15029_v26, %v807_v44  ;;  %v692_v63 = vadd.f32 %v15030_v31, %v676_v6  ;;  %v989_v49 = vmul.f32 %v11009_v18, %v11354_v60 }
 0x1f3   :  { %1045 = vrot.lane.b32.xlu1 %v1038_v27, %s10086_s30  ;;  %v848_v25 = vmul.f32 %v11050_v30, %v11470_v52  ;;  %v806_v33 = vadd.f32 %v799_v46, %v790_v32  ;;  %v1088_v11 = vmul.f32 %v10918_v36, %v11359_v59  ;;  %v1097_v35 = vmul.f32 %v11012_v24, %v11354_v60 }
 0x1f4   :  { %v1146_v7 = vadd.f32 %v1139_v47, %v1130_v54  ;;  %v725_v50 = vadd.f32 %v718_v40, %v709_v1  ;;  %v708_v8 = vadd.f32 %v701_v19, %v692_v63  ;;  %v996_v0 = vadd.f32 %v989_v49, %v980_v22  ;;  %v15034_v19 = vld [vmem:[#allocation63_spill] sm:$0xff]  ;;  %v15037_v22 = vld [vmem:[#allocation81_spill] sm:$0xff]  ;;  %v15038_v1 = vld [vmem:[#allocation50_spill] sm:$0xff] }
 0x1f5   :  { %v831_v5 = vmul.f32 %v15017_v61, %v11281_v13  ;;  %v1021_v17 = vmul.f32 %v11033_v16, %v11393_v41  ;;  %v979_v53 = vmul.f32 %v10913_v4, %v11453_v10  ;;  %v988_v28 = vmul.f32 %v11009_v18, %v11448_v58  ;;  %v15031_v61 = vld [vmem:[#allocation61_spill] sm:$0xff]  ;;  %v15035_v54 = vld [vmem:[#allocation71_spill] sm:$0xff] }
 0x1f6   :  { %v11559_v29 = vmul.f32 %v10817_v57, %v11354_v60  ;;  %737 = vrot.lane.b32.xlu0 %v725_v50, %s10089_s24  ;;  %v839_v47 = vadd.f32 %v832_v21, %v823_v42  ;;  %v717_v2 = vmul.f32 %v11018_v23, %v11317_v43  ;;  %v1012_v44 = vadd.f32 %v15031_v61, %v996_v0  ;;  %v15033_v60 = vld [vmem:[#allocation39_spill] sm:$0xff]  ;;  %v15039_v42 = vld [vmem:[#allocation62_spill] sm:$0xff]  ;;  %v15043_v0 = vld [vmem:[#allocation72_spill] sm:$0xff] }
 0x1f7   :  { %1153 = vrot.lane.b32.xlu1 %v1146_v7, %s10090_s25  ;;  %v822_v14 = vadd.f32 %v15032_v15, %v806_v33  ;;  %v1104_v4 = vadd.f32 %v1097_v35, %v1088_v11  ;;  %v995_v48 = vadd.f32 %v988_v28, %v979_v53  ;;  %v1087_v18 = vmul.f32 %v10918_v36, %v11453_v10  ;;  %v15040_v33 = vld [vmem:[#allocation53_spill] sm:$0xff]  ;;  %v15045_v53 = vld [vmem:[#allocation83_spill] sm:$0xff] }
 0x1f8   :  { %v900_v20 = vmul.f32 %v15033_v60, %v11359_v59  ;;  %v724_v45 = vadd.f32 %v717_v2, %v708_v8  ;;  %v1037_v32 = vmul.f32 %v14987_v12, %v11430_v55  ;;  %v1096_v23 = vmul.f32 %v11012_v24, %v11448_v58  ;;  %v15036_v59 = vld [vmem:[#allocation77_spill] sm:$0xff]  ;;  %v15046_v2 = vld [vmem:[#allocation64_spill] sm:$0xff] }
 0x1f9   :  { %v855_v46 = vadd.f32 %v848_v25, %v839_v47  ;;  %v838_v39 = vadd.f32 %v831_v5, %v822_v14  ;;  %v1028_v40 = vadd.f32 %v1021_v17, %v1012_v44  ;;  %v1020_v6 = vmul.f32 %v11033_v16, %v11465_v62  ;;  %v15041_v35 = vld [vmem:[#allocation85_spill] sm:$0xff]  ;;  %v15044_v5 = vld [vmem:[#allocation78_spill] sm:$0xff] }
 0x1fa   :  { %735 = vrot.lane.b32.xlu0 %v724_v45, %s10089_s24  ;;  %v1011_v36 = vadd.f32 %v15034_v19, %v995_v48  ;;  %v1103_v27 = vadd.f32 %v1096_v23, %v1087_v18  ;;  %v912_v21 = vadd.f32 %v15036_v59, %v15035_v54  ;;  %v937_v26 = vmul.f32 %v15038_v1, %v15037_v22  ;;  %v15042_v7 = vld [vmem:[#allocation41_spill] sm:$0xff]  ;;  %v15047_v14 = vld [vmem:[#allocation54_spill] sm:$0xff]  ;;  %v15051_v54 = vld [vmem:[#allocation55_spill] sm:$0xff] }
 0x1fb   :  { %867 = vrot.lane.b32.xlu1 %v855_v46, %s10085_s14  ;;  %v847_v24 = vmul.f32 %v11050_v30, %v11317_v43  ;;  %v1120_v31 = vadd.f32 %v15039_v42, %v1104_v4  ;;  %v1129_v16 = vmul.f32 %v11044_v38, %v11393_v41  ;;  %v1145_v63 = vmul.f32 %v14990_v37, %v11430_v55  ;;  %v15048_v4 = vld [vmem:[#allocation86_spill] sm:$0xff]  ;;  %v15049_v23 = vld [vmem:[#allocation69_spill] sm:$0xff] }
 0x1fc   :  { %v1044_v49 = vadd.f32 %v1037_v32, %v1028_v40  ;;  %v1036_v25 = vmul.f32 %v14987_v12, %v11470_v52  ;;  %v928_v11 = vadd.f32 %v15040_v33, %v912_v21  ;;  %v953_v50 = vmul.f32 %v15042_v7, %v15041_v35  ;;  %v15050_v46 = vld [vmem:[#allocation73_spill] sm:$0xff] }
 0x1fd   :  { %v854_v8 = vadd.f32 %v847_v24, %v838_v39  ;;  %v1128_v30 = vmul.f32 %v11044_v38, %v11465_v62  ;;  %v913_v17 = vadd.f32 %v15044_v5, %v15043_v0  ;;  %v938_v28 = vmul.f32 %v15038_v1, %v15045_v53  ;;  %v15054_v24 = vld [vmem:[#allocation38_spill] sm:$0xff] }
 0x1fe   :  { %1057 = vrot.lane.b32.xlu0 %v1044_v49, %s10086_s30  ;;  %v1027_v47 = vadd.f32 %v1020_v6, %v1011_v36  ;;  %v1119_v12 = vadd.f32 %v15046_v2, %v1103_v27  ;;  %v1144_v61 = vmul.f32 %v14990_v37, %v11470_v52  ;;  %v944_v44 = vadd.f32 %v937_v26, %v928_v11  ;;  %v15057_v11 = vld [vmem:[#allocation84_spill] sm:$0xff] }
 0x1ff   :  { %865 = vrot.lane.b32.xlu1 %v854_v8, %s10085_s14  ;;  %v1136_v15 = vadd.f32 %v1129_v16, %v1120_v31  ;;  %v929_v38 = vadd.f32 %v15047_v14, %v913_v17  ;;  %v954_v48 = vmul.f32 %v15042_v7, %v15048_v4  ;;  %v14836_v32 = vmov 0.0   ;;  %v15059_v8 = vld [vmem:[#allocation65_spill] sm:$0xff]  ;;  %v15061_v14 = vld [vmem:[#allocation12_spill] sm:$0xff] }
 0x200   :  { %v1043_v18 = vadd.f32 %v1036_v25, %v1027_v47  ;;  %v11610_v45 = vadd.f32 %v953_v50, %v944_v44  ;;  %1397 = vmatprep.mubr.f32.mxu1 %v14836_v32  ;;  %v910_v39 = vadd.f32 %v15050_v46, %v15049_v23  ;;  %1320 = vmatprep.mubr.f32.mxu0 %v14836_v32  ;;  %v15062_v46 = vld [vmem:[#allocation34_spill] sm:$0xff] }
 0x201   :  { %v908_v37 = vmul.f32 %v10817_v57, %v11448_v58  ;;  %v1152_v40 = vadd.f32 %v1145_v63, %v1136_v15  ;;  %v945_v6 = vadd.f32 %v938_v28, %v929_v38  ;;  %v935_v19 = vmul.f32 %v15038_v1, %v11388_v3  ;;  %v15052_v57 = vld [vmem:[#allocation80_spill] sm:$0xff]  ;;  %v15053_v58 = vld [vmem:[#allocation79_spill] sm:$0xff] }
 0x202   :  { %v899_v36 = vmul.f32 %v15033_v60, %v11453_v10  ;;  %1055 = vrot.lane.b32.xlu0 %v1043_v18, %s10086_s30  ;;  %v1135_v27 = vadd.f32 %v1128_v30, %v1119_v12  ;;  %v926_v59 = vadd.f32 %v15051_v54, %v910_v39  ;;  %v951_v21 = vmul.f32 %v15042_v7, %v11425_v34  ;;  %v15055_v10 = vld [vmem:[#allocation40_spill] sm:$0xff] }
 0x203   :  { %1165 = vrot.lane.b32.xlu1 %v1152_v40, %s10090_s25  ;;  %v11627_v22 = vadd.f32 %v954_v48, %v945_v6  ;;  %v911_v26 = vadd.f32 %v15053_v58, %v15052_v57  ;;  %v936_v3 = vmul.f32 %v15038_v1, %v11197_v56  ;;  %v924_v60 = vmul.f32 %v15055_v10, %v15054_v24  ;;  %v15056_v63 = vld [vmem:[#allocation56_spill] sm:$0xff]  ;;  %v15058_v56 = vld [vmem:[#allocation82_spill] sm:$0xff] }
 0x204   :  { %v1151_v42 = vadd.f32 %v1144_v61, %v1135_v27  ;;  %v942_v31 = vadd.f32 %v935_v19, %v926_v59  ;;  %v916_v16 = vadd.f32 %v11559_v29, %v900_v20  ;;  %v941_v34 = vmul.f32 %v15038_v1, %v11393_v41  ;;  %v15060_v20 = vld [vmem:[#allocation66_spill] sm:$0xff]  ;;  %v15063_v54 = vld [vmem:[#allocation32_spill] sm:$0xff] }
 0x205   :  { %v927_v49 = vadd.f32 %v15056_v63, %v911_v26  ;;  %v952_v25 = vmul.f32 %v15042_v7, %v11252_v51  ;;  %v957_v33 = vmul.f32 %v15042_v7, %v11430_v55  ;;  %v914_v35 = vadd.f32 %v15058_v56, %v15057_v11  ;;  %v15065_v56 = vld [vmem:[#allocation11_spill] sm:$0xff] }
 0x206   :  { %v11645_v50 = vadd.f32 %v951_v21, %v942_v31  ;;  %v932_v30 = vadd.f32 %v15059_v8, %v916_v16  ;;  %v915_v0 = vadd.f32 %v908_v37, %v899_v36  ;;  %v939_v29 = vmul.f32 %v15038_v1, %v11281_v13  ;;  %v9986_v37 = vld [vmem:[%s14754_s11 + $0x10] sm:$0xff] }
 0x207   :  { %1163 = vrot.lane.b32.xlu1 %v1151_v42, %s10090_s25  ;;  %v943_v41 = vadd.f32 %v936_v3, %v927_v49  ;;  %v930_v5 = vadd.f32 %v15060_v20, %v914_v35  ;;  %v940_v51 = vmul.f32 %v15038_v1, %v11465_v62  ;;  %v956_v53 = vmul.f32 %v15042_v7, %v11470_v52 }
 0x208   :  { %v948_v55 = vadd.f32 %v941_v34, %v932_v30  ;;  %v931_v17 = vadd.f32 %v924_v60, %v915_v0  ;;  %v955_v2 = vmul.f32 %v15042_v7, %v11317_v43  ;;  %v11669_v38 = vsub.s32 4, %v15061_v14  ;;  %v9985_v7 = vld [vmem:[%s14754_s11 + $0x18] sm:$0xff]  ;;  %v15064_v60 = vld [vmem:[#allocation10_spill] sm:$0xff] }
 0x209   :  { %v11656_v28 = vadd.f32 %v952_v25, %v943_v41  ;;  %v946_v47 = vadd.f32 %v939_v29, %v930_v5  ;;  %v11695_v21 = vsub.s32 7, %v15061_v14  ;;  %v11719_v29 = vstv %s14758_s15 }
 0x20a   :  { %v11660_v13 = vadd.f32 %v957_v33, %v948_v55  ;;  %v947_v12 = vadd.f32 %v940_v51, %v931_v17  ;;  %v764_v48 = vrot.slane %v9985_v7, %v11669_v38  ;;  %v760_v40 = vrot.slane %v9986_v37, %v11669_v38 }
 0x20b   :  { %v11662_v61 = vadd.f32 %v955_v2, %v946_v47  ;;  %v1190_v31 = vrot.slane %v9985_v7, %v11695_v21  ;;  %v1186_v33 = vrot.slane %v9986_v37, %v11695_v21 }
 0x20c   :  { %v11664_v44 = vadd.f32 %v956_v53, %v947_v12 }
 0x23e   :  { %v732_v15 = vpop.permute.xlu0 %731 }
 0x242   :  { %v862_v1 = vpop.permute.xlu0 %861 }
 0x243   :  { %v11666_v62 = vpop.permute.xlu1 %733 }
 0x244   :  { %v745_v18 = vsel %vm741_vm6, %v732_v15, %v11666_v62 }
 0x245   :  { %v780_v27 = vmul.f32 %v764_v48, %v745_v18  ;;  %v9988_v48 = vld [vmem:[%s14754_s11] sm:$0xff] }
 0x246   :  { %v730_v4 = vpop.permute.xlu0 %729  ;;  %v752_v18 = vrot.slane %v9988_v48, %v11669_v38 }
 0x247   :  { %v11671_v52 = vpop.permute.xlu1 %863  ;;  %v746_v19 = vsel %vm741_vm6, %v730_v4, %v732_v15 }
 0x248   :  { %v874_v43 = vsel %vm272_vm2, %v862_v1, %v11671_v52  ;;  %v779_v26 = vmul.f32 %v760_v40, %v746_v19  ;;  %v11745_v19 = vld [vmem:[%s14746_s3] sm:$0xff] }
 0x249   :  { %v881_v39 = vmul.f32 %v874_v43, %v15062_v46  ;;  %v15066_v43 = vld [vmem:[#allocation27_spill] sm:$0xff] }
 0x24a   :  { %v1052_v23 = vpop.permute.xlu0 %1051 }
 0x24b   :  { %v860_v6 = vpop.permute.xlu1 %859  ;;  %v888_v58 = vadd.f32 %v881_v39, %v780_v27  ;;  %v15067_v27 = vld [vmem:[#allocation33_spill] sm:$0xff] }
 0x24c   :  { %v875_v36 = vsel %vm272_vm2, %v860_v6, %v862_v1 }
 0x24d   :  { %v880_v59 = vmul.f32 %v875_v36, %v15063_v54  ;;  %v968_v49 = vadd.f32 %v11627_v22, %v888_v58 }
 0x24e   :  { %v1050_v57 = vpop.permute.xlu0 %1049 }
 0x24f   :  { %v11697_v3 = vpop.permute.xlu1 %1053  ;;  %v887_v10 = vadd.f32 %v880_v59, %v779_v26  ;;  %v1062_v16 = vsel %vm418_vm3, %v1050_v57, %v1052_v23  ;;  %v15068_v26 = vld [vmem:[#allocation31_spill] sm:$0xff] }
 0x250   :  { %v1061_v24 = vsel %vm418_vm3, %v1052_v23, %v11697_v3  ;;  %v1068_v35 = vmul.f32 %v1062_v16, %v15065_v56  ;;  %v11761_v16 = vld [vmem:[%s14746_s3 + $0x8] sm:$0xff]  ;;  %v1178_v56 = vrot.slane %v9988_v48, %v11695_v21 }
 0x251   :  { %v1069_v42 = vmul.f32 %v1061_v24, %v15064_v60  ;;  %v967_v11 = vadd.f32 %v11610_v45, %v887_v10  ;;  %v9987_v45 = vld [vmem:[%s14754_s11 + $0x8] sm:$0xff] }
 0x252   :  { %v756_v55 = vrot.slane %v9987_v45, %v11669_v38  ;;  %v1182_v59 = vrot.slane %v9987_v45, %v11695_v21 }
 0x253   :  { %v11707_v34 = vpop.permute.xlu0 %1161  ;;  %v1076_v30 = vadd.f32 %v1069_v42, %v968_v49  ;;  %v1075_v5 = vadd.f32 %v1068_v35, %v967_v11 }
 0x254   :  { %v1160_v63 = vpop.permute.xlu1 %1159 }
 0x255   :  { %v1170_v25 = vsel %vm1167_vm7, %v1160_v63, %v11707_v34 }
 0x256   :  { %v1206_v8 = vmul.f32 %v1190_v31, %v1170_v25 }
 0x258   :  { %v728_v0 = vpop.permute.xlu0 %727  ;;  %v1158_v41 = vpop.permute.xlu1 %1157  ;;  %v1213_v22 = vadd.f32 %v1206_v8, %v1076_v30 }
 0x259   :  { %v1171_v20 = vsel %vm1167_vm7, %v1158_v41, %v1160_v63  ;;  %v747_v53 = vsel %vm741_vm6, %v728_v0, %v730_v4 }
 0x25a   :  { %v1205_v51 = vmul.f32 %v1186_v33, %v1171_v20  ;;  %v1222_v17 = vadd.f32 %v11719_v29, %v1213_v22  ;;  %v778_v14 = vmul.f32 %v756_v55, %v747_v53  ;;  %v15069_v33 = vld [vmem:[#allocation14_spill] sm:$0xff]  ;;  %v9989_v20 = vld [vmem:[%s14754_s11 + $0x30] sm:$0xff] }
 0x25c   :  { %v740_v47 = vpop.permute.xlu0 %739  ;;  %v1229_v12 = vmax.f32 %v1222_v17, 0.0  ;;  %v1212_v15 = vadd.f32 %v1205_v51, %v1075_v5  ;;  %v776_v5 = vrot.slane %v9989_v20, %v11669_v38 }
 0x25d   :  { %v858_v2 = vpop.permute.xlu1 %857  ;;  %v748_v4 = vsel %vm741_vm6, %v740_v47, %v728_v0 }
 0x25e   :  { %v876_v1 = vsel %vm272_vm2, %v858_v2, %v860_v6  ;;  %1333 = vmatprep.subr.mxu1 %v1229_v12  ;;  %v1221_v23 = vadd.f32 %v11719_v29, %v1212_v15  ;;  %v777_v58 = vmul.f32 %v752_v18, %v748_v4  ;;  %v9990_v12 = vld [vmem:[%s14754_s11 + $0x20] sm:$0xff] }
 0x25f   :  { %v879_v7 = vmul.f32 %v876_v1, %v15066_v43  ;;  %v768_v15 = vrot.slane %v9990_v12, %v11669_v38  ;;  %v9991_v1 = vld [vmem:[%s14754_s11 + $0x28] sm:$0xff] }
 0x260   :  { %v1048_v46 = vpop.permute.xlu0 %1047  ;;  %v1228_v6 = vmax.f32 %v1221_v23, 0.0  ;;  %v15070_v43 = vld [vmem:[#allocation35_spill] sm:$0xff] }
 0x261   :  { %v886_v39 = vadd.f32 %v879_v7, %v778_v14  ;;  %v870_v37 = vpop.permute.xlu1 %869  ;;  %v1063_v40 = vsel %vm418_vm3, %v1048_v46, %v1050_v57  ;;  %v772_v14 = vrot.slane %v9991_v1, %v11669_v38 }
 0x262   :  { %v877_v36 = vsel %vm272_vm2, %v870_v37, %v858_v2  ;;  %v1067_v54 = vmul.f32 %v1063_v40, %v15067_v27  ;;  %1334 = vmatpush1.msra.mxu1 %v1228_v6  ;;  %v1202_v40 = vrot.slane %v9989_v20, %v11695_v21  ;;  %v15071_v27 = vld [vmem:[#allocation37_spill] sm:$0xff] }
 0x263   :  { %v878_v24 = vmul.f32 %v877_v36, %v15068_v26  ;;  %v966_v57 = vadd.f32 %v11656_v28, %v886_v39  ;;  %8306 = vmatmul.mubr.msk.f32.vlgmr.msra.gmra.mrb[0].mxu1 %vm1249_vm8, %v11745_v19 }
 0x264   :  { %v1156_v10 = vpop.permute.xlu0 %1155  ;;  %1403 = vmatprep.mubr.f32.mxu1 %v14836_v32 }
 0x265   :  { %v885_v60 = vadd.f32 %v878_v24, %v777_v58  ;;  %v1046_v42 = vpop.permute.xlu1 %1045  ;;  %v1172_v31 = vsel %vm1167_vm7, %v1156_v10, %v1158_v41  ;;  %v1074_v49 = vadd.f32 %v1067_v54, %v966_v57  ;;  %v15072_v58 = vld [vmem:[#allocation15_spill] sm:$0xff]  ;;  %v15073_v24 = vld [vmem:[#allocation18_spill] sm:$0xff] }
 0x266   :  { %v1064_v63 = vsel %vm418_vm3, %v1046_v42, %v1048_v46  ;;  %v1204_v28 = vmul.f32 %v1182_v59, %v1172_v31 }
 0x267   :  { %v965_v25 = vadd.f32 %v11645_v50, %v885_v60  ;;  %v1066_v11 = vmul.f32 %v1064_v63, %v15069_v33  ;;  %8307 = vmatmul.mubr.msk.f32.gmra.mrb[2].mxu1 %vm1249_vm8, %v11761_v16 }
 0x268   :  { %v738_v35 = vpop.permute.xlu0 %737  ;;  %v1211_v8 = vadd.f32 %v1204_v28, %v1074_v49  ;;  %8853 = vmatprep.mubr.msk.f32.mxu1 %vm1249_vm8, %v11745_v19  ;;  %v1198_v49 = vrot.slane %v9991_v1, %v11695_v21 }
 0x269   :  { %v1154_v30 = vpop.permute.xlu1 %1153  ;;  %v1073_v22 = vadd.f32 %v1066_v11, %v965_v25  ;;  %v742_v51 = vsel %vm741_vm6, %v738_v35, %v740_v47  ;;  %v15074_v11 = vld [vmem:[#allocation36_spill] sm:$0xff] }
 0x26a   :  { %v1173_v0 = vsel %vm1167_vm7, %v1154_v30, %v1156_v10  ;;  %v1220_v41 = vadd.f32 %v11719_v29, %v1211_v8  ;;  %v783_v47 = vmul.f32 %v776_v5, %v742_v51 }
 0x26b   :  { %v1203_v50 = vmul.f32 %v1178_v56, %v1173_v0 }
 0x26c   :  { %v736_v45 = vpop.permute.xlu0 %735  ;;  %v1227_v55 = vmax.f32 %v1220_v41, 0.0  ;;  %v15075_v41 = vld [vmem:[#allocation13_spill] sm:$0xff] }
 0x26d   :  { %v868_v17 = vpop.permute.xlu1 %867  ;;  %v1210_v53 = vadd.f32 %v1203_v50, %v1073_v22  ;;  %v744_v48 = vsel %vm741_vm6, %v11666_v62, %v736_v45  ;;  %v743_v23 = vsel %vm741_vm6, %v736_v45, %v738_v35 }
 0x26e   :  { %v871_v2 = vsel %vm272_vm2, %v868_v17, %v870_v37  ;;  %1256 = vmatprep.subr.mxu0 %v1227_v55  ;;  %v781_v6 = vmul.f32 %v768_v15, %v744_v48  ;;  %v782_v59 = vmul.f32 %v772_v14, %v743_v23  ;;  %v1578_v14 = vld [vmem:[%s14745_s2 + $0x10] sm:$0xff]  ;;  %v1647_v48 = vld [vmem:[%s14748_s5 + $0x20] sm:$0xff] }
 0x26f   :  { %v884_v7 = vmul.f32 %v871_v2, %v15070_v43  ;;  %v1219_v18 = vadd.f32 %v11719_v29, %v1210_v53  ;;  %v1577_v53 = vld [vmem:[%s14745_s2 + $0x8] sm:$0xff]  ;;  %v1649_v23 = vld [vmem:[%s14748_s5 + $0x30] sm:$0xff] }
 0x270   :  { %v1058_v4 = vpop.permute.xlu0 %1057  ;;  %v1644_v43 = vld [vmem:[%s14748_s5 + $0x8] sm:$0xff] }
 0x271   :  { %v891_v46 = vadd.f32 %v884_v7, %v783_v47  ;;  %v866_v39 = vpop.permute.xlu1 %865  ;;  %v1065_v37 = vsel %vm418_vm3, %v1058_v4, %v1046_v42  ;;  %v1226_v38 = vmax.f32 %v1219_v18, 0.0  ;;  %v1194_v42 = vrot.slane %v9990_v12, %v11695_v21  ;;  %v1581_v47 = vld [vmem:[%s14745_s2 + $0x28] sm:$0xff]  ;;  %v1645_v7 = vld [vmem:[%s14748_s5 + $0x10] sm:$0xff] }
 0x272   :  { %v872_v36 = vsel %vm272_vm2, %v866_v39, %v868_v17  ;;  %v873_v62 = vsel %vm272_vm2, %v11671_v52, %v866_v39  ;;  %v1072_v54 = vmul.f32 %v1065_v37, %v15071_v27  ;;  %v1648_v18 = vld [vmem:[%s14748_s5 + $0x28] sm:$0xff]  ;;  %v10092_v39 = vmov 0   ;;  %v1678_v37 = vld [vmem:[%s14752_s9 + $0x18] sm:$0xff]  ;;  %v1683_v27 = vld [vmem:[%s14753_s10] sm:$0xff] }
 0x273   :  { %v882_v26 = vmul.f32 %v873_v62, %v15072_v58  ;;  %v883_v57 = vmul.f32 %v872_v36, %v15073_v24  ;;  %v971_v10 = vadd.f32 %v11660_v13, %v891_v46  ;;  %1257 = vmatpush1.msra.mxu0 %v1226_v38  ;;  %v1580_v46 = vld [vmem:[%s14745_s2 + $0x20] sm:$0xff]  ;;  %9379 = vset.pattern.permute.xlu0 %v10092_v39  ;;  %v1680_v38 = vld [vmem:[%s14752_s9 + $0x28] sm:$0xff]  ;;  %v1677_v36 = vld [vmem:[%s14752_s9 + $0x10] sm:$0xff] }
 0x274   :  { %8304 = vmatmul.mubr.msk.f32.vlgmr.msra.gmra.mrb[0].mxu0 %vm1249_vm8, %v11745_v19  ;;  %v1056_v60 = vpop.permute.xlu0 %1055  ;;  %9380 = vset.pattern.permute.xlu1 %v10092_v39  ;;  %v1682_v62 = vld [vmem:[%s14752_s9 + $0x38] sm:$0xff]  ;;  %v1681_v58 = vld [vmem:[%s14752_s9 + $0x30] sm:$0xff]  ;;  %v1687_v24 = vld [vmem:[%s14753_s10 + $0x20] sm:$0xff] }
 0x275   :  { %v889_v31 = vadd.f32 %v882_v26, %v781_v6  ;;  %v890_v63 = vadd.f32 %v883_v57, %v782_v59  ;;  %v1166_v28 = vpop.permute.xlu1 %1165  ;;  %v1059_v52 = vsel %vm418_vm3, %v1056_v60, %v1058_v4  ;;  %1326 = vmatprep.mubr.f32.mxu0 %v14836_v32  ;;  %v1079_v25 = vadd.f32 %v1072_v54, %v971_v10  ;;  %v1650_v4 = vld [vmem:[%s14748_s5 + $0x38] sm:$0xff]  ;;  %v1679_v6 = vld [vmem:[%s14752_s9 + $0x20] sm:$0xff]  ;;  %v1684_v59 = vld [vmem:[%s14753_s10 + $0x8] sm:$0xff] }
 0x276   :  { %v1174_v13 = vsel %vm1167_vm7, %v1166_v28, %v1154_v30  ;;  %v1060_v33 = vsel %vm418_vm3, %v11697_v3, %v1056_v60  ;;  %v1071_v56 = vmul.f32 %v1059_v52, %v15074_v11  ;;  %2644 = vperm.xlu0 %9379, %v1678_v37   ;;  %2649 = vperm.xlu1 %9380, %v1679_v6   ;;  %v1675_v54 = vld [vmem:[%s14752_s9] sm:$0xff]  ;;  %v1686_v26 = vld [vmem:[%s14753_s10 + $0x18] sm:$0xff]  ;;  %v1689_v57 = vld [vmem:[%s14753_s10 + $0x30] sm:$0xff] }
 0x277   :  { %v1209_v35 = vmul.f32 %v1202_v40, %v1174_v13  ;;  %v969_v8 = vadd.f32 %v11662_v61, %v889_v31  ;;  %v970_v0 = vadd.f32 %v11664_v44, %v890_v63  ;;  %v1070_v22 = vmul.f32 %v1060_v33, %v15075_v41  ;;  %v1676_v40 = vld [vmem:[%s14752_s9 + $0x8] sm:$0xff]  ;;  %v1690_v10 = vld [vmem:[%s14753_s10 + $0x38] sm:$0xff]  ;;  %v1685_v60 = vld [vmem:[%s14753_s10 + $0x10] sm:$0xff] }
 0x278   :  { %8305 = vmatmul.mubr.msk.f32.gmra.mrb[2].mxu0 %vm1249_vm8, %v11761_v16  ;;  %v1236_v31 = vld [vmem:[%s14744_s1 + $0x18] sm:$0xff]  ;;  %v1235_v63 = vld [vmem:[%s14744_s1 + $0x10] sm:$0xff]  ;;  %v12010_v13 = vld [vmem:[%s14747_s4] sm:$0xff] }
 0x279   :  { %v1216_v21 = vadd.f32 %v1209_v35, %v1079_v25  ;;  %v1164_v50 = vpop.permute.xlu1 %1163  ;;  %1474 = vmatprep.mubr.f32.mxu0 %v14836_v32  ;;  %v1077_v30 = vadd.f32 %v1070_v22, %v969_v8  ;;  %v1078_v61 = vadd.f32 %v1071_v56, %v970_v0  ;;  %v12022_v56 = vld [vmem:[%s14747_s4 + $0x8] sm:$0xff]  ;;  %v12030_v35 = vld [vmem:[%s14747_s4 + $0x10] sm:$0xff]  ;;  %v1233_v8 = vld [vmem:[%s14744_s1] sm:$0xff] }
 0x27a   :  { %v1168_v3 = vsel %vm1167_vm7, %v1164_v50, %v1166_v28  ;;  %v1169_v20 = vsel %vm1167_vm7, %v11707_v34, %v1164_v50  ;;  %v1579_v34 = vld [vmem:[%s14745_s2 + $0x18] sm:$0xff]  ;;  %2654 = vperm.xlu0 %9379, %v1680_v38   ;;  %2664 = vperm.xlu1 %9380, %v1682_v62   ;;  %v1234_v0 = vld [vmem:[%s14744_s1 + $0x8] sm:$0xff] }
 0x27b   :  { %v1207_v5 = vmul.f32 %v1194_v42, %v1169_v20  ;;  %v1208_v44 = vmul.f32 %v1198_v49, %v1168_v3  ;;  %v1225_v51 = vadd.f32 %v11719_v29, %v1216_v21  ;;  %v1688_v42 = vld [vmem:[%s14753_s10 + $0x28] sm:$0xff]  ;;  %v12044_v41 = vld [vmem:[%s14747_s4 + $0x18] sm:$0xff]  ;;  %v12052_v3 = vld [vmem:[%s14747_s4 + $0x20] sm:$0xff] }
 0x27d   :  { %v1214_v45 = vadd.f32 %v1207_v5, %v1077_v30  ;;  %v1215_v55 = vadd.f32 %v1208_v44, %v1078_v61  ;;  %v1232_v17 = vmax.f32 %v1225_v51, 0.0  ;;  %v1640_v5 = vld [vmem:[%s14747_s4 + $0x28] sm:$0xff]  ;;  %v1641_v44 = vld [vmem:[%s14747_s4 + $0x30] sm:$0xff] }
 0x27e   :  { %2634 = vperm.xlu0 %9379, %v1676_v40   ;;  %2629 = vperm.xlu1 %9380, %v1675_v54   ;;  %v1239_v51 = vld [vmem:[%s14744_s1 + $0x30] sm:$0xff] }
 0x27f   :  { %v1223_v2 = vadd.f32 %v11719_v29, %v1214_v45  ;;  %8851 = vmatprep.subr.mxu1 %v1232_v17  ;;  %v1224_v12 = vadd.f32 %v11719_v29, %v1215_v55  ;;  %v11852_v29 = vld [vmem:[%s14748_s5] sm:$0xff] }
 0x280   :  { %8852 = vmatpush3.msra.mxu1 %v1232_v17 }
 0x281   :  { %v1230_v15 = vmax.f32 %v1223_v2, 0.0  ;;  %v1231_v1 = vmax.f32 %v1224_v12, 0.0  ;;  %8854 = vmatmul.mubr.msk.f32.vlgmr.msra.gmra.mrb[4].mxu1 %vm1249_vm8, %v11761_v16  ;;  %1715 = vmatprep.subr.mxu1 %v1577_v53  ;;  %v1642_v53 = vld [vmem:[%s14747_s4 + $0x38] sm:$0xff]  ;;  %v1238_v2 = vld [vmem:[%s14744_s1 + $0x28] sm:$0xff]  ;;  %v1237_v12 = vld [vmem:[%s14744_s1 + $0x20] sm:$0xff] }
 0x282   :  { %1716 = vmatpush1.msra.mxu1 %v1576_v9  ;;  %1779 = vmatprep.mubr.f32.mxu1 %v14836_v32 }
 0x283   :  { %1410 = vmatprep.subr.mxu0 %v1231_v1  ;;  %8996 = vmatprep.subr.mxu1 %v1579_v34 }
 0x284   :  { %1411 = vmatpush1.msra.mxu0 %v1230_v15  ;;  %2639 = vperm.xlu0 %9379, %v1677_v36  }
 0x285   :  { %8308 = vmatmul.mubr.msk.f32.vlgmr.msra.gmra.mrb[4].mxu0 %vm1249_vm8, %v11745_v19  ;;  %8354 = vmatmul.mubr.msk.f32.vlgmr.msra.gmra.mrb[6].mxu1 %vm1249_vm8, %v11852_v29  ;;  %v1582_v19 = vld [vmem:[%s14745_s2 + $0x30] sm:$0xff] }
 0x286   :  { %1785 = vmatprep.mubr.f32.mxu1 %v14836_v32  ;;  %1480 = vmatprep.mubr.f32.mxu0 %v14836_v32 }
 0x287   :  { %1828 = vmatprep.subr.mxu0 %v1579_v34  ;;  %8997 = vmatpush1.msra.mxu1 %v1578_v14 }
 0x288   :  { %1829 = vmatpush1.msra.mxu0 %v1578_v14  ;;  %1941 = vmatprep.subr.mxu1 %v1581_v47 }
 0x289   :  { %8355 = vmatmul.mubr.msk.f32.gmra.mrb[8].mxu1 %vm1249_vm8, %v1644_v43  ;;  %8309 = vmatmul.mubr.msk.f32.gmra.mrb[6].mxu0 %vm1249_vm8, %v11761_v16  ;;  %v1646_v16 = vld [vmem:[%s14748_s5 + $0x18] sm:$0xff] }
 0x28a   :  { %1791 = vmatprep.mubr.f32.mxu1 %v14836_v32  ;;  %1892 = vmatprep.mubr.f32.mxu0 %v14836_v32 }
 0x28b   :  { %8856 = vmatprep.subr.mxu0 %v1582_v19  ;;  %4437 = vperm.xlu0 %9379, %v1683_v27  }
 0x28c   :  { %2659 = vperm.xlu1 %9380, %v1681_v58  }
 0x28d   :  { %8356 = vmatmul.mubr.msk.f32.gmra.mrb[10].mxu1 %vm1249_vm8, %v1645_v7  ;;  %8362 = vmatmul.mubr.msk.f32.vlgmr.msra.gmra.mrb[8].mxu0 %vm1249_vm8, %v11852_v29 }
 0x28e   :  { %1797 = vmatprep.mubr.f32.mxu1 %v14836_v32  ;;  %1898 = vmatprep.mubr.f32.mxu0 %v14836_v32 }
 0x28f   :  { %8857 = vmatpush3.msra.mxu0 %v1582_v19  ;;  %4442 = vperm.xlu0 %9379, %v1684_v59  }
 0x291   :  { %8357 = vmatmul.mubr.msk.f32.gmra.mrb[12].mxu1 %vm1249_vm8, %v1646_v16  ;;  %8363 = vmatmul.mubr.msk.f32.gmra.mrb[10].mxu0 %vm1249_vm8, %v1644_v43 }
 0x292   :  { %1803 = vmatprep.mubr.f32.mxu1 %v14836_v32  ;;  %1904 = vmatprep.mubr.f32.mxu0 %v14836_v32 }
 0x293   :  { %4452 = vperm.xlu0 %9379, %v1686_v26  }
 0x295   :  { %8358 = vmatmul.mubr.msk.f32.gmra.mrb[14].mxu1 %vm1249_vm8, %v1647_v48  ;;  %8364 = vmatmul.mubr.msk.f32.gmra.mrb[12].mxu0 %vm1249_vm8, %v1645_v7 }
 0x296   :  { %1809 = vmatprep.mubr.f32.mxu1 %v14836_v32  ;;  %1910 = vmatprep.mubr.f32.mxu0 %v14836_v32 }
 0x297   :  { %4457 = vperm.xlu0 %9379, %v1687_v24  }
 0x299   :  { %8359 = vmatmul.mubr.msk.f32.gmra.mrb[16].mxu1 %vm1249_vm8, %v1648_v18  ;;  %8365 = vmatmul.mubr.msk.f32.gmra.mrb[14].mxu0 %vm1249_vm8, %v1646_v16 }
 0x29a   :  { %1815 = vmatprep.mubr.f32.mxu1 %v14836_v32  ;;  %8858 = vmatprep.mubr.msk.f32.mxu0 %vm1249_vm8, %v11852_v29 }
 0x29b   :  { %4467 = vperm.xlu0 %9379, %v1689_v57  }
 0x29d   :  { %8360 = vmatmul.mubr.msk.f32.gmra.mrb[18].mxu1 %vm1249_vm8, %v1649_v23  ;;  %8859 = vmatmul.mubr.msk.f32.vlgmr.msra.gmra.mrb[16].mxu0 %vm1249_vm8, %v1644_v43 }
 0x29e   :  { %1821 = vmatprep.mubr.f32.mxu1 %v14836_v32  ;;  %8861 = vmatprep.mubr.msk.f32.mxu0 %vm1249_vm8, %v1645_v7 }
 0x29f   :  { %4472 = vperm.xlu0 %9379, %v1690_v10  }
 0x2a1   :  { %8361 = vmatmul.mubr.msk.f32.gmra.mrb[20].mxu1 %vm1249_vm8, %v1650_v4  ;;  %8862 = vmatmul.mubr.msk.f32.gmra.mrb[18].mxu0 %vm1249_vm8, %v1646_v16 }
 0x2a2   :  { %1916 = vmatprep.mubr.f32.mxu1 %v14836_v32  ;;  %8864 = vmatprep.mubr.msk.f32.mxu0 %vm1249_vm8, %v1647_v48 }
 0x2a3   :  { %4447 = vperm.xlu0 %9379, %v1685_v60  }
 0x2a5   :  { %8366 = vmatmul.mubr.msk.f32.vlgmr.msra.gmra.mrb[22].mxu1 %vm1249_vm8, %v1647_v48  ;;  %8865 = vmatmul.mubr.msk.f32.gmra.mrb[20].mxu0 %vm1249_vm8, %v1648_v18 }
 0x2a6   :  { %1922 = vmatprep.mubr.f32.mxu1 %v14836_v32  ;;  %1942 = vmatpush1.msra.mxu1 %v1580_v46 }
 0x2a7   :  { %8867 = vmatprep.mubr.msk.f32.mxu0 %vm1249_vm8, %v1649_v23  ;;  %4462 = vperm.xlu0 %9379, %v1688_v42  }
 0x2a9   :  { %8367 = vmatmul.mubr.msk.f32.gmra.mrb[24].mxu1 %vm1249_vm8, %v1648_v18  ;;  %8868 = vmatmul.mubr.msk.f32.gmra.mrb[22].mxu0 %vm1249_vm8, %v1650_v4 }
 0x2aa   :  { %1928 = vmatprep.mubr.f32.mxu1 %v14836_v32  ;;  %2360 = vmatprep.mubr.f32.mxu0 %v14836_v32 }
 0x2ad   :  { %8368 = vmatmul.mubr.msk.f32.gmra.mrb[26].mxu1 %vm1249_vm8, %v1649_v23 }
 0x2ae   :  { %1934 = vmatprep.mubr.f32.mxu1 %v14836_v32 }
 0x2b1   :  { %8369 = vmatmul.mubr.msk.f32.gmra.mrb[28].mxu1 %vm1249_vm8, %v1650_v4 }
 0x2b2   :  { %2005 = vmatprep.mubr.f32.mxu1 %v14836_v32 }
 0x2b5   :  { %8370 = vmatmul.mubr.msk.f32.vlgmr.msra.gmra.mrb[30].mxu1 %vm1249_vm8, %v11852_v29 }
 0x2b6   :  { %2011 = vmatprep.mubr.f32.mxu1 %v14836_v32 }
 0x2b9   :  { %8371 = vmatmul.mubr.msk.f32.gmra.mrb[32].mxu1 %vm1249_vm8, %v1644_v43 }
 0x2ba   :  { %2017 = vmatprep.mubr.f32.mxu1 %v14836_v32 }
 0x2bd   :  { %8372 = vmatmul.mubr.msk.f32.gmra.mrb[34].mxu1 %vm1249_vm8, %v1645_v7 }
 0x2be   :  { %2023 = vmatprep.mubr.f32.mxu1 %v14836_v32 }
 0x2c1   :  { %8373 = vmatmul.mubr.msk.f32.gmra.mrb[36].mxu1 %vm1249_vm8, %v1646_v16 }
 0x2c2   :  { %2029 = vmatprep.mubr.f32.mxu1 %v14836_v32 }
 0x2c5   :  { %8374 = vmatmul.mubr.msk.f32.gmra.mrb[38].mxu1 %vm1249_vm8, %v1647_v48 }
 0x2c6   :  { %2035 = vmatprep.mubr.f32.mxu1 %v14836_v32 }
 0x2c9   :  { %8375 = vmatmul.mubr.msk.f32.gmra.mrb[40].mxu1 %vm1249_vm8, %v1648_v18 }
 0x2ca   :  { %2041 = vmatprep.mubr.f32.mxu1 %v14836_v32 }
 0x2cd   :  { %8376 = vmatmul.mubr.msk.f32.gmra.mrb[42].mxu1 %vm1249_vm8, %v1649_v23 }
 0x2ce   :  { %2047 = vmatprep.mubr.f32.mxu1 %v14836_v32 }
 0x2d1   :  { %8377 = vmatmul.mubr.msk.f32.gmra.mrb[44].mxu1 %vm1249_vm8, %v1650_v4 }
 0x2d2   :  { %2247 = vmatprep.mubr.f32.mxu1 %v14836_v32 }
 0x2f5   :  { %v12158_v4 = vpop.permute.xlu0 %2644  ;;  %v12160_v46 = vpop.permute.xlu1 %2649 }
 0x2f9   :  { %v12162_v39 = vpop.permute.xlu0 %2654  ;;  %v12164_v37 = vpop.permute.xlu1 %2664 }
 0x2fd   :  { %v12166_v6 = vpop.permute.xlu0 %2634  ;;  %v12168_v62 = vpop.permute.xlu1 %2629 }
 0x2fe   :  { %15076 = vst [vmem:[#allocation28_spill] sm:$0xff] %v12168_v62 }
 0x303   :  { %v12173_v57 = vpop.permute.xlu0 %2639 }
 0x336   :  { %v1399_v28 = vpop.f32.mrb[0].mxu1 }
 0x337   :  { %v1401_v52 = vpop.f32.mrb[1].mxu1  ;;  %v1564_v25 = vadd.f32 %v1399_v28, %v1235_v63 }
 0x338   :  { %v1565_v49 = vadd.f32 %v1401_v52, %v1236_v31 }
 0x33a   :  { %2296 = vmatprep.subr.mxu0 %v1565_v49  ;;  %v12012_v33 = vpop.f32.mrb[2].mxu1 }
 0x33b   :  { %2297 = vmatpush1.msra.mxu0 %v1564_v25  ;;  %v12014_v11 = vpop.f32.mrb[3].mxu1 }
 0x33c   :  { %8394 = vmatmul.mubr.msk.f32.vlgmr.msra.gmra.mrb[8].mxu0 %vm1249_vm8, %v12010_v13 }
 0x33d   :  { %2366 = vmatprep.mubr.f32.mxu0 %v14836_v32 }
 0x340   :  { %8395 = vmatmul.mubr.msk.f32.gmra.mrb[10].mxu0 %vm1249_vm8, %v12022_v56 }
 0x341   :  { %2372 = vmatprep.mubr.f32.mxu0 %v14836_v32 }
 0x344   :  { %8396 = vmatmul.mubr.msk.f32.gmra.mrb[12].mxu0 %vm1249_vm8, %v12030_v35 }
 0x345   :  { %2378 = vmatprep.mubr.f32.mxu0 %v14836_v32 }
 0x347   :  { %v1322_v22 = vpop.f32.mrb[0].mxu0 }
 0x348   :  { %v1562_v21 = vadd.f32 %v1322_v22, %v1233_v8  ;;  %v1324_v50 = vpop.f32.mrb[1].mxu0  ;;  %8397 = vmatmul.mubr.msk.f32.gmra.mrb[14].mxu0 %vm1249_vm8, %v12044_v41 }
 0x349   :  { %v1563_v30 = vadd.f32 %v1324_v50, %v1234_v0  ;;  %2384 = vmatprep.mubr.f32.mxu0 %v14836_v32 }
 0x34b   :  { %2183 = vmatprep.subr.mxu1 %v1563_v30  ;;  %v12054_v20 = vpop.f32.mrb[2].mxu0 }
 0x34c   :  { %2184 = vmatpush1.msra.mxu1 %v1562_v21  ;;  %v12056_v61 = vpop.f32.mrb[3].mxu0  ;;  %8398 = vmatmul.mubr.msk.f32.gmra.mrb[24].mxu0 %vm1249_vm8, %v12052_v3 }
 0x34d   :  { %8386 = vmatmul.mubr.msk.f32.vlgmr.msra.gmra.mrb[6].mxu1 %vm1249_vm8, %v12010_v13  ;;  %2390 = vmatprep.mubr.f32.mxu0 %v14836_v32 }
 0x34e   :  { %2253 = vmatprep.mubr.f32.mxu1 %v14836_v32 }
 0x350   :  { %8399 = vmatmul.mubr.msk.f32.gmra.mrb[26].mxu0 %vm1249_vm8, %v1640_v5 }
 0x351   :  { %8387 = vmatmul.mubr.msk.f32.gmra.mrb[8].mxu1 %vm1249_vm8, %v12022_v56  ;;  %2396 = vmatprep.mubr.f32.mxu0 %v14836_v32 }
 0x352   :  { %2259 = vmatprep.mubr.f32.mxu1 %v14836_v32 }
 0x354   :  { %v12078_v45 = vpop.f32.mrb[4].mxu1  ;;  %8400 = vmatmul.mubr.msk.f32.gmra.mrb[28].mxu0 %vm1249_vm8, %v1641_v44 }
 0x355   :  { %8388 = vmatmul.mubr.msk.f32.gmra.mrb[10].mxu1 %vm1249_vm8, %v12030_v35  ;;  %v1553_v55 = vpop.f32.mrb[5].mxu1  ;;  %2402 = vmatprep.mubr.f32.mxu0 %v14836_v32 }
 0x356   :  { %v1568_v17 = vadd.f32 %v1553_v55, %v1239_v51  ;;  %2265 = vmatprep.mubr.f32.mxu1 %v14836_v32 }
 0x358   :  { %8870 = vmatprep.subr.mxu0 %v1568_v17  ;;  %v1476_v9 = vpop.f32.mrb[4].mxu0  ;;  %8401 = vmatmul.mubr.msk.f32.gmra.mrb[30].mxu0 %vm1249_vm8, %v1642_v53 }
 0x359   :  { %8389 = vmatmul.mubr.msk.f32.gmra.mrb[12].mxu1 %vm1249_vm8, %v12044_v41  ;;  %v1478_v34 = vpop.f32.mrb[5].mxu0  ;;  %8871 = vmatpush3.msra.mxu0 %v1568_v17  ;;  %v1566_v1 = vadd.f32 %v1476_v9, %v1237_v12 }
 0x35a   :  { %2271 = vmatprep.mubr.f32.mxu1 %v14836_v32  ;;  %v1567_v15 = vadd.f32 %v1478_v34, %v1238_v2  ;;  %8872 = vmatprep.mubr.msk.f32.mxu0 %vm1249_vm8, %v12010_v13 }
 0x35c   :  { %2409 = vmatprep.subr.mxu1 %v1567_v15  ;;  %v12100_v29 = vpop.f32.mrb[6].mxu0  ;;  %8873 = vmatmul.mubr.msk.f32.vlgmr.msra.gmra.mrb[16].mxu0 %vm1249_vm8, %v12022_v56 }
 0x35d   :  { %8390 = vmatmul.mubr.msk.f32.gmra.mrb[14].mxu1 %vm1249_vm8, %v12052_v3  ;;  %v12106_v14 = vpop.f32.mrb[7].mxu0  ;;  %8875 = vmatprep.mubr.msk.f32.mxu0 %vm1249_vm8, %v12030_v35 }
 0x35e   :  { %2277 = vmatprep.mubr.f32.mxu1 %v14836_v32  ;;  %2410 = vmatpush1.msra.mxu1 %v1566_v1 }
 0x360   :  { %8876 = vmatmul.mubr.msk.f32.gmra.mrb[18].mxu0 %vm1249_vm8, %v12044_v41 }
 0x361   :  { %8391 = vmatmul.mubr.msk.f32.gmra.mrb[16].mxu1 %vm1249_vm8, %v1640_v5  ;;  %8878 = vmatprep.mubr.msk.f32.mxu0 %vm1249_vm8, %v12052_v3 }
 0x362   :  { %2283 = vmatprep.mubr.f32.mxu1 %v14836_v32 }
 0x364   :  { %8879 = vmatmul.mubr.msk.f32.gmra.mrb[20].mxu0 %vm1249_vm8, %v1640_v5 }
 0x365   :  { %8392 = vmatmul.mubr.msk.f32.gmra.mrb[18].mxu1 %vm1249_vm8, %v1641_v44  ;;  %8881 = vmatprep.mubr.msk.f32.mxu0 %vm1249_vm8, %v1641_v44 }
 0x366   :  { %2289 = vmatprep.mubr.f32.mxu1 %v14836_v32 }
 0x368   :  { %8882 = vmatmul.mubr.msk.f32.gmra.mrb[22].mxu0 %vm1249_vm8, %v1642_v53 }
 0x369   :  { %8393 = vmatmul.mubr.msk.f32.gmra.mrb[20].mxu1 %vm1249_vm8, %v1642_v53  ;;  %3063 = vmatprep.mubr.f32.mxu0 %v14836_v32 }
 0x36a   :  { %2473 = vmatprep.mubr.f32.mxu1 %v14836_v32 }
 0x36d   :  { %8402 = vmatmul.mubr.msk.f32.vlgmr.msra.gmra.mrb[30].mxu1 %vm1249_vm8, %v12010_v13 }
 0x36e   :  { %2479 = vmatprep.mubr.f32.mxu1 %v14836_v32 }
 0x371   :  { %8403 = vmatmul.mubr.msk.f32.gmra.mrb[32].mxu1 %vm1249_vm8, %v12022_v56 }
 0x372   :  { %2485 = vmatprep.mubr.f32.mxu1 %v14836_v32 }
 0x375   :  { %8404 = vmatmul.mubr.msk.f32.gmra.mrb[34].mxu1 %vm1249_vm8, %v12030_v35 }
 0x376   :  { %2491 = vmatprep.mubr.f32.mxu1 %v14836_v32 }
 0x378   :  { %v1918_v47 = vpop.f32.mrb[22].mxu1 }
 0x379   :  { %8405 = vmatmul.mubr.msk.f32.gmra.mrb[36].mxu1 %vm1249_vm8, %v12044_v41  ;;  %v1920_v43 = vpop.f32.mrb[23].mxu1 }
 0x37a   :  { %2497 = vmatprep.mubr.f32.mxu1 %v14836_v32 }
 0x37c   :  { %v12137_v19 = vpop.f32.mrb[24].mxu1 }
 0x37d   :  { %8406 = vmatmul.mubr.msk.f32.gmra.mrb[38].mxu1 %vm1249_vm8, %v12052_v3  ;;  %v12141_v7 = vpop.f32.mrb[25].mxu1 }
 0x37e   :  { %2503 = vmatprep.mubr.f32.mxu1 %v14836_v32 }
 0x380   :  { %v12144_v16 = vpop.f32.mrb[26].mxu1 }
 0x381   :  { %8407 = vmatmul.mubr.msk.f32.gmra.mrb[40].mxu1 %vm1249_vm8, %v1640_v5  ;;  %v12147_v48 = vpop.f32.mrb[27].mxu1 }
 0x382   :  { %2509 = vmatprep.mubr.f32.mxu1 %v14836_v32 }
 0x384   :  { %v12150_v18 = vpop.f32.mrb[28].mxu1 }
 0x385   :  { %8408 = vmatmul.mubr.msk.f32.gmra.mrb[42].mxu1 %vm1249_vm8, %v1641_v44  ;;  %v12153_v23 = vpop.f32.mrb[29].mxu1 }
 0x386   :  { %2515 = vmatprep.mubr.f32.mxu1 %v14836_v32 }
 0x389   :  { %8409 = vmatmul.mubr.msk.f32.gmra.mrb[44].mxu1 %vm1249_vm8, %v1642_v53 }
 0x38a   :  { %3176 = vmatprep.mubr.f32.mxu1 %v14836_v32 }
 0x40f   :  { %v2362_v38 = vpop.f32.mrb[8].mxu0 }
 0x410   :  { %v2364_v40 = vpop.f32.mrb[9].mxu0  ;;  %v2669_v54 = vadd.f32 %v12168_v62, %v2362_v38 }
 0x411   :  { %v2670_v58 = vadd.f32 %v12168_v62, %v2364_v40 }
 0x412   :  { %v2725_v60 = vmul.f32 0.5, %v2669_v54 }
 0x413   :  { %v2368_v36 = vpop.f32.mrb[10].mxu0  ;;  %v2726_v63 = vmul.f32 0.5, %v2670_v58 }
 0x414   :  { %v2370_v27 = vpop.f32.mrb[11].mxu0  ;;  %v2676_v24 = vadd.f32 %v12166_v6, %v2368_v36  ;;  %9381 = vtanh.f32 %v2725_v60 }
 0x415   :  { %v2677_v10 = vadd.f32 %v12166_v6, %v2370_v27  ;;  %9383 = vtanh.f32 %v2726_v63 }
 0x416   :  { %v2732_v52 = vmul.f32 0.5, %v2676_v24 }
 0x417   :  { %v2374_v59 = vpop.f32.mrb[12].mxu0  ;;  %v2733_v25 = vmul.f32 0.5, %v2677_v10 }
 0x418   :  { %v2376_v26 = vpop.f32.mrb[13].mxu0  ;;  %v2683_v42 = vadd.f32 %v12173_v57, %v2374_v59  ;;  %9385 = vtanh.f32 %v2732_v52 }
 0x419   :  { %v2684_v49 = vadd.f32 %v12173_v57, %v2376_v26  ;;  %9387 = vtanh.f32 %v2733_v25 }
 0x41a   :  { %v2739_v13 = vmul.f32 0.5, %v2683_v42 }
 0x41b   :  { %v2380_v31 = vpop.f32.mrb[14].mxu0  ;;  %v2740_v50 = vmul.f32 0.5, %v2684_v49 }
 0x41c   :  { %v2382_v28 = vpop.f32.mrb[15].mxu0  ;;  %v2690_v56 = vadd.f32 %v12158_v4, %v2380_v31  ;;  %9389 = vtanh.f32 %v2739_v13 }
 0x41d   :  { %v2691_v0 = vadd.f32 %v12158_v4, %v2382_v28  ;;  %9391 = vtanh.f32 %v2740_v50 }
 0x41e   :  { %v2746_v44 = vmul.f32 0.5, %v2690_v56  ;;  %v9382_v24 = vpop.eup %9381 }
 0x41f   :  { %v2386_v8 = vpop.f32.mrb[24].mxu0  ;;  %v2747_v53 = vmul.f32 0.5, %v2691_v0  ;;  %v9384_v42 = vpop.eup %9383 }
 0x420   :  { %v2249_v35 = vpop.f32.mrb[6].mxu1  ;;  %v2387_v41 = vadd.f32 %v2386_v8, %v1918_v47  ;;  %v2388_v21 = vpop.f32.mrb[25].mxu0 }
 0x421   :  { %v2251_v22 = vpop.f32.mrb[7].mxu1  ;;  %v2389_v30 = vadd.f32 %v2388_v21, %v1920_v43  ;;  %v2667_v3 = vadd.f32 %v12168_v62, %v2249_v35 }
 0x422   :  { %v2697_v5 = vadd.f32 %v12160_v46, %v2387_v41  ;;  %v2668_v12 = vadd.f32 %v12168_v62, %v2251_v22  ;;  %v12194_v52 = vpop.eup %9385 }
 0x423   :  { %v2698_v51 = vadd.f32 %v12160_v46, %v2389_v30  ;;  %v2392_v17 = vpop.f32.mrb[26].mxu0  ;;  %v2723_v43 = vmul.f32 0.5, %v2667_v3  ;;  %v9388_v35 = vpop.eup %9387 }
 0x424   :  { %v2255_v55 = vpop.f32.mrb[8].mxu1  ;;  %v2753_v2 = vmul.f32 0.5, %v2697_v5  ;;  %v2394_v15 = vpop.f32.mrb[27].mxu0  ;;  %v2393_v47 = vadd.f32 %v2392_v17, %v12137_v19  ;;  %v2724_v59 = vmul.f32 0.5, %v2668_v12  ;;  %v2817_v5 = vmul.f32 0.5, %v9388_v35 }
 0x425   :  { %v2674_v9 = vadd.f32 %v12166_v6, %v2255_v55  ;;  %v2257_v34 = vpop.f32.mrb[9].mxu1  ;;  %v2754_v1 = vmul.f32 0.5, %v2698_v51  ;;  %v2395_v60 = vadd.f32 %v2394_v15, %v12141_v7 }
 0x426   :  { %9393 = vtanh.f32 %v2753_v2  ;;  %v2675_v38 = vadd.f32 %v12166_v6, %v2257_v34  ;;  %v2704_v36 = vadd.f32 %v12162_v39, %v2393_v47  ;;  %v12198_v41 = vpop.eup %9389  ;;  %v2810_v34 = vmul.f32 0.5, %v9384_v42 }
 0x427   :  { %9395 = vtanh.f32 %v2746_v44  ;;  %v2730_v40 = vmul.f32 0.5, %v2674_v9  ;;  %v2398_v54 = vpop.f32.mrb[28].mxu0  ;;  %v2705_v49 = vadd.f32 %v12162_v39, %v2395_v60  ;;  %v12205_v3 = vpop.eup %9391 }
 0x428   :  { %v2261_v27 = vpop.f32.mrb[10].mxu1  ;;  %9397 = vtanh.f32 %v2747_v53  ;;  %v2400_v26 = vpop.f32.mrb[29].mxu0  ;;  %v2731_v10 = vmul.f32 0.5, %v2675_v38  ;;  %v2760_v31 = vmul.f32 0.5, %v2704_v36  ;;  %v12191_v63 = vadd.f32 %v2398_v54, %v12144_v16 }
 0x429   :  { %v2263_v58 = vpop.f32.mrb[11].mxu1  ;;  %9399 = vtanh.f32 %v2754_v1  ;;  %v2681_v19 = vadd.f32 %v12173_v57, %v2261_v27  ;;  %v2401_v7 = vadd.f32 %v2400_v26, %v12147_v48  ;;  %v12200_v16 = vpop.permute.xlu1 %2659  ;;  %v2761_v44 = vmul.f32 0.5, %v2705_v49  ;;  %v12217_v26 = vld [vmem:[%s14745_s2 + $0x88] sm:$0xff] }
 0x42a   :  { %9401 = vtanh.f32 %v2723_v43  ;;  %v2682_v28 = vadd.f32 %v12173_v57, %v2263_v58  ;;  %v12212_v58 = vmul.f32 0.5, %v9382_v24 }
 0x42b   :  { %9403 = vtanh.f32 %v2730_v40  ;;  %v2737_v25 = vmul.f32 0.5, %v2681_v19  ;;  %v2404_v56 = vpop.f32.mrb[30].mxu0  ;;  %v2712_v30 = vadd.f32 %v12200_v16, %v2401_v7  ;;  %v2859_v40 = vadd.f32 0.5, %v2817_v5 }
 0x42c   :  { %v2267_v13 = vpop.f32.mrb[12].mxu1  ;;  %9405 = vtanh.f32 %v2724_v59  ;;  %v2406_v0 = vpop.f32.mrb[31].mxu0  ;;  %v2738_v22 = vmul.f32 0.5, %v2682_v28  ;;  %v2405_v50 = vadd.f32 %v2404_v56, %v12150_v18  ;;  %v2852_v28 = vadd.f32 0.5, %v2810_v34 }
 0x42d   :  { %v2269_v8 = vpop.f32.mrb[13].mxu1  ;;  %9407 = vtanh.f32 %v2731_v10  ;;  %v2688_v21 = vadd.f32 %v12158_v4, %v2267_v13  ;;  %v2407_v53 = vadd.f32 %v2406_v0, %v12153_v23  ;;  %v2908_v0 = vmul.f32 %v12217_v26, %v2859_v40 }
 0x42e   :  { %9409 = vtanh.f32 %v2760_v31  ;;  %v2718_v48 = vadd.f32 %v12164_v37, %v2405_v50  ;;  %v2689_v47 = vadd.f32 %v12158_v4, %v2269_v8 }
 0x42f   :  { %9411 = vtanh.f32 %v2737_v25  ;;  %v8874_v55 = vpop.f32.mrb[16].mxu0  ;;  %v2744_v15 = vmul.f32 0.5, %v2688_v21  ;;  %v2719_v43 = vadd.f32 %v12164_v37, %v2407_v53 }
 0x430   :  { %v2273_v51 = vpop.f32.mrb[14].mxu1  ;;  %v9394_v17 = vpop.eup %9393  ;;  %9413 = vtanh.f32 %v2712_v30  ;;  %v2680_v10 = vadd.f32 %v8874_v55, %v12166_v6  ;;  %v2745_v56 = vmul.f32 0.5, %v2689_v47 }
 0x431   :  { %v2695_v2 = vadd.f32 %v12160_v46, %v2273_v51  ;;  %v2275_v12 = vpop.f32.mrb[15].mxu1  ;;  %v2588_v18 = vpop.f32.mrb[17].mxu0  ;;  %9415 = vtanh.f32 %v2738_v22  ;;  %v2837_v36 = vmul.f32 0.5, %v9394_v17 }
 0x432   :  { %v9396_v9 = vpop.eup %9395  ;;  %9417 = vtanh.f32 %v2718_v48  ;;  %v2696_v60 = vadd.f32 %v12160_v46, %v2275_v12  ;;  %v2736_v35 = vmul.f32 0.5, %v2680_v10  ;;  %v2673_v21 = vadd.f32 %v12168_v62, %v2588_v18  ;;  %v12234_v18 = vld [vmem:[%s14745_s2 + $0x80] sm:$0xff] }
 0x433   :  { %v9398_v1 = vpop.eup %9397  ;;  %9419 = vtanh.f32 %v2761_v44  ;;  %v2751_v27 = vmul.f32 0.5, %v2695_v2  ;;  %v8877_v54 = vpop.f32.mrb[18].mxu0  ;;  %v2830_v49 = vmul.f32 0.5, %v9396_v9  ;;  %v2879_v22 = vadd.f32 0.5, %v2837_v36 }
 0x434   :  { %v9400_v38 = vpop.eup %9399  ;;  %v2279_v23 = vpop.f32.mrb[16].mxu1  ;;  %9421 = vtanh.f32 %v2719_v43  ;;  %v2831_v25 = vmul.f32 0.5, %v9398_v1  ;;  %v2752_v7 = vmul.f32 0.5, %v2696_v60  ;;  %v2694_v51 = vadd.f32 %v8877_v54, %v12158_v4 }
 0x435   :  { %v9402_v59 = vpop.eup %9401  ;;  %v2281_v19 = vpop.f32.mrb[17].mxu1  ;;  %9423 = vtanh.f32 %v2744_v15  ;;  %v2838_v13 = vmul.f32 0.5, %v9400_v38  ;;  %v2702_v48 = vadd.f32 %v12162_v39, %v2279_v23  ;;  %v2872_v2 = vadd.f32 0.5, %v2830_v49 }
 0x436   :  { %v12221_v42 = vpop.f32.mrb[19].mxu0  ;;  %v9404_v31 = vpop.eup %9403  ;;  %9425 = vtanh.f32 %v2751_v27  ;;  %v2873_v12 = vadd.f32 0.5, %v2831_v25  ;;  %v2807_v9 = vmul.f32 0.5, %v9402_v59  ;;  %v2750_v47 = vmul.f32 0.5, %v2694_v51 }
 0x437   :  { %v9406_v24 = vpop.eup %9405  ;;  %v12225_v30 = vpop.f32.mrb[20].mxu0  ;;  %v2814_v44 = vmul.f32 0.5, %v9404_v31  ;;  %9427 = vtanh.f32 %v2736_v35  ;;  %v2880_v1 = vadd.f32 0.5, %v2838_v13  ;;  %v2942_v38 = vmul.f32 %v12234_v18, %v2879_v22 }
 0x438   :  { %v9408_v8 = vpop.eup %9407  ;;  %v2285_v50 = vpop.f32.mrb[18].mxu1  ;;  %9429 = vtanh.f32 %v2752_v7  ;;  %v2808_v15 = vmul.f32 0.5, %v9406_v24  ;;  %v2729_v36 = vmul.f32 0.5, %v2673_v21  ;;  %v2703_v27 = vadd.f32 %v12162_v39, %v2281_v19 }
 0x439   :  { %v9410_v5 = vpop.eup %9409  ;;  %v2287_v55 = vpop.f32.mrb[19].mxu1  ;;  %9431 = vtanh.f32 %v2745_v56  ;;  %v2856_v10 = vadd.f32 0.5, %v2814_v44  ;;  %v2815_v60 = vmul.f32 0.5, %v9408_v8  ;;  %v2758_v31 = vmul.f32 0.5, %v2702_v48  ;;  %v12246_v56 = vld [vmem:[%s14745_s2 + $0x70] sm:$0xff] }
 0x43a   :  { %v2608_v17 = vpop.f32.mrb[21].mxu0  ;;  %v12229_v53 = vpop.eup %9411  ;;  %v2709_v49 = vadd.f32 %v12200_v16, %v2285_v50  ;;  %9433 = vtanh.f32 %v2750_v47  ;;  %v2759_v35 = vmul.f32 0.5, %v2703_v27  ;;  %v2849_v22 = vadd.f32 0.5, %v2807_v9 }
 0x43b   :  { %v9414_v34 = vpop.eup %9413  ;;  %v8883_v54 = vpop.f32.mrb[22].mxu0  ;;  %v12250_v8 = vadd.f32 0.5, %v2808_v15  ;;  %v2943_v21 = vmul.f32 %v12217_v26, %v2880_v1  ;;  %v2844_v44 = vmul.f32 0.5, %v9410_v5  ;;  %v2710_v9 = vadd.f32 %v12200_v16, %v2287_v55 }
 0x43c   :  { %v12236_v43 = vpop.eup %9415  ;;  %v2915_v40 = vmul.f32 %v9414_v34, %v2852_v28  ;;  %v2291_v23 = vpop.f32.mrb[20].mxu1  ;;  %9435 = vtanh.f32 %v2709_v49  ;;  %v2701_v5 = vadd.f32 %v12160_v46, %v2608_v17  ;;  %v8313_v17 = vld [vmem:[%s14745_s2 + $0x78] sm:$0xff] }
 0x43d   :  { %v9418_v59 = vpop.eup %9417  ;;  %v2293_v25 = vpop.f32.mrb[21].mxu1  ;;  %9437 = vtanh.f32 %v2729_v36  ;;  %v2722_v36 = vadd.f32 %v8883_v54, %v12164_v37 }
 0x43e   :  { %v2618_v24 = vpop.f32.mrb[23].mxu0  ;;  %v12241_v13 = vpop.eup %9419  ;;  %v12248_v28 = vadd.f32 %v2915_v40, %v2908_v0  ;;  %v2949_v19 = vmul.f32 %v9418_v59, %v2872_v2  ;;  %v2905_v0 = vmul.f32 %v12246_v56, %v2856_v10  ;;  %9439 = vtanh.f32 %v2758_v31 }
 0x43f   :  { %v9422_v7 = vpop.eup %9421  ;;  %v2687_v2 = vadd.f32 %v12173_v57, %v12221_v42  ;;  %v2857_v40 = vadd.f32 0.5, %v2815_v60  ;;  %9441 = vtanh.f32 %v2759_v35  ;;  %v2708_v42 = vadd.f32 %v12225_v30, %v12162_v39 }
 0x440   :  { %v9424_v50 = vpop.eup %9423  ;;  %v12253_v48 = vadd.f32 %v2949_v19, %v2942_v38  ;;  %v2950_v51 = vmul.f32 %v9422_v7, %v2873_v12  ;;  %v2475_v34 = vpop.f32.mrb[30].mxu1  ;;  %9443 = vtanh.f32 %v2710_v9  ;;  %v2716_v38 = vadd.f32 %v12164_v37, %v2291_v23 }
 0x441   :  { %v2477_v15 = vpop.f32.mrb[31].mxu1  ;;  %v9426_v47 = vpop.eup %9425  ;;  %v2828_v12 = vmul.f32 0.5, %v9424_v50  ;;  %v2757_v55 = vmul.f32 0.5, %v2701_v5  ;;  %v2717_v59 = vadd.f32 %v12164_v37, %v2293_v25  ;;  %v2743_v49 = vmul.f32 0.5, %v2687_v2 }
 0x442   :  { %v12259_v26 = vadd.f32 %v2950_v51, %v2943_v21  ;;  %v9428_v1 = vpop.eup %9427  ;;  %9445 = vtanh.f32 %v12253_v48  ;;  %v2835_v31 = vmul.f32 0.5, %v9426_v47  ;;  %v2715_v23 = vadd.f32 %v12200_v16, %v2618_v24 }
 0x443   :  { %v9430_v27 = vpop.eup %9429  ;;  %9447 = vtanh.f32 %v2716_v38  ;;  %v2820_v19 = vmul.f32 0.5, %v9428_v1  ;;  %v2671_v35 = vadd.f32 %v12168_v62, %v2475_v34  ;;  %v2672_v30 = vadd.f32 %v12168_v62, %v2477_v15 }
 0x444   :  { %v2481_v10 = vpop.f32.mrb[32].mxu1  ;;  %v9432_v60 = vpop.eup %9431  ;;  %9449 = vtanh.f32 %v2757_v55  ;;  %v12274_v7 = vadd.f32 0.5, %v2844_v44  ;;  %v2836_v25 = vmul.f32 0.5, %v9430_v27  ;;  %v2906_v51 = vmul.f32 %v8313_v17, %v2857_v40  ;;  %v8318_v40 = vld [vmem:[%s14745_s2 + $0xa0] sm:$0xff] }
 0x445   :  { %v2483_v54 = vpop.f32.mrb[33].mxu1  ;;  %9451 = vtanh.f32 %v2722_v36  ;;  %v2678_v21 = vadd.f32 %v12166_v6, %v2481_v10  ;;  %v9434_v50 = vpop.eup %9433  ;;  %v2829_v9 = vmul.f32 0.5, %v9432_v60  ;;  %v2764_v2 = vmul.f32 0.5, %v2708_v42 }
 0x446   :  { %9453 = vtanh.f32 %v2717_v59  ;;  %v9436_v24 = vpop.eup %9435  ;;  %v2870_v5 = vadd.f32 0.5, %v2828_v12  ;;  %v2877_v1 = vadd.f32 0.5, %v2835_v31  ;;  %v2727_v38 = vmul.f32 0.5, %v2671_v35 }
 0x447   :  { %9455 = vtanh.f32 %v2715_v23  ;;  %v9438_v55 = vpop.eup %9437  ;;  %v2862_v15 = vadd.f32 0.5, %v2820_v19  ;;  %v2912_v44 = vmul.f32 %v9436_v24, %v2849_v22  ;;  %v2728_v27 = vmul.f32 0.5, %v2672_v30 }
 0x448   :  { %v2487_v47 = vpop.f32.mrb[34].mxu1  ;;  %9457 = vtanh.f32 %v2743_v49  ;;  %v12277_v36 = vpop.eup %9439  ;;  %v2878_v42 = vadd.f32 0.5, %v2836_v25  ;;  %v2834_v59 = vmul.f32 0.5, %v9434_v50  ;;  %v2734_v10 = vmul.f32 0.5, %v2678_v21 }
 0x449   :  { %v2489_v34 = vpop.f32.mrb[35].mxu1  ;;  %v2679_v12 = vadd.f32 %v12166_v6, %v2483_v54  ;;  %v12283_v60 = vpop.eup %9441  ;;  %v2871_v31 = vadd.f32 0.5, %v2829_v9  ;;  %v2919_v23 = vadd.f32 %v2912_v44, %v2905_v0  ;;  %9459 = vtanh.f32 %v2764_v2 }
 0x44a   :  { %v2685_v49 = vadd.f32 %v12173_v57, %v2487_v47  ;;  %v9444_v19 = vpop.eup %9443  ;;  %v2940_v35 = vmul.f32 %v12246_v56, %v2877_v1  ;;  %v2813_v30 = vmul.f32 0.5, %v9438_v55  ;;  %9461 = vtanh.f32 %v2727_v38 }
 0x44b   :  { %v2735_v24 = vmul.f32 0.5, %v2679_v12  ;;  %v2911_v50 = vmul.f32 %v8318_v40, %v2862_v15  ;;  %v2913_v21 = vmul.f32 %v9444_v19, %v12250_v8  ;;  %9463 = vtanh.f32 %v2728_v27 }
 0x44c   :  { %v2493_v22 = vpop.f32.mrb[36].mxu1  ;;  %v9446_v25 = vpop.eup %9445  ;;  %v2741_v54 = vmul.f32 0.5, %v2685_v49  ;;  %v2941_v9 = vmul.f32 %v8313_v17, %v2878_v42  ;;  %v2876_v0 = vadd.f32 0.5, %v2834_v59  ;;  %9465 = vtanh.f32 %v2734_v10 }
 0x44d   :  { %v2495_v32 = vpop.f32.mrb[37].mxu1  ;;  %v9448_v62 = vpop.eup %9447  ;;  %v2692_v2 = vadd.f32 %v12158_v4, %v2493_v22  ;;  %9467 = vtanh.f32 %v2919_v23  ;;  %v12289_v44 = vadd.f32 %v2913_v21, %v2906_v51  ;;  %v2855_v15 = vadd.f32 0.5, %v2813_v30 }
 0x44e   :  { %v9450_v47 = vpop.eup %9449  ;;  %v2947_v56 = vmul.f32 %v9448_v62, %v2870_v5  ;;  %v2693_v1 = vadd.f32 %v12158_v4, %v2495_v32  ;;  %9469 = vtanh.f32 %v2735_v24  ;;  %v2686_v59 = vadd.f32 %v12173_v57, %v2489_v34 }
 0x44f   :  { %v9452_v55 = vpop.eup %9451  ;;  %v2841_v12 = vmul.f32 0.5, %v9450_v47  ;;  %v2748_v8 = vmul.f32 0.5, %v2692_v2  ;;  %9471 = vtanh.f32 %v2741_v54  ;;  %v12294_v62 = vmul.f32 %v9446_v25, %v12274_v7 }
 0x450   :  { %v2499_v38 = vpop.f32.mrb[38].mxu1  ;;  %v9454_v49 = vpop.eup %9453  ;;  %v2954_v17 = vadd.f32 %v2947_v56, %v2940_v35  ;;  %v2953_v42 = vmul.f32 %v9452_v55, %v2876_v0  ;;  %v2749_v19 = vmul.f32 0.5, %v2693_v1  ;;  %v2816_v21 = vmul.f32 0.5, %v12194_v52 }
 0x451   :  { %v2501_v27 = vpop.f32.mrb[39].mxu1  ;;  %v9456_v10 = vpop.eup %9455  ;;  %v2883_v22 = vadd.f32 0.5, %v2841_v12  ;;  %v2948_v51 = vmul.f32 %v9454_v49, %v2871_v31  ;;  %v2699_v24 = vadd.f32 %v12160_v46, %v2499_v38  ;;  %v2842_v47 = vmul.f32 0.5, %v12277_v36 }
 0x452   :  { %v12296_v32 = vpop.eup %9457  ;;  %9473 = vtanh.f32 %v2954_v17  ;;  %v12298_v5 = vmul.f32 %v2954_v17, %v2919_v23  ;;  %v2918_v30 = vmul.f32 %v9456_v10, %v2855_v15  ;;  %v2700_v25 = vadd.f32 %v12160_v46, %v2501_v27 }
 0x453   :  { %v2946_v54 = vmul.f32 %v8318_v40, %v2883_v22  ;;  %v2955_v34 = vadd.f32 %v2948_v51, %v2941_v9  ;;  %9475 = vtanh.f32 %v2748_v8  ;;  %v9460_v31 = vpop.eup %9459  ;;  %v2755_v7 = vmul.f32 0.5, %v2699_v24 }
 0x454   :  { %v2505_v35 = vpop.f32.mrb[40].mxu1  ;;  %v12302_v2 = vadd.f32 %v2918_v30, %v2911_v50  ;;  %9477 = vtanh.f32 %v12259_v26  ;;  %v9462_v23 = vpop.eup %9461  ;;  %v2742_v40 = vmul.f32 0.5, %v2686_v59  ;;  %v2756_v9 = vmul.f32 0.5, %v2700_v25 }
 0x455   :  { %v2507_v0 = vpop.f32.mrb[41].mxu1  ;;  %v2960_v56 = vadd.f32 %v2953_v42, %v2946_v54  ;;  %v12308_v1 = vmul.f32 %v2955_v34, %v12289_v44  ;;  %9479 = vtanh.f32 %v2749_v19  ;;  %v9464_v52 = vpop.eup %9463  ;;  %v2706_v50 = vadd.f32 %v12162_v39, %v2505_v35 }
 0x456   :  { %9481 = vtanh.f32 %v2755_v7  ;;  %v9466_v55 = vpop.eup %9465  ;;  %v2845_v36 = vmul.f32 0.5, %v12241_v13  ;;  %v12316_v17 = vadd.f32 0.5, %v12212_v58  ;;  %v2858_v10 = vadd.f32 0.5, %v2816_v21 }
 0x457   :  { %9483 = vtanh.f32 %v2955_v34  ;;  %v12312_v8 = vpop.eup %9467  ;;  %v2762_v27 = vmul.f32 0.5, %v2706_v50  ;;  %v2821_v22 = vmul.f32 0.5, %v12229_v53  ;;  %v2884_v51 = vadd.f32 0.5, %v2842_v47 }
 0x458   :  { %v2511_v38 = vpop.f32.mrb[42].mxu1  ;;  %9485 = vtanh.f32 %v2756_v9  ;;  %v9470_v49 = vpop.eup %9469  ;;  %v2843_v30 = vmul.f32 0.5, %v12283_v60  ;;  %v2818_v13 = vmul.f32 0.5, %v9466_v55  ;;  %v2887_v54 = vadd.f32 0.5, %v2845_v36 }
 0x459   :  { %v2713_v15 = vadd.f32 %v12200_v16, %v2511_v38  ;;  %v2513_v12 = vpop.f32.mrb[43].mxu1  ;;  %v12319_v59 = vpop.eup %9471  ;;  %v2707_v34 = vadd.f32 %v12162_v39, %v2507_v0  ;;  %v2711_v21 = vadd.f32 %v12200_v16, %v12191_v63  ;;  %v12330_v60 = vmul.f32 %v12259_v26, %v12248_v28 }
 0x45a   :  { %v2714_v42 = vadd.f32 %v12200_v16, %v2513_v12  ;;  %v2811_v9 = vmul.f32 0.5, %v9462_v23  ;;  %v12336_v0 = vmul.f32 %v2960_v56, %v12302_v2  ;;  %v2860_v63 = vadd.f32 0.5, %v2818_v13  ;;  %v12346_v23 = vld [vmem:[%s14750_s7] sm:$0xff] }
 0x45b   :  { %9487 = vtanh.f32 %v2713_v15  ;;  %v2819_v38 = vmul.f32 0.5, %v9470_v49  ;;  %v2863_v12 = vadd.f32 0.5, %v2821_v22  ;;  %v2885_v36 = vadd.f32 0.5, %v2843_v30 }
 0x45c   :  { %9489 = vtanh.f32 %v2742_v40  ;;  %v2517_v19 = vpop.f32.mrb[44].mxu1  ;;  %v9474_v58 = vpop.eup %9473  ;;  %v12333_v40 = vmul.f32 %v12234_v18, %v2858_v10  ;;  %v2848_v26 = vmul.f32 0.5, %v9460_v31  ;;  %v8316_v18 = vld [vmem:[%s14745_s2 + $0x90] sm:$0xff]  ;;  %v2853_v31 = vadd.f32 0.5, %v2811_v9 }
 0x45d   :  { %9491 = vtanh.f32 %v2762_v27  ;;  %v2720_v24 = vadd.f32 %v12164_v37, %v2517_v19  ;;  %v2519_v35 = vpop.f32.mrb[45].mxu1  ;;  %v9476_v7 = vpop.eup %9475  ;;  %v2968_v25 = vmul.f32 %v9474_v58, %v2884_v51  ;;  %v2812_v27 = vmul.f32 0.5, %v9464_v52 }
 0x45e   :  { %9493 = vtanh.f32 %v2714_v42  ;;  %v2721_v53 = vadd.f32 %v12164_v37, %v2519_v35  ;;  %v9478_v47 = vpop.eup %9477  ;;  %v2763_v42 = vmul.f32 0.5, %v2707_v34  ;;  %v2832_v22 = vmul.f32 0.5, %v9476_v7 }
 0x45f   :  { %9495 = vtanh.f32 %v2720_v24  ;;  %v9480_v50 = vpop.eup %9479  ;;  %v12338_v55 = vmul.f32 %v9478_v47, %v2887_v54  ;;  %v2909_v30 = vmul.f32 %v8316_v18, %v2860_v63  ;;  %v2861_v13 = vadd.f32 0.5, %v2819_v38  ;;  %v8317_v24 = vld [vmem:[%s14745_s2 + $0x98] sm:$0xff] }
 0x460   :  { %9497 = vtanh.f32 %v2960_v56  ;;  %v9482_v15 = vpop.eup %9481  ;;  %v2833_v35 = vmul.f32 0.5, %v9480_v50  ;;  %v15077_v54 = vmov 0.0   ;;  %v2824_v7 = vmul.f32 0.5, %v12205_v3 }
 0x461   :  { %9499 = vtanh.f32 %v2721_v53  ;;  %v9484_v56 = vpop.eup %9483  ;;  %3112 = vmatprep.subr.mxu1 %v12338_v55  ;;  %v2839_v49 = vmul.f32 0.5, %v9482_v15  ;;  %v2822_v53 = vmul.f32 0.5, %v12236_v43  ;;  %v2854_v47 = vadd.f32 0.5, %v2812_v27  ;;  %v12393_v27 = vld [vmem:[%s14754_s11 + $0x40] ss:$0 sm:$0xff] }
 0x462   :  { %9501 = vtanh.f32 %v12248_v28  ;;  %v9486_v10 = vpop.eup %9485  ;;  %3113 = vmatpush1.msra.mxu1 %v12294_v62  ;;  %v12351_v51 = vmul.f32 %v9484_v56, %v2885_v36  ;;  %v2874_v50 = vadd.f32 0.5, %v2832_v22  ;;  %v2827_v43 = vmul.f32 0.5, %v12296_v32  ;;  %v12399_v32 = vld [vmem:[%s14750_s7 + $0x10] sm:$0xff] }
 0x463   :  { %9503 = vtanh.f32 %v2711_v21  ;;  %8426 = vmatmul.mubr.msk.f32.vlgmr.msra.gmra.mrb[46].mxu1 %vm1249_vm8, %v12346_v23  ;;  %v2840_v28 = vmul.f32 0.5, %v9486_v10  ;;  %v2881_v58 = vadd.f32 0.5, %v2839_v49  ;;  %v2910_v36 = vmul.f32 %v8317_v24, %v2861_v13 }
 0x464   :  { %9505 = vtanh.f32 %v12302_v2  ;;  %3182 = vmatprep.mubr.f32.mxu1 %v15077_v54  ;;  %v12366_v2 = vld [vmem:[%s14750_s7 + $0x8] sm:$0xff]  ;;  %2999 = vmatprep.subr.mxu0 %v12351_v51 }
 0x465   :  { %v9488_v19 = vpop.eup %9487  ;;  %9507 = vtanh.f32 %v12289_v44  ;;  %v12370_v44 = vmul.f32 %v12312_v8, %v2863_v12  ;;  %3000 = vmatpush1.msra.mxu0 %v2968_v25  ;;  %v2882_v63 = vadd.f32 0.5, %v2840_v28  ;;  %v12381_v8 = vld [vmem:[%s14754_s11 + $0x38] ss:$0 sm:$0xff]  ;;  %v2890_v12 = vadd.f32 0.5, %v2848_v26 }
 0x466   :  { %v12357_v52 = vpop.eup %9489  ;;  %v2916_v34 = vmul.f32 %v9488_v19, %v2853_v31  ;;  %9509 = vtanh.f32 %v2763_v42  ;;  %8418 = vmatmul.mubr.msk.f32.vlgmr.msra.gmra.mrb[32].mxu0 %vm1249_vm8, %v12346_v23  ;;  %v2875_v42 = vadd.f32 0.5, %v2833_v35  ;;  %v2866_v31 = vadd.f32 0.5, %v2824_v7 }
 0x467   :  { %v12372_v21 = vpop.eup %9491  ;;  %v12384_v15 = vmul.f32 %v2968_v25, %v12370_v44  ;;  %8427 = vmatmul.mubr.msk.f32.gmra.mrb[48].mxu1 %vm1249_vm8, %v12366_v2  ;;  %3069 = vmatprep.mubr.f32.mxu0 %v15077_v54  ;;  %v2944_v25 = vmul.f32 %v8316_v18, %v2881_v58  ;;  %v2945_v28 = vmul.f32 %v8317_v24, %v2882_v63  ;;  %v2869_v7 = vadd.f32 0.5, %v2827_v43  ;;  %v12417_v24 = vld [vmem:[%s14750_s7 + $0x18] sm:$0xff] }
 0x468   :  { %v9494_v9 = vpop.eup %9493  ;;  %v2923_v38 = vadd.f32 %v2916_v34, %v2909_v30  ;;  %3188 = vmatprep.mubr.f32.mxu1 %v15077_v54  ;;  %v12403_v30 = vmul.f32 %v12381_v8, %v12298_v5  ;;  %v12409_v58 = vmul.f32 %v12393_v27, %v12308_v1 }
 0x469   :  { %v9496_v3 = vpop.eup %9495  ;;  %v2917_v56 = vmul.f32 %v9494_v9, %v2854_v47  ;;  %v2864_v47 = vadd.f32 0.5, %v2822_v53 }
 0x46a   :  { %v9498_v49 = vpop.eup %9497  ;;  %9511 = vtanh.f32 %v2923_v38  ;;  %v2951_v26 = vmul.f32 %v9496_v3, %v2874_v50  ;;  %8419 = vmatmul.mubr.msk.f32.gmra.mrb[34].mxu0 %vm1249_vm8, %v12366_v2  ;;  %v2825_v3 = vmul.f32 0.5, %v12319_v59 }
 0x46b   :  { %v9500_v10 = vpop.eup %9499  ;;  %v2974_v22 = vmul.f32 %v9498_v49, %v2890_v12  ;;  %v2924_v19 = vadd.f32 %v2917_v56, %v2910_v36  ;;  %8428 = vmatmul.mubr.msk.f32.gmra.mrb[50].mxu1 %vm1249_vm8, %v12399_v32  ;;  %3075 = vmatprep.mubr.f32.mxu0 %v15077_v54  ;;  %v4938_v36 = vmul.f32 %v12403_v30, %v12403_v30  ;;  %v12445_v49 = vld [vmem:[%s14754_s11 + $0x48] ss:$0 sm:$0xff] }
 0x46c   :  { %v9502_v13 = vpop.eup %9501  ;;  %v2958_v18 = vadd.f32 %v2951_v26, %v2944_v25  ;;  %v2952_v35 = vmul.f32 %v9500_v10, %v2875_v42  ;;  %3194 = vmatprep.mubr.f32.mxu1 %v15077_v54  ;;  %v2826_v26 = vmul.f32 0.5, %v12357_v52  ;;  %v12462_v10 = vld [vmem:[%s14750_s7 + $0x20] sm:$0xff] }
 0x46d   :  { %v9504_v34 = vpop.eup %9503  ;;  %8884 = vmatprep.subr.mxu1 %v2974_v22  ;;  %v2936_v5 = vmul.f32 %v9502_v13, %v2866_v31  ;;  %9513 = vtanh.f32 %v2924_v19  ;;  %v2846_v13 = vmul.f32 0.5, %v12372_v21 }
 0x46e   :  { %v9506_v9 = vpop.eup %9505  ;;  %9515 = vtanh.f32 %v2958_v18  ;;  %8885 = vmatpush3.msra.mxu1 %v2974_v22  ;;  %v2914_v1 = vmul.f32 %v9504_v34, %v12316_v17  ;;  %v2959_v53 = vadd.f32 %v2952_v35, %v2945_v28  ;;  %v4928_v50 = vmul.f32 %v2958_v18, %v2923_v38  ;;  %v12432_v17 = vld [vmem:[%s14754_s11 + $0x50] ss:$0 sm:$0xff]  ;;  %8420 = vmatmul.mubr.msk.f32.gmra.mrb[36].mxu0 %vm1249_vm8, %v12399_v32 }
 0x46f   :  { %v9508_v63 = vpop.eup %9507  ;;  %3580 = vmatprep.subr.mxu1 %v2936_v5  ;;  %v12422_v43 = vmul.f32 %v12338_v55, %v2936_v5  ;;  %v12425_v12 = vmul.f32 %v9506_v9, %v2869_v7  ;;  %v4939_v55 = vmul.f32 %v12409_v58, %v12409_v58  ;;  %8429 = vmatmul.mubr.msk.f32.gmra.mrb[52].mxu1 %vm1249_vm8, %v12417_v24 }
 0x470   :  { %v2921_v59 = vadd.f32 %v2914_v1, %v12333_v40  ;;  %v4929_v38 = vmul.f32 %v2959_v53, %v2924_v19  ;;  %9517 = vtanh.f32 %v2959_v53  ;;  %v9510_v56 = vpop.eup %9509  ;;  %3081 = vmatprep.mubr.f32.mxu0 %v15077_v54  ;;  %v12450_v40 = vld [vmem:[%s14754_s11 + $0x58] ss:$0 sm:$0xff]  ;;  %v12452_v42 = vmul.f32 %v9508_v63, %v2864_v47  ;;  %3200 = vmatprep.mubr.f32.mxu1 %v15077_v54  ;;  %v12494_v47 = vld [vmem:[%s14750_s7 + $0x28] sm:$0xff] }
 0x471   :  { %v12455_v25 = vmul.f32 %v2974_v22, %v12425_v12  ;;  %v2867_v19 = vadd.f32 0.5, %v2825_v3  ;;  %v12469_v22 = vld [vmem:[%s14754_s11 + $0x60] ss:$0 sm:$0xff]  ;;  %v12473_v52 = vmul.f32 %v12432_v17, %v12330_v60  ;;  %v12483_v21 = vmul.f32 %v12450_v40, %v4928_v50  ;;  %v8520_v50 = vld [vmem:[%s14754_s11 + $0x68] ss:$0 sm:$0xff] }
 0x472   :  { %9519 = vtanh.f32 %v2921_v59  ;;  %v4926_v31 = vmul.f32 %v12253_v48, %v2921_v59  ;;  %v4869_v28 = vmul.f32 %v12351_v51, %v12452_v42  ;;  %8421 = vmatmul.mubr.msk.f32.gmra.mrb[38].mxu0 %vm1249_vm8, %v12417_v24  ;;  %v4945_v35 = vadd.f32 %v4939_v55, %v4938_v36 }
 0x473   :  { %v2847_v34 = vmul.f32 0.5, %v9510_v56  ;;  %8430 = vmatmul.mubr.msk.f32.gmra.mrb[54].mxu1 %vm1249_vm8, %v12462_v10  ;;  %3087 = vmatprep.mubr.f32.mxu0 %v15077_v54  ;;  %v2868_v51 = vadd.f32 0.5, %v2826_v26  ;;  %v12497_v7 = vmul.f32 %v12469_v22, %v4929_v38  ;;  %v2823_v1 = vmul.f32 0.5, %v12198_v41 }
 0x474   :  { %v9512_v18 = vpop.eup %9511  ;;  %v12480_v48 = vmul.f32 %v12445_v49, %v4926_v31  ;;  %3206 = vmatprep.mubr.f32.mxu1 %v15077_v54  ;;  %v2888_v53 = vadd.f32 0.5, %v2846_v13  ;;  %v4941_v63 = vmul.f32 %v12473_v52, %v12473_v52  ;;  %v4942_v36 = vmul.f32 %v12483_v21, %v12483_v21 }
 0x475   :  { %v12488_v60 = vmul.f32 %v9512_v18, %v2867_v19  ;;  %v12513_v38 = vmul.f32 %v12381_v8, %v12384_v15  ;;  %v2889_v55 = vadd.f32 0.5, %v2847_v34  ;;  %v12519_v26 = vmul.f32 %v12393_v27, %v4869_v28  ;;  %v12525_v19 = vld [vmem:[%s14750_s7 + $0x30] sm:$0xff] }
 0x476   :  { %v4940_v5 = vmul.f32 %v12480_v48, %v12480_v48  ;;  %8422 = vmatmul.mubr.msk.f32.gmra.mrb[40].mxu0 %vm1249_vm8, %v12462_v10  ;;  %v12528_v8 = vmul.f32 %v8520_v50, %v12336_v0  ;;  %v4943_v15 = vmul.f32 %v12497_v7, %v12497_v7  ;;  %v2865_v18 = vadd.f32 0.5, %v2823_v1  ;;  %v12546_v1 = vld [vmem:[%s14750_s7 + $0x38] sm:$0xff] }
 0x477   :  { %v9514_v9 = vpop.eup %9513  ;;  %8431 = vmatmul.mubr.msk.f32.gmra.mrb[56].mxu1 %vm1249_vm8, %v12494_v47  ;;  %3093 = vmatprep.mubr.f32.mxu0 %v15077_v54 }
 0x478   :  { %v9516_v3 = vpop.eup %9515  ;;  %v4946_v59 = vadd.f32 %v4945_v35, %v4940_v5  ;;  %v2938_v41 = vmul.f32 %v9514_v9, %v2868_v51  ;;  %3212 = vmatprep.mubr.f32.mxu1 %v15077_v54  ;;  %v4882_v51 = vmul.f32 %v12513_v38, %v12513_v38  ;;  %v4883_v5 = vmul.f32 %v12519_v26, %v12519_v26 }
 0x479   :  { %v2972_v56 = vmul.f32 %v9516_v3, %v2888_v53  ;;  %v4944_v53 = vmul.f32 %v12528_v8, %v12528_v8 }
 0x47a   :  { %v9518_v31 = vpop.eup %9517  ;;  %v4947_v13 = vadd.f32 %v4946_v59, %v4941_v63  ;;  %8423 = vmatmul.mubr.msk.f32.gmra.mrb[42].mxu0 %vm1249_vm8, %v12494_v47 }
 0x47b   :  { %v2973_v35 = vmul.f32 %v9518_v31, %v2889_v55  ;;  %v4872_v27 = vmul.f32 %v2972_v56, %v12488_v60  ;;  %8432 = vmatmul.mubr.msk.f32.gmra.mrb[58].mxu1 %vm1249_vm8, %v12525_v19  ;;  %3099 = vmatprep.mubr.f32.mxu0 %v15077_v54 }
 0x47c   :  { %v9520_v28 = vpop.eup %9519  ;;  %v4948_v34 = vadd.f32 %v4947_v13, %v4942_v36  ;;  %3218 = vmatprep.mubr.f32.mxu1 %v15077_v54  ;;  %v12553_v36 = vmul.f32 %v12432_v17, %v12422_v43 }
 0x47d   :  { %v2935_v0 = vmul.f32 %v9520_v28, %v2865_v18  ;;  %v4873_v9 = vmul.f32 %v2973_v35, %v2938_v41  ;;  %3225 = vmatprep.subr.mxu0 %v2973_v35  ;;  %v8328_v18 = vld [vmem:[%s14745_s2 + $0xf0] sm:$0xff]  ;;  %v1584_v28 = vld [vmem:[%s14745_s2 + $0x40] sm:$0xff] }
 0x47e   :  { %v4949_v63 = vadd.f32 %v4948_v34, %v4943_v15  ;;  %3226 = vmatpush1.msra.mxu0 %v2972_v56  ;;  %v4889_v56 = vadd.f32 %v4883_v5, %v4882_v51  ;;  %v8332_v35 = vld [vmem:[%s14745_s2 + $0x110] sm:$0xff]  ;;  %v12761_v34 = vld [vmem:[%s14751_s8 + $0x8] sm:$0xff]  ;;  %v8326_v51 = vld [vmem:[%s14745_s2 + $0xe0] sm:$0xff] }
 0x47f   :  { %v4870_v3 = vmul.f32 %v12294_v62, %v2935_v0  ;;  %8424 = vmatmul.mubr.msk.f32.gmra.mrb[44].mxu0 %vm1249_vm8, %v12525_v19  ;;  %3467 = vmatprep.subr.mxu0 %v12452_v42  ;;  %v12565_v62 = vmul.f32 %v12450_v40, %v4872_v27  ;;  %v12570_v43 = vmul.f32 %v12469_v22, %v4873_v9  ;;  %v12747_v27 = vld [vmem:[%s14751_s8] sm:$0xff]  ;;  %v12778_v5 = vld [vmem:[%s14751_s8 + $0x10] sm:$0xff]  ;;  %v12789_v9 = vld [vmem:[%s14751_s8 + $0x18] sm:$0xff] }
 0x480   :  { %v4950_v59 = vadd.f32 %v4949_v63, %v4944_v53  ;;  %8433 = vmatmul.mubr.msk.f32.gmra.mrb[60].mxu1 %vm1249_vm8, %v12546_v1  ;;  %3105 = vmatprep.mubr.f32.mxu0 %v15077_v54  ;;  %v12587_v22 = vmul.f32 %v8520_v50, %v12455_v25  ;;  %v12811_v53 = vld [vmem:[%s14751_s8 + $0x28] sm:$0xff]  ;;  %v12822_v63 = vld [vmem:[%s14751_s8 + $0x30] sm:$0xff] }
 0x481   :  { %v12561_v55 = vmul.f32 %v12445_v49, %v4870_v3  ;;  %8886 = vmatprep.mubr.msk.f32.mxu1 %vm1249_vm8, %v12346_v23  ;;  %v4885_v49 = vmul.f32 %v12553_v36, %v12553_v36  ;;  %v4886_v40 = vmul.f32 %v12565_v62, %v12565_v62  ;;  %v4887_v31 = vmul.f32 %v12570_v43, %v12570_v43  ;;  %v12833_v3 = vld [vmem:[%s14751_s8 + $0x38] sm:$0xff] }
 0x482   :  { %4951 = vadd.xlane.f32.xlu0 %v4950_v59  ;;  %v4888_v25 = vmul.f32 %v12587_v22, %v12587_v22  ;;  %v1583_v59 = vld [vmem:[%s14745_s2 + $0x38] sm:$0xff] }
 0x483   :  { %v4884_v17 = vmul.f32 %v12561_v55, %v12561_v55  ;;  %8425 = vmatmul.mubr.msk.f32.gmra.mrb[46].mxu0 %vm1249_vm8, %v12546_v1 }
 0x484   :  { %8887 = vmatmul.mubr.msk.f32.vlgmr.msra.gmra.mrb[62].mxu1 %vm1249_vm8, %v12366_v2  ;;  %3289 = vmatprep.mubr.f32.mxu0 %v15077_v54 }
 0x485   :  { %v4890_v42 = vadd.f32 %v4889_v56, %v4884_v17  ;;  %3581 = vmatpush1.msra.mxu1 %v2935_v0  ;;  %8889 = vmatprep.mubr.msk.f32.mxu1 %vm1249_vm8, %v12399_v32  ;;  %v8331_v0 = vld [vmem:[%s14745_s2 + $0x108] sm:$0xff]  ;;  %v1588_v56 = vld [vmem:[%s14745_s2 + $0x60] sm:$0xff] }
 0x486   :  { %8898 = vmatprep.subr.mxu1 %v12425_v12  ;;  %v8330_v17 = vld [vmem:[%s14745_s2 + $0x100] sm:$0xff] }
 0x487   :  { %v4891_v15 = vadd.f32 %v4890_v42, %v4885_v49  ;;  %8434 = vmatmul.mubr.msk.f32.vlgmr.msra.gmra.mrb[48].mxu0 %vm1249_vm8, %v12346_v23  ;;  %v1586_v49 = vld [vmem:[%s14745_s2 + $0x50] sm:$0xff]  ;;  %v1587_v42 = vld [vmem:[%s14745_s2 + $0x58] sm:$0xff] }
 0x488   :  { %8890 = vmatmul.mubr.msk.f32.gmra.mrb[64].mxu1 %vm1249_vm8, %v12417_v24  ;;  %3468 = vmatpush1.msra.mxu0 %v12370_v44  ;;  %v8329_v44 = vld [vmem:[%s14745_s2 + $0xf8] sm:$0xff] }
 0x489   :  { %v4892_v13 = vadd.f32 %v4891_v15, %v4886_v40  ;;  %8892 = vmatprep.mubr.msk.f32.mxu1 %vm1249_vm8, %v12462_v10  ;;  %3693 = vmatprep.subr.mxu0 %v2938_v41  ;;  %v8327_v41 = vld [vmem:[%s14745_s2 + $0xe8] sm:$0xff]  ;;  %v1241_v40 = vld [vmem:[%s14744_s1 + $0x40] sm:$0xff] }
 0x48a   :  { %3295 = vmatprep.mubr.f32.mxu0 %v15077_v54  ;;  %v12893_v15 = vld [vmem:[%s14748_s5] sm:$0xff] }
 0x48b   :  { %v4893_v50 = vadd.f32 %v4892_v13, %v4887_v31  ;;  %8435 = vmatmul.mubr.msk.f32.gmra.mrb[50].mxu0 %vm1249_vm8, %v12366_v2  ;;  %v12617_v2 = vld [vmem:[%s14749_s6] sm:$0xff]  ;;  %v1570_v31 = vadd.f32 %v12056_v61, %v1241_v40  ;;  %v12904_v61 = vld [vmem:[%s14748_s5 + $0x8] sm:$0xff]  ;;  %v12915_v13 = vld [vmem:[%s14748_s5 + $0x10] sm:$0xff] }
 0x48c   :  { %8893 = vmatmul.mubr.msk.f32.gmra.mrb[66].mxu1 %vm1249_vm8, %v12494_v47  ;;  %3301 = vmatprep.mubr.f32.mxu0 %v15077_v54  ;;  %v13113_v40 = vld [vmem:[%s14747_s4 + $0x20] sm:$0xff] }
 0x48d   :  { %v4894_v23 = vadd.f32 %v4893_v50, %v4888_v25  ;;  %8895 = vmatprep.mubr.msk.f32.mxu1 %vm1249_vm8, %v12525_v19  ;;  %v12926_v25 = vld [vmem:[%s14748_s5 + $0x18] sm:$0xff]  ;;  %v12937_v50 = vld [vmem:[%s14748_s5 + $0x20] sm:$0xff] }
 0x48f   :  { %4895 = vadd.xlane.f32.xlu1 %v4894_v23  ;;  %8436 = vmatmul.mubr.msk.f32.gmra.mrb[52].mxu0 %vm1249_vm8, %v12399_v32  ;;  %v12632_v32 = vld [vmem:[%s14749_s6 + $0x8] sm:$0xff] }
 0x490   :  { %8896 = vmatmul.mubr.msk.f32.gmra.mrb[68].mxu1 %vm1249_vm8, %v12546_v1  ;;  %3307 = vmatprep.mubr.f32.mxu0 %v15077_v54  ;;  %v1585_v23 = vld [vmem:[%s14745_s2 + $0x48] sm:$0xff] }
 0x491   :  { %3644 = vmatprep.mubr.f32.mxu1 %v15077_v54 }
 0x493   :  { %8437 = vmatmul.mubr.msk.f32.gmra.mrb[54].mxu0 %vm1249_vm8, %v12417_v24  ;;  %v12643_v24 = vld [vmem:[%s14749_s6 + $0x10] sm:$0xff] }
 0x494   :  { %8458 = vmatmul.mubr.msk.f32.vlgmr.msra.gmra.mrb[46].mxu1 %vm1249_vm8, %v12617_v2  ;;  %3313 = vmatprep.mubr.f32.mxu0 %v15077_v54 }
 0x495   :  { %8899 = vmatpush3.msra.mxu1 %v12425_v12  ;;  %3650 = vmatprep.mubr.f32.mxu1 %v15077_v54  ;;  %v12654_v12 = vld [vmem:[%s14749_s6 + $0x18] sm:$0xff] }
 0x496   :  { %4048 = vmatprep.subr.mxu1 %v8329_v44  ;;  %v12954_v44 = vld [vmem:[%s14748_s5 + $0x28] sm:$0xff] }
 0x497   :  { %8438 = vmatmul.mubr.msk.f32.gmra.mrb[56].mxu0 %vm1249_vm8, %v12462_v10  ;;  %v12665_v10 = vld [vmem:[%s14749_s6 + $0x20] sm:$0xff] }
 0x498   :  { %8459 = vmatmul.mubr.msk.f32.gmra.mrb[48].mxu1 %vm1249_vm8, %v12632_v32  ;;  %3319 = vmatprep.mubr.f32.mxu0 %v15077_v54 }
 0x499   :  { %3656 = vmatprep.mubr.f32.mxu1 %v15077_v54 }
 0x49b   :  { %8439 = vmatmul.mubr.msk.f32.gmra.mrb[58].mxu0 %vm1249_vm8, %v12494_v47  ;;  %v12676_v47 = vld [vmem:[%s14749_s6 + $0x28] sm:$0xff] }
 0x49c   :  { %8460 = vmatmul.mubr.msk.f32.gmra.mrb[50].mxu1 %vm1249_vm8, %v12643_v24  ;;  %3325 = vmatprep.mubr.f32.mxu0 %v15077_v54 }
 0x49d   :  { %3662 = vmatprep.mubr.f32.mxu1 %v15077_v54 }
 0x49f   :  { %8440 = vmatmul.mubr.msk.f32.gmra.mrb[60].mxu0 %vm1249_vm8, %v12525_v19  ;;  %v12690_v19 = vld [vmem:[%s14749_s6 + $0x30] sm:$0xff] }
 0x4a0   :  { %8461 = vmatmul.mubr.msk.f32.gmra.mrb[52].mxu1 %vm1249_vm8, %v12654_v12  ;;  %3331 = vmatprep.mubr.f32.mxu0 %v15077_v54 }
 0x4a1   :  { %3668 = vmatprep.mubr.f32.mxu1 %v15077_v54 }
 0x4a3   :  { %8441 = vmatmul.mubr.msk.f32.gmra.mrb[62].mxu0 %vm1249_vm8, %v12546_v1  ;;  %v12800_v1 = vld [vmem:[%s14751_s8 + $0x20] sm:$0xff] }
 0x4a4   :  { %8462 = vmatmul.mubr.msk.f32.gmra.mrb[54].mxu1 %vm1249_vm8, %v12665_v10  ;;  %3531 = vmatprep.mubr.f32.mxu0 %v15077_v54 }
 0x4a5   :  { %3674 = vmatprep.mubr.f32.mxu1 %v15077_v54 }
 0x4a7   :  { %8450 = vmatmul.mubr.msk.f32.vlgmr.msra.gmra.mrb[32].mxu0 %vm1249_vm8, %v12617_v2 }
 0x4a8   :  { %8463 = vmatmul.mubr.msk.f32.gmra.mrb[56].mxu1 %vm1249_vm8, %v12676_v47  ;;  %3694 = vmatpush1.msra.mxu0 %v12488_v60  ;;  %v12702_v60 = vld [vmem:[%s14749_s6 + $0x38] sm:$0xff] }
 0x4a9   :  { %3680 = vmatprep.mubr.f32.mxu1 %v15077_v54  ;;  %3537 = vmatprep.mubr.f32.mxu0 %v15077_v54 }
 0x4aa   :  { %3935 = vmatprep.subr.mxu0 %v8327_v41 }
 0x4ab   :  { %8451 = vmatmul.mubr.msk.f32.gmra.mrb[34].mxu0 %vm1249_vm8, %v12632_v32 }
 0x4ac   :  { %8464 = vmatmul.mubr.msk.f32.gmra.mrb[58].mxu1 %vm1249_vm8, %v12690_v19  ;;  %3543 = vmatprep.mubr.f32.mxu0 %v15077_v54 }
 0x4ad   :  { %3686 = vmatprep.mubr.f32.mxu1 %v15077_v54 }
 0x4af   :  { %8452 = vmatmul.mubr.msk.f32.gmra.mrb[36].mxu0 %vm1249_vm8, %v12643_v24 }
 0x4b0   :  { %8465 = vmatmul.mubr.msk.f32.gmra.mrb[60].mxu1 %vm1249_vm8, %v12702_v60  ;;  %3549 = vmatprep.mubr.f32.mxu0 %v15077_v54 }
 0x4b1   :  { %8900 = vmatprep.mubr.msk.f32.mxu1 %vm1249_vm8, %v12617_v2 }
 0x4b3   :  { %8453 = vmatmul.mubr.msk.f32.gmra.mrb[38].mxu0 %vm1249_vm8, %v12654_v12 }
 0x4b4   :  { %8901 = vmatmul.mubr.msk.f32.vlgmr.msra.gmra.mrb[62].mxu1 %vm1249_vm8, %v12632_v32  ;;  %3555 = vmatprep.mubr.f32.mxu0 %v15077_v54 }
 0x4b5   :  { %8903 = vmatprep.mubr.msk.f32.mxu1 %vm1249_vm8, %v12643_v24  ;;  %4049 = vmatpush1.msra.mxu1 %v8328_v18  ;;  %v13013_v18 = vpop.permute.xlu0 %4437 }
 0x4b6   :  { %8912 = vmatprep.subr.mxu1 %v8332_v35  ;;  %15078 = vst [vmem:[#allocation42_spill] sm:$0xff] %v13013_v18 }
 0x4b7   :  { %8454 = vmatmul.mubr.msk.f32.gmra.mrb[40].mxu0 %vm1249_vm8, %v12665_v10 }
 0x4b8   :  { %8904 = vmatmul.mubr.msk.f32.gmra.mrb[64].mxu1 %vm1249_vm8, %v12654_v12  ;;  %3561 = vmatprep.mubr.f32.mxu0 %v15077_v54 }
 0x4b9   :  { %8906 = vmatprep.mubr.msk.f32.mxu1 %vm1249_vm8, %v12665_v10 }
 0x4bb   :  { %8455 = vmatmul.mubr.msk.f32.gmra.mrb[42].mxu0 %vm1249_vm8, %v12676_v47 }
 0x4bc   :  { %8907 = vmatmul.mubr.msk.f32.gmra.mrb[66].mxu1 %vm1249_vm8, %v12676_v47  ;;  %3567 = vmatprep.mubr.f32.mxu0 %v15077_v54 }
 0x4bd   :  { %8909 = vmatprep.mubr.msk.f32.mxu1 %vm1249_vm8, %v12690_v19 }
 0x4bf   :  { %8456 = vmatmul.mubr.msk.f32.gmra.mrb[44].mxu0 %vm1249_vm8, %v12690_v19 }
 0x4c0   :  { %8910 = vmatmul.mubr.msk.f32.gmra.mrb[68].mxu1 %vm1249_vm8, %v12702_v60  ;;  %3573 = vmatprep.mubr.f32.mxu0 %v15077_v54 }
 0x4c1   :  { %4112 = vmatprep.mubr.f32.mxu1 %v15077_v54 }
 0x4c3   :  { %8457 = vmatmul.mubr.msk.f32.gmra.mrb[46].mxu0 %vm1249_vm8, %v12702_v60 }
 0x4c4   :  { %8490 = vmatmul.mubr.msk.f32.vlgmr.msra.gmra.mrb[46].mxu1 %vm1249_vm8, %v12747_v27  ;;  %3757 = vmatprep.mubr.f32.mxu0 %v15077_v54 }
 0x4c5   :  { %4118 = vmatprep.mubr.f32.mxu1 %v15077_v54  ;;  %8913 = vmatpush3.msra.mxu1 %v8332_v35 }
 0x4c6   :  { %5092 = vmatprep.subr.mxu1 %v1584_v28 }
 0x4c7   :  { %8466 = vmatmul.mubr.msk.f32.vlgmr.msra.gmra.mrb[48].mxu0 %vm1249_vm8, %v12617_v2  ;;  %v1589_v2 = vld [vmem:[%s14745_s2 + $0x68] sm:$0xff] }
 0x4c8   :  { %8491 = vmatmul.mubr.msk.f32.gmra.mrb[48].mxu1 %vm1249_vm8, %v12761_v34  ;;  %3763 = vmatprep.mubr.f32.mxu0 %v15077_v54 }
 0x4c9   :  { %4124 = vmatprep.mubr.f32.mxu1 %v15077_v54  ;;  %3936 = vmatpush1.msra.mxu0 %v8326_v51 }
 0x4ca   :  { %4161 = vmatprep.subr.mxu0 %v8331_v0  ;;  %v13026_v0 = vpop.permute.xlu0 %4442 }
 0x4cb   :  { %8467 = vmatmul.mubr.msk.f32.gmra.mrb[50].mxu0 %vm1249_vm8, %v12632_v32  ;;  %v12965_v32 = vld [vmem:[%s14748_s5 + $0x30] sm:$0xff]  ;;  %15079 = vst [vmem:[#allocation70_spill] sm:$0xff] %v13026_v0 }
 0x4cc   :  { %8492 = vmatmul.mubr.msk.f32.gmra.mrb[50].mxu1 %vm1249_vm8, %v12778_v5  ;;  %3769 = vmatprep.mubr.f32.mxu0 %v15077_v54 }
 0x4cd   :  { %4130 = vmatprep.mubr.f32.mxu1 %v15077_v54 }
 0x4cf   :  { %8468 = vmatmul.mubr.msk.f32.gmra.mrb[52].mxu0 %vm1249_vm8, %v12643_v24  ;;  %v1240_v24 = vld [vmem:[%s14744_s1 + $0x38] sm:$0xff] }
 0x4d0   :  { %8493 = vmatmul.mubr.msk.f32.gmra.mrb[52].mxu1 %vm1249_vm8, %v12789_v9  ;;  %3775 = vmatprep.mubr.f32.mxu0 %v15077_v54 }
 0x4d1   :  { %4136 = vmatprep.mubr.f32.mxu1 %v15077_v54 }
 0x4d3   :  { %8469 = vmatmul.mubr.msk.f32.gmra.mrb[54].mxu0 %vm1249_vm8, %v12654_v12  ;;  %v12979_v12 = vld [vmem:[%s14748_s5 + $0x38] sm:$0xff]  ;;  %s10093_s5 = smov 1e-24  }
 0x4d4   :  { %8494 = vmatmul.mubr.msk.f32.gmra.mrb[54].mxu1 %vm1249_vm8, %v12800_v1  ;;  %3781 = vmatprep.mubr.f32.mxu0 %v15077_v54 }
 0x4d5   :  { %4142 = vmatprep.mubr.f32.mxu1 %v15077_v54 }
 0x4d7   :  { %8470 = vmatmul.mubr.msk.f32.gmra.mrb[56].mxu0 %vm1249_vm8, %v12665_v10  ;;  %v1245_v10 = vld [vmem:[%s14744_s1 + $0x60] sm:$0xff] }
 0x4d8   :  { %8495 = vmatmul.mubr.msk.f32.gmra.mrb[56].mxu1 %vm1249_vm8, %v12811_v53  ;;  %3787 = vmatprep.mubr.f32.mxu0 %v15077_v54  ;;  %v1574_v41 = vadd.f32 %v12106_v14, %v1245_v10 }
 0x4d9   :  { %4148 = vmatprep.mubr.f32.mxu1 %v15077_v54 }
 0x4db   :  { %8471 = vmatmul.mubr.msk.f32.gmra.mrb[58].mxu0 %vm1249_vm8, %v12676_v47  ;;  %v1569_v47 = vadd.f32 %v12054_v20, %v1240_v24 }
 0x4dc   :  { %8496 = vmatmul.mubr.msk.f32.gmra.mrb[58].mxu1 %vm1249_vm8, %v12822_v63  ;;  %3793 = vmatprep.mubr.f32.mxu0 %v15077_v54 }
 0x4dd   :  { %4154 = vmatprep.mubr.f32.mxu1 %v15077_v54 }
 0x4df   :  { %8472 = vmatmul.mubr.msk.f32.gmra.mrb[60].mxu0 %vm1249_vm8, %v12690_v19 }
 0x4e0   :  { %8497 = vmatmul.mubr.msk.f32.gmra.mrb[60].mxu1 %vm1249_vm8, %v12833_v3  ;;  %3799 = vmatprep.mubr.f32.mxu0 %v15077_v54 }
 0x4e1   :  { %8914 = vmatprep.mubr.msk.f32.mxu1 %vm1249_vm8, %v12747_v27 }
 0x4e3   :  { %8473 = vmatmul.mubr.msk.f32.gmra.mrb[62].mxu0 %vm1249_vm8, %v12702_v60 }
 0x4e4   :  { %8915 = vmatmul.mubr.msk.f32.vlgmr.msra.gmra.mrb[62].mxu1 %vm1249_vm8, %v12761_v34  ;;  %3999 = vmatprep.mubr.f32.mxu0 %v15077_v54 }
 0x4e5   :  { %8917 = vmatprep.mubr.msk.f32.mxu1 %vm1249_vm8, %v12778_v5  ;;  %5093 = vmatpush1.msra.mxu1 %v1583_v59 }
 0x4e6   :  { %5318 = vmatprep.subr.mxu1 %v1588_v56  ;;  %v13096_v56 = vld [vmem:[%s14747_s4 + $0x18] sm:$0xff] }
 0x4e7   :  { %8482 = vmatmul.mubr.msk.f32.vlgmr.msra.gmra.mrb[32].mxu0 %vm1249_vm8, %v12747_v27 }
 0x4e8   :  { %8918 = vmatmul.mubr.msk.f32.gmra.mrb[64].mxu1 %vm1249_vm8, %v12789_v9  ;;  %4005 = vmatprep.mubr.f32.mxu0 %v15077_v54 }
 0x4e9   :  { %8920 = vmatprep.mubr.msk.f32.mxu1 %vm1249_vm8, %v12800_v1  ;;  %4162 = vmatpush1.msra.mxu0 %v8330_v17  ;;  %v1242_v17 = vld [vmem:[%s14744_s1 + $0x48] sm:$0xff] }
 0x4ea   :  { %5205 = vmatprep.subr.mxu0 %v1586_v49  ;;  %v1246_v49 = vld [vmem:[%s14744_s1 + $0x68] sm:$0xff] }
 0x4eb   :  { %8483 = vmatmul.mubr.msk.f32.gmra.mrb[34].mxu0 %vm1249_vm8, %v12761_v34 }
 0x4ec   :  { %8921 = vmatmul.mubr.msk.f32.gmra.mrb[66].mxu1 %vm1249_vm8, %v12811_v53  ;;  %4011 = vmatprep.mubr.f32.mxu0 %v15077_v54 }
 0x4ed   :  { %8923 = vmatprep.mubr.msk.f32.mxu1 %vm1249_vm8, %v12822_v63 }
 0x4ef   :  { %8484 = vmatmul.mubr.msk.f32.gmra.mrb[36].mxu0 %vm1249_vm8, %v12778_v5 }
 0x4f0   :  { %8924 = vmatmul.mubr.msk.f32.gmra.mrb[68].mxu1 %vm1249_vm8, %v12833_v3  ;;  %4017 = vmatprep.mubr.f32.mxu0 %v15077_v54 }
 0x4f1   :  { %5156 = vmatprep.mubr.f32.mxu1 %v15077_v54 }
 0x4f3   :  { %8485 = vmatmul.mubr.msk.f32.gmra.mrb[38].mxu0 %vm1249_vm8, %v12789_v9 }
 0x4f4   :  { %8556 = vmatmul.mubr.msk.f32.vlgmr.msra.gmra.mrb[70].mxu1 %vm1249_vm8, %v12893_v15  ;;  %4023 = vmatprep.mubr.f32.mxu0 %v15077_v54 }
 0x4f5   :  { %5319 = vmatpush1.msra.mxu1 %v1587_v42  ;;  %5162 = vmatprep.mubr.f32.mxu1 %v15077_v54 }
 0x4f6   :  { %5536 = vmatprep.subr.mxu1 %v1570_v31  ;;  %v1571_v31 = vadd.f32 %v12012_v33, %v1242_v17 }
 0x4f7   :  { %8486 = vmatmul.mubr.msk.f32.gmra.mrb[40].mxu0 %vm1249_vm8, %v12800_v1 }
 0x4f8   :  { %8557 = vmatmul.mubr.msk.f32.gmra.mrb[72].mxu1 %vm1249_vm8, %v12904_v61  ;;  %4029 = vmatprep.mubr.f32.mxu0 %v15077_v54 }
 0x4f9   :  { %5168 = vmatprep.mubr.f32.mxu1 %v15077_v54 }
 0x4fb   :  { %8487 = vmatmul.mubr.msk.f32.gmra.mrb[42].mxu0 %vm1249_vm8, %v12811_v53 }
 0x4fc   :  { %8558 = vmatmul.mubr.msk.f32.gmra.mrb[74].mxu1 %vm1249_vm8, %v12915_v13  ;;  %4035 = vmatprep.mubr.f32.mxu0 %v15077_v54 }
 0x4fd   :  { %5174 = vmatprep.mubr.f32.mxu1 %v15077_v54 }
 0x4ff   :  { %8488 = vmatmul.mubr.msk.f32.gmra.mrb[44].mxu0 %vm1249_vm8, %v12822_v63 }
 0x500   :  { %8559 = vmatmul.mubr.msk.f32.gmra.mrb[76].mxu1 %vm1249_vm8, %v12926_v25  ;;  %4041 = vmatprep.mubr.f32.mxu0 %v15077_v54 }
 0x501   :  { %5180 = vmatprep.mubr.f32.mxu1 %v15077_v54 }
 0x503   :  { %8489 = vmatmul.mubr.msk.f32.gmra.mrb[46].mxu0 %vm1249_vm8, %v12833_v3 }
 0x504   :  { %8560 = vmatmul.mubr.msk.f32.gmra.mrb[78].mxu1 %vm1249_vm8, %v12937_v50  ;;  %4225 = vmatprep.mubr.f32.mxu0 %v15077_v54 }
 0x505   :  { %5186 = vmatprep.mubr.f32.mxu1 %v15077_v54 }
 0x507   :  { %8498 = vmatmul.mubr.msk.f32.vlgmr.msra.gmra.mrb[48].mxu0 %vm1249_vm8, %v12747_v27  ;;  %v1243_v27 = vld [vmem:[%s14744_s1 + $0x50] sm:$0xff] }
 0x508   :  { %8561 = vmatmul.mubr.msk.f32.gmra.mrb[80].mxu1 %vm1249_vm8, %v12954_v44  ;;  %4231 = vmatprep.mubr.f32.mxu0 %v15077_v54  ;;  %v1572_v51 = vadd.f32 %v12014_v11, %v1243_v27  ;;  %v13039_v11 = vpop.permute.xlu0 %4452 }
 0x509   :  { %5192 = vmatprep.mubr.f32.mxu1 %v15077_v54  ;;  %5206 = vmatpush1.msra.mxu0 %v1585_v23  ;;  %15080 = vst [vmem:[#allocation22_spill] sm:$0xff] %v13039_v11  ;;  %v1575_v23 = vadd.f32 %v12078_v45, %v1246_v49  ;;  %v13143_v45 = vld [vmem:[%s14747_s4 + $0x30] sm:$0xff] }
 0x50a   :  { %8926 = vmatprep.subr.mxu0 %v1589_v2 }
 0x50b   :  { %8499 = vmatmul.mubr.msk.f32.gmra.mrb[50].mxu0 %vm1249_vm8, %v12761_v34 }
 0x50c   :  { %8562 = vmatmul.mubr.msk.f32.gmra.mrb[82].mxu1 %vm1249_vm8, %v12965_v32  ;;  %4237 = vmatprep.mubr.f32.mxu0 %v15077_v54 }
 0x50d   :  { %5198 = vmatprep.mubr.f32.mxu1 %v15077_v54 }
 0x50f   :  { %8500 = vmatmul.mubr.msk.f32.gmra.mrb[52].mxu0 %vm1249_vm8, %v12778_v5  ;;  %v1244_v5 = vld [vmem:[%s14744_s1 + $0x58] sm:$0xff] }
 0x510   :  { %8563 = vmatmul.mubr.msk.f32.gmra.mrb[84].mxu1 %vm1249_vm8, %v12979_v12  ;;  %4243 = vmatprep.mubr.f32.mxu0 %v15077_v54 }
 0x511   :  { %5382 = vmatprep.mubr.f32.mxu1 %v15077_v54 }
 0x513   :  { %8501 = vmatmul.mubr.msk.f32.gmra.mrb[54].mxu0 %vm1249_vm8, %v12789_v9  ;;  %v1573_v9 = vadd.f32 %v12100_v29, %v1244_v5  ;;  %v13070_v29 = vld [vmem:[%s14747_s4 + $0x8] sm:$0xff] }
 0x514   :  { %8572 = vmatmul.mubr.msk.f32.vlgmr.msra.gmra.mrb[86].mxu1 %vm1249_vm8, %v12893_v15  ;;  %4249 = vmatprep.mubr.f32.mxu0 %v15077_v54 }
 0x515   :  { %5537 = vmatpush1.msra.mxu1 %v1569_v47  ;;  %5388 = vmatprep.mubr.f32.mxu1 %v15077_v54 }
 0x516   :  { %5762 = vmatprep.subr.mxu1 %v1574_v41 }
 0x517   :  { %8502 = vmatmul.mubr.msk.f32.gmra.mrb[56].mxu0 %vm1249_vm8, %v12800_v1  ;;  %v13052_v1 = vpop.permute.xlu0 %4457 }
 0x518   :  { %8573 = vmatmul.mubr.msk.f32.gmra.mrb[88].mxu1 %vm1249_vm8, %v12904_v61  ;;  %4255 = vmatprep.mubr.f32.mxu0 %v15077_v54  ;;  %15081 = vst [vmem:[#allocation20_spill] sm:$0xff] %v13052_v1 }
 0x519   :  { %5394 = vmatprep.mubr.f32.mxu1 %v15077_v54 }
 0x51b   :  { %8503 = vmatmul.mubr.msk.f32.gmra.mrb[58].mxu0 %vm1249_vm8, %v12811_v53  ;;  %v13059_v53 = vld [vmem:[%s14747_s4] sm:$0xff] }
 0x51c   :  { %v4896_v20 = vpop.xlane.xlu1 %4895  ;;  %8574 = vmatmul.mubr.msk.f32.gmra.mrb[90].mxu1 %vm1249_vm8, %v12915_v13  ;;  %4261 = vmatprep.mubr.f32.mxu0 %v15077_v54 }
 0x51d   :  { %v4897_v14 = vrot.slane %v4896_v20, 4  ;;  %5400 = vmatprep.mubr.f32.mxu1 %v15077_v54 }
 0x51f   :  { %v4898_v19 = vadd.f32 %v4897_v14, %v4896_v20  ;;  %8504 = vmatmul.mubr.msk.f32.gmra.mrb[60].mxu0 %vm1249_vm8, %v12822_v63  ;;  %v13075_v63 = vpop.permute.xlu0 %4467 }
 0x520   :  { %8575 = vmatmul.mubr.msk.f32.gmra.mrb[92].mxu1 %vm1249_vm8, %v12926_v25  ;;  %4267 = vmatprep.mubr.f32.mxu0 %v15077_v54  ;;  %15082 = vst [vmem:[#allocation23_spill] sm:$0xff] %v13075_v63 }
 0x521   :  { %v4899_v60 = vrot.slane %v4898_v19, 2  ;;  %5406 = vmatprep.mubr.f32.mxu1 %v15077_v54 }
 0x523   :  { %v4900_v35 = vadd.f32 %v4899_v60, %v4898_v19  ;;  %8505 = vmatmul.mubr.msk.f32.gmra.mrb[62].mxu0 %vm1249_vm8, %v12833_v3  ;;  %v13083_v3 = vld [vmem:[%s14747_s4 + $0x10] sm:$0xff]  ;;  %v13089_v59 = vpop.permute.xlu0 %4472 }
 0x524   :  { %8576 = vmatmul.mubr.msk.f32.gmra.mrb[94].mxu1 %vm1249_vm8, %v12937_v50  ;;  %5269 = vmatprep.mubr.f32.mxu0 %v15077_v54  ;;  %15083 = vst [vmem:[#allocation16_spill] sm:$0xff] %v13089_v59 }
 0x525   :  { %v4901_v28 = vrot.slane %v4900_v35, 1  ;;  %5412 = vmatprep.mubr.f32.mxu1 %v15077_v54 }
 0x527   :  { %v4902_v34 = vadd.f32 %v4901_v28, %v4900_v35  ;;  %8564 = vmatmul.mubr.msk.f32.vlgmr.msra.gmra.mrb[64].mxu0 %vm1249_vm8, %v12893_v15  ;;  %v13119_v42 = vpop.permute.xlu0 %4447 }
 0x528   :  { %8577 = vmatmul.mubr.msk.f32.gmra.mrb[96].mxu1 %vm1249_vm8, %v12954_v44  ;;  %8927 = vmatpush3.msra.mxu0 %v1589_v2  ;;  %15084 = vst [vmem:[#allocation24_spill] sm:$0xff] %v13119_v42  ;;  %v13129_v2 = vld [vmem:[%s14747_s4 + $0x28] sm:$0xff] }
 0x529   :  { %9334 = vpush %v4902_v34  ;;  %5418 = vmatprep.mubr.f32.mxu1 %v15077_v54  ;;  %5649 = vmatprep.subr.mxu0 %v1572_v51 }
 0x52a   :  { %5275 = vmatprep.mubr.f32.mxu0 %v15077_v54 }
 0x52b   :  { %8565 = vmatmul.mubr.msk.f32.gmra.mrb[66].mxu0 %vm1249_vm8, %v12904_v61  ;;  %v13136_v33 = vpop.permute.xlu0 %4462 }
 0x52c   :  { %8578 = vmatmul.mubr.msk.f32.gmra.mrb[98].mxu1 %vm1249_vm8, %v12965_v32  ;;  %5281 = vmatprep.mubr.f32.mxu0 %v15077_v54  ;;  %15085 = vst [vmem:[#allocation17_spill] sm:$0xff] %v13136_v33 }
 0x52d   :  { %5424 = vmatprep.mubr.f32.mxu1 %v15077_v54 }
 0x52f   :  { %8566 = vmatmul.mubr.msk.f32.gmra.mrb[68].mxu0 %vm1249_vm8, %v12915_v13 }
 0x530   :  { %8579 = vmatmul.mubr.msk.f32.gmra.mrb[100].mxu1 %vm1249_vm8, %v12979_v12  ;;  %5287 = vmatprep.mubr.f32.mxu0 %v15077_v54 }
 0x531   :  { %5600 = vmatprep.mubr.f32.mxu1 %v15077_v54 }
 0x533   :  { %8567 = vmatmul.mubr.msk.f32.gmra.mrb[70].mxu0 %vm1249_vm8, %v12926_v25 }
 0x534   :  { %8588 = vmatmul.mubr.msk.f32.vlgmr.msra.gmra.mrb[70].mxu1 %vm1249_vm8, %v13059_v53  ;;  %5293 = vmatprep.mubr.f32.mxu0 %v15077_v54 }
 0x535   :  { %5763 = vmatpush1.msra.mxu1 %v1573_v9  ;;  %5606 = vmatprep.mubr.f32.mxu1 %v15077_v54 }
 0x537   :  { %8568 = vmatmul.mubr.msk.f32.gmra.mrb[72].mxu0 %vm1249_vm8, %v12937_v50 }
 0x538   :  { %8589 = vmatmul.mubr.msk.f32.gmra.mrb[72].mxu1 %vm1249_vm8, %v13070_v29  ;;  %5299 = vmatprep.mubr.f32.mxu0 %v15077_v54 }
 0x539   :  { %5612 = vmatprep.mubr.f32.mxu1 %v15077_v54 }
 0x53b   :  { %8569 = vmatmul.mubr.msk.f32.gmra.mrb[74].mxu0 %vm1249_vm8, %v12954_v44 }
 0x53c   :  { %8590 = vmatmul.mubr.msk.f32.gmra.mrb[74].mxu1 %vm1249_vm8, %v13083_v3  ;;  %5305 = vmatprep.mubr.f32.mxu0 %v15077_v54 }
 0x53d   :  { %5618 = vmatprep.mubr.f32.mxu1 %v15077_v54 }
 0x53f   :  { %8570 = vmatmul.mubr.msk.f32.gmra.mrb[76].mxu0 %vm1249_vm8, %v12965_v32 }
 0x540   :  { %8591 = vmatmul.mubr.msk.f32.gmra.mrb[76].mxu1 %vm1249_vm8, %v13096_v56  ;;  %5311 = vmatprep.mubr.f32.mxu0 %v15077_v54 }
 0x541   :  { %5624 = vmatprep.mubr.f32.mxu1 %v15077_v54 }
 0x543   :  { %8571 = vmatmul.mubr.msk.f32.gmra.mrb[78].mxu0 %vm1249_vm8, %v12979_v12 }
 0x544   :  { %8592 = vmatmul.mubr.msk.f32.gmra.mrb[78].mxu1 %vm1249_vm8, %v13113_v40  ;;  %8928 = vmatprep.mubr.msk.f32.mxu0 %vm1249_vm8, %v12893_v15  ;;  %v4952_v15 = vpop.xlane.xlu0 %4951 }
 0x545   :  { %5630 = vmatprep.mubr.f32.mxu1 %v15077_v54 }
 0x547   :  { %8929 = vmatmul.mubr.msk.f32.vlgmr.msra.gmra.mrb[80].mxu0 %vm1249_vm8, %v12904_v61  ;;  %v10007_v61 = vld [vmem:[%s14747_s4 + $0x38] sm:$0xff] }
 0x548   :  { %8593 = vmatmul.mubr.msk.f32.gmra.mrb[80].mxu1 %vm1249_vm8, %v13129_v2  ;;  %5650 = vmatpush1.msra.mxu0 %v1571_v31 }
 0x549   :  { %5636 = vmatprep.mubr.f32.mxu1 %v15077_v54  ;;  %8940 = vmatprep.subr.mxu0 %v1575_v23 }
 0x54a   :  { %8931 = vmatprep.mubr.msk.f32.mxu0 %vm1249_vm8, %v12915_v13  ;;  %v4953_v13 = vrot.slane %v4952_v15, 4 }
 0x54b   :  { %8932 = vmatmul.mubr.msk.f32.gmra.mrb[82].mxu0 %vm1249_vm8, %v12926_v25 }
 0x54c   :  { %8594 = vmatmul.mubr.msk.f32.gmra.mrb[82].mxu1 %vm1249_vm8, %v13143_v45  ;;  %8934 = vmatprep.mubr.msk.f32.mxu0 %vm1249_vm8, %v12937_v50  ;;  %v4954_v25 = vadd.f32 %v4953_v13, %v4952_v15 }
 0x54d   :  { %5642 = vmatprep.mubr.f32.mxu1 %v15077_v54 }
 0x54e   :  { %v4955_v50 = vrot.slane %v4954_v25, 2 }
 0x54f   :  { %8935 = vmatmul.mubr.msk.f32.gmra.mrb[84].mxu0 %vm1249_vm8, %v12954_v44 }
 0x550   :  { %8595 = vmatmul.mubr.msk.f32.gmra.mrb[84].mxu1 %vm1249_vm8, %v10007_v61  ;;  %8937 = vmatprep.mubr.msk.f32.mxu0 %vm1249_vm8, %v12965_v32  ;;  %v4956_v32 = vadd.f32 %v4955_v50, %v4954_v25 }
 0x551   :  { %5826 = vmatprep.mubr.f32.mxu1 %v15077_v54 }
 0x552   :  { %v4957_v24 = vrot.slane %v4956_v32, 1 }
 0x553   :  { %8938 = vmatmul.mubr.msk.f32.gmra.mrb[86].mxu0 %vm1249_vm8, %v12979_v12 }
 0x554   :  { %8604 = vmatmul.mubr.msk.f32.vlgmr.msra.gmra.mrb[86].mxu1 %vm1249_vm8, %v13059_v53  ;;  %5713 = vmatprep.mubr.f32.mxu0 %v15077_v54  ;;  %v4958_v10 = vadd.f32 %v4957_v24, %v4956_v32 }
 0x555   :  { %5832 = vmatprep.mubr.f32.mxu1 %v15077_v54 }
 0x557   :  { %8596 = vmatmul.mubr.msk.f32.vlgmr.msra.gmra.mrb[64].mxu0 %vm1249_vm8, %v13059_v53 }
 0x558   :  { %8605 = vmatmul.mubr.msk.f32.gmra.mrb[88].mxu1 %vm1249_vm8, %v13070_v29  ;;  %8941 = vmatpush3.msra.mxu0 %v1575_v23 }
 0x559   :  { %5838 = vmatprep.mubr.f32.mxu1 %v15077_v54  ;;  %5719 = vmatprep.mubr.f32.mxu0 %v15077_v54 }
 0x55a   :  { %s9335_s4 = spop %9334 }
 0x55b   :  { %s4904_s0 = smax.f32 %s10093_s5, %s9335_s4  ;;  %8597 = vmatmul.mubr.msk.f32.gmra.mrb[66].mxu0 %vm1249_vm8, %v13070_v29 }
 0x55c   :  { %v4905_v44 = vstv %s4904_s0  ;;  %8606 = vmatmul.mubr.msk.f32.gmra.mrb[90].mxu1 %vm1249_vm8, %v13083_v3  ;;  %5725 = vmatprep.mubr.f32.mxu0 %v15077_v54 }
 0x55d   :  { %9521 = vrsqrt.f32 %v4905_v44  ;;  %5844 = vmatprep.mubr.f32.mxu1 %v15077_v54 }
 0x55f   :  { %8598 = vmatmul.mubr.msk.f32.gmra.mrb[68].mxu0 %vm1249_vm8, %v13083_v3 }
 0x560   :  { %8607 = vmatmul.mubr.msk.f32.gmra.mrb[92].mxu1 %vm1249_vm8, %v13096_v56  ;;  %5731 = vmatprep.mubr.f32.mxu0 %v15077_v54 }
 0x561   :  { %5850 = vmatprep.mubr.f32.mxu1 %v15077_v54 }
 0x563   :  { %8599 = vmatmul.mubr.msk.f32.gmra.mrb[70].mxu0 %vm1249_vm8, %v13096_v56 }
 0x564   :  { %8608 = vmatmul.mubr.msk.f32.gmra.mrb[94].mxu1 %vm1249_vm8, %v13113_v40  ;;  %5737 = vmatprep.mubr.f32.mxu0 %v15077_v54 }
 0x565   :  { %5856 = vmatprep.mubr.f32.mxu1 %v15077_v54 }
 0x567   :  { %v9522_v12 = vpop.eup %9521  ;;  %8600 = vmatmul.mubr.msk.f32.gmra.mrb[72].mxu0 %vm1249_vm8, %v13113_v40 }
 0x568   :  { %9336 = vpush %v9522_v12  ;;  %8609 = vmatmul.mubr.msk.f32.gmra.mrb[96].mxu1 %vm1249_vm8, %v13129_v2  ;;  %5743 = vmatprep.mubr.f32.mxu0 %v15077_v54 }
 0x569   :  { %9338 = vpush %v4958_v10  ;;  %5862 = vmatprep.mubr.f32.mxu1 %v15077_v54 }
 0x56b   :  { %8601 = vmatmul.mubr.msk.f32.gmra.mrb[74].mxu0 %vm1249_vm8, %v13129_v2 }
 0x56c   :  { %8610 = vmatmul.mubr.msk.f32.gmra.mrb[98].mxu1 %vm1249_vm8, %v13143_v45  ;;  %5749 = vmatprep.mubr.f32.mxu0 %v15077_v54 }
 0x56d   :  { %5868 = vmatprep.mubr.f32.mxu1 %v15077_v54 }
 0x56f   :  { %8602 = vmatmul.mubr.msk.f32.gmra.mrb[76].mxu0 %vm1249_vm8, %v13143_v45 }
 0x570   :  { %8611 = vmatmul.mubr.msk.f32.gmra.mrb[100].mxu1 %vm1249_vm8, %v10007_v61  ;;  %5755 = vmatprep.mubr.f32.mxu0 %v15077_v54 }
 0x571   :  { %6465 = vmatprep.mubr.f32.mxu1 %v15077_v54 }
 0x573   :  { %8603 = vmatmul.mubr.msk.f32.gmra.mrb[78].mxu0 %vm1249_vm8, %v10007_v61 }
 0x574   :  { %8942 = vmatprep.mubr.msk.f32.mxu0 %vm1249_vm8, %v13059_v53 }
 0x577   :  { %8943 = vmatmul.mubr.msk.f32.vlgmr.msra.gmra.mrb[80].mxu0 %vm1249_vm8, %v13070_v29 }
 0x578   :  { %8945 = vmatprep.mubr.msk.f32.mxu0 %vm1249_vm8, %v13083_v3 }
 0x57b   :  { %8946 = vmatmul.mubr.msk.f32.gmra.mrb[82].mxu0 %vm1249_vm8, %v13096_v56 }
 0x57c   :  { %8948 = vmatprep.mubr.msk.f32.mxu0 %vm1249_vm8, %v13113_v40 }
 0x57f   :  { %8949 = vmatmul.mubr.msk.f32.gmra.mrb[84].mxu0 %vm1249_vm8, %v13129_v2 }
 0x580   :  { %8951 = vmatprep.mubr.msk.f32.mxu0 %vm1249_vm8, %v13143_v45 }
 0x583   :  { %8952 = vmatmul.mubr.msk.f32.gmra.mrb[86].mxu0 %vm1249_vm8, %v10007_v61 }
 0x584   :  { %6352 = vmatprep.mubr.f32.mxu0 %v15077_v54 }
 0x597   :  { %v4114_v47 = vpop.f32.mrb[46].mxu1 }
 0x598   :  { %v4116_v41 = vpop.f32.mrb[47].mxu1 }
 0x599   :  { %s9337_s20 = spop %9336 }
 0x59a   :  { %v4908_v20 = vstv %s9337_s20  ;;  %s9339_s13 = spop %9338 }
 0x59b   :  { %v4909_v14 = vmul.f32 %v4908_v20, %v12513_v38  ;;  %v4910_v19 = vmul.f32 %v4908_v20, %v12519_v26  ;;  %v4911_v60 = vmul.f32 %v4908_v20, %v12561_v55  ;;  %s4960_s27 = smax.f32 %s10093_s5, %s9339_s13  ;;  %v4120_v35 = vpop.f32.mrb[48].mxu1  ;;  %v4912_v27 = vmul.f32 %v4908_v20, %v12553_v36 }
 0x59c   :  { %v4913_v28 = vmul.f32 %v4908_v20, %v12565_v62  ;;  %v4914_v34 = vmul.f32 %v4908_v20, %v12570_v43  ;;  %v4122_v51 = vpop.f32.mrb[49].mxu1  ;;  %v4915_v5 = vmul.f32 %v4908_v20, %v12587_v22  ;;  %v4961_v38 = vstv %s4960_s27 }
 0x59d   :  { %8528 = vst [vmem:[%s14759_s16 + $0x70] sm:$0xff] %v4909_v14  ;;  %8529 = vst [vmem:[%s14759_s16 + $0x78] sm:$0xff] %v4910_v19  ;;  %9523 = vrsqrt.f32 %v4961_v38  ;;  %v4484_v26 = vadd.f32 %v13026_v0, %v4120_v35  ;;  %v4485_v55 = vadd.f32 %v13026_v0, %v4122_v51  ;;  %v4477_v43 = vadd.f32 %v13013_v18, %v4114_v47 }
 0x59e   :  { %8530 = vst [vmem:[%s14759_s16 + $0x80] sm:$0xff] %v4911_v60  ;;  %8531 = vst [vmem:[%s14759_s16 + $0x88] sm:$0xff] %v4912_v27  ;;  %v4478_v22 = vadd.f32 %v13013_v18, %v4116_v41 }
 0x59f   :  { %8532 = vst [vmem:[%s14759_s16 + $0x90] sm:$0xff] %v4913_v28  ;;  %8533 = vst [vmem:[%s14759_s16 + $0x98] sm:$0xff] %v4914_v34  ;;  %v4126_v36 = vpop.f32.mrb[50].mxu1  ;;  %v4540_v9 = vmul.f32 0.5, %v4484_v26  ;;  %v4541_v3 = vmul.f32 0.5, %v4485_v55  ;;  %v4533_v17 = vmul.f32 0.5, %v4477_v43 }
 0x5a0   :  { %8534 = vst [vmem:[%s14759_s16 + $0xa0] sm:$0xff] %v4915_v5  ;;  %v4128_v62 = vpop.f32.mrb[51].mxu1  ;;  %v4491_v53 = vadd.f32 %v13119_v42, %v4126_v36  ;;  %v4534_v49 = vmul.f32 0.5, %v4478_v22 }
 0x5a1   :  { %9525 = vtanh.f32 %v4540_v9  ;;  %v4492_v13 = vadd.f32 %v13119_v42, %v4128_v62 }
 0x5a2   :  { %v4547_v31 = vmul.f32 0.5, %v4491_v53  ;;  %9527 = vtanh.f32 %v4541_v3 }
 0x5a3   :  { %v4132_v29 = vpop.f32.mrb[52].mxu1  ;;  %9529 = vtanh.f32 %v4533_v17  ;;  %v4548_v47 = vmul.f32 0.5, %v4492_v13 }
 0x5a4   :  { %v4134_v56 = vpop.f32.mrb[53].mxu1  ;;  %v4498_v40 = vadd.f32 %v13039_v11, %v4132_v29  ;;  %9531 = vtanh.f32 %v4534_v49 }
 0x5a5   :  { %v4499_v23 = vadd.f32 %v13039_v11, %v4134_v56  ;;  %9533 = vtanh.f32 %v4547_v31 }
 0x5a6   :  { %v4554_v50 = vmul.f32 0.5, %v4498_v40 }
 0x5a7   :  { %v4138_v2 = vpop.f32.mrb[54].mxu1  ;;  %v9524_v45 = vpop.eup %9523  ;;  %v4555_v32 = vmul.f32 0.5, %v4499_v23 }
 0x5a8   :  { %v4505_v15 = vadd.f32 %v13052_v1, %v4138_v2  ;;  %v4140_v61 = vpop.f32.mrb[55].mxu1  ;;  %9340 = vpush %v9524_v45  ;;  %v8342_v45 = vld [vmem:[%s14745_s2 + $0x160] sm:$0xff] }
 0x5a9   :  { %v4506_v25 = vadd.f32 %v13052_v1, %v4140_v61 }
 0x5aa   :  { %v4561_v44 = vmul.f32 0.5, %v4505_v15 }
 0x5ab   :  { %v4562_v24 = vmul.f32 0.5, %v4506_v25  ;;  %v4144_v12 = vpop.f32.mrb[56].mxu1  ;;  %v9526_v60 = vpop.eup %9525  ;;  %v8343_v25 = vld [vmem:[%s14745_s2 + $0x168] sm:$0xff] }
 0x5ac   :  { %9535 = vtanh.f32 %v4561_v44  ;;  %v4146_v10 = vpop.f32.mrb[57].mxu1  ;;  %v4512_v41 = vadd.f32 %v13136_v33, %v4144_v12  ;;  %v9528_v34 = vpop.eup %9527  ;;  %v4624_v26 = vmul.f32 0.5, %v9526_v60 }
 0x5ad   :  { %9537 = vtanh.f32 %v4562_v24  ;;  %v4513_v27 = vadd.f32 %v13136_v33, %v4146_v10  ;;  %v9530_v51 = vpop.eup %9529  ;;  %v4625_v43 = vmul.f32 0.5, %v9528_v34 }
 0x5ae   :  { %9539 = vtanh.f32 %v4554_v50  ;;  %v4568_v35 = vmul.f32 0.5, %v4512_v41  ;;  %v9532_v38 = vpop.eup %9531  ;;  %v4617_v3 = vmul.f32 0.5, %v9530_v51  ;;  %v4666_v40 = vadd.f32 0.5, %v4624_v26 }
 0x5af   :  { %9541 = vtanh.f32 %v4555_v32  ;;  %v4150_v20 = vpop.f32.mrb[58].mxu1  ;;  %v9534_v62 = vpop.eup %9533  ;;  %v4569_v22 = vmul.f32 0.5, %v4513_v27  ;;  %v4618_v56 = vmul.f32 0.5, %v9532_v38  ;;  %v4667_v15 = vadd.f32 0.5, %v4625_v43 }
 0x5b0   :  { %v4519_v14 = vadd.f32 %v13075_v63, %v4150_v20  ;;  %v4152_v19 = vpop.f32.mrb[59].mxu1  ;;  %9543 = vtanh.f32 %v4548_v47  ;;  %v4659_v12 = vadd.f32 0.5, %v4617_v3  ;;  %v4715_v60 = vmul.f32 %v8342_v45, %v4666_v40 }
 0x5b1   :  { %v4520_v28 = vadd.f32 %v13075_v63, %v4152_v19  ;;  %v4660_v10 = vadd.f32 0.5, %v4618_v56 }
 0x5b2   :  { %9545 = vtanh.f32 %v4519_v14 }
 0x5b3   :  { %9547 = vtanh.f32 %v4520_v28  ;;  %v4156_v5 = vpop.f32.mrb[60].mxu1 }
 0x5b4   :  { %v4526_v36 = vadd.f32 %v13089_v59, %v4156_v5  ;;  %v4158_v55 = vpop.f32.mrb[61].mxu1  ;;  %9549 = vtanh.f32 %v4568_v35  ;;  %v4631_v35 = vmul.f32 0.5, %v9534_v62  ;;  %v4716_v5 = vmul.f32 %v8343_v25, %v4667_v15 }
 0x5b5   :  { %v4527_v9 = vadd.f32 %v13089_v59, %v4158_v55 }
 0x5b6   :  { %v9536_v53 = vpop.eup %9535  ;;  %9551 = vtanh.f32 %v4526_v36 }
 0x5b7   :  { %v9538_v29 = vpop.eup %9537  ;;  %9553 = vtanh.f32 %v4527_v9  ;;  %v8916_v17 = vpop.f32.mrb[62].mxu1  ;;  %v4645_v61 = vmul.f32 0.5, %v9536_v53 }
 0x5b8   :  { %v9540_v49 = vpop.eup %9539  ;;  %v4488_v31 = vadd.f32 %v8916_v17, %v13026_v0  ;;  %v4340_v23 = vpop.f32.mrb[63].mxu1  ;;  %9555 = vtanh.f32 %v4569_v22  ;;  %v4646_v50 = vmul.f32 0.5, %v9538_v29 }
 0x5b9   :  { %v9542_v2 = vpop.eup %9541  ;;  %v4481_v13 = vadd.f32 %v13013_v18, %v4340_v23  ;;  %v4638_v47 = vmul.f32 0.5, %v9540_v49  ;;  %v4687_v38 = vadd.f32 0.5, %v4645_v61 }
 0x5ba   :  { %v4544_v44 = vmul.f32 0.5, %v4488_v31  ;;  %v4001_v32 = vpop.f32.mrb[32].mxu0  ;;  %v9544_v24 = vpop.eup %9543  ;;  %v4639_v27 = vmul.f32 0.5, %v9542_v2  ;;  %v4688_v55 = vadd.f32 0.5, %v4646_v50 }
 0x5bb   :  { %v4537_v41 = vmul.f32 0.5, %v4481_v13  ;;  %v8919_v20 = vpop.f32.mrb[64].mxu1  ;;  %v4003_v14 = vpop.f32.mrb[33].mxu0  ;;  %v4632_v29 = vmul.f32 0.5, %v9544_v24  ;;  %v4680_v3 = vadd.f32 0.5, %v4638_v47  ;;  %v4750_v61 = vmul.f32 %v8342_v45, %v4687_v38 }
 0x5bc   :  { %v9546_v19 = vpop.eup %9545  ;;  %v4502_v28 = vadd.f32 %v8919_v20, %v13039_v11  ;;  %v4350_v34 = vpop.f32.mrb[65].mxu1  ;;  %9557 = vtanh.f32 %v4544_v44  ;;  %v4681_v40 = vadd.f32 0.5, %v4639_v27  ;;  %v4751_v44 = vmul.f32 %v8343_v25, %v4688_v55 }
 0x5bd   :  { %v9548_v51 = vpop.eup %9547  ;;  %v4722_v26 = vmul.f32 %v9546_v19, %v4659_v12  ;;  %v4495_v36 = vadd.f32 %v13119_v42, %v4350_v34  ;;  %9559 = vtanh.f32 %v4537_v41  ;;  %v4475_v27 = vadd.f32 %v13013_v18, %v4001_v32 }
 0x5be   :  { %v4723_v43 = vmul.f32 %v9548_v51, %v4660_v10  ;;  %v4558_v22 = vmul.f32 0.5, %v4502_v28  ;;  %v4007_v9 = vpop.f32.mrb[34].mxu0  ;;  %v9550_v53 = vpop.eup %9549  ;;  %v4476_v55 = vadd.f32 %v13013_v18, %v4003_v14 }
 0x5bf   :  { %v4729_v56 = vadd.f32 %v4722_v26, %v4715_v60  ;;  %v8922_v62 = vpop.f32.mrb[66].mxu1  ;;  %v4009_v17 = vpop.f32.mrb[35].mxu0  ;;  %v4551_v23 = vmul.f32 0.5, %v4495_v36  ;;  %v4652_v12 = vmul.f32 0.5, %v9550_v53  ;;  %v4482_v25 = vadd.f32 %v13026_v0, %v4007_v9 }
 0x5c0   :  { %v9552_v49 = vpop.eup %9551  ;;  %v4730_v31 = vadd.f32 %v4723_v43, %v4716_v5  ;;  %9561 = vtanh.f32 %v4558_v22  ;;  %v4360_v2 = vpop.f32.mrb[67].mxu1  ;;  %v4516_v20 = vadd.f32 %v8922_v62, %v13136_v33  ;;  %v4483_v38 = vadd.f32 %v13026_v0, %v4009_v17 }
 0x5c1   :  { %v9554_v15 = vpop.eup %9553  ;;  %9563 = vtanh.f32 %v4729_v56  ;;  %v4757_v13 = vmul.f32 %v9552_v49, %v4680_v3  ;;  %v4509_v50 = vadd.f32 %v13052_v1, %v4360_v2  ;;  %v4673_v62 = vadd.f32 0.5, %v4631_v35 }
 0x5c2   :  { %9565 = vtanh.f32 %v4730_v31  ;;  %v4758_v24 = vmul.f32 %v9554_v15, %v4681_v40  ;;  %v4013_v10 = vpop.f32.mrb[36].mxu0  ;;  %v9556_v47 = vpop.eup %9555  ;;  %v4572_v22 = vmul.f32 0.5, %v4516_v20  ;;  %v4538_v9 = vmul.f32 0.5, %v4482_v25 }
 0x5c3   :  { %v4764_v41 = vadd.f32 %v4757_v13, %v4750_v61  ;;  %v4565_v19 = vmul.f32 0.5, %v4509_v50  ;;  %v8925_v60 = vpop.f32.mrb[68].mxu1  ;;  %v4015_v28 = vpop.f32.mrb[37].mxu0  ;;  %9567 = vtanh.f32 %v4551_v23  ;;  %v4653_v36 = vmul.f32 0.5, %v9556_v47 }
 0x5c4   :  { %v4765_v34 = vadd.f32 %v4758_v24, %v4751_v44  ;;  %v4530_v45 = vadd.f32 %v8925_v60, %v13089_v59  ;;  %v4370_v51 = vpop.f32.mrb[69].mxu1  ;;  %v4674_v17 = vadd.f32 0.5, %v4632_v29  ;;  %v4694_v14 = vadd.f32 0.5, %v4652_v12 }
 0x5c5   :  { %9569 = vtanh.f32 %v4764_v41  ;;  %v4523_v5 = vadd.f32 %v13075_v63, %v4370_v51  ;;  %v13286_v26 = vmul.f32 %v4764_v41, %v4729_v56  ;;  %v4539_v56 = vmul.f32 0.5, %v4483_v38 }
 0x5c6   :  { %9571 = vtanh.f32 %v4765_v34  ;;  %v4019_v32 = vpop.f32.mrb[38].mxu0  ;;  %v13289_v43 = vmul.f32 %v4765_v34, %v4730_v31  ;;  %v9558_v3 = vpop.eup %9557  ;;  %v4695_v15 = vadd.f32 0.5, %v4653_v36  ;;  %v4531_v31 = vmul.f32 0.5, %v4475_v27 }
 0x5c7   :  { %9573 = vtanh.f32 %v4565_v19  ;;  %v4021_v53 = vpop.f32.mrb[39].mxu0  ;;  %v4496_v49 = vadd.f32 %v13039_v11, %v4019_v32  ;;  %v9560_v40 = vpop.eup %9559  ;;  %v4532_v61 = vmul.f32 0.5, %v4476_v55  ;;  %v4628_v44 = vmul.f32 0.5, %v9558_v3 }
 0x5c8   :  { %9575 = vtanh.f32 %v4530_v45  ;;  %v4497_v23 = vadd.f32 %v13039_v11, %v4021_v53  ;;  %v4489_v35 = vadd.f32 %v13119_v42, %v4013_v10  ;;  %v4621_v45 = vmul.f32 0.5, %v9560_v40  ;;  %v13299_v10 = vld [vmem:[%s14754_s11 + $0x48] ss:$0 sm:$0xff] }
 0x5c9   :  { %9577 = vtanh.f32 %v4523_v5  ;;  %v4552_v29 = vmul.f32 0.5, %v4496_v49  ;;  %v4490_v36 = vadd.f32 %v13119_v42, %v4015_v28  ;;  %v8346_v28 = vld [vmem:[%s14745_s2 + $0x180] sm:$0xff] }
 0x5ca   :  { %v9562_v2 = vpop.eup %9561  ;;  %v4025_v13 = vpop.f32.mrb[40].mxu0  ;;  %9579 = vtanh.f32 %v4572_v22  ;;  %v4553_v12 = vmul.f32 0.5, %v4497_v23  ;;  %v13306_v22 = vld [vmem:[%s14754_s11 + $0x50] ss:$0 sm:$0xff] }
 0x5cb   :  { %v9564_v50 = vpop.eup %9563  ;;  %v4503_v24 = vadd.f32 %v13052_v1, %v4025_v13  ;;  %v4027_v47 = vpop.f32.mrb[41].mxu0  ;;  %9581 = vtanh.f32 %v4538_v9  ;;  %v4642_v60 = vmul.f32 0.5, %v9562_v2  ;;  %v4663_v2 = vadd.f32 0.5, %v4621_v45 }
 0x5cc   :  { %v9566_v41 = vpop.eup %9565  ;;  %v4504_v20 = vadd.f32 %v13052_v1, %v4027_v47  ;;  %v4743_v19 = vmul.f32 %v9564_v50, %v4673_v62  ;;  %9583 = vtanh.f32 %v4539_v56  ;;  %v4670_v62 = vadd.f32 0.5, %v4628_v44 }
 0x5cd   :  { %v4744_v27 = vmul.f32 %v9566_v41, %v4674_v17  ;;  %v9568_v34 = vpop.eup %9567  ;;  %9585 = vtanh.f32 %v4531_v31  ;;  %v4559_v51 = vmul.f32 0.5, %v4503_v24  ;;  %v4684_v40 = vadd.f32 0.5, %v4642_v60 }
 0x5ce   :  { %v4031_v25 = vpop.f32.mrb[42].mxu0  ;;  %v4855_v5 = vmul.f32 %v13299_v10, %v4743_v19  ;;  %9587 = vtanh.f32 %v4532_v61  ;;  %v4560_v55 = vmul.f32 0.5, %v4504_v20  ;;  %v4545_v17 = vmul.f32 0.5, %v4489_v35 }
 0x5cf   :  { %v9570_v38 = vpop.eup %9569  ;;  %v4033_v32 = vpop.f32.mrb[43].mxu0  ;;  %v4856_v53 = vmul.f32 %v13306_v22, %v4744_v27  ;;  %9589 = vtanh.f32 %v4552_v29  ;;  %v4546_v50 = vmul.f32 0.5, %v4490_v36  ;;  %v4719_v35 = vmul.f32 %v8346_v28, %v4670_v62 }
 0x5d0   :  { %v9572_v3 = vpop.eup %9571  ;;  %v13309_v9 = vmul.f32 %v9570_v38, %v4694_v14  ;;  %8523 = vst [vmem:[%s14759_s16 + $0x48] sm:$0xff] %v4855_v5  ;;  %9591 = vtanh.f32 %v4553_v12  ;;  %v4635_v45 = vmul.f32 0.5, %v9568_v34 }
 0x5d1   :  { %v9574_v49 = vpop.eup %9573  ;;  %v13317_v56 = vmul.f32 %v9572_v3, %v4695_v15  ;;  %8524 = vst [vmem:[%s14759_s16 + $0x50] sm:$0xff] %v4856_v53  ;;  %9593 = vtanh.f32 %v4559_v51  ;;  %v4511_v53 = vadd.f32 %v13136_v33, %v4033_v32 }
 0x5d2   :  { %v9576_v23 = vpop.eup %9575  ;;  %v4649_v14 = vmul.f32 0.5, %v9574_v49  ;;  %v4037_v31 = vpop.f32.mrb[44].mxu0  ;;  %9595 = vtanh.f32 %v4560_v55  ;;  %v13325_v20 = vmul.f32 %v13309_v9, %v4743_v19  ;;  %v4510_v55 = vadd.f32 %v13136_v33, %v4031_v25 }
 0x5d3   :  { %v9578_v61 = vpop.eup %9577  ;;  %v4761_v13 = vmul.f32 %v9576_v23, %v4684_v40  ;;  %v4517_v44 = vadd.f32 %v13075_v63, %v4037_v31  ;;  %v4039_v24 = vpop.f32.mrb[45].mxu0  ;;  %9597 = vtanh.f32 %v4545_v17  ;;  %v13328_v60 = vmul.f32 %v13317_v56, %v4744_v27 }
 0x5d4   :  { %v4691_v47 = vadd.f32 0.5, %v4649_v14  ;;  %v4726_v15 = vmul.f32 %v9578_v61, %v4663_v2  ;;  %v4518_v41 = vadd.f32 %v13075_v63, %v4039_v24  ;;  %v9580_v29 = vpop.eup %9579  ;;  %v13338_v23 = vadd.f32 0.5, %v4635_v45  ;;  %v8340_v45 = vld [vmem:[%s14745_s2 + $0x150] sm:$0xff] }
 0x5d5   :  { %v9582_v12 = vpop.eup %9581  ;;  %9599 = vtanh.f32 %v4517_v44  ;;  %v4656_v25 = vmul.f32 0.5, %v9580_v29  ;;  %v4566_v31 = vmul.f32 0.5, %v4510_v55  ;;  %v4567_v61 = vmul.f32 0.5, %v4511_v53 }
 0x5d6   :  { %v4754_v51 = vmul.f32 %v8346_v28, %v4691_v47  ;;  %v13330_v5 = vadd.f32 %v4726_v15, %v4719_v35  ;;  %v4043_v38 = vpop.f32.mrb[46].mxu0  ;;  %v9584_v36 = vpop.eup %9583  ;;  %9601 = vtanh.f32 %v4518_v41  ;;  %v4622_v27 = vmul.f32 0.5, %v9582_v12 }
 0x5d7   :  { %v4524_v3 = vadd.f32 %v13089_v59, %v4043_v38  ;;  %v4045_v19 = vpop.f32.mrb[47].mxu0  ;;  %v9586_v62 = vpop.eup %9585  ;;  %9603 = vtanh.f32 %v4546_v50  ;;  %v4623_v28 = vmul.f32 0.5, %v9584_v36 }
 0x5d8   :  { %v13335_v49 = vadd.f32 %v4761_v13, %v4754_v51  ;;  %v9588_v34 = vpop.eup %9587  ;;  %v4525_v40 = vadd.f32 %v13089_v59, %v4045_v19  ;;  %v4615_v14 = vmul.f32 0.5, %v9586_v62  ;;  %v4664_v24 = vadd.f32 0.5, %v4622_v27  ;;  %v8341_v62 = vld [vmem:[%s14745_s2 + $0x158] sm:$0xff] }
 0x5d9   :  { %9605 = vtanh.f32 %v4524_v3  ;;  %v9590_v17 = vpop.eup %9589  ;;  %s9341_s17 = spop %9340  ;;  %v4616_v44 = vmul.f32 0.5, %v9588_v34  ;;  %v4665_v15 = vadd.f32 0.5, %v4623_v28 }
 0x5da   :  { %9607 = vtanh.f32 %v13330_v5  ;;  %v4227_v32 = vpop.f32.mrb[48].mxu0  ;;  %v9592_v2 = vpop.eup %9591  ;;  %v4964_v35 = vstv %s9341_s17  ;;  %v4636_v51 = vmul.f32 0.5, %v9590_v17  ;;  %v4657_v19 = vadd.f32 0.5, %v4615_v14 }
 0x5db   :  { %9609 = vtanh.f32 %v4525_v40  ;;  %v4229_v13 = vpop.f32.mrb[49].mxu0  ;;  %v9594_v50 = vpop.eup %9593  ;;  %v4965_v29 = vmul.f32 %v4964_v35, %v12403_v30  ;;  %v4966_v12 = vmul.f32 %v4964_v35, %v12409_v58  ;;  %v4967_v36 = vmul.f32 %v4964_v35, %v12480_v48 }
 0x5dc   :  { %9611 = vtanh.f32 %v13335_v49  ;;  %v9596_v47 = vpop.eup %9595  ;;  %v4643_v41 = vmul.f32 0.5, %v9594_v50  ;;  %v4968_v55 = vmul.f32 %v4964_v35, %v12473_v52  ;;  %v4969_v30 = vmul.f32 %v4964_v35, %v12483_v21 }
 0x5dd   :  { %v4644_v38 = vmul.f32 0.5, %v9596_v47  ;;  %v9598_v3 = vpop.eup %9597  ;;  %9613 = vtanh.f32 %v4566_v31  ;;  %v4970_v58 = vmul.f32 %v4964_v35, %v12497_v7  ;;  %8535 = vst [vmem:[%s14759_s16 + $0xa8] sm:$0xff] %v4965_v29  ;;  %8536 = vst [vmem:[%s14759_s16 + $0xb0] sm:$0xff] %v4966_v12  ;;  %v4658_v27 = vadd.f32 0.5, %v4616_v44 }
 0x5de   :  { %v4233_v53 = vpop.f32.mrb[50].mxu0  ;;  %v4637_v34 = vmul.f32 0.5, %v9592_v2  ;;  %v4685_v28 = vadd.f32 0.5, %v4643_v41  ;;  %v4971_v40 = vmul.f32 %v4964_v35, %v12528_v8  ;;  %8537 = vst [vmem:[%s14759_s16 + $0xb8] sm:$0xff] %v4967_v36  ;;  %8538 = vst [vmem:[%s14759_s16 + $0xc0] sm:$0xff] %v4968_v55  ;;  %v4713_v7 = vmul.f32 %v8340_v45, %v4664_v24 }
 0x5df   :  { %v4235_v52 = vpop.f32.mrb[51].mxu0  ;;  %v9600_v48 = vpop.eup %9599  ;;  %9615 = vtanh.f32 %v4567_v61  ;;  %8539 = vst [vmem:[%s14759_s16 + $0xc8] sm:$0xff] %v4969_v30  ;;  %8540 = vst [vmem:[%s14759_s16 + $0xd0] sm:$0xff] %v4970_v58  ;;  %v4479_v8 = vadd.f32 %v13013_v18, %v4227_v32  ;;  %v4714_v14 = vmul.f32 %v8341_v62, %v4665_v15  ;;  %v4678_v31 = vadd.f32 0.5, %v4636_v51 }
 0x5e0   :  { %v9602_v21 = vpop.eup %9601  ;;  %v4720_v17 = vmul.f32 %v9600_v48, %v4657_v19  ;;  %v4686_v50 = vadd.f32 0.5, %v4644_v38  ;;  %8541 = vst [vmem:[%s14759_s16 + $0xd8] sm:$0xff] %v4971_v40  ;;  %v4698_v35 = vadd.f32 0.5, %v4656_v25  ;;  %v4486_v41 = vadd.f32 %v13026_v0, %v4233_v53 }
 0x5e1   :  { %v9604_v2 = vpop.eup %9603  ;;  %v4721_v44 = vmul.f32 %v9602_v21, %v4658_v27  ;;  %v4487_v29 = vadd.f32 %v13026_v0, %v4235_v52  ;;  %v4679_v36 = vadd.f32 0.5, %v4637_v34  ;;  %v4748_v15 = vmul.f32 %v8340_v45, %v4685_v28 }
 0x5e2   :  { %v4239_v61 = vpop.f32.mrb[52].mxu0  ;;  %v4727_v47 = vadd.f32 %v4720_v17, %v4713_v7  ;;  %v4629_v19 = vmul.f32 0.5, %v9598_v3  ;;  %v4535_v30 = vmul.f32 0.5, %v4479_v8  ;;  %v4480_v58 = vadd.f32 %v13013_v18, %v4229_v13 }
 0x5e3   :  { %v9606_v24 = vpop.eup %9605  ;;  %v13379_v12 = vpop.f32.mrb[53].mxu0  ;;  %v4728_v51 = vadd.f32 %v4721_v44, %v4714_v14  ;;  %v4749_v25 = vmul.f32 %v8341_v62, %v4686_v50  ;;  %v4542_v52 = vmul.f32 0.5, %v4486_v41  ;;  %v4543_v21 = vmul.f32 0.5, %v4487_v29  ;;  %v13392_v14 = vld [vmem:[%s14754_s11 + $0x68] ss:$0 sm:$0xff] }
 0x5e4   :  { %v9608_v32 = vpop.eup %9607  ;;  %v4755_v38 = vmul.f32 %v9606_v24, %v4678_v31  ;;  %9617 = vtanh.f32 %v4727_v47  ;;  %v4536_v62 = vmul.f32 0.5, %v4480_v58  ;;  %v4630_v50 = vmul.f32 0.5, %v9604_v2 }
 0x5e5   :  { %v9610_v55 = vpop.eup %9609  ;;  %9619 = vtanh.f32 %v4728_v51  ;;  %v4747_v45 = vmul.f32 %v9608_v32, %v13338_v23  ;;  %v4493_v2 = vadd.f32 %v13119_v42, %v4239_v61 }
 0x5e6   :  { %v9612_v48 = vpop.eup %9611  ;;  %v4762_v27 = vadd.f32 %v4755_v38, %v4748_v15  ;;  %v4756_v53 = vmul.f32 %v9610_v55, %v4679_v36  ;;  %v4245_v40 = vpop.f32.mrb[54].mxu0  ;;  %v13408_v38 = vmul.f32 %v13335_v49, %v13330_v5  ;;  %v4671_v55 = vadd.f32 0.5, %v4629_v19 }
 0x5e7   :  { %v4500_v7 = vadd.f32 %v13039_v11, %v4245_v40  ;;  %v4247_v34 = vpop.f32.mrb[55].mxu0  ;;  %v9614_v13 = vpop.eup %9613  ;;  %v13387_v8 = vmul.f32 %v9612_v48, %v4698_v35  ;;  %v4859_v31 = vmul.f32 %v13392_v14, %v4747_v45  ;;  %v4785_v48 = vmul.f32 0.5, %v13309_v9  ;;  %v13417_v9 = vld [vmem:[%s14754_s11 + $0x38] ss:$0 sm:$0xff] }
 0x5e8   :  { %9621 = vtanh.f32 %v4762_v27  ;;  %v13384_v28 = vmul.f32 %v4762_v27, %v4727_v47  ;;  %v4763_v3 = vadd.f32 %v4756_v53, %v4749_v25  ;;  %v4501_v17 = vadd.f32 %v13039_v11, %v4247_v34 }
 0x5e9   :  { %9623 = vtanh.f32 %v4535_v30  ;;  %v4556_v44 = vmul.f32 0.5, %v4500_v7  ;;  %v9616_v47 = vpop.eup %9615  ;;  %8527 = vst [vmem:[%s14759_s16 + $0x68] sm:$0xff] %v4859_v31  ;;  %v13402_v32 = vmul.f32 %v13387_v8, %v4747_v45  ;;  %v4650_v15 = vmul.f32 0.5, %v9614_v13 }
 0x5ea   :  { %9625 = vtanh.f32 %v4763_v3  ;;  %v13395_v23 = vmul.f32 %v4763_v3, %v4728_v51  ;;  %v4251_v24 = vpop.f32.mrb[56].mxu0  ;;  %v4557_v41 = vmul.f32 0.5, %v4501_v17  ;;  %v4672_v27 = vadd.f32 0.5, %v4630_v50  ;;  %v13424_v50 = vld [vmem:[%s14754_s11 + $0x40] ss:$0 sm:$0xff] }
 0x5eb   :  { %9627 = vtanh.f32 %v4542_v52  ;;  %v4507_v29 = vadd.f32 %v13052_v1, %v4251_v24  ;;  %v4253_v35 = vpop.f32.mrb[57].mxu0  ;;  %v4651_v53 = vmul.f32 0.5, %v9616_v47  ;;  %v4549_v52 = vmul.f32 0.5, %v4493_v2 }
 0x5ec   :  { %9629 = vtanh.f32 %v4543_v21  ;;  %v4508_v36 = vadd.f32 %v13052_v1, %v4253_v35  ;;  %v4494_v21 = vadd.f32 %v13119_v42, %v13379_v12  ;;  %v4692_v5 = vadd.f32 0.5, %v4650_v15 }
 0x5ed   :  { %9631 = vtanh.f32 %v4536_v62  ;;  %v4563_v51 = vmul.f32 0.5, %v4507_v29  ;;  %v4786_v45 = vmul.f32 0.5, %v13317_v56  ;;  %v4693_v13 = vadd.f32 0.5, %v4651_v53 }
 0x5ee   :  { %9633 = vtanh.f32 %v4556_v44  ;;  %v4564_v30 = vmul.f32 0.5, %v4508_v36  ;;  %v4257_v58 = vpop.f32.mrb[58].mxu0  ;;  %v9618_v25 = vpop.eup %9617  ;;  %v4550_v24 = vmul.f32 0.5, %v4494_v21  ;;  %v4789_v15 = vmul.f32 0.5, %v13387_v8 }
 0x5ef   :  { %9635 = vtanh.f32 %v4557_v41  ;;  %v4259_v61 = vpop.f32.mrb[59].mxu0  ;;  %v9620_v40 = vpop.eup %9619  ;;  %v4741_v7 = vmul.f32 %v9618_v25, %v4671_v55  ;;  %v4514_v55 = vadd.f32 %v13136_v33, %v4257_v58 }
 0x5f0   :  { %9637 = vtanh.f32 %v4563_v51  ;;  %v4742_v49 = vmul.f32 %v9620_v40, %v4672_v27  ;;  %v4515_v40 = vadd.f32 %v13136_v33, %v4259_v61  ;;  %v8344_v61 = vld [vmem:[%s14745_s2 + $0x170] sm:$0xff] }
 0x5f1   :  { %9639 = vtanh.f32 %v4564_v30  ;;  %v4853_v3 = vmul.f32 %v13417_v9, %v4741_v7 }
 0x5f2   :  { %v9622_v19 = vpop.eup %9621  ;;  %v4263_v34 = vpop.f32.mrb[60].mxu0  ;;  %9641 = vtanh.f32 %v4785_v48  ;;  %v4854_v56 = vmul.f32 %v13424_v50, %v4742_v49 }
 0x5f3   :  { %v9624_v17 = vpop.eup %9623  ;;  %v4521_v12 = vadd.f32 %v13075_v63, %v4263_v34  ;;  %v4265_v62 = vpop.f32.mrb[61].mxu0  ;;  %v4776_v31 = vmul.f32 %v9622_v19, %v4692_v5  ;;  %9643 = vtanh.f32 %v4549_v52  ;;  %8521 = vst [vmem:[%s14759_s16 + $0x38] sm:$0xff] %v4853_v3 }
 0x5f4   :  { %v9626_v44 = vpop.eup %9625  ;;  %v4522_v47 = vadd.f32 %v13075_v63, %v4265_v62  ;;  %8522 = vst [vmem:[%s14759_s16 + $0x40] sm:$0xff] %v4854_v56  ;;  %v4619_v34 = vmul.f32 0.5, %v9624_v17  ;;  %v4571_v56 = vmul.f32 0.5, %v4515_v40 }
 0x5f5   :  { %v9628_v41 = vpop.eup %9627  ;;  %9645 = vtanh.f32 %v4521_v12  ;;  %v4777_v29 = vmul.f32 %v9626_v44, %v4693_v13  ;;  %v13434_v35 = vmul.f32 %v4776_v31, %v4741_v7  ;;  %v4783_v8 = vmul.f32 0.5, %v4776_v31 }
 0x5f6   :  { %v9630_v2 = vpop.eup %9629  ;;  %9647 = vtanh.f32 %v4522_v47  ;;  %v4269_v36 = vpop.f32.mrb[62].mxu0  ;;  %v4626_v53 = vmul.f32 0.5, %v9628_v41  ;;  %v4570_v13 = vmul.f32 0.5, %v4514_v55  ;;  %v4661_v17 = vadd.f32 0.5, %v4619_v34  ;;  %v8345_v47 = vld [vmem:[%s14745_s2 + $0x178] sm:$0xff] }
 0x5f7   :  { %v9632_v51 = vpop.eup %9631  ;;  %v4528_v30 = vadd.f32 %v13089_v59, %v4269_v36  ;;  %v4271_v48 = vpop.f32.mrb[63].mxu0  ;;  %v4784_v25 = vmul.f32 0.5, %v4777_v29  ;;  %9649 = vtanh.f32 %v4786_v45  ;;  %v4627_v7 = vmul.f32 0.5, %v9630_v2 }
 0x5f8   :  { %v9634_v27 = vpop.eup %9633  ;;  %9651 = vtanh.f32 %v4550_v24  ;;  %v4529_v52 = vadd.f32 %v13089_v59, %v4271_v48  ;;  %v4981_v5 = vmul.f32 %v4777_v29, %v4742_v49  ;;  %v4620_v3 = vmul.f32 0.5, %v9632_v51 }
 0x5f9   :  { %v9636_v21 = vpop.eup %9635  ;;  %9653 = vtanh.f32 %v4528_v30  ;;  %v4668_v12 = vadd.f32 0.5, %v4626_v53  ;;  %v4669_v44 = vadd.f32 0.5, %v4627_v7  ;;  %v4640_v41 = vmul.f32 0.5, %v9634_v27 }
 0x5fa   :  { %v9638_v19 = vpop.eup %9637  ;;  %9655 = vtanh.f32 %v4529_v52  ;;  %v4662_v2 = vadd.f32 0.5, %v4620_v3  ;;  %v4641_v36 = vmul.f32 0.5, %v9636_v21  ;;  %v13450_v21 = vmul.f32 %v13299_v10, %v13286_v26 }
 0x5fb   :  { %v9640_v58 = vpop.eup %9639  ;;  %9657 = vtanh.f32 %v4784_v25  ;;  %v4647_v62 = vmul.f32 0.5, %v9638_v19  ;;  %v4717_v55 = vmul.f32 %v8344_v61, %v4668_v12  ;;  %v4718_v53 = vmul.f32 %v8345_v47, %v4669_v44 }
 0x5fc   :  { %v9642_v45 = vpop.eup %9641  ;;  %9659 = vtanh.f32 %v4789_v15  ;;  %v4648_v24 = vmul.f32 0.5, %v9640_v58  ;;  %v4682_v19 = vadd.f32 0.5, %v4640_v41  ;;  %15086 = vst [vmem:[#allocation26_spill] sm:$0xff] %v13450_v21  ;;  %v4683_v3 = vadd.f32 0.5, %v4641_v36 }
 0x5fd   :  { %v4799_v49 = vmul.f32 0.5, %v9642_v45  ;;  %9661 = vtanh.f32 %v4783_v8  ;;  %v9644_v31 = vpop.eup %9643  ;;  %v4689_v30 = vadd.f32 0.5, %v4647_v62  ;;  %v13457_v45 = vmul.f32 %v13417_v9, %v13434_v35 }
 0x5fe   :  { %9663 = vtanh.f32 %v4570_v13  ;;  %v4690_v40 = vadd.f32 0.5, %v4648_v24  ;;  %v13460_v12 = vmul.f32 %v13424_v50, %v4981_v5  ;;  %v13464_v41 = vmul.f32 %v13417_v9, %v13384_v28 }
 0x5ff   :  { %v9646_v29 = vpop.eup %9645  ;;  %v4806_v15 = vadd.f32 0.5, %v4799_v49  ;;  %9665 = vtanh.f32 %v4571_v56  ;;  %v4752_v56 = vmul.f32 %v8344_v61, %v4689_v30  ;;  %v13469_v5 = vmul.f32 %v13424_v50, %v13395_v23 }
 0x600   :  { %v9648_v51 = vpop.eup %9647  ;;  %v4724_v48 = vmul.f32 %v9646_v29, %v4661_v17  ;;  %v4753_v49 = vmul.f32 %v8345_v47, %v4690_v40  ;;  %15087 = vst [vmem:[#allocation49_spill] sm:$0xff] %v13464_v41  ;;  %v4994_v47 = vmul.f32 %v13457_v45, %v13457_v45  ;;  %v4995_v28 = vmul.f32 %v13460_v12, %v13460_v12 }
 0x601   :  { %v9650_v25 = vpop.eup %9649  ;;  %v4725_v52 = vmul.f32 %v9648_v51, %v4662_v2  ;;  %v4841_v7 = vmul.f32 %v13299_v10, %v4806_v15  ;;  %15088 = vst [vmem:[#allocation30_spill] sm:$0xff] %v13469_v5  ;;  %v13480_v23 = vmul.f32 %v13299_v10, %v13325_v20  ;;  %v4633_v40 = vmul.f32 0.5, %v9644_v31 }
 0x602   :  { %v9652_v8 = vpop.eup %9651  ;;  %v4731_v34 = vadd.f32 %v4724_v48, %v4717_v55  ;;  %v4800_v27 = vmul.f32 0.5, %v9650_v25  ;;  %v5050_v10 = vmul.f32 %v13464_v41, %v13464_v41  ;;  %v5051_v20 = vmul.f32 %v13469_v5, %v13469_v5 }
 0x603   :  { %v9654_v58 = vpop.eup %9653  ;;  %v4732_v13 = vadd.f32 %v4725_v52, %v4718_v53  ;;  %4848 = vst [vmem:[%s14759_s16 + $0x10] sm:$0xff] %v4841_v7 }
 0x604   :  { %v9656_v62 = vpop.eup %9655  ;;  %9667 = vtanh.f32 %v4731_v34  ;;  %v4759_v44 = vmul.f32 %v9654_v58, %v4682_v19  ;;  %v4807_v26 = vadd.f32 0.5, %v4800_v27  ;;  %v4634_v27 = vmul.f32 0.5, %v9652_v8 }
 0x605   :  { %v9658_v24 = vpop.eup %9657  ;;  %9669 = vtanh.f32 %v4732_v13  ;;  %v4760_v17 = vmul.f32 %v9656_v62, %v4683_v3 }
 0x606   :  { %v9660_v29 = vpop.eup %9659  ;;  %v4766_v2 = vadd.f32 %v4759_v44, %v4752_v56  ;;  %v4798_v35 = vmul.f32 0.5, %v9658_v24  ;;  %v4842_v36 = vmul.f32 %v13306_v22, %v4807_v26  ;;  %v5001_v26 = vadd.f32 %v4995_v28, %v4994_v47 }
 0x607   :  { %v9662_v61 = vpop.eup %9661  ;;  %v4767_v15 = vadd.f32 %v4760_v17, %v4753_v49  ;;  %v5602_v51 = vpop.f32.mrb[70].mxu1  ;;  %v4803_v55 = vmul.f32 0.5, %v9660_v29  ;;  %v4996_v17 = vmul.f32 %v13480_v23, %v13480_v23 }
 0x608   :  { %9671 = vtanh.f32 %v4766_v2  ;;  %v5604_v30 = vpop.f32.mrb[71].mxu1  ;;  %v4805_v48 = vadd.f32 0.5, %v4798_v35  ;;  %4849 = vst [vmem:[%s14759_s16 + $0x18] sm:$0xff] %v4842_v36  ;;  %v4797_v25 = vmul.f32 0.5, %v9662_v61  ;;  %v9664_v53 = vpop.eup %9663  ;;  %v5040_v7 = vmul.f32 %v4766_v2, %v4731_v34 }
 0x609   :  { %9673 = vtanh.f32 %v4767_v15  ;;  %v4810_v52 = vadd.f32 0.5, %v4803_v55  ;;  %v9666_v19 = vpop.eup %9665  ;;  %v5041_v62 = vmul.f32 %v4767_v15, %v4732_v13  ;;  %v13498_v34 = vmul.f32 %v13306_v22, %v13289_v43  ;;  %v15090_v55 = vld [vmem:[#allocation28_spill] sm:$0xff] }
 0x60a   :  { %v4840_v58 = vmul.f32 %v13424_v50, %v4805_v48  ;;  %v4804_v3 = vadd.f32 0.5, %v4797_v25  ;;  %v13493_v50 = vmul.f32 %v13306_v22, %v13328_v60  ;;  %v4675_v13 = vadd.f32 0.5, %v4633_v40 }
 0x60b   :  { %v5608_v56 = vpop.f32.mrb[72].mxu1  ;;  %v4845_v44 = vmul.f32 %v13392_v14, %v4810_v52  ;;  %15089 = vst [vmem:[#allocation67_spill] sm:$0xff] %v13498_v34  ;;  %v4654_v24 = vmul.f32 0.5, %v9664_v53  ;;  %v4676_v60 = vadd.f32 0.5, %v4634_v27  ;;  %v4655_v2 = vmul.f32 0.5, %v9666_v19 }
 0x60c   :  { %v5610_v31 = vpop.f32.mrb[73].mxu1  ;;  %4847 = vst [vmem:[%s14759_s16 + $0x8] sm:$0xff] %v4840_v58  ;;  %v4839_v8 = vmul.f32 %v13417_v9, %v4804_v3  ;;  %v5987_v49 = vadd.f32 %v5608_v56, %v12166_v6  ;;  %v5002_v36 = vadd.f32 %v5001_v26, %v4996_v17  ;;  %v5052_v61 = vmul.f32 %v13450_v21, %v13450_v21  ;;  %v13523_v19 = vld [vmem:[%s14754_s11 + $0x58] ss:$0 sm:$0xff]  ;;  %v13531_v56 = vld [vmem:[%s14754_s11 + $0x60] ss:$0 sm:$0xff] }
 0x60d   :  { %4852 = vst [vmem:[%s14759_s16 + $0x30] sm:$0xff] %v4845_v44  ;;  %v5988_v9 = vadd.f32 %v5610_v31, %v12166_v6  ;;  %v5057_v15 = vadd.f32 %v5051_v20, %v5050_v10  ;;  %v5980_v47 = vadd.f32 %v5602_v51, %v15090_v55  ;;  %v5981_v28 = vadd.f32 %v5604_v30, %v15090_v55 }
 0x60e   :  { %v9668_v29 = vpop.eup %9667  ;;  %4846 = vst [vmem:[%s14759_s16] sm:$0xff] %v4839_v8  ;;  %v5053_v53 = vmul.f32 %v13498_v34, %v13498_v34  ;;  %v4696_v40 = vadd.f32 0.5, %v4654_v24  ;;  %v6043_v52 = vmul.f32 0.5, %v5987_v49  ;;  %v4997_v51 = vmul.f32 %v13493_v50, %v13493_v50 }
 0x60f   :  { %v9670_v43 = vpop.eup %9669  ;;  %v13510_v22 = vpop.f32.mrb[74].mxu1  ;;  %v4745_v35 = vmul.f32 %v9668_v29, %v4675_v13  ;;  %v4697_v30 = vadd.f32 0.5, %v4655_v2  ;;  %v6044_v3 = vmul.f32 0.5, %v5988_v9  ;;  %v13536_v26 = vmul.f32 %v13392_v14, %v13402_v32 }
 0x610   :  { %v13516_v48 = vpop.f32.mrb[75].mxu1  ;;  %v4746_v25 = vmul.f32 %v9670_v43, %v4676_v60  ;;  %v5003_v8 = vadd.f32 %v5002_v36, %v4997_v51  ;;  %v13542_v13 = vmul.f32 %v13523_v19, %v5040_v7  ;;  %v5058_v24 = vadd.f32 %v5057_v15, %v5052_v61 }
 0x611   :  { %v4857_v27 = vmul.f32 %v13523_v19, %v4745_v35  ;;  %15091 = vst [vmem:[#allocation21_spill] sm:$0xff] %v13536_v26  ;;  %v6036_v49 = vmul.f32 0.5, %v5980_v47  ;;  %v6037_v17 = vmul.f32 0.5, %v5981_v28  ;;  %9675 = vtanh.f32 %v6043_v52 }
 0x612   :  { %v9672_v58 = vpop.eup %9671  ;;  %v4858_v44 = vmul.f32 %v13531_v56, %v4746_v25  ;;  %15092 = vst [vmem:[#allocation74_spill] sm:$0xff] %v13542_v13  ;;  %v13549_v43 = vmul.f32 %v13531_v56, %v5041_v62  ;;  %9677 = vtanh.f32 %v6044_v3 }
 0x613   :  { %v9674_v10 = vpop.eup %9673  ;;  %v5620_v20 = vpop.f32.mrb[76].mxu1  ;;  %v4780_v31 = vmul.f32 %v9672_v58, %v4696_v40  ;;  %8525 = vst [vmem:[%s14759_s16 + $0x58] sm:$0xff] %v4857_v27  ;;  %v5054_v40 = vmul.f32 %v13542_v13, %v13542_v13  ;;  %v5059_v27 = vadd.f32 %v5058_v24, %v5053_v53 }
 0x614   :  { %v6001_v29 = vadd.f32 %v5620_v20, %v12158_v4  ;;  %v5622_v60 = vpop.f32.mrb[77].mxu1  ;;  %v4781_v2 = vmul.f32 %v9674_v10, %v4697_v30  ;;  %8526 = vst [vmem:[%s14759_s16 + $0x60] sm:$0xff] %v4858_v44  ;;  %15093 = vst [vmem:[#allocation43_spill] sm:$0xff] %v13549_v43  ;;  %v5055_v58 = vmul.f32 %v13549_v43, %v13549_v43 }
 0x615   :  { %v4787_v32 = vmul.f32 0.5, %v4780_v31  ;;  %v4984_v9 = vmul.f32 %v4780_v31, %v4745_v35  ;;  %v6002_v7 = vadd.f32 %v5622_v60, %v12158_v4  ;;  %v5060_v53 = vadd.f32 %v5059_v27, %v5054_v40 }
 0x616   :  { %v4788_v36 = vmul.f32 0.5, %v4781_v2  ;;  %v4985_v61 = vmul.f32 %v4781_v2, %v4746_v25  ;;  %v6057_v15 = vmul.f32 0.5, %v6001_v29  ;;  %v13574_v60 = vmul.f32 %v13392_v14, %v13408_v38 }
 0x617   :  { %v5626_v47 = vpop.f32.mrb[78].mxu1  ;;  %9679 = vtanh.f32 %v4787_v32  ;;  %v13553_v28 = vmul.f32 %v13523_v19, %v4984_v9  ;;  %v6058_v30 = vmul.f32 0.5, %v6002_v7  ;;  %v5995_v2 = vadd.f32 %v13516_v48, %v12173_v57 }
 0x618   :  { %9681 = vtanh.f32 %v6036_v49  ;;  %v6008_v35 = vadd.f32 %v5626_v47, %v12160_v46  ;;  %v5628_v52 = vpop.f32.mrb[79].mxu1  ;;  %v13559_v62 = vmul.f32 %v13531_v56, %v4985_v61  ;;  %v5000_v49 = vmul.f32 %v13536_v26, %v13536_v26  ;;  %15094 = vst [vmem:[#allocation57_spill] sm:$0xff] %v13574_v60 }
 0x619   :  { %9683 = vtanh.f32 %v6037_v17  ;;  %v6009_v25 = vadd.f32 %v5628_v52, %v12160_v46  ;;  %v4998_v51 = vmul.f32 %v13553_v28, %v13553_v28  ;;  %v5994_v17 = vadd.f32 %v13510_v22, %v12173_v57 }
 0x61a   :  { %v6064_v3 = vmul.f32 0.5, %v6008_v35  ;;  %9685 = vtanh.f32 %v4788_v36  ;;  %v4999_v44 = vmul.f32 %v13559_v62, %v13559_v62  ;;  %v5061_v7 = vadd.f32 %v5060_v53, %v5055_v58 }
 0x61b   :  { %9687 = vtanh.f32 %v6057_v15  ;;  %v6065_v10 = vmul.f32 0.5, %v6009_v25  ;;  %v5632_v20 = vpop.f32.mrb[80].mxu1  ;;  %v5004_v31 = vadd.f32 %v5003_v8, %v4998_v51  ;;  %v9676_v8 = vpop.eup %9675  ;;  %v6050_v22 = vmul.f32 0.5, %v5994_v17 }
 0x61c   :  { %9689 = vtanh.f32 %v6064_v3  ;;  %v5634_v24 = vpop.f32.mrb[81].mxu1  ;;  %v9678_v36 = vpop.eup %9677  ;;  %v5056_v14 = vmul.f32 %v13574_v60, %v13574_v60  ;;  %v6051_v35 = vmul.f32 0.5, %v5995_v2  ;;  %v6127_v27 = vmul.f32 0.5, %v9676_v8 }
 0x61d   :  { %9691 = vtanh.f32 %v6065_v10  ;;  %v5005_v29 = vadd.f32 %v5004_v31, %v4999_v44  ;;  %v6015_v25 = vadd.f32 %v5632_v20, %v12162_v39  ;;  %v6128_v3 = vmul.f32 0.5, %v9678_v36 }
 0x61e   :  { %9693 = vtanh.f32 %v6058_v30  ;;  %v5062_v58 = vadd.f32 %v5061_v7, %v5056_v14  ;;  %v6016_v44 = vadd.f32 %v5634_v24, %v12162_v39  ;;  %v6169_v7 = vadd.f32 0.5, %v6127_v27 }
 0x61f   :  { %v5638_v32 = vpop.f32.mrb[82].mxu1  ;;  %v5006_v9 = vadd.f32 %v5005_v29, %v5000_v49  ;;  %v6071_v36 = vmul.f32 0.5, %v6015_v25 }
 0x620   :  { %v6022_v61 = vadd.f32 %v5638_v32, %v12200_v16  ;;  %v5640_v15 = vpop.f32.mrb[83].mxu1 }
 0x621   :  { %v9680_v47 = vpop.eup %9679  ;;  %v6023_v40 = vadd.f32 %v5640_v15, %v12200_v16  ;;  %5007 = vadd.xlane.f32.xlu1 %v5006_v9 }
 0x622   :  { %v9682_v38 = vpop.eup %9681  ;;  %9695 = vtanh.f32 %v6022_v61  ;;  %v4801_v48 = vmul.f32 0.5, %v9680_v47  ;;  %v8319_v47 = vld [vmem:[%s14745_s2 + $0xa8] sm:$0xff] }
 0x623   :  { %v9684_v52 = vpop.eup %9683  ;;  %9697 = vtanh.f32 %v6023_v40  ;;  %v5644_v51 = vpop.f32.mrb[84].mxu1  ;;  %v6120_v8 = vmul.f32 0.5, %v9682_v38  ;;  %v6072_v40 = vmul.f32 0.5, %v6016_v44  ;;  %v6218_v44 = vmul.f32 %v8319_v47, %v6169_v7 }
 0x624   :  { %v9686_v30 = vpop.eup %9685  ;;  %v6029_v10 = vadd.f32 %v5644_v51, %v12164_v37  ;;  %v5646_v31 = vpop.f32.mrb[85].mxu1  ;;  %v4808_v53 = vadd.f32 0.5, %v4801_v48  ;;  %9699 = vtanh.f32 %v6050_v22  ;;  %v6121_v20 = vmul.f32 0.5, %v9684_v52 }
 0x625   :  { %v9688_v49 = vpop.eup %9687  ;;  %v6030_v17 = vadd.f32 %v5646_v31, %v12164_v37  ;;  %v4802_v29 = vmul.f32 0.5, %v9686_v30  ;;  %5063 = vadd.xlane.f32.xlu1 %v5062_v58  ;;  %v6170_v22 = vadd.f32 0.5, %v6128_v3  ;;  %v6162_v51 = vadd.f32 0.5, %v6120_v8 }
 0x626   :  { %v9690_v2 = vpop.eup %9689  ;;  %9701 = vtanh.f32 %v6029_v10  ;;  %v4843_v32 = vmul.f32 %v13523_v19, %v4808_v53  ;;  %v8320_v19 = vld [vmem:[%s14745_s2 + $0xb0] sm:$0xff]  ;;  %v6141_v48 = vmul.f32 0.5, %v9688_v49 }
 0x627   :  { %v9692_v9 = vpop.eup %9691  ;;  %9703 = vtanh.f32 %v6030_v17  ;;  %v5828_v24 = vpop.f32.mrb[86].mxu1  ;;  %v4809_v61 = vadd.f32 0.5, %v4802_v29  ;;  %v6148_v52 = vmul.f32 0.5, %v9690_v2  ;;  %v6219_v29 = vmul.f32 %v8320_v19, %v6170_v22 }
 0x628   :  { %v9694_v15 = vpop.eup %9693  ;;  %9705 = vtanh.f32 %v6051_v35  ;;  %v5984_v14 = vadd.f32 %v5828_v24, %v15090_v55  ;;  %v5830_v38 = vpop.f32.mrb[87].mxu1  ;;  %4850 = vst [vmem:[%s14759_s16 + $0x20] sm:$0xff] %v4843_v32  ;;  %v6163_v35 = vadd.f32 0.5, %v6121_v20  ;;  %v6149_v58 = vmul.f32 0.5, %v9692_v9 }
 0x629   :  { %v5985_v27 = vadd.f32 %v5830_v38, %v15090_v55  ;;  %v4844_v25 = vmul.f32 %v13531_v56, %v4809_v61  ;;  %v6142_v10 = vmul.f32 0.5, %v9694_v15  ;;  %9707 = vtanh.f32 %v6071_v36 }
 0x62a   :  { %v6040_v30 = vmul.f32 0.5, %v5984_v14  ;;  %v5715_v3 = vpop.f32.mrb[64].mxu0  ;;  %9709 = vtanh.f32 %v6072_v40  ;;  %v6183_v32 = vadd.f32 0.5, %v6141_v48  ;;  %v6190_v9 = vadd.f32 0.5, %v6148_v52 }
 0x62b   :  { %v6041_v31 = vmul.f32 0.5, %v5985_v27  ;;  %v5834_v53 = vpop.f32.mrb[88].mxu1  ;;  %4851 = vst [vmem:[%s14759_s16 + $0x28] sm:$0xff] %v4844_v25  ;;  %v5717_v49 = vpop.f32.mrb[65].mxu0  ;;  %v5982_v8 = vadd.f32 %v5715_v3, %v15090_v55  ;;  %v6191_v24 = vadd.f32 0.5, %v6149_v58  ;;  %v6184_v27 = vadd.f32 0.5, %v6142_v10 }
 0x62c   :  { %v9696_v17 = vpop.eup %9695  ;;  %v5991_v56 = vadd.f32 %v5834_v53, %v12166_v6  ;;  %v5836_v2 = vpop.f32.mrb[89].mxu1  ;;  %9711 = vtanh.f32 %v6040_v30  ;;  %v5983_v58 = vadd.f32 %v5717_v49, %v15090_v55  ;;  %v6253_v30 = vmul.f32 %v8319_v47, %v6190_v9 }
 0x62d   :  { %v9698_v20 = vpop.eup %9697  ;;  %v6225_v7 = vmul.f32 %v9696_v17, %v6162_v51  ;;  %v5992_v36 = vadd.f32 %v5836_v2, %v12166_v6  ;;  %9713 = vtanh.f32 %v6041_v31  ;;  %v6038_v51 = vmul.f32 0.5, %v5982_v8 }
 0x62e   :  { %v6226_v61 = vmul.f32 %v9698_v20, %v6163_v35  ;;  %v6047_v15 = vmul.f32 0.5, %v5991_v56  ;;  %v5721_v14 = vpop.f32.mrb[66].mxu0  ;;  %v9700_v38 = vpop.eup %9699  ;;  %v6254_v31 = vmul.f32 %v8320_v19, %v6191_v24 }
 0x62f   :  { %v6232_v22 = vadd.f32 %v6225_v7, %v6218_v44  ;;  %v6048_v40 = vmul.f32 0.5, %v5992_v36  ;;  %v5840_v25 = vpop.f32.mrb[90].mxu1  ;;  %v5723_v53 = vpop.f32.mrb[67].mxu0  ;;  %v5989_v8 = vadd.f32 %v5721_v14, %v12166_v6 }
 0x630   :  { %v9702_v59 = vpop.eup %9701  ;;  %v13605_v3 = vadd.f32 %v6226_v61, %v6219_v29  ;;  %v5998_v48 = vadd.f32 %v5840_v25, %v12173_v57  ;;  %v5842_v52 = vpop.f32.mrb[91].mxu1  ;;  %9715 = vtanh.f32 %v6047_v15 }
 0x631   :  { %v9704_v35 = vpop.eup %9703  ;;  %v6260_v17 = vmul.f32 %v9702_v59, %v6183_v32  ;;  %v5999_v10 = vadd.f32 %v5842_v52, %v12173_v57  ;;  %9717 = vtanh.f32 %v6232_v22  ;;  %v6039_v32 = vmul.f32 0.5, %v5983_v58 }
 0x632   :  { %v13610_v44 = vpop.eup %9705  ;;  %v6261_v56 = vmul.f32 %v9704_v35, %v6184_v27  ;;  %v6054_v2 = vmul.f32 0.5, %v5998_v48  ;;  %v5727_v29 = vpop.f32.mrb[68].mxu0  ;;  %9719 = vtanh.f32 %v6048_v40  ;;  %v5990_v40 = vadd.f32 %v5723_v53, %v12166_v6 }
 0x633   :  { %v6267_v20 = vadd.f32 %v6260_v17, %v6253_v30  ;;  %v6055_v7 = vmul.f32 0.5, %v5999_v10  ;;  %v5846_v36 = vpop.f32.mrb[92].mxu1  ;;  %v5729_v49 = vpop.f32.mrb[69].mxu0  ;;  %9721 = vtanh.f32 %v6038_v51  ;;  %v6045_v51 = vmul.f32 0.5, %v5989_v8 }
 0x634   :  { %v13613_v61 = vadd.f32 %v6261_v56, %v6254_v31  ;;  %v6005_v59 = vadd.f32 %v5846_v36, %v12158_v4  ;;  %v5848_v47 = vpop.f32.mrb[93].mxu1  ;;  %v9708_v9 = vpop.eup %9707  ;;  %v5996_v58 = vadd.f32 %v5727_v29, %v12173_v57  ;;  %v6134_v30 = vmul.f32 0.5, %v9700_v38 }
 0x635   :  { %9723 = vtanh.f32 %v6267_v20  ;;  %v13616_v19 = vmul.f32 %v6267_v20, %v6232_v22  ;;  %v6006_v24 = vadd.f32 %v5848_v47, %v12158_v4  ;;  %v9710_v15 = vpop.eup %9709  ;;  %v6155_v56 = vmul.f32 0.5, %v9708_v9 }
 0x636   :  { %v13621_v27 = vmul.f32 %v13613_v61, %v13605_v3  ;;  %9725 = vtanh.f32 %v6054_v2  ;;  %v6061_v14 = vmul.f32 0.5, %v6005_v59  ;;  %v5733_v25 = vpop.f32.mrb[70].mxu0  ;;  %v9712_v35 = vpop.eup %9711  ;;  %v6046_v20 = vmul.f32 0.5, %v5990_v40 }
 0x637   :  { %9727 = vtanh.f32 %v6055_v7  ;;  %v6062_v48 = vmul.f32 0.5, %v6006_v24  ;;  %v5852_v52 = vpop.f32.mrb[94].mxu1  ;;  %v5735_v22 = vpop.f32.mrb[71].mxu0  ;;  %v5997_v7 = vadd.f32 %v5729_v49, %v12173_v57  ;;  %v6052_v38 = vmul.f32 0.5, %v5996_v58 }
 0x638   :  { %9729 = vtanh.f32 %v6039_v32  ;;  %v6012_v17 = vadd.f32 %v5852_v52, %v12160_v46  ;;  %v5854_v10 = vpop.f32.mrb[95].mxu1  ;;  %v9714_v31 = vpop.eup %9713  ;;  %v13630_v24 = vadd.f32 0.5, %v6134_v30  ;;  %v6197_v52 = vadd.f32 0.5, %v6155_v56 }
 0x639   :  { %9731 = vtanh.f32 %v6061_v14  ;;  %v6013_v2 = vadd.f32 %v5854_v10, %v12160_v46  ;;  %v6003_v40 = vadd.f32 %v5733_v25, %v12158_v4  ;;  %v6053_v58 = vmul.f32 0.5, %v5997_v7 }
 0x63a   :  { %9733 = vtanh.f32 %v6062_v48  ;;  %v6068_v53 = vmul.f32 0.5, %v6012_v17  ;;  %v5739_v36 = vpop.f32.mrb[72].mxu0  ;;  %v9716_v8 = vpop.eup %9715  ;;  %v6004_v10 = vadd.f32 %v5735_v22, %v12158_v4  ;;  %v6156_v63 = vmul.f32 0.5, %v9710_v15 }
 0x63b   :  { %v6069_v29 = vmul.f32 0.5, %v6013_v2  ;;  %9735 = vtanh.f32 %v6045_v51  ;;  %v5858_v59 = vpop.f32.mrb[96].mxu1  ;;  %v5741_v47 = vpop.f32.mrb[73].mxu0  ;;  %v6125_v7 = vmul.f32 0.5, %v9714_v31 }
 0x63c   :  { %v13628_v32 = vpop.eup %9717  ;;  %9737 = vtanh.f32 %v6068_v53  ;;  %v6019_v9 = vadd.f32 %v5858_v59, %v12162_v39  ;;  %v5860_v14 = vpop.f32.mrb[97].mxu1  ;;  %v6124_v53 = vmul.f32 0.5, %v9712_v35  ;;  %v13643_v42 = vadd.f32 0.5, %v6156_v63  ;;  %v13653_v63 = vld [vmem:[%s14745_s2 + $0xc8] sm:$0xff] }
 0x63d   :  { %v9720_v48 = vpop.eup %9719  ;;  %9739 = vtanh.f32 %v6069_v29  ;;  %v6020_v49 = vadd.f32 %v5860_v14, %v12162_v39  ;;  %v6131_v29 = vmul.f32 0.5, %v9716_v8  ;;  %v6011_v31 = vadd.f32 %v5741_v47, %v12160_v46 }
 0x63e   :  { %v9722_v17 = vpop.eup %9721  ;;  %9741 = vtanh.f32 %v6046_v20  ;;  %v6075_v51 = vmul.f32 0.5, %v6019_v9  ;;  %v5745_v2 = vpop.f32.mrb[74].mxu0  ;;  %v6132_v22 = vmul.f32 0.5, %v9720_v48  ;;  %v6059_v9 = vmul.f32 0.5, %v6003_v40 }
 0x63f   :  { %v9724_v30 = vpop.eup %9723  ;;  %v6076_v33 = vmul.f32 0.5, %v6020_v49  ;;  %9743 = vtanh.f32 %v6052_v38  ;;  %v5864_v59 = vpop.f32.mrb[98].mxu1  ;;  %v6060_v38 = vmul.f32 0.5, %v6004_v10  ;;  %v6010_v49 = vadd.f32 %v5739_v36, %v12160_v46 }
 0x640   :  { %v5747_v1 = vpop.f32.mrb[75].mxu0  ;;  %v9726_v56 = vpop.eup %9725  ;;  %9745 = vtanh.f32 %v6075_v51  ;;  %v6026_v14 = vadd.f32 %v5864_v59, %v12200_v16  ;;  %v13637_v11 = vmul.f32 %v9724_v30, %v6197_v52  ;;  %v13645_v59 = vadd.f32 0.5, %v6124_v53 }
 0x641   :  { %v5866_v25 = vpop.f32.mrb[99].mxu1  ;;  %v13639_v20 = vpop.eup %9727  ;;  %9747 = vtanh.f32 %v6076_v33  ;;  %v6173_v40 = vadd.f32 0.5, %v6131_v29  ;;  %v6017_v10 = vadd.f32 %v5745_v2, %v12162_v39  ;;  %v6174_v53 = vadd.f32 0.5, %v6132_v22  ;;  %v13659_v29 = vld [vmem:[%s14745_s2 + $0xd0] sm:$0xff] }
 0x642   :  { %v9730_v15 = vpop.eup %9729  ;;  %9749 = vtanh.f32 %v6053_v58  ;;  %v6027_v35 = vadd.f32 %v5866_v25, %v12200_v16  ;;  %v5751_v8 = vpop.f32.mrb[76].mxu0  ;;  %v6167_v0 = vadd.f32 0.5, %v6125_v7  ;;  %v6066_v2 = vmul.f32 0.5, %v6010_v49 }
 0x643   :  { %v9732_v51 = vpop.eup %9731  ;;  %9751 = vtanh.f32 %v6026_v14  ;;  %v5870_v52 = vpop.f32.mrb[100].mxu1  ;;  %v6122_v14 = vmul.f32 0.5, %v9722_v17  ;;  %v6123_v60 = vmul.f32 0.5, %v9730_v15  ;;  %v6067_v43 = vmul.f32 0.5, %v6011_v31 }
 0x644   :  { %v5753_v48 = vpop.f32.mrb[77].mxu0  ;;  %v9734_v33 = vpop.eup %9733  ;;  %9753 = vtanh.f32 %v6027_v35  ;;  %v6033_v58 = vadd.f32 %v5870_v52, %v12164_v37  ;;  %v6138_v35 = vmul.f32 0.5, %v9726_v56  ;;  %v6018_v17 = vadd.f32 %v5747_v1, %v12162_v39 }
 0x645   :  { %v5872_v30 = vpop.f32.mrb[101].mxu1  ;;  %v9736_v36 = vpop.eup %9735  ;;  %9755 = vtanh.f32 %v6059_v9  ;;  %v6145_v7 = vmul.f32 0.5, %v9732_v51  ;;  %v6073_v13 = vmul.f32 0.5, %v6017_v10  ;;  %v6223_v56 = vmul.f32 %v13659_v29, %v6174_v53 }
 0x646   :  { %v6034_v47 = vadd.f32 %v5872_v30, %v12164_v37  ;;  %v9738_v25 = vpop.eup %9737  ;;  %9757 = vtanh.f32 %v6060_v38  ;;  %v5757_v52 = vpop.f32.mrb[78].mxu0  ;;  %v6222_v30 = vmul.f32 %v13653_v63, %v6173_v40  ;;  %v13667_v38 = vadd.f32 0.5, %v6122_v14 }
 0x647   :  { %v9740_v18 = vpop.eup %9739  ;;  %9759 = vtanh.f32 %v6033_v58  ;;  %v5759_v22 = vpop.f32.mrb[79].mxu0  ;;  %v6152_v49 = vmul.f32 0.5, %v9738_v25  ;;  %v6074_v1 = vmul.f32 0.5, %v6018_v17  ;;  %v6024_v58 = vadd.f32 %v5751_v8, %v12200_v16 }
 0x648   :  { %v9742_v9 = vpop.eup %9741  ;;  %9761 = vtanh.f32 %v13613_v61  ;;  %v6153_v31 = vmul.f32 0.5, %v9740_v18  ;;  %v13674_v61 = vadd.f32 0.5, %v6138_v35  ;;  %v6146_v10 = vmul.f32 0.5, %v9734_v33 }
 0x649   :  { %v13664_v34 = vpop.eup %9743  ;;  %9763 = vtanh.f32 %v6034_v47  ;;  %v13676_v21 = vadd.f32 0.5, %v6123_v60  ;;  %v6187_v47 = vadd.f32 0.5, %v6145_v7  ;;  %v6129_v25 = vmul.f32 0.5, %v9736_v36 }
 0x64a   :  { %v13669_v15 = vpop.eup %9745  ;;  %9765 = vtanh.f32 %v6066_v2  ;;  %v8944_v40 = vpop.f32.mrb[80].mxu0  ;;  %v6025_v18 = vadd.f32 %v5753_v48, %v12200_v16  ;;  %v6194_v17 = vadd.f32 0.5, %v6152_v49  ;;  %v6130_v8 = vmul.f32 0.5, %v9742_v9 }
 0x64b   :  { %v13672_v51 = vpop.eup %9747  ;;  %9767 = vtanh.f32 %v6067_v43  ;;  %v5941_v53 = vpop.f32.mrb[81].mxu0  ;;  %v6031_v5 = vadd.f32 %v5757_v52, %v12164_v37  ;;  %v6195_v41 = vadd.f32 0.5, %v6153_v31  ;;  %v6032_v43 = vadd.f32 %v5759_v22, %v12164_v37 }
 0x64c   :  { %v13678_v14 = vpop.eup %9749  ;;  %9769 = vtanh.f32 %v6073_v13  ;;  %v6188_v7 = vadd.f32 0.5, %v6146_v10  ;;  %v5993_v13 = vadd.f32 %v8944_v40, %v12166_v6  ;;  %v6171_v49 = vadd.f32 0.5, %v6129_v25 }
 0x64d   :  { %v9752_v2 = vpop.eup %9751  ;;  %9771 = vtanh.f32 %v6074_v1  ;;  %v5986_v52 = vadd.f32 %v5941_v53, %v15090_v55  ;;  %v6172_v31 = vadd.f32 0.5, %v6130_v8  ;;  %v6258_v6 = vmul.f32 %v13659_v29, %v6195_v41  ;;  %v8322_v41 = vld [vmem:[%s14745_s2 + $0xc0] sm:$0xff] }
 0x64e   :  { %v9754_v35 = vpop.eup %9753  ;;  %v6229_v60 = vmul.f32 %v9752_v2, %v13645_v59  ;;  %9773 = vtanh.f32 %v6024_v58  ;;  %v8947_v33 = vpop.f32.mrb[82].mxu0  ;;  %v6049_v22 = vmul.f32 0.5, %v5993_v13 }
 0x64f   :  { %v9756_v26 = vpop.eup %9755  ;;  %v6230_v36 = vmul.f32 %v9754_v35, %v6167_v0  ;;  %9775 = vtanh.f32 %v6025_v18  ;;  %v13685_v48 = vpop.f32.mrb[83].mxu0  ;;  %v6257_v0 = vmul.f32 %v13653_v63, %v6194_v17  ;;  %v6007_v18 = vadd.f32 %v8947_v33, %v12158_v4 }
 0x650   :  { %v9758_v9 = vpop.eup %9757  ;;  %v13687_v1 = vadd.f32 %v6229_v60, %v6222_v30  ;;  %9777 = vtanh.f32 %v6031_v5  ;;  %v8321_v5 = vld [vmem:[%s14745_s2 + $0xb8] sm:$0xff]  ;;  %v6143_v55 = vmul.f32 0.5, %v9756_v26  ;;  %v6042_v17 = vmul.f32 0.5, %v5986_v52 }
 0x651   :  { %v9760_v59 = vpop.eup %9759  ;;  %v13690_v58 = vadd.f32 %v6230_v36, %v6223_v56  ;;  %9779 = vtanh.f32 %v6032_v43  ;;  %v6144_v53 = vmul.f32 0.5, %v9758_v9  ;;  %v6063_v35 = vmul.f32 0.5, %v6007_v18 }
 0x652   :  { %v9762_v10 = vpop.eup %9761  ;;  %9781 = vtanh.f32 %v13687_v1  ;;  %v6264_v40 = vmul.f32 %v9760_v59, %v6187_v47  ;;  %v8950_v25 = vpop.f32.mrb[84].mxu0  ;;  %v6220_v43 = vmul.f32 %v8321_v5, %v6171_v49  ;;  %v6221_v9 = vmul.f32 %v8322_v41, %v6172_v31  ;;  %v13716_v59 = vld [vmem:[%s14750_s7] sm:$0xff] }
 0x653   :  { %v9764_v30 = vpop.eup %9763  ;;  %v13699_v56 = vmul.f32 %v9762_v10, %v13643_v42  ;;  %v5961_v2 = vpop.f32.mrb[85].mxu0  ;;  %9783 = vtanh.f32 %v6049_v22  ;;  %v6021_v42 = vadd.f32 %v8950_v25, %v12162_v39  ;;  %v6159_v22 = vmul.f32 0.5, %v13669_v15  ;;  %v13727_v15 = vld [vmem:[%s14750_s7 + $0x8] sm:$0xff] }
 0x654   :  { %v9766_v63 = vpop.eup %9765  ;;  %v6271_v29 = vadd.f32 %v6264_v40, %v6257_v0  ;;  %v6265_v47 = vmul.f32 %v9764_v30, %v6188_v7  ;;  %v6014_v60 = vadd.f32 %v5961_v2, %v12160_v46  ;;  %v6186_v40 = vadd.f32 0.5, %v6144_v53 }
 0x655   :  { %v9768_v8 = vpop.eup %9767  ;;  %6288 = vmatprep.subr.mxu0 %v13699_v56  ;;  %v6150_v26 = vmul.f32 0.5, %v9766_v63  ;;  %v6077_v46 = vmul.f32 0.5, %v6021_v42 }
 0x656   :  { %v13708_v4 = vpop.eup %9769  ;;  %9785 = vtanh.f32 %v6271_v29  ;;  %v6272_v33 = vadd.f32 %v6265_v47, %v6258_v6  ;;  %6289 = vmatpush1.msra.mxu0 %v13637_v11  ;;  %v6151_v36 = vmul.f32 0.5, %v9768_v8  ;;  %v8953_v7 = vpop.f32.mrb[86].mxu0  ;;  %v6070_v31 = vmul.f32 0.5, %v6014_v60 }
 0x657   :  { %v13711_v13 = vpop.eup %9771  ;;  %v6192_v52 = vadd.f32 0.5, %v6150_v26  ;;  %8620 = vmatmul.mubr.msk.f32.vlgmr.msra.gmra.mrb[88].mxu0 %vm1249_vm8, %v13716_v59  ;;  %9787 = vtanh.f32 %v6063_v35  ;;  %v5971_v39 = vpop.f32.mrb[87].mxu0  ;;  %v6185_v6 = vadd.f32 0.5, %v6143_v55  ;;  %v13736_v8 = vmul.f32 %v13628_v32, %v13630_v24  ;;  %v13753_v24 = vld [vmem:[%s14750_s7 + $0x10] sm:$0xff] }
 0x658   :  { %v9774_v49 = vpop.eup %9773  ;;  %v6193_v10 = vadd.f32 0.5, %v6151_v36  ;;  %6358 = vmatprep.mubr.f32.mxu0 %v15077_v54  ;;  %9789 = vtanh.f32 %v6042_v17  ;;  %v6028_v17 = vadd.f32 %v5971_v39, %v12200_v16  ;;  %v13742_v42 = vmul.f32 %v6271_v29, %v13687_v1 }
 0x659   :  { %v9776_v0 = vpop.eup %9775  ;;  %v6227_v25 = vmul.f32 %v9774_v49, %v13667_v38  ;;  %9791 = vtanh.f32 %v6077_v46  ;;  %v6255_v18 = vmul.f32 %v8321_v5, %v6192_v52  ;;  %v6035_v38 = vadd.f32 %v8953_v7, %v12164_v37  ;;  %v13774_v46 = vld [vmem:[%s14750_s7 + $0x18] sm:$0xff] }
 0x65a   :  { %v9778_v30 = vpop.eup %9777  ;;  %v6256_v2 = vmul.f32 %v8322_v41, %v6193_v10  ;;  %v6228_v63 = vmul.f32 %v9776_v0, %v13676_v21  ;;  %9793 = vtanh.f32 %v6070_v31  ;;  %v6000_v60 = vadd.f32 %v13685_v48, %v12173_v57 }
 0x65b   :  { %v9780_v47 = vpop.eup %9779  ;;  %8621 = vmatmul.mubr.msk.f32.gmra.mrb[90].mxu0 %vm1249_vm8, %v13727_v15  ;;  %v6234_v55 = vadd.f32 %v6227_v25, %v6220_v43  ;;  %v6262_v53 = vmul.f32 %v9778_v30, %v6185_v6  ;;  %9795 = vtanh.f32 %v6272_v33  ;;  %v13748_v43 = vmul.f32 %v13637_v11, %v13736_v8 }
 0x65c   :  { %v9782_v5 = vpop.eup %9781  ;;  %6364 = vmatprep.mubr.f32.mxu0 %v15077_v54  ;;  %v6235_v21 = vadd.f32 %v6228_v63, %v6221_v9  ;;  %v6263_v41 = vmul.f32 %v9780_v47, %v6186_v40  ;;  %v6201_v32 = vadd.f32 0.5, %v6159_v22  ;;  %v13760_v1 = vmul.f32 %v6272_v33, %v13690_v58 }
 0x65d   :  { %9797 = vtanh.f32 %v6234_v55  ;;  %v6269_v26 = vadd.f32 %v6262_v53, %v6255_v18  ;;  %v13739_v35 = vmul.f32 %v9782_v5, %v13674_v61  ;;  %v9784_v37 = vpop.eup %9783  ;;  %v6160_v29 = vmul.f32 0.5, %v13672_v51 }
 0x65e   :  { %v6270_v16 = vadd.f32 %v6263_v41, %v6256_v2  ;;  %9799 = vtanh.f32 %v6035_v38  ;;  %v6136_v9 = vmul.f32 0.5, %v13664_v34  ;;  %v6056_v52 = vmul.f32 0.5, %v6000_v60 }
 0x65f   :  { %8622 = vmatmul.mubr.msk.f32.gmra.mrb[92].mxu0 %vm1249_vm8, %v13753_v24  ;;  %9801 = vtanh.f32 %v6269_v26  ;;  %v13757_v61 = vmul.f32 %v6269_v26, %v6234_v55  ;;  %v6133_v51 = vmul.f32 0.5, %v9784_v37  ;;  %v6157_v49 = vmul.f32 0.5, %v13708_v4  ;;  %v13789_v4 = vld [vmem:[%s14750_s7 + $0x20] sm:$0xff] }
 0x660   :  { %v9786_v57 = vpop.eup %9785  ;;  %6370 = vmatprep.mubr.f32.mxu0 %v15077_v54  ;;  %9803 = vtanh.f32 %v6028_v17  ;;  %v13763_v11 = vmul.f32 %v6270_v16, %v6235_v21  ;;  %v6202_v22 = vadd.f32 0.5, %v6160_v29  ;;  %v6139_v6 = vmul.f32 0.5, %v13639_v20 }
 0x661   :  { %v9788_v48 = vpop.eup %9787  ;;  %v6285_v36 = vmul.f32 %v9786_v57, %v6201_v32  ;;  %9805 = vtanh.f32 %v13605_v3  ;;  %v6178_v40 = vadd.f32 0.5, %v6136_v9  ;;  %v6137_v25 = vmul.f32 0.5, %v13678_v14  ;;  %v8325_v14 = vld [vmem:[%s14745_s2 + $0xd8] sm:$0xff]  ;;  %v13803_v57 = vld [vmem:[%s14750_s7 + $0x28] sm:$0xff] }
 0x662   :  { %v9790_v7 = vpop.eup %9789  ;;  %9807 = vtanh.f32 %v13690_v58  ;;  %v6147_v39 = vmul.f32 0.5, %v9788_v48  ;;  %v6135_v58 = vmul.f32 0.5, %v13610_v44  ;;  %v6175_v18 = vadd.f32 0.5, %v6133_v51 }
 0x663   :  { %v13769_v33 = vpop.eup %9791  ;;  %8623 = vmatmul.mubr.msk.f32.gmra.mrb[94].mxu0 %vm1249_vm8, %v13774_v46  ;;  %9809 = vtanh.f32 %v6270_v16  ;;  %v13779_v3 = vmul.f32 %v6285_v36, %v13739_v35  ;;  %v6126_v10 = vmul.f32 0.5, %v9790_v7  ;;  %v6199_v55 = vadd.f32 0.5, %v6157_v49 }
 0x664   :  { %v9794_v34 = vpop.eup %9793  ;;  %6376 = vmatprep.mubr.f32.mxu0 %v15077_v54  ;;  %9811 = vtanh.f32 %v6235_v21  ;;  %v6189_v44 = vadd.f32 0.5, %v6147_v39  ;;  %v6158_v20 = vmul.f32 0.5, %v13711_v13  ;;  %v6177_v26 = vadd.f32 0.5, %v6135_v58 }
 0x665   :  { %v6154_v31 = vmul.f32 0.5, %v9794_v34  ;;  %v9796_v0 = vpop.eup %9795  ;;  %9813 = vtanh.f32 %v6056_v52  ;;  %v6168_v17 = vadd.f32 0.5, %v6126_v10  ;;  %v6181_v37 = vadd.f32 0.5, %v6139_v6  ;;  %v10022_v6 = vld [vmem:[%s14754_s11 + $0x48] ss:$0 sm:$0xff] }
 0x666   :  { %v6286_v63 = vmul.f32 %v9796_v0, %v6202_v22  ;;  %v6179_v13 = vadd.f32 0.5, %v6137_v25  ;;  %v6224_v32 = vmul.f32 %v8325_v14, %v6175_v18  ;;  %v6200_v9 = vadd.f32 0.5, %v6158_v20 }
 0x667   :  { %v9798_v30 = vpop.eup %9797  ;;  %8624 = vmatmul.mubr.msk.f32.gmra.mrb[96].mxu0 %vm1249_vm8, %v13789_v4  ;;  %v6196_v2 = vadd.f32 0.5, %v6154_v31 }
 0x668   :  { %v9800_v47 = vpop.eup %9799  ;;  %6382 = vmatprep.mubr.f32.mxu0 %v15077_v54  ;;  %v13798_v53 = vmul.f32 %v9798_v30, %v6178_v40  ;;  %6514 = vmatprep.subr.mxu0 %v6286_v63  ;;  %v10023_v40 = vld [vmem:[%s14754_s11 + $0x40] ss:$0 sm:$0xff] }
 0x669   :  { %v9802_v38 = vpop.eup %9801  ;;  %v6259_v5 = vmul.f32 %v8325_v14, %v6196_v2  ;;  %v6266_v21 = vmul.f32 %v9800_v47, %v6189_v44  ;;  %6515 = vmatpush1.msra.mxu0 %v6285_v36  ;;  %v10021_v36 = vld [vmem:[%s14754_s11 + $0x38] ss:$0 sm:$0xff]  ;;  %v13828_v25 = vmul.f32 %v10023_v40, %v13621_v27  ;;  %v13845_v47 = vmul.f32 %v10022_v6, %v13757_v61 }
 0x66a   :  { %v9804_v41 = vpop.eup %9803  ;;  %v6283_v16 = vmul.f32 %v9802_v38, %v6199_v55  ;;  %v13812_v51 = vmul.f32 %v10021_v36, %v13748_v43  ;;  %v13816_v22 = vmul.f32 %v10021_v36, %v13616_v19  ;;  %v13833_v19 = vld [vmem:[%s14750_s7 + $0x30] sm:$0xff]  ;;  %v6161_v55 = vmul.f32 0.5, %v13769_v33  ;;  %v13861_v33 = vld [vmem:[%s14750_s7 + $0x38] sm:$0xff] }
 0x66b   :  { %v9806_v60 = vpop.eup %9805  ;;  %8625 = vmatmul.mubr.msk.f32.gmra.mrb[98].mxu0 %vm1249_vm8, %v13803_v57  ;;  %v6273_v48 = vadd.f32 %v6266_v21, %v6259_v5  ;;  %v6231_v29 = vmul.f32 %v9804_v41, %v6168_v17  ;;  %v8113_v61 = vmul.f32 %v13828_v25, %v13828_v25  ;;  %v10026_v17 = vld [vmem:[%s14754_s11 + $0x50] ss:$0 sm:$0xff] }
 0x66c   :  { %v9808_v7 = vpop.eup %9807  ;;  %6388 = vmatprep.mubr.f32.mxu0 %v15077_v54  ;;  %v6247_v52 = vmul.f32 %v9806_v60, %v6177_v26  ;;  %v8044_v39 = vmul.f32 %v6283_v16, %v13798_v53  ;;  %v8056_v27 = vmul.f32 %v13812_v51, %v13812_v51  ;;  %v8112_v38 = vmul.f32 %v13816_v22, %v13816_v22 }
 0x66d   :  { %v9810_v34 = vpop.eup %9809  ;;  %v6238_v49 = vadd.f32 %v6231_v29, %v6224_v32  ;;  %v6251_v58 = vmul.f32 %v9808_v7, %v6181_v37  ;;  %9815 = vtanh.f32 %v6273_v48  ;;  %v13872_v21 = vmul.f32 %v10026_v17, %v13763_v11 }
 0x66e   :  { %v9812_v10 = vpop.eup %9811  ;;  %6732 = vmatprep.subr.mxu0 %v6247_v52  ;;  %v8043_v31 = vmul.f32 %v13699_v56, %v6247_v52  ;;  %v6284_v0 = vmul.f32 %v9810_v34, %v6200_v9  ;;  %v13822_v43 = vmul.f32 %v10022_v6, %v8044_v39  ;;  %v8114_v37 = vmul.f32 %v13845_v47, %v13845_v47 }
 0x66f   :  { %8626 = vmatmul.mubr.msk.f32.gmra.mrb[100].mxu0 %vm1249_vm8, %v13833_v19  ;;  %9817 = vtanh.f32 %v6238_v49  ;;  %v8047_v56 = vmul.f32 %v6286_v63, %v6251_v58  ;;  %v6249_v30 = vmul.f32 %v9812_v10, %v6179_v13  ;;  %v13837_v18 = vmul.f32 %v6273_v48, %v6238_v49  ;;  %v9814_v44 = vpop.eup %9813  ;;  %v10027_v13 = vld [vmem:[%s14754_s11 + $0x58] ss:$0 sm:$0xff]  ;;  %v10028_v49 = vld [vmem:[%s14754_s11 + $0x60] ss:$0 sm:$0xff] }
 0x670   :  { %6394 = vmatprep.mubr.f32.mxu0 %v15077_v54  ;;  %v13840_v2 = vmul.f32 %v10023_v40, %v8043_v31  ;;  %6401 = vmatprep.subr.mxu1 %v6284_v0  ;;  %v8058_v14 = vmul.f32 %v13822_v43, %v13822_v43  ;;  %v6140_v41 = vmul.f32 0.5, %v9814_v44  ;;  %v6203_v60 = vadd.f32 0.5, %v6161_v55  ;;  %v10029_v40 = vld [vmem:[%s14754_s11 + $0x68] ss:$0 sm:$0xff] }
 0x671   :  { %6402 = vmatpush1.msra.mxu1 %v6283_v16  ;;  %v8045_v20 = vmul.f32 %v6284_v0, %v6249_v30  ;;  %v13885_v11 = vmul.f32 %v10027_v13, %v13779_v3  ;;  %v8119_v48 = vadd.f32 %v8113_v61, %v8112_v38  ;;  %v8115_v7 = vmul.f32 %v13872_v21, %v13872_v21 }
 0x672   :  { %v8057_v63 = vmul.f32 %v13840_v2, %v13840_v2  ;;  %8628 = vmatmul.mubr.msk.f32.vlgmr.msra.gmra.mrb[102].mxu1 %vm1249_vm8, %v13716_v59  ;;  %v6182_v9 = vadd.f32 0.5, %v6140_v41  ;;  %v13895_v34 = vmul.f32 %v10027_v13, %v13742_v42  ;;  %v13900_v10 = vmul.f32 %v10028_v49, %v8047_v56  ;;  %v8338_v13 = vld [vmem:[%s14745_s2 + $0x140] sm:$0xff] }
 0x673   :  { %8627 = vmatmul.mubr.msk.f32.gmra.mrb[102].mxu0 %vm1249_vm8, %v13861_v33  ;;  %6471 = vmatprep.mubr.f32.mxu1 %v15077_v54  ;;  %v13869_v5 = vmul.f32 %v10026_v17, %v8045_v20  ;;  %v8120_v3 = vadd.f32 %v8119_v48, %v8114_v37  ;;  %v8060_v31 = vmul.f32 %v13885_v11, %v13885_v11 }
 0x674   :  { %6578 = vmatprep.mubr.f32.mxu0 %v15077_v54  ;;  %v8063_v26 = vadd.f32 %v8057_v63, %v8056_v27  ;;  %v13914_v6 = vmul.f32 %v10028_v49, %v13760_v1  ;;  %v8061_v44 = vmul.f32 %v13900_v10, %v13900_v10  ;;  %v13926_v27 = vmul.f32 %v10029_v40, %v13837_v18 }
 0x675   :  { %v8059_v16 = vmul.f32 %v13869_v5, %v13869_v5  ;;  %v8121_v0 = vadd.f32 %v8120_v3, %v8115_v7  ;;  %v8339_v7 = vld [vmem:[%s14745_s2 + $0x148] sm:$0xff]  ;;  %v10040_v3 = vld [vmem:[%s14751_s8 + $0x10] sm:$0xff] }
 0x676   :  { %8629 = vmatmul.mubr.msk.f32.gmra.mrb[104].mxu1 %vm1249_vm8, %v13727_v15  ;;  %v8064_v32 = vadd.f32 %v8063_v26, %v8058_v14  ;;  %15095 = vst [vmem:[#allocation25_spill] sm:$0xff] %v13914_v6  ;;  %15096 = vst [vmem:[#allocation19_spill] sm:$0xff] %v13926_v27  ;;  %v8117_v63 = vmul.f32 %v13914_v6, %v13914_v6  ;;  %v8118_v14 = vmul.f32 %v13926_v27, %v13926_v27  ;;  %v10037_v26 = vld [vmem:[%s14749_s6 + $0x38] sm:$0xff] }
 0x677   :  { %v9816_v29 = vpop.eup %9815  ;;  %8636 = vmatmul.mubr.msk.f32.vlgmr.msra.gmra.mrb[104].mxu0 %vm1249_vm8, %v13716_v59  ;;  %6477 = vmatprep.mubr.f32.mxu1 %v15077_v54 }
 0x678   :  { %6733 = vmatpush1.msra.mxu0 %v13736_v8  ;;  %6584 = vmatprep.mubr.f32.mxu0 %v15077_v54  ;;  %v6287_v52 = vmul.f32 %v9816_v29, %v6203_v60  ;;  %v8065_v36 = vadd.f32 %v8064_v32, %v8059_v16  ;;  %v8333_v16 = vld [vmem:[%s14745_s2 + $0x118] sm:$0xff]  ;;  %v8335_v29 = vld [vmem:[%s14745_s2 + $0x128] sm:$0xff] }
 0x679   :  { %v9818_v39 = vpop.eup %9817  ;;  %6958 = vmatprep.subr.mxu0 %v6251_v58 }
 0x67a   :  { %8630 = vmatmul.mubr.msk.f32.gmra.mrb[106].mxu1 %vm1249_vm8, %v13753_v24  ;;  %v13904_v8 = vmul.f32 %v9818_v39, %v6182_v9  ;;  %8954 = vmatprep.subr.mxu1 %v6287_v52  ;;  %v8066_v58 = vadd.f32 %v8065_v36, %v8060_v31  ;;  %v10038_v9 = vld [vmem:[%s14751_s8] sm:$0xff]  ;;  %v10039_v36 = vld [vmem:[%s14751_s8 + $0x8] sm:$0xff]  ;;  %v10041_v39 = vld [vmem:[%s14751_s8 + $0x18] sm:$0xff] }
 0x67b   :  { %8637 = vmatmul.mubr.msk.f32.gmra.mrb[106].mxu0 %vm1249_vm8, %v13727_v15  ;;  %6483 = vmatprep.mubr.f32.mxu1 %v15077_v54 }
 0x67c   :  { %6590 = vmatprep.mubr.f32.mxu0 %v15077_v54  ;;  %v8048_v42 = vmul.f32 %v6287_v52, %v13904_v8  ;;  %8955 = vmatpush3.msra.mxu1 %v6287_v52  ;;  %v8067_v55 = vadd.f32 %v8066_v58, %v8061_v44  ;;  %v8337_v52 = vld [vmem:[%s14745_s2 + $0x138] sm:$0xff] }
 0x67d   :  { %6845 = vmatprep.subr.mxu1 %v6249_v30  ;;  %v8116_v30 = vmul.f32 %v13895_v34, %v13895_v34  ;;  %v10045_v44 = vld [vmem:[%s14751_s8 + $0x38] sm:$0xff] }
 0x67e   :  { %8631 = vmatmul.mubr.msk.f32.gmra.mrb[108].mxu1 %vm1249_vm8, %v13774_v46  ;;  %v13921_v56 = vmul.f32 %v10029_v40, %v8048_v42  ;;  %v10043_v42 = vld [vmem:[%s14751_s8 + $0x28] sm:$0xff] }
 0x67f   :  { %8638 = vmatmul.mubr.msk.f32.gmra.mrb[108].mxu0 %vm1249_vm8, %v13753_v24  ;;  %6489 = vmatprep.mubr.f32.mxu1 %v15077_v54  ;;  %v8122_v20 = vadd.f32 %v8121_v0, %v8116_v30  ;;  %v10044_v0 = vld [vmem:[%s14751_s8 + $0x30] sm:$0xff] }
 0x680   :  { %6596 = vmatprep.mubr.f32.mxu0 %v15077_v54  ;;  %v8062_v1 = vmul.f32 %v13921_v56, %v13921_v56 }
 0x681   :  { %v8123_v38 = vadd.f32 %v8122_v20, %v8117_v63 }
 0x682   :  { %8632 = vmatmul.mubr.msk.f32.gmra.mrb[110].mxu1 %vm1249_vm8, %v13789_v4  ;;  %v8068_v18 = vadd.f32 %v8067_v55, %v8062_v1 }
 0x683   :  { %8639 = vmatmul.mubr.msk.f32.gmra.mrb[110].mxu0 %vm1249_vm8, %v13774_v46  ;;  %6495 = vmatprep.mubr.f32.mxu1 %v15077_v54  ;;  %v8124_v61 = vadd.f32 %v8123_v38, %v8118_v14 }
 0x684   :  { %6602 = vmatprep.mubr.f32.mxu0 %v15077_v54  ;;  %8069 = vadd.xlane.f32.xlu1 %v8068_v18 }
 0x686   :  { %8633 = vmatmul.mubr.msk.f32.gmra.mrb[112].mxu1 %vm1249_vm8, %v13803_v57 }
 0x687   :  { %8640 = vmatmul.mubr.msk.f32.gmra.mrb[112].mxu0 %vm1249_vm8, %v13789_v4  ;;  %6501 = vmatprep.mubr.f32.mxu1 %v15077_v54 }
 0x688   :  { %6608 = vmatprep.mubr.f32.mxu0 %v15077_v54  ;;  %8125 = vadd.xlane.f32.xlu1 %v8124_v61 }
 0x68a   :  { %8634 = vmatmul.mubr.msk.f32.gmra.mrb[114].mxu1 %vm1249_vm8, %v13833_v19 }
 0x68b   :  { %8641 = vmatmul.mubr.msk.f32.gmra.mrb[114].mxu0 %vm1249_vm8, %v13803_v57  ;;  %6507 = vmatprep.mubr.f32.mxu1 %v15077_v54 }
 0x68c   :  { %6614 = vmatprep.mubr.f32.mxu0 %v15077_v54 }
 0x68e   :  { %8635 = vmatmul.mubr.msk.f32.gmra.mrb[116].mxu1 %vm1249_vm8, %v13861_v33 }
 0x68f   :  { %8642 = vmatmul.mubr.msk.f32.gmra.mrb[116].mxu0 %vm1249_vm8, %v13833_v19  ;;  %8956 = vmatprep.mubr.msk.f32.mxu1 %vm1249_vm8, %v13716_v59  ;;  %v8334_v59 = vld [vmem:[%s14745_s2 + $0x120] sm:$0xff] }
 0x690   :  { %6620 = vmatprep.mubr.f32.mxu0 %v15077_v54 }
 0x692   :  { %8957 = vmatmul.mubr.msk.f32.vlgmr.msra.gmra.mrb[118].mxu1 %vm1249_vm8, %v13727_v15  ;;  %v13982_v15 = vld [vmem:[%s14749_s6] sm:$0xff] }
 0x693   :  { %8643 = vmatmul.mubr.msk.f32.gmra.mrb[118].mxu0 %vm1249_vm8, %v13861_v33  ;;  %6846 = vmatpush1.msra.mxu1 %v13798_v53  ;;  %v10034_v53 = vld [vmem:[%s14749_s6 + $0x20] sm:$0xff] }
 0x694   :  { %6796 = vmatprep.mubr.f32.mxu0 %v15077_v54  ;;  %8968 = vmatprep.subr.mxu1 %v13904_v8 }
 0x695   :  { %8959 = vmatprep.mubr.msk.f32.mxu1 %vm1249_vm8, %v13753_v24  ;;  %v10031_v24 = vld [vmem:[%s14749_s6 + $0x8] sm:$0xff] }
 0x696   :  { %8960 = vmatmul.mubr.msk.f32.gmra.mrb[120].mxu1 %vm1249_vm8, %v13774_v46  ;;  %v8336_v46 = vld [vmem:[%s14745_s2 + $0x130] sm:$0xff] }
 0x697   :  { %8652 = vmatmul.mubr.msk.f32.vlgmr.msra.gmra.mrb[88].mxu0 %vm1249_vm8, %v13982_v15  ;;  %8962 = vmatprep.mubr.msk.f32.mxu1 %vm1249_vm8, %v13789_v4  ;;  %v10033_v4 = vld [vmem:[%s14749_s6 + $0x18] sm:$0xff] }
 0x698   :  { %6959 = vmatpush1.msra.mxu0 %v13739_v35  ;;  %6802 = vmatprep.mubr.f32.mxu0 %v15077_v54  ;;  %v10032_v35 = vld [vmem:[%s14749_s6 + $0x10] sm:$0xff] }
 0x699   :  { %7176 = vmatprep.subr.mxu0 %v8334_v59 }
 0x69a   :  { %8963 = vmatmul.mubr.msk.f32.gmra.mrb[122].mxu1 %vm1249_vm8, %v13803_v57  ;;  %v10035_v57 = vld [vmem:[%s14749_s6 + $0x28] sm:$0xff] }
 0x69b   :  { %8653 = vmatmul.mubr.msk.f32.gmra.mrb[90].mxu0 %vm1249_vm8, %v10031_v24  ;;  %8965 = vmatprep.mubr.msk.f32.mxu1 %vm1249_vm8, %v13833_v19 }
 0x69c   :  { %6808 = vmatprep.mubr.f32.mxu0 %v15077_v54 }
 0x69e   :  { %8966 = vmatmul.mubr.msk.f32.gmra.mrb[124].mxu1 %vm1249_vm8, %v13861_v33  ;;  %v10036_v33 = vld [vmem:[%s14749_s6 + $0x30] sm:$0xff] }
 0x69f   :  { %8654 = vmatmul.mubr.msk.f32.gmra.mrb[92].mxu0 %vm1249_vm8, %v10032_v35  ;;  %6909 = vmatprep.mubr.f32.mxu1 %v15077_v54 }
 0x6a0   :  { %6814 = vmatprep.mubr.f32.mxu0 %v15077_v54 }
 0x6a2   :  { %8660 = vmatmul.mubr.msk.f32.vlgmr.msra.gmra.mrb[102].mxu1 %vm1249_vm8, %v13982_v15 }
 0x6a3   :  { %8655 = vmatmul.mubr.msk.f32.gmra.mrb[94].mxu0 %vm1249_vm8, %v10033_v4  ;;  %8969 = vmatpush3.msra.mxu1 %v13904_v8  ;;  %v10042_v8 = vld [vmem:[%s14751_s8 + $0x20] sm:$0xff] }
 0x6a4   :  { %6820 = vmatprep.mubr.f32.mxu0 %v15077_v54  ;;  %6915 = vmatprep.mubr.f32.mxu1 %v15077_v54 }
 0x6a5   :  { %7289 = vmatprep.subr.mxu1 %v8336_v46 }
 0x6a6   :  { %8661 = vmatmul.mubr.msk.f32.gmra.mrb[104].mxu1 %vm1249_vm8, %v10031_v24 }
 0x6a7   :  { %8656 = vmatmul.mubr.msk.f32.gmra.mrb[96].mxu0 %vm1249_vm8, %v10034_v53  ;;  %6921 = vmatprep.mubr.f32.mxu1 %v15077_v54 }
 0x6a8   :  { %6826 = vmatprep.mubr.f32.mxu0 %v15077_v54 }
 0x6aa   :  { %8662 = vmatmul.mubr.msk.f32.gmra.mrb[106].mxu1 %vm1249_vm8, %v10032_v35 }
 0x6ab   :  { %8657 = vmatmul.mubr.msk.f32.gmra.mrb[98].mxu0 %vm1249_vm8, %v10035_v57  ;;  %6927 = vmatprep.mubr.f32.mxu1 %v15077_v54 }
 0x6ac   :  { %6832 = vmatprep.mubr.f32.mxu0 %v15077_v54 }
 0x6ae   :  { %8663 = vmatmul.mubr.msk.f32.gmra.mrb[108].mxu1 %vm1249_vm8, %v10033_v4  ;;  %v5008_v19 = vpop.xlane.xlu1 %5007 }
 0x6af   :  { %8658 = vmatmul.mubr.msk.f32.gmra.mrb[100].mxu0 %vm1249_vm8, %v10036_v33  ;;  %6933 = vmatprep.mubr.f32.mxu1 %v15077_v54  ;;  %v5009_v17 = vrot.slane %v5008_v19, 4 }
 0x6b0   :  { %6838 = vmatprep.mubr.f32.mxu0 %v15077_v54 }
 0x6b1   :  { %v5010_v41 = vadd.f32 %v5009_v17, %v5008_v19 }
 0x6b2   :  { %8664 = vmatmul.mubr.msk.f32.gmra.mrb[110].mxu1 %vm1249_vm8, %v10034_v53  ;;  %v5064_v49 = vpop.xlane.xlu1 %5063 }
 0x6b3   :  { %8659 = vmatmul.mubr.msk.f32.gmra.mrb[102].mxu0 %vm1249_vm8, %v10037_v26  ;;  %6939 = vmatprep.mubr.f32.mxu1 %v15077_v54  ;;  %v5011_v37 = vrot.slane %v5010_v41, 2  ;;  %v5065_v31 = vrot.slane %v5064_v49, 4 }
 0x6b4   :  { %7022 = vmatprep.mubr.f32.mxu0 %v15077_v54 }
 0x6b5   :  { %v5012_v60 = vadd.f32 %v5011_v37, %v5010_v41  ;;  %v5066_v58 = vadd.f32 %v5065_v31, %v5064_v49 }
 0x6b6   :  { %8665 = vmatmul.mubr.msk.f32.gmra.mrb[112].mxu1 %vm1249_vm8, %v10035_v57 }
 0x6b7   :  { %8668 = vmatmul.mubr.msk.f32.vlgmr.msra.gmra.mrb[104].mxu0 %vm1249_vm8, %v13982_v15  ;;  %6945 = vmatprep.mubr.f32.mxu1 %v15077_v54  ;;  %v5013_v32 = vrot.slane %v5012_v60, 1  ;;  %v5067_v40 = vrot.slane %v5066_v58, 2 }
 0x6b8   :  { %7028 = vmatprep.mubr.f32.mxu0 %v15077_v54  ;;  %7177 = vmatpush1.msra.mxu0 %v8333_v16  ;;  %v15099_v16 = vld [vmem:[#allocation30_spill] sm:$0xff] }
 0x6b9   :  { %v5014_v48 = vadd.f32 %v5013_v32, %v5012_v60  ;;  %7402 = vmatprep.subr.mxu0 %v8338_v13  ;;  %v5068_v1 = vadd.f32 %v5067_v40, %v5066_v58  ;;  %v15100_v13 = vld [vmem:[#allocation26_spill] sm:$0xff] }
 0x6ba   :  { %8666 = vmatmul.mubr.msk.f32.gmra.mrb[114].mxu1 %vm1249_vm8, %v10036_v33  ;;  %v15105_v40 = vld [vmem:[#allocation42_spill] sm:$0xff] }
 0x6bb   :  { %8669 = vmatmul.mubr.msk.f32.gmra.mrb[106].mxu0 %vm1249_vm8, %v10031_v24  ;;  %6951 = vmatprep.mubr.f32.mxu1 %v15077_v54  ;;  %9342 = vpush %v5014_v48  ;;  %v5069_v55 = vrot.slane %v5068_v1, 1  ;;  %v15101_v48 = vld [vmem:[#allocation67_spill] sm:$0xff] }
 0x6bc   :  { %7034 = vmatprep.mubr.f32.mxu0 %v15077_v54 }
 0x6bd   :  { %v5070_v18 = vadd.f32 %v5069_v55, %v5068_v1 }
 0x6be   :  { %8667 = vmatmul.mubr.msk.f32.gmra.mrb[116].mxu1 %vm1249_vm8, %v10037_v26 }
 0x6bf   :  { %8670 = vmatmul.mubr.msk.f32.gmra.mrb[108].mxu0 %vm1249_vm8, %v10032_v35  ;;  %8970 = vmatprep.mubr.msk.f32.mxu1 %vm1249_vm8, %v13982_v15 }
 0x6c0   :  { %7040 = vmatprep.mubr.f32.mxu0 %v15077_v54 }
 0x6c2   :  { %8971 = vmatmul.mubr.msk.f32.vlgmr.msra.gmra.mrb[118].mxu1 %vm1249_vm8, %v10031_v24 }
 0x6c3   :  { %8671 = vmatmul.mubr.msk.f32.gmra.mrb[110].mxu0 %vm1249_vm8, %v10033_v4  ;;  %8973 = vmatprep.mubr.msk.f32.mxu1 %vm1249_vm8, %v10032_v35 }
 0x6c4   :  { %7046 = vmatprep.mubr.f32.mxu0 %v15077_v54  ;;  %7290 = vmatpush1.msra.mxu1 %v8335_v29 }
 0x6c5   :  { %8982 = vmatprep.subr.mxu1 %v8339_v7 }
 0x6c6   :  { %8974 = vmatmul.mubr.msk.f32.gmra.mrb[120].mxu1 %vm1249_vm8, %v10033_v4 }
 0x6c7   :  { %8672 = vmatmul.mubr.msk.f32.gmra.mrb[112].mxu0 %vm1249_vm8, %v10034_v53  ;;  %8976 = vmatprep.mubr.msk.f32.mxu1 %vm1249_vm8, %v10034_v53  ;;  %v15097_v53 = vld [vmem:[#allocation21_spill] sm:$0xff] }
 0x6c8   :  { %7052 = vmatprep.mubr.f32.mxu0 %v15077_v54 }
 0x6ca   :  { %8977 = vmatmul.mubr.msk.f32.gmra.mrb[122].mxu1 %vm1249_vm8, %v10035_v57 }
 0x6cb   :  { %8673 = vmatmul.mubr.msk.f32.gmra.mrb[114].mxu0 %vm1249_vm8, %v10035_v57  ;;  %8979 = vmatprep.mubr.msk.f32.mxu1 %vm1249_vm8, %v10036_v33 }
 0x6cc   :  { %7058 = vmatprep.mubr.f32.mxu0 %v15077_v54 }
 0x6ce   :  { %8980 = vmatmul.mubr.msk.f32.gmra.mrb[124].mxu1 %vm1249_vm8, %v10037_v26 }
 0x6cf   :  { %8674 = vmatmul.mubr.msk.f32.gmra.mrb[116].mxu0 %vm1249_vm8, %v10036_v33  ;;  %7353 = vmatprep.mubr.f32.mxu1 %v15077_v54 }
 0x6d0   :  { %7064 = vmatprep.mubr.f32.mxu0 %v15077_v54 }
 0x6d2   :  { %8692 = vmatmul.mubr.msk.f32.vlgmr.msra.gmra.mrb[102].mxu1 %vm1249_vm8, %v10038_v9 }
 0x6d3   :  { %8675 = vmatmul.mubr.msk.f32.gmra.mrb[118].mxu0 %vm1249_vm8, %v10037_v26  ;;  %7359 = vmatprep.mubr.f32.mxu1 %v15077_v54  ;;  %v15098_v26 = vld [vmem:[#allocation49_spill] sm:$0xff] }
 0x6d4   :  { %7240 = vmatprep.mubr.f32.mxu0 %v15077_v54  ;;  %8983 = vmatpush3.msra.mxu1 %v8339_v7  ;;  %v15102_v7 = vld [vmem:[#allocation74_spill] sm:$0xff] }
 0x6d6   :  { %8693 = vmatmul.mubr.msk.f32.gmra.mrb[104].mxu1 %vm1249_vm8, %v10039_v36 }
 0x6d7   :  { %8684 = vmatmul.mubr.msk.f32.vlgmr.msra.gmra.mrb[88].mxu0 %vm1249_vm8, %v10038_v9  ;;  %7365 = vmatprep.mubr.f32.mxu1 %v15077_v54 }
 0x6d8   :  { %7246 = vmatprep.mubr.f32.mxu0 %v15077_v54  ;;  %7403 = vmatpush1.msra.mxu0 %v8337_v52  ;;  %v15103_v52 = vld [vmem:[#allocation43_spill] sm:$0xff] }
 0x6da   :  { %8694 = vmatmul.mubr.msk.f32.gmra.mrb[106].mxu1 %vm1249_vm8, %v10040_v3 }
 0x6db   :  { %8685 = vmatmul.mubr.msk.f32.gmra.mrb[90].mxu0 %vm1249_vm8, %v10039_v36  ;;  %7371 = vmatprep.mubr.f32.mxu1 %v15077_v54 }
 0x6dc   :  { %7252 = vmatprep.mubr.f32.mxu0 %v15077_v54 }
 0x6de   :  { %8695 = vmatmul.mubr.msk.f32.gmra.mrb[108].mxu1 %vm1249_vm8, %v10041_v39 }
 0x6df   :  { %8686 = vmatmul.mubr.msk.f32.gmra.mrb[92].mxu0 %vm1249_vm8, %v10040_v3  ;;  %7377 = vmatprep.mubr.f32.mxu1 %v15077_v54 }
 0x6e0   :  { %7258 = vmatprep.mubr.f32.mxu0 %v15077_v54 }
 0x6e2   :  { %8696 = vmatmul.mubr.msk.f32.gmra.mrb[110].mxu1 %vm1249_vm8, %v10042_v8 }
 0x6e3   :  { %8687 = vmatmul.mubr.msk.f32.gmra.mrb[94].mxu0 %vm1249_vm8, %v10041_v39  ;;  %7383 = vmatprep.mubr.f32.mxu1 %v15077_v54 }
 0x6e4   :  { %7264 = vmatprep.mubr.f32.mxu0 %v15077_v54 }
 0x6e6   :  { %8697 = vmatmul.mubr.msk.f32.gmra.mrb[112].mxu1 %vm1249_vm8, %v10043_v42 }
 0x6e7   :  { %8688 = vmatmul.mubr.msk.f32.gmra.mrb[96].mxu0 %vm1249_vm8, %v10042_v8  ;;  %7389 = vmatprep.mubr.f32.mxu1 %v15077_v54 }
 0x6e8   :  { %7270 = vmatprep.mubr.f32.mxu0 %v15077_v54 }
 0x6ea   :  { %8698 = vmatmul.mubr.msk.f32.gmra.mrb[114].mxu1 %vm1249_vm8, %v10044_v0 }
 0x6eb   :  { %8689 = vmatmul.mubr.msk.f32.gmra.mrb[98].mxu0 %vm1249_vm8, %v10043_v42  ;;  %7395 = vmatprep.mubr.f32.mxu1 %v15077_v54 }
 0x6ec   :  { %7276 = vmatprep.mubr.f32.mxu0 %v15077_v54  ;;  %s9343_s15 = spop %9342 }
 0x6ed   :  { %s5016_s7 = smax.f32 %s10093_s5, %s9343_s15 }
 0x6ee   :  { %8699 = vmatmul.mubr.msk.f32.gmra.mrb[116].mxu1 %vm1249_vm8, %v10045_v44  ;;  %v5017_v30 = vstv %s5016_s7 }
 0x6ef   :  { %8690 = vmatmul.mubr.msk.f32.gmra.mrb[100].mxu0 %vm1249_vm8, %v10044_v0  ;;  %8984 = vmatprep.mubr.msk.f32.mxu1 %vm1249_vm8, %v10038_v9  ;;  %9819 = vrsqrt.f32 %v5017_v30 }
 0x6f0   :  { %7282 = vmatprep.mubr.f32.mxu0 %v15077_v54 }
 0x6f2   :  { %8985 = vmatmul.mubr.msk.f32.vlgmr.msra.gmra.mrb[118].mxu1 %vm1249_vm8, %v10039_v36 }
 0x6f3   :  { %8691 = vmatmul.mubr.msk.f32.gmra.mrb[102].mxu0 %vm1249_vm8, %v10045_v44  ;;  %8987 = vmatprep.mubr.msk.f32.mxu1 %vm1249_vm8, %v10040_v3 }
 0x6f4   :  { %7466 = vmatprep.mubr.f32.mxu0 %v15077_v54 }
 0x6f6   :  { %8988 = vmatmul.mubr.msk.f32.gmra.mrb[120].mxu1 %vm1249_vm8, %v10041_v39 }
 0x6f7   :  { %8700 = vmatmul.mubr.msk.f32.vlgmr.msra.gmra.mrb[104].mxu0 %vm1249_vm8, %v10038_v9  ;;  %8990 = vmatprep.mubr.msk.f32.mxu1 %vm1249_vm8, %v10042_v8 }
 0x6f8   :  { %7472 = vmatprep.mubr.f32.mxu0 %v15077_v54 }
 0x6f9   :  { %v9820_v20 = vpop.eup %9819 }
 0x6fa   :  { %8991 = vmatmul.mubr.msk.f32.gmra.mrb[122].mxu1 %vm1249_vm8, %v10043_v42  ;;  %9344 = vpush %v9820_v20 }
 0x6fb   :  { %8701 = vmatmul.mubr.msk.f32.gmra.mrb[106].mxu0 %vm1249_vm8, %v10039_v36  ;;  %8993 = vmatprep.mubr.msk.f32.mxu1 %vm1249_vm8, %v10044_v0  ;;  %9346 = vpush %v5070_v18 }
 0x6fc   :  { %7478 = vmatprep.mubr.f32.mxu0 %v15077_v54 }
 0x6fe   :  { %8994 = vmatmul.mubr.msk.f32.gmra.mrb[124].mxu1 %vm1249_vm8, %v10045_v44 }
 0x6ff   :  { %8702 = vmatmul.mubr.msk.f32.gmra.mrb[108].mxu0 %vm1249_vm8, %v10040_v3  ;;  %v15104_v3 = vld [vmem:[#allocation57_spill] sm:$0xff] }
 0x700   :  { %7484 = vmatprep.mubr.f32.mxu0 %v15077_v54 }
 0x703   :  { %8703 = vmatmul.mubr.msk.f32.gmra.mrb[110].mxu0 %vm1249_vm8, %v10041_v39 }
 0x704   :  { %7490 = vmatprep.mubr.f32.mxu0 %v15077_v54 }
 0x707   :  { %8704 = vmatmul.mubr.msk.f32.gmra.mrb[112].mxu0 %vm1249_vm8, %v10042_v8 }
 0x708   :  { %7496 = vmatprep.mubr.f32.mxu0 %v15077_v54 }
 0x70b   :  { %8705 = vmatmul.mubr.msk.f32.gmra.mrb[114].mxu0 %vm1249_vm8, %v10043_v42 }
 0x70c   :  { %7502 = vmatprep.mubr.f32.mxu0 %v15077_v54 }
 0x70f   :  { %8706 = vmatmul.mubr.msk.f32.gmra.mrb[116].mxu0 %vm1249_vm8, %v10044_v0 }
 0x710   :  { %7508 = vmatprep.mubr.f32.mxu0 %v15077_v54 }
 0x711   :  { %v8070_v63 = vpop.xlane.xlu1 %8069 }
 0x712   :  { %v8071_v14 = vrot.slane %v8070_v63, 4 }
 0x713   :  { %8707 = vmatmul.mubr.msk.f32.gmra.mrb[118].mxu0 %vm1249_vm8, %v10045_v44 }
 0x714   :  { %v8072_v38 = vadd.f32 %v8071_v14, %v8070_v63  ;;  %v15106_v14 = vld [vmem:[#allocation70_spill] sm:$0xff] }
 0x716   :  { %v8073_v61 = vrot.slane %v8072_v38, 2 }
 0x72b   :  { %s9345_s8 = spop %9344 }
 0x72c   :  { %v5020_v59 = vstv %s9345_s8  ;;  %s9347_s18 = spop %9346 }
 0x72d   :  { %v5021_v15 = vmul.f32 %v5020_v59, %v13457_v45  ;;  %v5022_v24 = vmul.f32 %v5020_v59, %v13460_v12  ;;  %v5023_v35 = vmul.f32 %v5020_v59, %v13480_v23  ;;  %v5024_v46 = vmul.f32 %v5020_v59, %v13493_v50  ;;  %s5072_s21 = smax.f32 %s10093_s5, %s9347_s18 }
 0x72e   :  { %v5025_v54 = vmul.f32 %v5020_v59, %v13553_v28  ;;  %v5026_v4 = vmul.f32 %v5020_v59, %v13559_v62  ;;  %v5027_v57 = vmul.f32 %v5020_v59, %v15097_v53  ;;  %v5073_v19 = vstv %s5072_s21  ;;  %v8126_v28 = vpop.xlane.xlu1 %8125 }
 0x72f   :  { %8542 = vst [vmem:[%s14759_s16 + $0xe0] sm:$0xff] %v5021_v15  ;;  %8543 = vst [vmem:[%s14759_s16 + $0xe8] sm:$0xff] %v5022_v24  ;;  %9821 = vrsqrt.f32 %v5073_v19  ;;  %v8074_v45 = vadd.f32 %v8073_v61, %v8072_v38  ;;  %v8127_v62 = vrot.slane %v8126_v28, 4 }
 0x730   :  { %8544 = vst [vmem:[%s14759_s16 + $0xf0] sm:$0xff] %v5023_v35  ;;  %8545 = vst [vmem:[%s14759_s16 + $0xf8] sm:$0xff] %v5024_v46 }
 0x731   :  { %8546 = vst [vmem:[%s14759_s16 + $0x100] sm:$0xff] %v5025_v54  ;;  %8547 = vst [vmem:[%s14759_s16 + $0x108] sm:$0xff] %v5026_v4  ;;  %v8075_v12 = vrot.slane %v8074_v45, 1  ;;  %v8128_v33 = vadd.f32 %v8127_v62, %v8126_v28 }
 0x732   :  { %8548 = vst [vmem:[%s14759_s16 + $0x110] sm:$0xff] %v5027_v57 }
 0x733   :  { %v8076_v50 = vadd.f32 %v8075_v12, %v8074_v45  ;;  %v8129_v17 = vrot.slane %v8128_v33, 2 }
 0x735   :  { %v8130_v8 = vadd.f32 %v8129_v17, %v8128_v33 }
 0x737   :  { %v8131_v31 = vrot.slane %v8130_v8, 1 }
 0x739   :  { %v9822_v23 = vpop.eup %9821  ;;  %v8132_v58 = vadd.f32 %v8131_v31, %v8130_v8 }
 0x73a   :  { %9348 = vpush %v9822_v23 }
 0x73b   :  { %9350 = vpush %v8076_v50  ;;  %v15107_v50 = vld [vmem:[#allocation24_spill] sm:$0xff] }
 0x76b   :  { %s9349_s0 = spop %9348 }
 0x76c   :  { %v5076_v41 = vstv %s9349_s0  ;;  %s9351_s20 = spop %9350 }
 0x76d   :  { %v5077_v37 = vmul.f32 %v5076_v41, %v15098_v26  ;;  %v5078_v60 = vmul.f32 %v5076_v41, %v15099_v16  ;;  %v5079_v32 = vmul.f32 %v5076_v41, %v15100_v13  ;;  %v5080_v29 = vmul.f32 %v5076_v41, %v15101_v48  ;;  %s8078_s13 = smax.f32 %s10093_s5, %s9351_s20 }
 0x76e   :  { %v5081_v9 = vmul.f32 %v5076_v41, %v15102_v7  ;;  %v5082_v36 = vmul.f32 %v5076_v41, %v15103_v52  ;;  %v5083_v39 = vmul.f32 %v5076_v41, %v15104_v3  ;;  %v8079_v49 = vstv %s8078_s13 }
 0x76f   :  { %8549 = vst [vmem:[%s14759_s16 + $0x118] sm:$0xff] %v5077_v37  ;;  %8550 = vst [vmem:[%s14759_s16 + $0x120] sm:$0xff] %v5078_v60  ;;  %9823 = vrsqrt.f32 %v8079_v49 }
 0x770   :  { %8551 = vst [vmem:[%s14759_s16 + $0x128] sm:$0xff] %v5079_v32  ;;  %8552 = vst [vmem:[%s14759_s16 + $0x130] sm:$0xff] %v5080_v29  ;;  %v15108_v29 = vld [vmem:[#allocation22_spill] sm:$0xff] }
 0x771   :  { %8553 = vst [vmem:[%s14759_s16 + $0x138] sm:$0xff] %v5081_v9  ;;  %8554 = vst [vmem:[%s14759_s16 + $0x140] sm:$0xff] %v5082_v36 }
 0x772   :  { %8555 = vst [vmem:[%s14759_s16 + $0x148] sm:$0xff] %v5083_v39 }
 0x779   :  { %v9824_v42 = vpop.eup %9823 }
 0x77a   :  { %9352 = vpush %v9824_v42 }
 0x77b   :  { %9354 = vpush %v8132_v58 }
 0x7a5   :  { %v7355_v0 = vpop.f32.mrb[102].mxu1 }
 0x7a6   :  { %v7678_v44 = vadd.f32 %v7355_v0, %v15105_v40  ;;  %v7357_v30 = vpop.f32.mrb[103].mxu1  ;;  %v15109_v0 = vld [vmem:[#allocation20_spill] sm:$0xff] }
 0x7a7   :  { %v7679_v1 = vadd.f32 %v7357_v30, %v15105_v40 }
 0x7a8   :  { %v7734_v55 = vmul.f32 0.5, %v7678_v44 }
 0x7a9   :  { %v7735_v20 = vmul.f32 0.5, %v7679_v1  ;;  %v7361_v18 = vpop.f32.mrb[104].mxu1 }
 0x7aa   :  { %v7242_v63 = vpop.f32.mrb[88].mxu0  ;;  %v7685_v38 = vadd.f32 %v7361_v18, %v15106_v14  ;;  %v7363_v61 = vpop.f32.mrb[105].mxu1  ;;  %9825 = vtanh.f32 %v7734_v55 }
 0x7ab   :  { %v7676_v59 = vadd.f32 %v7242_v63, %v15105_v40  ;;  %v7244_v15 = vpop.f32.mrb[89].mxu0  ;;  %v7686_v24 = vadd.f32 %v7363_v61, %v15106_v14  ;;  %s9353_s23 = spop %9352  ;;  %9827 = vtanh.f32 %v7735_v20 }
 0x7ac   :  { %v7677_v35 = vadd.f32 %v7244_v15, %v15105_v40  ;;  %v7741_v46 = vmul.f32 0.5, %v7685_v38  ;;  %v8082_v54 = vstv %s9353_s23  ;;  %s9355_s4 = spop %9354 }
 0x7ad   :  { %v7732_v4 = vmul.f32 0.5, %v7676_v59  ;;  %v7742_v53 = vmul.f32 0.5, %v7686_v24  ;;  %v7367_v57 = vpop.f32.mrb[106].mxu1  ;;  %v8083_v19 = vmul.f32 %v8082_v54, %v13812_v51  ;;  %v8084_v45 = vmul.f32 %v8082_v54, %v13840_v2  ;;  %s8134_s15 = smax.f32 %s10093_s5, %s9355_s4 }
 0x7ae   :  { %v7733_v12 = vmul.f32 0.5, %v7677_v35  ;;  %v7248_v23 = vpop.f32.mrb[90].mxu0  ;;  %9829 = vtanh.f32 %v7741_v46  ;;  %v7692_v28 = vadd.f32 %v7367_v57, %v15107_v50  ;;  %v7369_v62 = vpop.f32.mrb[107].mxu1  ;;  %v8085_v33 = vmul.f32 %v8082_v54, %v13822_v43 }
 0x7af   :  { %9831 = vtanh.f32 %v7732_v4  ;;  %v7683_v17 = vadd.f32 %v7248_v23, %v15106_v14  ;;  %v7250_v41 = vpop.f32.mrb[91].mxu0  ;;  %v7693_v26 = vadd.f32 %v7369_v62, %v15107_v50  ;;  %v8086_v37 = vmul.f32 %v8082_v54, %v13869_v5  ;;  %8730 = vst [vmem:[%s14759_s16 + $0x1c0] sm:$0xff] %v8083_v19  ;;  %8731 = vst [vmem:[%s14759_s16 + $0x1c8] sm:$0xff] %v8084_v45 }
 0x7b0   :  { %9833 = vtanh.f32 %v7733_v12  ;;  %v7684_v51 = vadd.f32 %v7250_v41, %v15106_v14  ;;  %v7748_v43 = vmul.f32 0.5, %v7692_v28  ;;  %v8087_v2 = vmul.f32 %v8082_v54, %v13885_v11  ;;  %8732 = vst [vmem:[%s14759_s16 + $0x1d0] sm:$0xff] %v8085_v33 }
 0x7b1   :  { %v7739_v16 = vmul.f32 0.5, %v7683_v17  ;;  %9835 = vtanh.f32 %v7742_v53  ;;  %v7749_v5 = vmul.f32 0.5, %v7693_v26  ;;  %v7373_v60 = vpop.f32.mrb[108].mxu1  ;;  %v8088_v13 = vmul.f32 %v8082_v54, %v13900_v10  ;;  %8733 = vst [vmem:[%s14759_s16 + $0x1d8] sm:$0xff] %v8086_v37 }
 0x7b2   :  { %v7740_v32 = vmul.f32 0.5, %v7684_v51  ;;  %v7254_v48 = vpop.f32.mrb[92].mxu0  ;;  %9837 = vtanh.f32 %v7748_v43  ;;  %v7699_v11 = vadd.f32 %v7373_v60, %v15108_v29  ;;  %v7375_v7 = vpop.f32.mrb[109].mxu1  ;;  %v8089_v9 = vmul.f32 %v8082_v54, %v13921_v56  ;;  %8734 = vst [vmem:[%s14759_s16 + $0x1e0] sm:$0xff] %v8087_v2 }
 0x7b3   :  { %9839 = vtanh.f32 %v7739_v16  ;;  %v7690_v10 = vadd.f32 %v7254_v48, %v15107_v50  ;;  %v7256_v52 = vpop.f32.mrb[93].mxu0  ;;  %v7700_v36 = vadd.f32 %v7375_v7, %v15108_v29  ;;  %8735 = vst [vmem:[%s14759_s16 + $0x1e8] sm:$0xff] %v8088_v13  ;;  %v8135_v18 = vstv %s8134_s15 }
 0x7b4   :  { %9841 = vtanh.f32 %v7740_v32  ;;  %v7691_v3 = vadd.f32 %v7256_v52, %v15107_v50  ;;  %8736 = vst [vmem:[%s14759_s16 + $0x1f0] sm:$0xff] %v8089_v9  ;;  %v9826_v56 = vpop.eup %9825  ;;  %v7755_v49 = vmul.f32 0.5, %v7699_v11  ;;  %v15110_v11 = vld [vmem:[#allocation17_spill] sm:$0xff] }
 0x7b5   :  { %v7746_v39 = vmul.f32 0.5, %v7690_v10  ;;  %v7379_v8 = vpop.f32.mrb[110].mxu1  ;;  %v9828_v31 = vpop.eup %9827  ;;  %9843 = vtanh.f32 %v7749_v5  ;;  %v7756_v20 = vmul.f32 0.5, %v7700_v36  ;;  %v7818_v57 = vmul.f32 0.5, %v9826_v56  ;;  %v14290_v52 = vld [vmem:[%s14745_s2 + $0x198] sm:$0xff] }
 0x7b6   :  { %v7747_v42 = vmul.f32 0.5, %v7691_v3  ;;  %v7260_v58 = vpop.f32.mrb[94].mxu0  ;;  %v7706_v44 = vadd.f32 %v7379_v8, %v15109_v0  ;;  %v7381_v30 = vpop.f32.mrb[111].mxu1  ;;  %v7819_v28 = vmul.f32 0.5, %v9828_v31 }
 0x7b7   :  { %9845 = vtanh.f32 %v7746_v39  ;;  %v7697_v1 = vadd.f32 %v7260_v58, %v15108_v29  ;;  %v7262_v55 = vpop.f32.mrb[95].mxu0  ;;  %v7707_v33 = vadd.f32 %v7381_v30, %v15109_v0  ;;  %v14293_v39 = vadd.f32 0.5, %v7818_v57 }
 0x7b8   :  { %v9830_v63 = vpop.eup %9829  ;;  %9847 = vtanh.f32 %v7747_v42  ;;  %v7698_v38 = vadd.f32 %v7262_v55, %v15108_v29  ;;  %v7762_v54 = vmul.f32 0.5, %v7706_v44 }
 0x7b9   :  { %v9832_v61 = vpop.eup %9831  ;;  %v7753_v59 = vmul.f32 0.5, %v7697_v1  ;;  %9849 = vtanh.f32 %v7755_v49  ;;  %v7385_v15 = vpop.f32.mrb[112].mxu1  ;;  %v7825_v12 = vmul.f32 0.5, %v9830_v63  ;;  %v7763_v3 = vmul.f32 0.5, %v7707_v33 }
 0x7ba   :  { %v9834_v24 = vpop.eup %9833  ;;  %v7754_v35 = vmul.f32 0.5, %v7698_v38  ;;  %v7266_v46 = vpop.f32.mrb[96].mxu0  ;;  %9851 = vrsqrt.f32 %v8135_v18  ;;  %v7816_v41 = vmul.f32 0.5, %v9832_v61  ;;  %v14295_v49 = vadd.f32 0.5, %v7819_v28  ;;  %v14309_v61 = vld [vmem:[%s14745_s2 + $0x188] sm:$0xff] }
 0x7bb   :  { %v14277_v4 = vpop.f32.mrb[113].mxu1  ;;  %v9836_v53 = vpop.eup %9835  ;;  %v7704_v19 = vadd.f32 %v7266_v46, %v15109_v0  ;;  %9853 = vtanh.f32 %v7756_v20  ;;  %v7817_v26 = vmul.f32 0.5, %v9834_v24  ;;  %v7867_v48 = vadd.f32 0.5, %v7825_v12 }
 0x7bc   :  { %v7268_v45 = vpop.f32.mrb[97].mxu0  ;;  %v9838_v23 = vpop.eup %9837  ;;  %9855 = vtanh.f32 %v7753_v59  ;;  %v7826_v5 = vmul.f32 0.5, %v9836_v53  ;;  %v14299_v44 = vadd.f32 0.5, %v7816_v41  ;;  %v7713_v20 = vadd.f32 %v7385_v15, %v15110_v11  ;;  %v14322_v53 = vld [vmem:[%s14745_s2 + $0x190] sm:$0xff] }
 0x7bd   :  { %v7705_v62 = vadd.f32 %v7268_v45, %v15109_v0  ;;  %v9840_v17 = vpop.eup %9839  ;;  %9857 = vtanh.f32 %v7754_v35  ;;  %v7760_v37 = vmul.f32 0.5, %v7704_v19  ;;  %v14282_v51 = vpop.f32.mrb[114].mxu1  ;;  %v7832_v31 = vmul.f32 0.5, %v9838_v23  ;;  %v14317_v35 = vld [vmem:[%s14745_s2 + $0x1a0] sm:$0xff]  ;;  %v15111_v19 = vld [vmem:[#allocation23_spill] sm:$0xff] }
 0x7be   :  { %v9842_v43 = vpop.eup %9841  ;;  %v7823_v2 = vmul.f32 0.5, %v9840_v17  ;;  %v7272_v60 = vpop.f32.mrb[98].mxu0  ;;  %9859 = vtanh.f32 %v7762_v54  ;;  %v7868_v1 = vadd.f32 0.5, %v7826_v5  ;;  %v14304_v38 = vadd.f32 0.5, %v7817_v26 }
 0x7bf   :  { %v7761_v16 = vmul.f32 0.5, %v7705_v62  ;;  %v14284_v13 = vpop.f32.mrb[115].mxu1  ;;  %v7824_v32 = vmul.f32 0.5, %v9842_v43  ;;  %9861 = vtanh.f32 %v7760_v37  ;;  %v7711_v7 = vadd.f32 %v7272_v60, %v15110_v11  ;;  %v7274_v9 = vpop.f32.mrb[99].mxu0 }
 0x7c0   :  { %v9844_v10 = vpop.eup %9843  ;;  %v7712_v36 = vadd.f32 %v7274_v9, %v15110_v11  ;;  %v7865_v30 = vadd.f32 0.5, %v7823_v2  ;;  %v14312_v24 = vmul.f32 %v14290_v52, %v7867_v48  ;;  %v14326_v33 = vadd.f32 0.5, %v7832_v31 }
 0x7c1   :  { %9863 = vtanh.f32 %v7761_v16  ;;  %v9846_v56 = vpop.eup %9845  ;;  %v7767_v8 = vmul.f32 0.5, %v7711_v7  ;;  %v14297_v42 = vpop.f32.mrb[116].mxu1  ;;  %v7866_v59 = vadd.f32 0.5, %v7824_v32  ;;  %v7833_v15 = vmul.f32 0.5, %v9844_v10  ;;  %v15112_v32 = vld [vmem:[#allocation16_spill] sm:$0xff] }
 0x7c2   :  { %v9848_v58 = vpop.eup %9847  ;;  %v7278_v55 = vpop.f32.mrb[100].mxu0  ;;  %v7768_v57 = vmul.f32 0.5, %v7712_v36  ;;  %9865 = vtanh.f32 %v7763_v3  ;;  %v7830_v28 = vmul.f32 0.5, %v9846_v56  ;;  %v14331_v26 = vmul.f32 %v14309_v61, %v7865_v30 }
 0x7c3   :  { %v14302_v18 = vpop.f32.mrb[117].mxu1  ;;  %v9850_v63 = vpop.eup %9849  ;;  %v7718_v45 = vadd.f32 %v7278_v55, %v15111_v19  ;;  %v7831_v62 = vmul.f32 0.5, %v9848_v58  ;;  %9867 = vtanh.f32 %v7767_v8  ;;  %v14334_v37 = vmul.f32 %v14317_v35, %v7868_v1 }
 0x7c4   :  { %v7280_v46 = vpop.f32.mrb[101].mxu0  ;;  %v9852_v54 = vpop.eup %9851  ;;  %v7839_v43 = vmul.f32 0.5, %v9850_v63  ;;  %v14339_v60 = vmul.f32 %v14322_v53, %v7866_v59  ;;  %v7714_v9 = vadd.f32 %v14277_v4, %v15110_v11  ;;  %v14344_v36 = vadd.f32 0.5, %v7833_v15 }
 0x7c5   :  { %v7719_v12 = vadd.f32 %v7280_v46, %v15111_v19  ;;  %v9854_v23 = vpop.eup %9853  ;;  %9356 = vpush %v9852_v54  ;;  %v14328_v17 = vpop.f32.mrb[118].mxu1  ;;  %9869 = vtanh.f32 %v7718_v45  ;;  %v7720_v56 = vadd.f32 %v14282_v51, %v15111_v19  ;;  %v14349_v31 = vadd.f32 0.5, %v7830_v28 }
 0x7c6   :  { %v9856_v41 = vpop.eup %9855  ;;  %v7284_v2 = vpop.f32.mrb[102].mxu0  ;;  %v14351_v58 = vadd.f32 0.5, %v7831_v62  ;;  %v7769_v30 = vmul.f32 0.5, %v7713_v20  ;;  %v7840_v63 = vmul.f32 0.5, %v9854_v23  ;;  %v7721_v15 = vadd.f32 %v14284_v13, %v15111_v19 }
 0x7c7   :  { %v14336_v16 = vpop.f32.mrb[119].mxu1  ;;  %v9858_v5 = vpop.eup %9857  ;;  %9871 = vtanh.f32 %v7719_v12  ;;  %v7725_v48 = vadd.f32 %v7284_v2, %v15112_v32  ;;  %v7837_v51 = vmul.f32 0.5, %v9856_v41  ;;  %v7770_v12 = vmul.f32 0.5, %v7714_v9 }
 0x7c8   :  { %v7286_v7 = vpop.f32.mrb[103].mxu0  ;;  %v9860_v10 = vpop.eup %9859  ;;  %9873 = vtanh.f32 %v7768_v57  ;;  %v7838_v54 = vmul.f32 0.5, %v9858_v5  ;;  %v14360_v28 = vadd.f32 0.5, %v7839_v43  ;;  %v7727_v13 = vadd.f32 %v14297_v42, %v15112_v32 }
 0x7c9   :  { %v7726_v3 = vadd.f32 %v7286_v7, %v15112_v32  ;;  %v9862_v8 = vpop.eup %9861  ;;  %9875 = vtanh.f32 %v7725_v48  ;;  %v14353_v1 = vpop.f32.mrb[120].mxu1  ;;  %v7846_v20 = vmul.f32 0.5, %v9860_v10  ;;  %v14367_v7 = vadd.f32 0.5, %v7840_v63 }
 0x7ca   :  { %v7844_v4 = vmul.f32 0.5, %v9862_v8  ;;  %v7468_v59 = vpop.f32.mrb[104].mxu0  ;;  %v14357_v46 = vpop.f32.mrb[121].mxu1  ;;  %v7728_v43 = vadd.f32 %v14302_v18, %v15112_v32  ;;  %v7880_v8 = vadd.f32 0.5, %v7838_v54 }
 0x7cb   :  { %v9864_v55 = vpop.eup %9863  ;;  %9877 = vtanh.f32 %v7726_v3  ;;  %v7680_v57 = vadd.f32 %v7468_v59, %v15105_v40  ;;  %v7470_v45 = vpop.f32.mrb[105].mxu0  ;;  %v7888_v59 = vadd.f32 0.5, %v7846_v20 }
 0x7cc   :  { %v7681_v62 = vadd.f32 %v7470_v45, %v15105_v40  ;;  %9879 = vtanh.f32 %v7720_v56  ;;  %v7845_v23 = vmul.f32 0.5, %v9864_v55  ;;  %v9866_v41 = vpop.eup %9865  ;;  %v7886_v5 = vadd.f32 0.5, %v7844_v4 }
 0x7cd   :  { %v7736_v2 = vmul.f32 0.5, %v7680_v57  ;;  %9881 = vtanh.f32 %v7769_v30  ;;  %v14365_v48 = vpop.f32.mrb[122].mxu1  ;;  %v9868_v10 = vpop.eup %9867  ;;  %v7879_v56 = vadd.f32 0.5, %v7837_v51  ;;  %v7847_v18 = vmul.f32 0.5, %v9866_v41 }
 0x7ce   :  { %v7474_v3 = vpop.f32.mrb[106].mxu0  ;;  %9883 = vtanh.f32 %v7721_v15  ;;  %v14371_v9 = vpop.f32.mrb[123].mxu1  ;;  %v7737_v30 = vmul.f32 0.5, %v7681_v62  ;;  %v7887_v15 = vadd.f32 0.5, %v7845_v23  ;;  %v7949_v54 = vmul.f32 %v14309_v61, %v7886_v5 }
 0x7cf   :  { %9885 = vtanh.f32 %v7770_v12  ;;  %v7476_v55 = vpop.f32.mrb[107].mxu0  ;;  %v9870_v42 = vpop.eup %9869  ;;  %v7687_v4 = vadd.f32 %v7474_v3, %v15106_v14 }
 0x7d0   :  { %9887 = vtanh.f32 %v7736_v2  ;;  %v7688_v63 = vadd.f32 %v7476_v55, %v15106_v14  ;;  %v7921_v45 = vmul.f32 %v9870_v42, %v14299_v44  ;;  %v7950_v61 = vmul.f32 %v14322_v53, %v7887_v15 }
 0x7d1   :  { %v9872_v57 = vpop.eup %9871  ;;  %9889 = vtanh.f32 %v7727_v13  ;;  %v14376_v27 = vpop.f32.mrb[124].mxu1  ;;  %v7743_v62 = vmul.f32 0.5, %v7687_v4  ;;  %v7889_v4 = vadd.f32 0.5, %v7847_v18 }
 0x7d2   :  { %v9874_v51 = vpop.eup %9873  ;;  %v7922_v12 = vmul.f32 %v9872_v57, %v14304_v38  ;;  %v7480_v20 = vpop.f32.mrb[108].mxu0  ;;  %9891 = vtanh.f32 %v7728_v43  ;;  %v7928_v55 = vadd.f32 %v7921_v45, %v14331_v26  ;;  %v7744_v23 = vmul.f32 0.5, %v7688_v63 }
 0x7d3   :  { %v14380_v2 = vpop.f32.mrb[125].mxu1  ;;  %v9876_v3 = vpop.eup %9875  ;;  %9893 = vtanh.f32 %v7737_v30  ;;  %v7694_v44 = vadd.f32 %v7480_v20, %v15107_v50  ;;  %v7689_v43 = vadd.f32 %v14328_v17, %v15106_v14 }
 0x7d4   :  { %v7482_v13 = vpop.f32.mrb[109].mxu0  ;;  %v7929_v42 = vadd.f32 %v7922_v12, %v14339_v60  ;;  %v7956_v6 = vmul.f32 %v9876_v3, %v7879_v56  ;;  %9895 = vtanh.f32 %v7743_v62  ;;  %v7951_v3 = vmul.f32 %v14290_v52, %v7888_v59 }
 0x7d5   :  { %v9878_v41 = vpop.eup %9877  ;;  %v7695_v38 = vadd.f32 %v7482_v13, %v15107_v50  ;;  %9897 = vtanh.f32 %v7928_v55  ;;  %v7750_v63 = vmul.f32 0.5, %v7694_v44  ;;  %v7952_v59 = vmul.f32 %v14317_v35, %v7889_v4 }
 0x7d6   :  { %v7957_v5 = vmul.f32 %v9878_v41, %v7880_v8  ;;  %v9880_v26 = vpop.eup %9879  ;;  %9899 = vtanh.f32 %v7929_v42  ;;  %v7963_v30 = vadd.f32 %v7956_v6, %v7949_v54  ;;  %v7486_v57 = vpop.f32.mrb[110].mxu0  ;;  %v7703_v35 = vadd.f32 %v14353_v1, %v15108_v29 }
 0x7d7   :  { %v9882_v45 = vpop.eup %9881  ;;  %9901 = vtanh.f32 %v7744_v23  ;;  %v7923_v60 = vmul.f32 %v9880_v26, %v14293_v39  ;;  %v7701_v56 = vadd.f32 %v7486_v57, %v15108_v29  ;;  %v7488_v12 = vpop.f32.mrb[111].mxu0  ;;  %v7751_v15 = vmul.f32 0.5, %v7695_v38 }
 0x7d8   :  { %v7964_v20 = vadd.f32 %v7957_v5, %v7950_v61  ;;  %v9884_v53 = vpop.eup %9883  ;;  %9903 = vtanh.f32 %v7963_v30  ;;  %v14391_v8 = vmul.f32 %v7963_v30, %v7928_v55  ;;  %v7702_v14 = vadd.f32 %v7488_v12, %v15108_v29 }
 0x7d9   :  { %v9886_v17 = vpop.eup %9885  ;;  %v7930_v18 = vadd.f32 %v7923_v60, %v14312_v24  ;;  %v7924_v54 = vmul.f32 %v9884_v53, %v14295_v49  ;;  %v7851_v39 = vmul.f32 0.5, %v9868_v10  ;;  %v7757_v23 = vmul.f32 0.5, %v7701_v56 }
 0x7da   :  { %9905 = vtanh.f32 %v7964_v20  ;;  %v14394_v6 = vmul.f32 %v7964_v20, %v7929_v42  ;;  %v9888_v62 = vpop.eup %9887  ;;  %v7492_v44 = vpop.f32.mrb[112].mxu0  ;;  %v7758_v41 = vmul.f32 0.5, %v7702_v14  ;;  %v7682_v42 = vadd.f32 %v14336_v16, %v15105_v40 }
 0x7db   :  { %9907 = vtanh.f32 %v7750_v63  ;;  %v9890_v55 = vpop.eup %9889  ;;  %v14400_v13 = vadd.f32 %v7924_v54, %v14334_v37  ;;  %v7494_v38 = vpop.f32.mrb[113].mxu0  ;;  %v7852_v61 = vmul.f32 0.5, %v9874_v51  ;;  %v7708_v52 = vadd.f32 %v7492_v44, %v15109_v0 }
 0x7dc   :  { %9909 = vtanh.f32 %v7930_v18  ;;  %v9892_v24 = vpop.eup %9891  ;;  %v7958_v49 = vmul.f32 %v9890_v55, %v14360_v28  ;;  %v7853_v5 = vmul.f32 0.5, %v9882_v45  ;;  %v7745_v40 = vmul.f32 0.5, %v7689_v43 }
 0x7dd   :  { %9911 = vtanh.f32 %v7751_v15  ;;  %v9894_v10 = vpop.eup %9893  ;;  %v7959_v37 = vmul.f32 %v9892_v24, %v14367_v7  ;;  %v7709_v16 = vadd.f32 %v7494_v38, %v15109_v0  ;;  %v7738_v28 = vmul.f32 0.5, %v7682_v42 }
 0x7de   :  { %9913 = vtanh.f32 %v14400_v13  ;;  %v9896_v26 = vpop.eup %9895  ;;  %v7965_v30 = vadd.f32 %v7958_v49, %v7951_v3  ;;  %v7498_v51 = vpop.f32.mrb[114].mxu0  ;;  %v7764_v7 = vmul.f32 0.5, %v7708_v52  ;;  %v7696_v43 = vadd.f32 %v14357_v46, %v15107_v50 }
 0x7df   :  { %9915 = vtanh.f32 %v7757_v23  ;;  %v9898_v63 = vpop.eup %9897  ;;  %v14410_v57 = vadd.f32 %v7959_v37, %v7952_v59  ;;  %v7500_v4 = vpop.f32.mrb[115].mxu0  ;;  %v7854_v56 = vmul.f32 0.5, %v9886_v17  ;;  %v7765_v12 = vmul.f32 0.5, %v7709_v16 }
 0x7e0   :  { %9917 = vtanh.f32 %v7758_v41  ;;  %v9900_v45 = vpop.eup %9899  ;;  %v14414_v20 = vmul.f32 %v7965_v30, %v7930_v18  ;;  %v7715_v53 = vadd.f32 %v7498_v51, %v15110_v11  ;;  %v7820_v14 = vmul.f32 0.5, %v9888_v62 }
 0x7e1   :  { %9919 = vtanh.f32 %v7965_v30  ;;  %v9902_v60 = vpop.eup %9901  ;;  %v7759_v29 = vmul.f32 0.5, %v7703_v35  ;;  %v7716_v1 = vadd.f32 %v7500_v4, %v15110_v11  ;;  %v7827_v3 = vmul.f32 0.5, %v9896_v26 }
 0x7e2   :  { %9921 = vtanh.f32 %v14410_v57  ;;  %v9904_v15 = vpop.eup %9903  ;;  %v7504_v54 = vpop.f32.mrb[116].mxu0  ;;  %v7752_v23 = vmul.f32 0.5, %v7696_v43  ;;  %v7717_v50 = vadd.f32 %v14365_v48, %v15110_v11  ;;  %v7828_v44 = vmul.f32 0.5, %v9902_v60 }
 0x7e3   :  { %9923 = vtanh.f32 %v7745_v40  ;;  %v7506_v46 = vpop.f32.mrb[117].mxu0  ;;  %v7771_v55 = vmul.f32 0.5, %v7715_v53  ;;  %v7710_v62 = vadd.f32 %v14371_v9, %v15109_v0  ;;  %v7893_v42 = vadd.f32 0.5, %v7851_v39  ;;  %v14458_v53 = vld [vmem:[%s14754_s11 + $0x38] ss:$0 sm:$0xff] }
 0x7e4   :  { %v9906_v18 = vpop.eup %9905  ;;  %9925 = vtanh.f32 %v7738_v28  ;;  %v7894_v38 = vadd.f32 0.5, %v7852_v61  ;;  %v7772_v24 = vmul.f32 0.5, %v7716_v1  ;;  %v7895_v52 = vadd.f32 0.5, %v7853_v5 }
 0x7e5   :  { %v14423_v17 = vpop.eup %9907  ;;  %9927 = vtanh.f32 %v7764_v7  ;;  %v7896_v59 = vadd.f32 0.5, %v7854_v56  ;;  %v7773_v11 = vmul.f32 0.5, %v7717_v50  ;;  %v14429_v26 = vadd.f32 0.5, %v7820_v14 }
 0x7e6   :  { %v9910_v41 = vpop.eup %9909  ;;  %9929 = vtanh.f32 %v7765_v12  ;;  %v7510_v48 = vpop.f32.mrb[118].mxu0  ;;  %v7821_v30 = vmul.f32 0.5, %v9894_v10  ;;  %v7766_v40 = vmul.f32 0.5, %v7710_v62  ;;  %v7869_v9 = vadd.f32 0.5, %v7827_v3  ;;  %v14475_v62 = vld [vmem:[%s14754_s11 + $0x40] ss:$0 sm:$0xff] }
 0x7e7   :  { %v14427_v49 = vpop.eup %9911  ;;  %9931 = vtanh.f32 %v7759_v29  ;;  %v7512_v16 = vpop.f32.mrb[119].mxu0  ;;  %v7870_v39 = vadd.f32 0.5, %v7828_v44  ;;  %v7722_v61 = vadd.f32 %v7504_v54, %v15111_v19  ;;  %v7723_v5 = vadd.f32 %v7506_v46, %v15111_v19  ;;  %v8351_v54 = vld [vmem:[%s14745_s2 + $0x1a8] sm:$0xff]  ;;  %v8352_v46 = vld [vmem:[%s14745_s2 + $0x1b0] sm:$0xff] }
 0x7e8   :  { %v9914_v37 = vpop.eup %9913  ;;  %9933 = vtanh.f32 %v7752_v23  ;;  %v7731_v28 = vadd.f32 %v14376_v27, %v15112_v32  ;;  %v14436_v35 = vmul.f32 %v9898_v63, %v14349_v31  ;;  %v7724_v4 = vadd.f32 %v14380_v2, %v15111_v19 }
 0x7e9   :  { %v9916_v0 = vpop.eup %9915  ;;  %9935 = vtanh.f32 %v7771_v55  ;;  %v14441_v7 = vmul.f32 %v9900_v45, %v14351_v58  ;;  %v14444_v43 = vmul.f32 %v9910_v41, %v14326_v33  ;;  %v7729_v56 = vadd.f32 %v7510_v48, %v15112_v32  ;;  %v8353_v48 = vld [vmem:[%s14745_s2 + $0x1b8] sm:$0xff] }
 0x7ea   :  { %v9918_v51 = vpop.eup %9917  ;;  %9937 = vtanh.f32 %v7772_v24  ;;  %v14448_v27 = vmul.f32 %v9914_v37, %v14344_v36  ;;  %v14450_v31 = vmul.f32 %v9904_v15, %v7893_v42  ;;  %v7730_v12 = vadd.f32 %v7512_v16, %v15112_v32 }
 0x7eb   :  { %v9920_v10 = vpop.eup %9919  ;;  %9939 = vtanh.f32 %v7773_v11  ;;  %v7978_v19 = vmul.f32 %v9906_v18, %v7894_v38  ;;  %v8027_v36 = vmul.f32 %v14458_v53, %v14436_v35  ;;  %v7841_v14 = vmul.f32 0.5, %v9916_v0 }
 0x7ec   :  { %v9922_v60 = vpop.eup %9921  ;;  %9941 = vtanh.f32 %v7766_v40  ;;  %v7979_v2 = vmul.f32 %v9920_v10, %v7895_v52  ;;  %v7842_v29 = vmul.f32 0.5, %v9918_v51  ;;  %v8028_v41 = vmul.f32 %v14475_v62, %v14441_v7  ;;  %v14489_v40 = vld [vmem:[%s14754_s11 + $0x48] ss:$0 sm:$0xff] }
 0x7ed   :  { %v9924_v63 = vpop.eup %9923  ;;  %9943 = vtanh.f32 %v7722_v61  ;;  %v14453_v33 = vmul.f32 %v9922_v60, %v7896_v59  ;;  %v7985_v32 = vmul.f32 0.5, %v7978_v19  ;;  %8723 = vst [vmem:[%s14759_s16 + $0x188] sm:$0xff] %v8027_v36  ;;  %v7863_v38 = vadd.f32 0.5, %v7821_v30 }
 0x7ee   :  { %v9926_v58 = vpop.eup %9925  ;;  %v7829_v45 = vmul.f32 0.5, %v9924_v63  ;;  %9945 = vtanh.f32 %v7723_v5  ;;  %v7986_v23 = vmul.f32 0.5, %v7979_v2  ;;  %v7918_v11 = vmul.f32 %v8351_v54, %v7869_v9  ;;  %8724 = vst [vmem:[%s14759_s16 + $0x190] sm:$0xff] %v8028_v41 }
 0x7ef   :  { %v9928_v15 = vpop.eup %9927  ;;  %9947 = vtanh.f32 %v7731_v28  ;;  %v7822_v18 = vmul.f32 0.5, %v9926_v58  ;;  %v7987_v55 = vmul.f32 0.5, %v14453_v33  ;;  %v8029_v30 = vmul.f32 %v14489_v40, %v14444_v43 }
 0x7f0   :  { %v9930_v1 = vpop.eup %9929  ;;  %v7848_v3 = vmul.f32 0.5, %v9928_v15  ;;  %9949 = vtanh.f32 %v7724_v4  ;;  %v7871_v24 = vadd.f32 0.5, %v7829_v45  ;;  %v7919_v0 = vmul.f32 %v8352_v46, %v7870_v39  ;;  %v14507_v39 = vld [vmem:[%s14754_s11 + $0x50] ss:$0 sm:$0xff] }
 0x7f1   :  { %v9932_v50 = vpop.eup %9931  ;;  %v7849_v44 = vmul.f32 0.5, %v9930_v1  ;;  %9951 = vtanh.f32 %v7729_v56  ;;  %v7834_v9 = vmul.f32 0.5, %v14423_v17  ;;  %v7883_v5 = vadd.f32 0.5, %v7841_v14  ;;  %8725 = vst [vmem:[%s14759_s16 + $0x198] sm:$0xff] %v8029_v30 }
 0x7f2   :  { %v14479_v42 = vpop.eup %9933  ;;  %v7890_v52 = vadd.f32 0.5, %v7848_v3  ;;  %9953 = vtanh.f32 %v7730_v12  ;;  %v7843_v37 = vmul.f32 0.5, %v9932_v50  ;;  %v7884_v28 = vadd.f32 0.5, %v7842_v29 }
 0x7f3   :  { %v14481_v59 = vpop.eup %9935  ;;  %9955 = vtanh.f32 %v7985_v32  ;;  %v7891_v61 = vadd.f32 0.5, %v7849_v44  ;;  %v7864_v10 = vadd.f32 0.5, %v7822_v18  ;;  %v7920_v60 = vmul.f32 %v8353_v48, %v7871_v24 }
 0x7f4   :  { %v14496_v16 = vpop.eup %9937  ;;  %9957 = vtanh.f32 %v7986_v23  ;;  %v7953_v56 = vmul.f32 %v8351_v54, %v7890_v52  ;;  %v8030_v17 = vmul.f32 %v14507_v39, %v14448_v27  ;;  %v8154_v63 = vmul.f32 %v14450_v31, %v14436_v35 }
 0x7f5   :  { %v14499_v51 = vpop.eup %9939  ;;  %9959 = vtanh.f32 %v7987_v55  ;;  %v7885_v58 = vadd.f32 0.5, %v7843_v37  ;;  %v8155_v36 = vmul.f32 %v7978_v19, %v14441_v7  ;;  %v8156_v15 = vmul.f32 %v7979_v2, %v14444_v43 }
 0x7f6   :  { %v9942_v4 = vpop.eup %9941  ;;  %s9357_s7 = spop %9356  ;;  %v7954_v29 = vmul.f32 %v8352_v46, %v7891_v61  ;;  %8726 = vst [vmem:[%s14759_s16 + $0x1a0] sm:$0xff] %v8030_v17  ;;  %v14521_v35 = vmul.f32 %v14453_v33, %v14448_v27  ;;  %v7876_v37 = vadd.f32 0.5, %v7834_v9 }
 0x7f7   :  { %v9944_v12 = vpop.eup %9943  ;;  %v7850_v45 = vmul.f32 0.5, %v9942_v4  ;;  %v8138_v1 = vstv %s9357_s7  ;;  %v7835_v4 = vmul.f32 0.5, %v14427_v49  ;;  %v14563_v49 = vmul.f32 %v14489_v40, %v8156_v15 }
 0x7f8   :  { %v9946_v14 = vpop.eup %9945  ;;  %v7925_v32 = vmul.f32 %v9944_v12, %v14429_v26  ;;  %v8139_v7 = vmul.f32 %v8138_v1, %v13816_v22  ;;  %v8140_v43 = vmul.f32 %v8138_v1, %v13828_v25  ;;  %v8141_v26 = vmul.f32 %v8138_v1, %v13845_v47  ;;  %v15113_v47 = vld [vmem:[#allocation25_spill] sm:$0xff] }
 0x7f9   :  { %v9948_v54 = vpop.eup %9947  ;;  %v7892_v18 = vadd.f32 0.5, %v7850_v45  ;;  %v7926_v3 = vmul.f32 %v9946_v14, %v7863_v38  ;;  %v8142_v50 = vmul.f32 %v8138_v1, %v13872_v21  ;;  %v8143_v27 = vmul.f32 %v8138_v1, %v13895_v34  ;;  %v15114_v21 = vld [vmem:[#allocation19_spill] sm:$0xff] }
 0x7fa   :  { %v9950_v19 = vpop.eup %9949  ;;  %v7932_v2 = vadd.f32 %v7925_v32, %v7918_v11  ;;  %v7962_v23 = vmul.f32 %v9948_v54, %v7885_v58  ;;  %8737 = vst [vmem:[%s14759_s16 + $0x1f8] sm:$0xff] %v8139_v7  ;;  %8738 = vst [vmem:[%s14759_s16 + $0x200] sm:$0xff] %v8140_v43  ;;  %v8144_v33 = vmul.f32 %v8138_v1, %v15113_v47  ;;  %v7857_v58 = vmul.f32 0.5, %v14499_v51 }
 0x7fb   :  { %v9952_v46 = vpop.eup %9951  ;;  %v7955_v44 = vmul.f32 %v8353_v48, %v7892_v18  ;;  %v7933_v55 = vadd.f32 %v7926_v3, %v7919_v0  ;;  %v7927_v41 = vmul.f32 %v9950_v19, %v7864_v10  ;;  %v8145_v38 = vmul.f32 %v8138_v1, %v15114_v21  ;;  %8739 = vst [vmem:[%s14759_s16 + $0x208] sm:$0xff] %v8141_v26 }
 0x7fc   :  { %v9954_v22 = vpop.eup %9953  ;;  %9961 = vtanh.f32 %v7932_v2  ;;  %v7960_v25 = vmul.f32 %v9952_v46, %v7883_v5  ;;  %8740 = vst [vmem:[%s14759_s16 + $0x210] sm:$0xff] %v8142_v50  ;;  %8741 = vst [vmem:[%s14759_s16 + $0x218] sm:$0xff] %v8143_v27  ;;  %v14552_v10 = vmul.f32 %v14458_v53, %v8154_v63  ;;  %v14557_v12 = vmul.f32 %v14475_v62, %v8155_v36  ;;  %v14620_v27 = vld [vmem:[%s14754_s11 + $0x60] ss:$0 sm:$0xff] }
 0x7fd   :  { %v9956_v34 = vpop.eup %9955  ;;  %9963 = vtanh.f32 %v7933_v55  ;;  %v7969_v24 = vadd.f32 %v7962_v23, %v7955_v44  ;;  %v7934_v52 = vadd.f32 %v7927_v41, %v7920_v60  ;;  %v7961_v11 = vmul.f32 %v9954_v22, %v7884_v28  ;;  %8742 = vst [vmem:[%s14759_s16 + $0x220] sm:$0xff] %v8144_v33  ;;  %8743 = vst [vmem:[%s14759_s16 + $0x228] sm:$0xff] %v8145_v38 }
 0x7fe   :  { %v9958_v48 = vpop.eup %9957  ;;  %v7967_v30 = vadd.f32 %v7960_v25, %v7953_v56  ;;  %v7999_v0 = vmul.f32 0.5, %v9956_v34  ;;  %v7836_v56 = vmul.f32 0.5, %v14479_v42  ;;  %v7984_v42 = vmul.f32 0.5, %v14450_v31 }
 0x7ff   :  { %v9960_v61 = vpop.eup %9959  ;;  %9965 = vtanh.f32 %v7969_v24  ;;  %v7968_v5 = vadd.f32 %v7961_v11, %v7954_v29  ;;  %v8000_v28 = vmul.f32 0.5, %v9958_v48  ;;  %v8168_v29 = vmul.f32 %v14552_v10, %v14552_v10 }
 0x800   :  { %9967 = vtanh.f32 %v7934_v52  ;;  %v8001_v9 = vmul.f32 0.5, %v9960_v61  ;;  %v8006_v60 = vadd.f32 0.5, %v7999_v0  ;;  %v8213_v51 = vmul.f32 %v14410_v57, %v14400_v13 }
 0x801   :  { %9969 = vtanh.f32 %v7967_v30  ;;  %v8007_v17 = vadd.f32 0.5, %v8000_v28  ;;  %v8214_v36 = vmul.f32 %v7967_v30, %v7932_v2  ;;  %v8215_v1 = vmul.f32 %v7968_v5, %v7933_v55  ;;  %v10052_v30 = vld [vmem:[%s14754_s11 + $0x68] ss:$0 sm:$0xff] }
 0x802   :  { %9971 = vtanh.f32 %v7968_v5  ;;  %v8008_v45 = vadd.f32 0.5, %v8001_v9  ;;  %v8013_v14 = vmul.f32 %v14475_v62, %v8006_v60  ;;  %v8169_v15 = vmul.f32 %v14557_v12, %v14557_v12 }
 0x803   :  { %v8014_v63 = vmul.f32 %v14489_v40, %v8007_v17  ;;  %9973 = vtanh.f32 %v7984_v42  ;;  %v14579_v31 = vmul.f32 %v7969_v24, %v7934_v52  ;;  %v14583_v54 = vmul.f32 %v14458_v53, %v14391_v8 }
 0x804   :  { %v8015_v32 = vmul.f32 %v14507_v39, %v8008_v45  ;;  %8717 = vst [vmem:[%s14759_s16 + $0x158] sm:$0xff] %v8013_v14  ;;  %v7877_v3 = vadd.f32 0.5, %v7835_v4  ;;  %v7855_v13 = vmul.f32 0.5, %v14481_v59  ;;  %v14591_v57 = vmul.f32 %v14475_v62, %v14394_v6 }
 0x805   :  { %8718 = vst [vmem:[%s14759_s16 + $0x160] sm:$0xff] %v8014_v63  ;;  %v14595_v7 = vmul.f32 %v14489_v40, %v14414_v20  ;;  %v7856_v8 = vmul.f32 0.5, %v14496_v16  ;;  %v14600_v2 = vmul.f32 %v14507_v39, %v14521_v35  ;;  %v8170_v59 = vmul.f32 %v14563_v49, %v14563_v49  ;;  %v14611_v16 = vld [vmem:[%s14754_s11 + $0x58] ss:$0 sm:$0xff] }
 0x806   :  { %v9962_v18 = vpop.eup %9961  ;;  %8719 = vst [vmem:[%s14759_s16 + $0x168] sm:$0xff] %v8015_v32  ;;  %v7899_v23 = vadd.f32 0.5, %v7857_v58  ;;  %v8224_v6 = vmul.f32 %v14583_v54, %v14583_v54  ;;  %v8225_v20 = vmul.f32 %v14591_v57, %v14591_v57  ;;  %v7878_v40 = vadd.f32 0.5, %v7836_v56 }
 0x807   :  { %v9964_v43 = vpop.eup %9963  ;;  %v7946_v19 = vmul.f32 %v9962_v18, %v7876_v37  ;;  %v8175_v50 = vadd.f32 %v8169_v15, %v8168_v29  ;;  %v14615_v46 = vmul.f32 %v14507_v39, %v8213_v51  ;;  %v7897_v55 = vadd.f32 0.5, %v7855_v13 }
 0x808   :  { %v7947_v26 = vmul.f32 %v9964_v43, %v7877_v3  ;;  %v8226_v25 = vmul.f32 %v14595_v7, %v14595_v7  ;;  %v7898_v33 = vadd.f32 0.5, %v7856_v8  ;;  %v8171_v39 = vmul.f32 %v14600_v2, %v14600_v2 }
 0x809   :  { %v9966_v62 = vpop.eup %9965  ;;  %v8031_v35 = vmul.f32 %v14611_v16, %v7946_v19  ;;  %v8176_v38 = vadd.f32 %v8175_v50, %v8170_v59  ;;  %v14634_v11 = vmul.f32 %v14611_v16, %v8214_v36  ;;  %v8231_v48 = vadd.f32 %v8225_v20, %v8224_v6 }
 0x80a   :  { %v9968_v44 = vpop.eup %9967  ;;  %v7983_v41 = vmul.f32 %v9966_v62, %v7899_v23  ;;  %v8032_v22 = vmul.f32 %v14620_v27, %v7947_v26  ;;  %v8227_v5 = vmul.f32 %v14615_v46, %v14615_v46  ;;  %v14645_v58 = vmul.f32 %v14620_v27, %v8215_v1 }
 0x80b   :  { %v9970_v47 = vpop.eup %9969  ;;  %v7948_v21 = vmul.f32 %v9968_v44, %v7878_v40  ;;  %8727 = vst [vmem:[%s14759_s16 + $0x1a8] sm:$0xff] %v8031_v35  ;;  %v8232_v9 = vadd.f32 %v8231_v48, %v8226_v25  ;;  %v8228_v63 = vmul.f32 %v14634_v11, %v14634_v11  ;;  %v8177_v42 = vadd.f32 %v8176_v38, %v8171_v39 }
 0x80c   :  { %v9972_v34 = vpop.eup %9971  ;;  %v7981_v24 = vmul.f32 %v9970_v47, %v7897_v55  ;;  %v7990_v52 = vmul.f32 0.5, %v7983_v41  ;;  %8728 = vst [vmem:[%s14759_s16 + $0x1b0] sm:$0xff] %v8032_v22  ;;  %v8229_v13 = vmul.f32 %v14645_v58, %v14645_v58  ;;  %v14670_v59 = vmul.f32 %v10052_v30, %v14579_v31 }
 0x80d   :  { %v7982_v37 = vmul.f32 %v9972_v34, %v7898_v33  ;;  %v8033_v0 = vmul.f32 %v10052_v30, %v7948_v21  ;;  %v8160_v61 = vmul.f32 %v7983_v41, %v7948_v21  ;;  %v9974_v60 = vpop.eup %9973  ;;  %v8233_v1 = vadd.f32 %v8232_v9, %v8227_v5 }
 0x80e   :  { %v7988_v28 = vmul.f32 0.5, %v7981_v24  ;;  %9975 = vtanh.f32 %v7990_v52  ;;  %v8158_v4 = vmul.f32 %v7981_v24, %v7946_v19  ;;  %v7998_v14 = vmul.f32 0.5, %v9974_v60 }
 0x80f   :  { %v7989_v56 = vmul.f32 0.5, %v7982_v37  ;;  %8729 = vst [vmem:[%s14759_s16 + $0x1b8] sm:$0xff] %v8033_v0  ;;  %v8159_v17 = vmul.f32 %v7982_v37, %v7947_v26  ;;  %v14655_v32 = vmul.f32 %v10052_v30, %v8160_v61  ;;  %v8234_v43 = vadd.f32 %v8233_v1, %v8228_v63 }
 0x810   :  { %9977 = vtanh.f32 %v7988_v28  ;;  %v14648_v45 = vmul.f32 %v14611_v16, %v8158_v4  ;;  %v8005_v36 = vadd.f32 0.5, %v7998_v14  ;;  %v8230_v62 = vmul.f32 %v14670_v59, %v14670_v59 }
 0x811   :  { %9979 = vtanh.f32 %v7989_v56  ;;  %v14653_v29 = vmul.f32 %v14620_v27, %v8159_v17  ;;  %v8174_v8 = vmul.f32 %v14655_v32, %v14655_v32  ;;  %v8235_v6 = vadd.f32 %v8234_v43, %v8229_v13 }
 0x812   :  { %v8172_v51 = vmul.f32 %v14648_v45, %v14648_v45  ;;  %v8012_v3 = vmul.f32 %v14458_v53, %v8005_v36 }
 0x813   :  { %v8173_v15 = vmul.f32 %v14653_v29, %v14653_v29  ;;  %v8236_v55 = vadd.f32 %v8235_v6, %v8230_v62 }
 0x814   :  { %v8178_v18 = vadd.f32 %v8177_v42, %v8172_v51  ;;  %8716 = vst [vmem:[%s14759_s16 + $0x150] sm:$0xff] %v8012_v3 }
 0x816   :  { %v8179_v19 = vadd.f32 %v8178_v18, %v8173_v15 }
 0x818   :  { %v9976_v23 = vpop.eup %9975  ;;  %v8180_v26 = vadd.f32 %v8179_v19, %v8174_v8 }
 0x819   :  { %v8004_v20 = vmul.f32 0.5, %v9976_v23 }
 0x81a   :  { %v9978_v53 = vpop.eup %9977  ;;  %8181 = vadd.xlane.f32.xlu1 %v8180_v26 }
 0x81b   :  { %v9980_v40 = vpop.eup %9979  ;;  %v8002_v35 = vmul.f32 0.5, %v9978_v53  ;;  %v8011_v50 = vadd.f32 0.5, %v8004_v20 }
 0x81c   :  { %v8003_v44 = vmul.f32 0.5, %v9980_v40 }
 0x81d   :  { %v8009_v41 = vadd.f32 0.5, %v8002_v35  ;;  %v8018_v22 = vmul.f32 %v10052_v30, %v8011_v50 }
 0x81e   :  { %v8010_v25 = vadd.f32 0.5, %v8003_v44  ;;  %8237 = vadd.xlane.f32.xlu1 %v8236_v55 }
 0x81f   :  { %v8016_v31 = vmul.f32 %v14611_v16, %v8009_v41  ;;  %8722 = vst [vmem:[%s14759_s16 + $0x180] sm:$0xff] %v8018_v22 }
 0x820   :  { %v8017_v47 = vmul.f32 %v14620_v27, %v8010_v25 }
 0x821   :  { %8720 = vst [vmem:[%s14759_s16 + $0x170] sm:$0xff] %v8016_v31 }
 0x822   :  { %8721 = vst [vmem:[%s14759_s16 + $0x178] sm:$0xff] %v8017_v47 }
 0x8a7   :  { %v8182_v33 = vpop.xlane.xlu1 %8181 }
 0x8a8   :  { %v8183_v21 = vrot.slane %v8182_v33, 4 }
 0x8aa   :  { %v8184_v39 = vadd.f32 %v8183_v21, %v8182_v33 }
 0x8ab   :  { %v8238_v52 = vpop.xlane.xlu1 %8237 }
 0x8ac   :  { %v8185_v38 = vrot.slane %v8184_v39, 2  ;;  %v8239_v48 = vrot.slane %v8238_v52, 4 }
 0x8ae   :  { %v8186_v34 = vadd.f32 %v8185_v38, %v8184_v39  ;;  %v8240_v37 = vadd.f32 %v8239_v48, %v8238_v52 }
 0x8b0   :  { %v8187_v16 = vrot.slane %v8186_v34, 1  ;;  %v8241_v27 = vrot.slane %v8240_v37, 2 }
 0x8b2   :  { %v8188_v24 = vadd.f32 %v8187_v16, %v8186_v34  ;;  %v8242_v0 = vadd.f32 %v8241_v27, %v8240_v37 }
 0x8b4   :  { %9358 = vpush %v8188_v24  ;;  %v8243_v61 = vrot.slane %v8242_v0, 1 }
 0x8b6   :  { %v8244_v28 = vadd.f32 %v8243_v61, %v8242_v0 }
 0x8e5   :  { %s9359_s12 = spop %9358 }
 0x8e6   :  { %s8190_s25 = smax.f32 %s10093_s5, %s9359_s12 }
 0x8e7   :  { %v8191_v30 = vstv %s8190_s25 }
 0x8e8   :  { %9981 = vrsqrt.f32 %v8191_v30 }
 0x8f2   :  { %v9982_v5 = vpop.eup %9981 }
 0x8f3   :  { %9360 = vpush %v9982_v5 }
 0x8f4   :  { %9362 = vpush %v8244_v28 }
 0x924   :  { %s9361_s14 = spop %9360 }
 0x925   :  { %v8194_v4 = vstv %s9361_s14  ;;  %s9363_s30 = spop %9362 }
 0x926   :  { %v8195_v9 = vmul.f32 %v8194_v4, %v14552_v10  ;;  %v8196_v60 = vmul.f32 %v8194_v4, %v14557_v12  ;;  %v8197_v56 = vmul.f32 %v8194_v4, %v14563_v49  ;;  %v8198_v17 = vmul.f32 %v8194_v4, %v14600_v2  ;;  %s8246_s26 = smax.f32 %s10093_s5, %s9363_s30 }
 0x927   :  { %v8199_v14 = vmul.f32 %v8194_v4, %v14648_v45  ;;  %v8200_v63 = vmul.f32 %v8194_v4, %v14653_v29  ;;  %v8201_v42 = vmul.f32 %v8194_v4, %v14655_v32  ;;  %v8247_v51 = vstv %s8246_s26 }
 0x928   :  { %8744 = vst [vmem:[%s14759_s16 + $0x230] sm:$0xff] %v8195_v9  ;;  %8745 = vst [vmem:[%s14759_s16 + $0x238] sm:$0xff] %v8196_v60  ;;  %9983 = vrsqrt.f32 %v8247_v51 }
 0x929   :  { %8746 = vst [vmem:[%s14759_s16 + $0x240] sm:$0xff] %v8197_v56  ;;  %8747 = vst [vmem:[%s14759_s16 + $0x248] sm:$0xff] %v8198_v17 }
 0x92a   :  { %8748 = vst [vmem:[%s14759_s16 + $0x250] sm:$0xff] %v8199_v14  ;;  %8749 = vst [vmem:[%s14759_s16 + $0x258] sm:$0xff] %v8200_v63 }
 0x92b   :  { %8750 = vst [vmem:[%s14759_s16 + $0x260] sm:$0xff] %v8201_v42 }
 0x932   :  { %v9984_v10 = vpop.eup %9983 }
 0x933   :  { %9364 = vpush %v9984_v10 }
 0x964   :  { %s9365_s18 = spop %9364 }
 0x965   :  { %v8250_v12 = vstv %s9365_s18 }
 0x966   :  { %v8251_v49 = vmul.f32 %v8250_v12, %v14583_v54  ;;  %v8252_v2 = vmul.f32 %v8250_v12, %v14591_v57  ;;  %v8253_v45 = vmul.f32 %v8250_v12, %v14595_v7  ;;  %v8254_v29 = vmul.f32 %v8250_v12, %v14615_v46 }
 0x967   :  { %v8255_v32 = vmul.f32 %v8250_v12, %v14634_v11  ;;  %v8256_v36 = vmul.f32 %v8250_v12, %v14645_v58  ;;  %v8257_v1 = vmul.f32 %v8250_v12, %v14670_v59 }
 0x968   :  { %8751 = vst [vmem:[%s14759_s16 + $0x268] sm:$0xff] %v8251_v49  ;;  %8752 = vst [vmem:[%s14759_s16 + $0x270] sm:$0xff] %v8252_v2 }
 0x969   :  { %8753 = vst [vmem:[%s14759_s16 + $0x278] sm:$0xff] %v8253_v45  ;;  %8754 = vst [vmem:[%s14759_s16 + $0x280] sm:$0xff] %v8254_v29 }
 0x96a   :  { %8755 = vst [vmem:[%s14759_s16 + $0x288] sm:$0xff] %v8255_v32  ;;  %8756 = vst [vmem:[%s14759_s16 + $0x290] sm:$0xff] %v8256_v36 }
 0x96b   :  { %8757 = vst [vmem:[%s14759_s16 + $0x298] sm:$0xff] %v8257_v1 }
 0x96c   :  { %8270 = vsyncpa [#allocation5], 1 }
 0x96d   :  { %8271 = vsyncpa [#allocation7], 1 }

</bundles_post_ra>
